<compile_context>
chip_gen: v6e
topology: v6e:2x2x1
jax: 0.10.0
libtpu: 0.0.40
codegen_flags: <defaults>
</compile_context>

<pallas_src>
import jax
import jax.numpy as jnp
from jax import lax
from jax.experimental import pallas as pl
from jax.experimental.pallas import tpu as pltpu

INPUT_DIM = 1
HIDDEN = 128
NUM_LAYERS = 2


# ----------------------------- Pallas kernel -------------------------------
def lstm_kernel(x_ref,            # (T, B, I)   time-major input
                wih0_ref,         # (I, 4H)
                whh0_ref,         # (H, 4H)
                b0_ref,           # (1, 4H) = b_ih0 + b_hh0
                w1_ref,           # (2H, 4H) = [w_ih1.T ; w_hh1.T]
                b1_ref,           # (1, 4H) = b_ih1 + b_hh1
                wfc_ref,          # (H, 1)
                bfc_ref,          # (1, 1)
                logits_ref,       # (T*B, 1) output
                hn_ref,           # (2, B, H) output
                cn_ref,           # (2, B, H) output
                gx0_ref,          # (T, B, 4H) VMEM scratch: precomputed input gates
                h1_hist_ref):     # (T, B, H)  VMEM scratch: layer-1 hidden history
    T, B, I = x_ref.shape
    H = whh0_ref.shape[0]

    # ---- hoisted layer-0 input projection: gx0[t] = x_t @ W_ih0^T + (b_ih0 + b_hh0)
    x2d = x_ref[...].reshape(T * B, I)                                   # (T*B, I)
    gx0 = jnp.dot(x2d, wih0_ref[...],
                  preferred_element_type=jnp.float32).reshape(T, B, 4 * H)
    gx0_ref[...] = gx0 + b0_ref[...].reshape(1, 1, 4 * H)

    # ---- weights / hoisted bias broadcast (kept out of the unrolled loop)
    whh0 = whh0_ref[...]                                                 # (H, 4H)
    w1 = w1_ref[...]                                                     # (2H, 4H)
    b1 = jnp.broadcast_to(b1_ref[...], (B, 4 * H))                       # (B, 4H)

    def gates_to_hc(gates, c):
        i_g = jax.nn.sigmoid(gates[:, 0 * H:1 * H])
        f_g = jax.nn.sigmoid(gates[:, 1 * H:2 * H])
        g_g = jnp.tanh(gates[:, 2 * H:3 * H])
        o_g = jax.nn.sigmoid(gates[:, 3 * H:4 * H])
        c_new = f_g * c + i_g * g_g
        h_new = o_g * jnp.tanh(c_new)
        return h_new, c_new

    def step(t, carry):
        h0, c0, h1, c1 = carry
        # layer 0: only the recurrent dot remains on the per-step path
        g0 = gx0_ref[t] + jnp.dot(h0, whh0, preferred_element_type=jnp.float32)
        h0, c0 = gates_to_hc(g0, c0)
        # layer 1: single fused dot over K = 2H ([h0_t, h1_{t-1}] @ [W_ih1; W_hh1])
        hcat = jnp.concatenate([h0, h1], axis=-1)                        # (B, 2H)
        g1 = jnp.dot(hcat, w1, preferred_element_type=jnp.float32) + b1
        h1, c1 = gates_to_hc(g1, c1)
        h1_hist_ref[t] = h1
        return (h0, c0, h1, c1)

    zeros = jnp.zeros((B, H), jnp.float32)
    h0, c0, h1, c1 = lax.fori_loop(0, T, step, (zeros, zeros, zeros, zeros),
                                   unroll=True)

    hn_ref[0] = h0
    hn_ref[1] = h1
    cn_ref[0] = c0
    cn_ref[1] = c1

    # ---- single lane-dense FC after the recurrence (one dot, one store)
    h_all = h1_hist_ref[...].reshape(T * B, H)
    logits_ref[...] = (jnp.dot(h_all, wfc_ref[...],
                               preferred_element_type=jnp.float32)
                       + bfc_ref[...])


# ------------------------------ wrapper -------------------------------------
def lstm_model_forward(x, params):
    """Mirrors LSTM_Model.forward: returns (logits (B, T), (h_n, c_n))."""
    (w_ih0, w_hh0, b_ih0, b_hh0,
     w_ih1, w_hh1, b_ih1, b_hh1,
     w_fc, b_fc) = params

    B, T, I = x.shape
    H = w_hh0.shape[1]

    # glue: transposes / weight stacking / bias fusion done once outside the kernel
    x_tbi = jnp.transpose(x, (1, 0, 2))                        # (T, B, I)
    wih0_t = w_ih0.T                                           # (I, 4H)
    whh0_t = w_hh0.T                                           # (H, 4H)
    b0 = (b_ih0 + b_hh0).reshape(1, 4 * H)
    w1 = jnp.concatenate([w_ih1.T, w_hh1.T], axis=0)           # (2H, 4H)
    b1 = (b_ih1 + b_hh1).reshape(1, 4 * H)
    wfc_t = w_fc.T                                             # (H, 1)
    bfc = b_fc.reshape(1, 1)

    vmem = pl.BlockSpec(memory_space=pltpu.MemorySpace.VMEM)
    out_shapes = (
        jax.ShapeDtypeStruct((T * B, 1), jnp.float32),              # logits (time-major, flat)
        jax.ShapeDtypeStruct((NUM_LAYERS, B, H), jnp.float32),      # h_n
        jax.ShapeDtypeStruct((NUM_LAYERS, B, H), jnp.float32),      # c_n
    )
    logits_flat, h_n, c_n = pl.pallas_call(
        lstm_kernel,
        out_shape=out_shapes,
        in_specs=[vmem] * 8,
        out_specs=(vmem, vmem, vmem),
        scratch_shapes=[
            pltpu.VMEM((T, B, 4 * H), jnp.float32),   # precomputed layer-0 input gates
            pltpu.VMEM((T, B, H), jnp.float32),       # layer-1 hidden history
        ],
    )(x_tbi, wih0_t, whh0_t, b0, w1, b1, wfc_t, bfc)

    logits = jnp.transpose(logits_flat.reshape(T, B), (1, 0))  # (B, T)
    return logits, (h_n, c_n)


# --------------------------- pure-JAX reference ------------------------------
def lstm_model_ref(x, params):
    (w_ih0, w_hh0, b_ih0, b_hh0,
     w_ih1, w_hh1, b_ih1, b_hh1,
     w_fc, b_fc) = params
    B, T, _ = x.shape
    H = w_hh0.shape[1]

    def cell(x_t, h, c, wih, whh, bih, bhh):
        gates = x_t @ wih.T + bih + h @ whh.T + bhh
        i, f, g, o = jnp.split(gates, 4, axis=-1)
        c = jax.nn.sigmoid(f) * c + jax.nn.sigmoid(i) * jnp.tanh(g)
        h = jax.nn.sigmoid(o) * jnp.tanh(c)
        return h, c

    def scan_fn(carry, x_t):
        h0, c0, h1, c1 = carry
        h0, c0 = cell(x_t, h0, c0, w_ih0, w_hh0, b_ih0, b_hh0)
        h1, c1 = cell(h0, h1, c1, w_ih1, w_hh1, b_ih1, b_hh1)
        return (h0, c0, h1, c1), h1

    z = jnp.zeros((B, H), jnp.float32)
    (h0, c0, h1, c1), hs = lax.scan(scan_fn, (z, z, z, z),
                                    jnp.transpose(x, (1, 0, 2)))
    lstm_out = jnp.transpose(hs, (1, 0, 2))                    # (B, T, H)
    logits = (lstm_out @ w_fc.T + b_fc)[..., 0]                # (B, T)
    h_n = jnp.stack([h0, h1]); c_n = jnp.stack([c0, c1])
    return logits, (h_n, c_n)


# ------------------------------- main ----------------------------------------
if __name__ == "__main__":
    key = jax.random.PRNGKey(0)
    B, T, I, H = 8, 8, INPUT_DIM, HIDDEN

    ks = jax.random.split(key, 12)
    bound = 1.0 / jnp.sqrt(H)     # PyTorch LSTM/Linear default uniform init scale

    def u(k, shape):
        return jax.random.uniform(k, shape, jnp.float32, -bound, bound)

    params = (
        u(ks[0], (4 * H, I)),   # w_ih_l0
        u(ks[1], (4 * H, H)),   # w_hh_l0
        u(ks[2], (4 * H,)),     # b_ih_l0
        u(ks[3], (4 * H,)),     # b_hh_l0
        u(ks[4], (4 * H, H)),   # w_ih_l1
        u(ks[5], (4 * H, H)),   # w_hh_l1
        u(ks[6], (4 * H,)),     # b_ih_l1
        u(ks[7], (4 * H,)),     # b_hh_l1
        u(ks[8], (1, H)),       # fc weight
        u(ks[9], (1,)),         # fc bias
    )

    x = jax.random.normal(ks[10], (B, T, I), jnp.float32)

    logits, (h_n, c_n) = lstm_model_forward(x, params)
    jax.block_until_ready((logits, h_n, c_n))

    ref_logits, (ref_h, ref_c) = lstm_model_ref(x, params)
    assert logits.shape == (B, T)
    assert h_n.shape == (NUM_LAYERS, B, H) and c_n.shape == (NUM_LAYERS, B, H)
    assert jnp.allclose(logits, ref_logits, atol=1e-4, rtol=1e-4)
    assert jnp.allclose(h_n, ref_h, atol=1e-4, rtol=1e-4)
    assert jnp.allclose(c_n, ref_c, atol=1e-4, rtol=1e-4)

    print("KERNEL_OK")
</pallas_src>

<mosaic_0001>
module attributes {stable_mosaic.version = 11 : i64} {
  func.func @lstm_kernel(%arg0: memref<8x8x1xf32, #tpu.memory_space<vmem>>, %arg1: memref<1x512xf32, #tpu.memory_space<vmem>>, %arg2: memref<128x512xf32, #tpu.memory_space<vmem>>, %arg3: memref<1x512xf32, #tpu.memory_space<vmem>>, %arg4: memref<256x512xf32, #tpu.memory_space<vmem>>, %arg5: memref<1x512xf32, #tpu.memory_space<vmem>>, %arg6: memref<128x1xf32, #tpu.memory_space<vmem>>, %arg7: memref<1x1xf32, #tpu.memory_space<vmem>>, %arg8: memref<64x1xf32, #tpu.memory_space<vmem>>, %arg9: memref<2x8x128xf32, #tpu.memory_space<vmem>>, %arg10: memref<2x8x128xf32, #tpu.memory_space<vmem>>, %arg11: memref<8x8x512xf32, #tpu.memory_space<vmem>>, %arg12: memref<8x8x128xf32, #tpu.memory_space<vmem>>) attributes {dimension_semantics = [], scalar_prefetch = 0 : i64, scratch_operands = 2 : i64, tpu.core_type = #tpu.core_type<tc>} {
    %c0 = arith.constant 0 : index
    %c0_0 = arith.constant 0 : index
    %c0_1 = arith.constant 0 : index
    %0 = vector.load %arg0[%c0, %c0_0, %c0_1] : memref<8x8x1xf32, #tpu.memory_space<vmem>>, vector<8x8x1xf32>
    %1 = vector.shape_cast %0 : vector<8x8x1xf32> to vector<64x1xf32>
    %c0_2 = arith.constant 0 : index
    %c0_3 = arith.constant 0 : index
    %2 = vector.load %arg1[%c0_2, %c0_3] : memref<1x512xf32, #tpu.memory_space<vmem>>, vector<1x512xf32>
    %cst = arith.constant dense<0.000000e+00> : vector<64x512xf32>
    %3 = tpu.matmul %1, %2, %cst {dimension_numbers = #tpu.dot_dimension_numbers<[1], [0], [0], [1], [0, 0, 1, 1], [], []>} : vector<64x1xf32>, vector<1x512xf32>, vector<64x512xf32> -> vector<64x512xf32>
    %4 = vector.shape_cast %3 : vector<64x512xf32> to vector<8x8x512xf32>
    %c0_4 = arith.constant 0 : index
    %c0_5 = arith.constant 0 : index
    %5 = vector.load %arg3[%c0_4, %c0_5] : memref<1x512xf32, #tpu.memory_space<vmem>>, vector<1x512xf32>
    %6 = vector.shape_cast %5 : vector<1x512xf32> to vector<1x1x512xf32>
    %7 = vector.broadcast %6 : vector<1x1x512xf32> to vector<8x8x512xf32>
    %8 = arith.addf %4, %7 : vector<8x8x512xf32>
    %c0_6 = arith.constant 0 : index
    %c0_7 = arith.constant 0 : index
    %c0_8 = arith.constant 0 : index
    %9 = vector.load %arg11[%c0_6, %c0_7, %c0_8] : memref<8x8x512xf32, #tpu.memory_space<vmem>>, vector<8x8x512xf32>
    tpu.vector_store %arg11[%c0_6, %c0_7, %c0_8], %8 {strides = array<i32>} : memref<8x8x512xf32, #tpu.memory_space<vmem>>, vector<8x8x512xf32>,
    %c0_9 = arith.constant 0 : index
    %c0_10 = arith.constant 0 : index
    %10 = vector.load %arg2[%c0_9, %c0_10] : memref<128x512xf32, #tpu.memory_space<vmem>>, vector<128x512xf32>
    %c0_11 = arith.constant 0 : index
    %c0_12 = arith.constant 0 : index
    %11 = vector.load %arg4[%c0_11, %c0_12] : memref<256x512xf32, #tpu.memory_space<vmem>>, vector<256x512xf32>
    %c0_13 = arith.constant 0 : index
    %c0_14 = arith.constant 0 : index
    %12 = vector.load %arg5[%c0_13, %c0_14] : memref<1x512xf32, #tpu.memory_space<vmem>>, vector<1x512xf32>
    %13 = vector.shape_cast %12 : vector<1x512xf32> to vector<1x512xf32>
    %14 = vector.broadcast %13 : vector<1x512xf32> to vector<8x512xf32>
    %cst_15 = arith.constant 0.000000e+00 : f32
    %15 = vector.broadcast %cst_15 : f32 to vector<8x128xf32>
    %c0_i32 = arith.constant 0 : i32
    %16 = arith.index_cast %c0_i32 : i32 to index
    %c0_16 = arith.constant 0 : index
    %c0_17 = arith.constant 0 : index
    %17 = vector.load %arg11[%16, %c0_16, %c0_17] : memref<8x8x512xf32, #tpu.memory_space<vmem>>, vector<1x8x512xf32>
    %18 = vector.shape_cast %17 : vector<1x8x512xf32> to vector<8x512xf32>
    %cst_18 = arith.constant dense<0.000000e+00> : vector<8x512xf32>
    %19 = tpu.matmul %15, %10, %cst_18 {dimension_numbers = #tpu.dot_dimension_numbers<[1], [0], [0], [1], [0, 0, 1, 1], [], []>} : vector<8x128xf32>, vector<128x512xf32>, vector<8x512xf32> -> vector<8x512xf32>
    %20 = arith.addf %18, %19 : vector<8x512xf32>
    %21 = vector.extract_strided_slice %20 {offsets = [0, 0], sizes = [8, 128], strides = [1, 1]} : vector<8x512xf32> to vector<8x128xf32>
    %22 = arith.negf %21 : vector<8x128xf32>
    %23 = math.exp %22 : vector<8x128xf32>
    %cst_19 = arith.constant 1.000000e+00 : f32
    %24 = vector.broadcast %cst_19 : f32 to vector<8x128xf32>
    %25 = arith.addf %24, %23 : vector<8x128xf32>
    %26 = arith.divf %24, %25 : vector<8x128xf32>
    %27 = vector.extract_strided_slice %20 {offsets = [0, 128], sizes = [8, 128], strides = [1, 1]} : vector<8x512xf32> to vector<8x128xf32>
    %28 = arith.negf %27 : vector<8x128xf32>
    %29 = math.exp %28 : vector<8x128xf32>
    %cst_20 = arith.constant 1.000000e+00 : f32
    %30 = vector.broadcast %cst_20 : f32 to vector<8x128xf32>
    %31 = arith.addf %30, %29 : vector<8x128xf32>
    %32 = arith.divf %30, %31 : vector<8x128xf32>
    %33 = vector.extract_strided_slice %20 {offsets = [0, 256], sizes = [8, 128], strides = [1, 1]} : vector<8x512xf32> to vector<8x128xf32>
    %34 = math.tanh %33 : vector<8x128xf32>
    %35 = vector.extract_strided_slice %20 {offsets = [0, 384], sizes = [8, 128], strides = [1, 1]} : vector<8x512xf32> to vector<8x128xf32>
    %36 = arith.negf %35 : vector<8x128xf32>
    %37 = math.exp %36 : vector<8x128xf32>
    %cst_21 = arith.constant 1.000000e+00 : f32
    %38 = vector.broadcast %cst_21 : f32 to vector<8x128xf32>
    %39 = arith.addf %38, %37 : vector<8x128xf32>
    %40 = arith.divf %38, %39 : vector<8x128xf32>
    %41 = arith.mulf %32, %15 : vector<8x128xf32>
    %42 = arith.mulf %26, %34 : vector<8x128xf32>
    %43 = arith.addf %41, %42 : vector<8x128xf32>
    %44 = math.tanh %43 : vector<8x128xf32>
    %45 = arith.mulf %40, %44 : vector<8x128xf32>
    %46 = tpu.concatenate %45, %15 in 1 : vector<8x128xf32>, vector<8x128xf32> -> vector<8x256xf32>
    %cst_22 = arith.constant dense<0.000000e+00> : vector<8x512xf32>
    %47 = tpu.matmul %46, %11, %cst_22 {dimension_numbers = #tpu.dot_dimension_numbers<[1], [0], [0], [1], [0, 0, 1, 1], [], []>} : vector<8x256xf32>, vector<256x512xf32>, vector<8x512xf32> -> vector<8x512xf32>
    %48 = arith.addf %47, %14 : vector<8x512xf32>
    %49 = vector.extract_strided_slice %48 {offsets = [0, 0], sizes = [8, 128], strides = [1, 1]} : vector<8x512xf32> to vector<8x128xf32>
    %50 = arith.negf %49 : vector<8x128xf32>
    %51 = math.exp %50 : vector<8x128xf32>
    %cst_23 = arith.constant 1.000000e+00 : f32
    %52 = vector.broadcast %cst_23 : f32 to vector<8x128xf32>
    %53 = arith.addf %52, %51 : vector<8x128xf32>
    %54 = arith.divf %52, %53 : vector<8x128xf32>
    %55 = vector.extract_strided_slice %48 {offsets = [0, 128], sizes = [8, 128], strides = [1, 1]} : vector<8x512xf32> to vector<8x128xf32>
    %56 = arith.negf %55 : vector<8x128xf32>
    %57 = math.exp %56 : vector<8x128xf32>
    %cst_24 = arith.constant 1.000000e+00 : f32
    %58 = vector.broadcast %cst_24 : f32 to vector<8x128xf32>
    %59 = arith.addf %58, %57 : vector<8x128xf32>
    %60 = arith.divf %58, %59 : vector<8x128xf32>
    %61 = vector.extract_strided_slice %48 {offsets = [0, 256], sizes = [8, 128], strides = [1, 1]} : vector<8x512xf32> to vector<8x128xf32>
    %62 = math.tanh %61 : vector<8x128xf32>
    %63 = vector.extract_strided_slice %48 {offsets = [0, 384], sizes = [8, 128], strides = [1, 1]} : vector<8x512xf32> to vector<8x128xf32>
    %64 = arith.negf %63 : vector<8x128xf32>
    %65 = math.exp %64 : vector<8x128xf32>
    %cst_25 = arith.constant 1.000000e+00 : f32
    %66 = vector.broadcast %cst_25 : f32 to vector<8x128xf32>
    %67 = arith.addf %66, %65 : vector<8x128xf32>
    %68 = arith.divf %66, %67 : vector<8x128xf32>
    %69 = arith.mulf %60, %15 : vector<8x128xf32>
    %70 = arith.mulf %54, %62 : vector<8x128xf32>
    %71 = arith.addf %69, %70 : vector<8x128xf32>
    %72 = math.tanh %71 : vector<8x128xf32>
    %73 = arith.mulf %68, %72 : vector<8x128xf32>
    %74 = arith.index_cast %c0_i32 : i32 to index
    %c0_26 = arith.constant 0 : index
    %c0_27 = arith.constant 0 : index
    %75 = vector.load %arg12[%74, %c0_26, %c0_27] : memref<8x8x128xf32, #tpu.memory_space<vmem>>, vector<1x8x128xf32>
    %76 = vector.shape_cast %75 : vector<1x8x128xf32> to vector<8x128xf32>
    %77 = vector.shape_cast %73 : vector<8x128xf32> to vector<1x8x128xf32>
    tpu.vector_store %arg12[%74, %c0_26, %c0_27], %77 {strides = array<i32>} : memref<8x8x128xf32, #tpu.memory_space<vmem>>, vector<1x8x128xf32>,
    %c1_i32 = arith.constant 1 : i32
    %78 = arith.index_cast %c1_i32 : i32 to index
    %c0_28 = arith.constant 0 : index
    %c0_29 = arith.constant 0 : index
    %79 = vector.load %arg11[%78, %c0_28, %c0_29] : memref<8x8x512xf32, #tpu.memory_space<vmem>>, vector<1x8x512xf32>
    %80 = vector.shape_cast %79 : vector<1x8x512xf32> to vector<8x512xf32>
    %cst_30 = arith.constant dense<0.000000e+00> : vector<8x512xf32>
    %81 = tpu.matmul %45, %10, %cst_30 {dimension_numbers = #tpu.dot_dimension_numbers<[1], [0], [0], [1], [0, 0, 1, 1], [], []>} : vector<8x128xf32>, vector<128x512xf32>, vector<8x512xf32> -> vector<8x512xf32>
    %82 = arith.addf %80, %81 : vector<8x512xf32>
    %83 = vector.extract_strided_slice %82 {offsets = [0, 0], sizes = [8, 128], strides = [1, 1]} : vector<8x512xf32> to vector<8x128xf32>
    %84 = arith.negf %83 : vector<8x128xf32>
    %85 = math.exp %84 : vector<8x128xf32>
    %cst_31 = arith.constant 1.000000e+00 : f32
    %86 = vector.broadcast %cst_31 : f32 to vector<8x128xf32>
    %87 = arith.addf %86, %85 : vector<8x128xf32>
    %88 = arith.divf %86, %87 : vector<8x128xf32>
    %89 = vector.extract_strided_slice %82 {offsets = [0, 128], sizes = [8, 128], strides = [1, 1]} : vector<8x512xf32> to vector<8x128xf32>
    %90 = arith.negf %89 : vector<8x128xf32>
    %91 = math.exp %90 : vector<8x128xf32>
    %cst_32 = arith.constant 1.000000e+00 : f32
    %92 = vector.broadcast %cst_32 : f32 to vector<8x128xf32>
    %93 = arith.addf %92, %91 : vector<8x128xf32>
    %94 = arith.divf %92, %93 : vector<8x128xf32>
    %95 = vector.extract_strided_slice %82 {offsets = [0, 256], sizes = [8, 128], strides = [1, 1]} : vector<8x512xf32> to vector<8x128xf32>
    %96 = math.tanh %95 : vector<8x128xf32>
    %97 = vector.extract_strided_slice %82 {offsets = [0, 384], sizes = [8, 128], strides = [1, 1]} : vector<8x512xf32> to vector<8x128xf32>
    %98 = arith.negf %97 : vector<8x128xf32>
    %99 = math.exp %98 : vector<8x128xf32>
    %cst_33 = arith.constant 1.000000e+00 : f32
    %100 = vector.broadcast %cst_33 : f32 to vector<8x128xf32>
    %101 = arith.addf %100, %99 : vector<8x128xf32>
    %102 = arith.divf %100, %101 : vector<8x128xf32>
    %103 = arith.mulf %94, %43 : vector<8x128xf32>
    %104 = arith.mulf %88, %96 : vector<8x128xf32>
    %105 = arith.addf %103, %104 : vector<8x128xf32>
    %106 = math.tanh %105 : vector<8x128xf32>
    %107 = arith.mulf %102, %106 : vector<8x128xf32>
    %108 = tpu.concatenate %107, %73 in 1 : vector<8x128xf32>, vector<8x128xf32> -> vector<8x256xf32>
    %cst_34 = arith.constant dense<0.000000e+00> : vector<8x512xf32>
    %109 = tpu.matmul %108, %11, %cst_34 {dimension_numbers = #tpu.dot_dimension_numbers<[1], [0], [0], [1], [0, 0, 1, 1], [], []>} : vector<8x256xf32>, vector<256x512xf32>, vector<8x512xf32> -> vector<8x512xf32>
    %110 = arith.addf %109, %14 : vector<8x512xf32>
    %111 = vector.extract_strided_slice %110 {offsets = [0, 0], sizes = [8, 128], strides = [1, 1]} : vector<8x512xf32> to vector<8x128xf32>
    %112 = arith.negf %111 : vector<8x128xf32>
    %113 = math.exp %112 : vector<8x128xf32>
    %cst_35 = arith.constant 1.000000e+00 : f32
    %114 = vector.broadcast %cst_35 : f32 to vector<8x128xf32>
    %115 = arith.addf %114, %113 : vector<8x128xf32>
    %116 = arith.divf %114, %115 : vector<8x128xf32>
    %117 = vector.extract_strided_slice %110 {offsets = [0, 128], sizes = [8, 128], strides = [1, 1]} : vector<8x512xf32> to vector<8x128xf32>
    %118 = arith.negf %117 : vector<8x128xf32>
    %119 = math.exp %118 : vector<8x128xf32>
    %cst_36 = arith.constant 1.000000e+00 : f32
    %120 = vector.broadcast %cst_36 : f32 to vector<8x128xf32>
    %121 = arith.addf %120, %119 : vector<8x128xf32>
    %122 = arith.divf %120, %121 : vector<8x128xf32>
    %123 = vector.extract_strided_slice %110 {offsets = [0, 256], sizes = [8, 128], strides = [1, 1]} : vector<8x512xf32> to vector<8x128xf32>
    %124 = math.tanh %123 : vector<8x128xf32>
    %125 = vector.extract_strided_slice %110 {offsets = [0, 384], sizes = [8, 128], strides = [1, 1]} : vector<8x512xf32> to vector<8x128xf32>
    %126 = arith.negf %125 : vector<8x128xf32>
    %127 = math.exp %126 : vector<8x128xf32>
    %cst_37 = arith.constant 1.000000e+00 : f32
    %128 = vector.broadcast %cst_37 : f32 to vector<8x128xf32>
    %129 = arith.addf %128, %127 : vector<8x128xf32>
    %130 = arith.divf %128, %129 : vector<8x128xf32>
    %131 = arith.mulf %122, %71 : vector<8x128xf32>
    %132 = arith.mulf %116, %124 : vector<8x128xf32>
    %133 = arith.addf %131, %132 : vector<8x128xf32>
    %134 = math.tanh %133 : vector<8x128xf32>
    %135 = arith.mulf %130, %134 : vector<8x128xf32>
    %136 = arith.index_cast %c1_i32 : i32 to index
    %c0_38 = arith.constant 0 : index
    %c0_39 = arith.constant 0 : index
    %137 = vector.load %arg12[%136, %c0_38, %c0_39] : memref<8x8x128xf32, #tpu.memory_space<vmem>>, vector<1x8x128xf32>
    %138 = vector.shape_cast %137 : vector<1x8x128xf32> to vector<8x128xf32>
    %139 = vector.shape_cast %135 : vector<8x128xf32> to vector<1x8x128xf32>
    tpu.vector_store %arg12[%136, %c0_38, %c0_39], %139 {strides = array<i32>} : memref<8x8x128xf32, #tpu.memory_space<vmem>>, vector<1x8x128xf32>,
    %c2_i32 = arith.constant 2 : i32
    %140 = arith.index_cast %c2_i32 : i32 to index
    %c0_40 = arith.constant 0 : index
    %c0_41 = arith.constant 0 : index
    %141 = vector.load %arg11[%140, %c0_40, %c0_41] : memref<8x8x512xf32, #tpu.memory_space<vmem>>, vector<1x8x512xf32>
    %142 = vector.shape_cast %141 : vector<1x8x512xf32> to vector<8x512xf32>
    %cst_42 = arith.constant dense<0.000000e+00> : vector<8x512xf32>
    %143 = tpu.matmul %107, %10, %cst_42 {dimension_numbers = #tpu.dot_dimension_numbers<[1], [0], [0], [1], [0, 0, 1, 1], [], []>} : vector<8x128xf32>, vector<128x512xf32>, vector<8x512xf32> -> vector<8x512xf32>
    %144 = arith.addf %142, %143 : vector<8x512xf32>
    %145 = vector.extract_strided_slice %144 {offsets = [0, 0], sizes = [8, 128], strides = [1, 1]} : vector<8x512xf32> to vector<8x128xf32>
    %146 = arith.negf %145 : vector<8x128xf32>
    %147 = math.exp %146 : vector<8x128xf32>
    %cst_43 = arith.constant 1.000000e+00 : f32
    %148 = vector.broadcast %cst_43 : f32 to vector<8x128xf32>
    %149 = arith.addf %148, %147 : vector<8x128xf32>
    %150 = arith.divf %148, %149 : vector<8x128xf32>
    %151 = vector.extract_strided_slice %144 {offsets = [0, 128], sizes = [8, 128], strides = [1, 1]} : vector<8x512xf32> to vector<8x128xf32>
    %152 = arith.negf %151 : vector<8x128xf32>
    %153 = math.exp %152 : vector<8x128xf32>
    %cst_44 = arith.constant 1.000000e+00 : f32
    %154 = vector.broadcast %cst_44 : f32 to vector<8x128xf32>
    %155 = arith.addf %154, %153 : vector<8x128xf32>
    %156 = arith.divf %154, %155 : vector<8x128xf32>
    %157 = vector.extract_strided_slice %144 {offsets = [0, 256], sizes = [8, 128], strides = [1, 1]} : vector<8x512xf32> to vector<8x128xf32>
    %158 = math.tanh %157 : vector<8x128xf32>
    %159 = vector.extract_strided_slice %144 {offsets = [0, 384], sizes = [8, 128], strides = [1, 1]} : vector<8x512xf32> to vector<8x128xf32>
    %160 = arith.negf %159 : vector<8x128xf32>
    %161 = math.exp %160 : vector<8x128xf32>
    %cst_45 = arith.constant 1.000000e+00 : f32
    %162 = vector.broadcast %cst_45 : f32 to vector<8x128xf32>
    %163 = arith.addf %162, %161 : vector<8x128xf32>
    %164 = arith.divf %162, %163 : vector<8x128xf32>
    %165 = arith.mulf %156, %105 : vector<8x128xf32>
    %166 = arith.mulf %150, %158 : vector<8x128xf32>
    %167 = arith.addf %165, %166 : vector<8x128xf32>
    %168 = math.tanh %167 : vector<8x128xf32>
    %169 = arith.mulf %164, %168 : vector<8x128xf32>
    %170 = tpu.concatenate %169, %135 in 1 : vector<8x128xf32>, vector<8x128xf32> -> vector<8x256xf32>
    %cst_46 = arith.constant dense<0.000000e+00> : vector<8x512xf32>
    %171 = tpu.matmul %170, %11, %cst_46 {dimension_numbers = #tpu.dot_dimension_numbers<[1], [0], [0], [1], [0, 0, 1, 1], [], []>} : vector<8x256xf32>, vector<256x512xf32>, vector<8x512xf32> -> vector<8x512xf32>
    %172 = arith.addf %171, %14 : vector<8x512xf32>
    %173 = vector.extract_strided_slice %172 {offsets = [0, 0], sizes = [8, 128], strides = [1, 1]} : vector<8x512xf32> to vector<8x128xf32>
    %174 = arith.negf %173 : vector<8x128xf32>
    %175 = math.exp %174 : vector<8x128xf32>
    %cst_47 = arith.constant 1.000000e+00 : f32
    %176 = vector.broadcast %cst_47 : f32 to vector<8x128xf32>
    %177 = arith.addf %176, %175 : vector<8x128xf32>
    %178 = arith.divf %176, %177 : vector<8x128xf32>
    %179 = vector.extract_strided_slice %172 {offsets = [0, 128], sizes = [8, 128], strides = [1, 1]} : vector<8x512xf32> to vector<8x128xf32>
    %180 = arith.negf %179 : vector<8x128xf32>
    %181 = math.exp %180 : vector<8x128xf32>
    %cst_48 = arith.constant 1.000000e+00 : f32
    %182 = vector.broadcast %cst_48 : f32 to vector<8x128xf32>
    %183 = arith.addf %182, %181 : vector<8x128xf32>
    %184 = arith.divf %182, %183 : vector<8x128xf32>
    %185 = vector.extract_strided_slice %172 {offsets = [0, 256], sizes = [8, 128], strides = [1, 1]} : vector<8x512xf32> to vector<8x128xf32>
    %186 = math.tanh %185 : vector<8x128xf32>
    %187 = vector.extract_strided_slice %172 {offsets = [0, 384], sizes = [8, 128], strides = [1, 1]} : vector<8x512xf32> to vector<8x128xf32>
    %188 = arith.negf %187 : vector<8x128xf32>
    %189 = math.exp %188 : vector<8x128xf32>
    %cst_49 = arith.constant 1.000000e+00 : f32
    %190 = vector.broadcast %cst_49 : f32 to vector<8x128xf32>
    %191 = arith.addf %190, %189 : vector<8x128xf32>
    %192 = arith.divf %190, %191 : vector<8x128xf32>
    %193 = arith.mulf %184, %133 : vector<8x128xf32>
    %194 = arith.mulf %178, %186 : vector<8x128xf32>
    %195 = arith.addf %193, %194 : vector<8x128xf32>
    %196 = math.tanh %195 : vector<8x128xf32>
    %197 = arith.mulf %192, %196 : vector<8x128xf32>
    %198 = arith.index_cast %c2_i32 : i32 to index
    %c0_50 = arith.constant 0 : index
    %c0_51 = arith.constant 0 : index
    %199 = vector.load %arg12[%198, %c0_50, %c0_51] : memref<8x8x128xf32, #tpu.memory_space<vmem>>, vector<1x8x128xf32>
    %200 = vector.shape_cast %199 : vector<1x8x128xf32> to vector<8x128xf32>
    %201 = vector.shape_cast %197 : vector<8x128xf32> to vector<1x8x128xf32>
    tpu.vector_store %arg12[%198, %c0_50, %c0_51], %201 {strides = array<i32>} : memref<8x8x128xf32, #tpu.memory_space<vmem>>, vector<1x8x128xf32>,
    %c3_i32 = arith.constant 3 : i32
    %202 = arith.index_cast %c3_i32 : i32 to index
    %c0_52 = arith.constant 0 : index
    %c0_53 = arith.constant 0 : index
    %203 = vector.load %arg11[%202, %c0_52, %c0_53] : memref<8x8x512xf32, #tpu.memory_space<vmem>>, vector<1x8x512xf32>
    %204 = vector.shape_cast %203 : vector<1x8x512xf32> to vector<8x512xf32>
    %cst_54 = arith.constant dense<0.000000e+00> : vector<8x512xf32>
    %205 = tpu.matmul %169, %10, %cst_54 {dimension_numbers = #tpu.dot_dimension_numbers<[1], [0], [0], [1], [0, 0, 1, 1], [], []>} : vector<8x128xf32>, vector<128x512xf32>, vector<8x512xf32> -> vector<8x512xf32>
    %206 = arith.addf %204, %205 : vector<8x512xf32>
    %207 = vector.extract_strided_slice %206 {offsets = [0, 0], sizes = [8, 128], strides = [1, 1]} : vector<8x512xf32> to vector<8x128xf32>
    %208 = arith.negf %207 : vector<8x128xf32>
    %209 = math.exp %208 : vector<8x128xf32>
    %cst_55 = arith.constant 1.000000e+00 : f32
    %210 = vector.broadcast %cst_55 : f32 to vector<8x128xf32>
    %211 = arith.addf %210, %209 : vector<8x128xf32>
    %212 = arith.divf %210, %211 : vector<8x128xf32>
    %213 = vector.extract_strided_slice %206 {offsets = [0, 128], sizes = [8, 128], strides = [1, 1]} : vector<8x512xf32> to vector<8x128xf32>
    %214 = arith.negf %213 : vector<8x128xf32>
    %215 = math.exp %214 : vector<8x128xf32>
    %cst_56 = arith.constant 1.000000e+00 : f32
    %216 = vector.broadcast %cst_56 : f32 to vector<8x128xf32>
    %217 = arith.addf %216, %215 : vector<8x128xf32>
    %218 = arith.divf %216, %217 : vector<8x128xf32>
    %219 = vector.extract_strided_slice %206 {offsets = [0, 256], sizes = [8, 128], strides = [1, 1]} : vector<8x512xf32> to vector<8x128xf32>
    %220 = math.tanh %219 : vector<8x128xf32>
    %221 = vector.extract_strided_slice %206 {offsets = [0, 384], sizes = [8, 128], strides = [1, 1]} : vector<8x512xf32> to vector<8x128xf32>
    %222 = arith.negf %221 : vector<8x128xf32>
    %223 = math.exp %222 : vector<8x128xf32>
    %cst_57 = arith.constant 1.000000e+00 : f32
    %224 = vector.broadcast %cst_57 : f32 to vector<8x128xf32>
    %225 = arith.addf %224, %223 : vector<8x128xf32>
    %226 = arith.divf %224, %225 : vector<8x128xf32>
    %227 = arith.mulf %218, %167 : vector<8x128xf32>
    %228 = arith.mulf %212, %220 : vector<8x128xf32>
    %229 = arith.addf %227, %228 : vector<8x128xf32>
    %230 = math.tanh %229 : vector<8x128xf32>
    %231 = arith.mulf %226, %230 : vector<8x128xf32>
    %232 = tpu.concatenate %231, %197 in 1 : vector<8x128xf32>, vector<8x128xf32> -> vector<8x256xf32>
    %cst_58 = arith.constant dense<0.000000e+00> : vector<8x512xf32>
    %233 = tpu.matmul %232, %11, %cst_58 {dimension_numbers = #tpu.dot_dimension_numbers<[1], [0], [0], [1], [0, 0, 1, 1], [], []>} : vector<8x256xf32>, vector<256x512xf32>, vector<8x512xf32> -> vector<8x512xf32>
    %234 = arith.addf %233, %14 : vector<8x512xf32>
    %235 = vector.extract_strided_slice %234 {offsets = [0, 0], sizes = [8, 128], strides = [1, 1]} : vector<8x512xf32> to vector<8x128xf32>
    %236 = arith.negf %235 : vector<8x128xf32>
    %237 = math.exp %236 : vector<8x128xf32>
    %cst_59 = arith.constant 1.000000e+00 : f32
    %238 = vector.broadcast %cst_59 : f32 to vector<8x128xf32>
    %239 = arith.addf %238, %237 : vector<8x128xf32>
    %240 = arith.divf %238, %239 : vector<8x128xf32>
    %241 = vector.extract_strided_slice %234 {offsets = [0, 128], sizes = [8, 128], strides = [1, 1]} : vector<8x512xf32> to vector<8x128xf32>
    %242 = arith.negf %241 : vector<8x128xf32>
    %243 = math.exp %242 : vector<8x128xf32>
    %cst_60 = arith.constant 1.000000e+00 : f32
    %244 = vector.broadcast %cst_60 : f32 to vector<8x128xf32>
    %245 = arith.addf %244, %243 : vector<8x128xf32>
    %246 = arith.divf %244, %245 : vector<8x128xf32>
    %247 = vector.extract_strided_slice %234 {offsets = [0, 256], sizes = [8, 128], strides = [1, 1]} : vector<8x512xf32> to vector<8x128xf32>
    %248 = math.tanh %247 : vector<8x128xf32>
    %249 = vector.extract_strided_slice %234 {offsets = [0, 384], sizes = [8, 128], strides = [1, 1]} : vector<8x512xf32> to vector<8x128xf32>
    %250 = arith.negf %249 : vector<8x128xf32>
    %251 = math.exp %250 : vector<8x128xf32>
    %cst_61 = arith.constant 1.000000e+00 : f32
    %252 = vector.broadcast %cst_61 : f32 to vector<8x128xf32>
    %253 = arith.addf %252, %251 : vector<8x128xf32>
    %254 = arith.divf %252, %253 : vector<8x128xf32>
    %255 = arith.mulf %246, %195 : vector<8x128xf32>
    %256 = arith.mulf %240, %248 : vector<8x128xf32>
    %257 = arith.addf %255, %256 : vector<8x128xf32>
    %258 = math.tanh %257 : vector<8x128xf32>
    %259 = arith.mulf %254, %258 : vector<8x128xf32>
    %260 = arith.index_cast %c3_i32 : i32 to index
    %c0_62 = arith.constant 0 : index
    %c0_63 = arith.constant 0 : index
    %261 = vector.load %arg12[%260, %c0_62, %c0_63] : memref<8x8x128xf32, #tpu.memory_space<vmem>>, vector<1x8x128xf32>
    %262 = vector.shape_cast %261 : vector<1x8x128xf32> to vector<8x128xf32>
    %263 = vector.shape_cast %259 : vector<8x128xf32> to vector<1x8x128xf32>
    tpu.vector_store %arg12[%260, %c0_62, %c0_63], %263 {strides = array<i32>} : memref<8x8x128xf32, #tpu.memory_space<vmem>>, vector<1x8x128xf32>,
    %c4_i32 = arith.constant 4 : i32
    %264 = arith.index_cast %c4_i32 : i32 to index
    %c0_64 = arith.constant 0 : index
    %c0_65 = arith.constant 0 : index
    %265 = vector.load %arg11[%264, %c0_64, %c0_65] : memref<8x8x512xf32, #tpu.memory_space<vmem>>, vector<1x8x512xf32>
    %266 = vector.shape_cast %265 : vector<1x8x512xf32> to vector<8x512xf32>
    %cst_66 = arith.constant dense<0.000000e+00> : vector<8x512xf32>
    %267 = tpu.matmul %231, %10, %cst_66 {dimension_numbers = #tpu.dot_dimension_numbers<[1], [0], [0], [1], [0, 0, 1, 1], [], []>} : vector<8x128xf32>, vector<128x512xf32>, vector<8x512xf32> -> vector<8x512xf32>
    %268 = arith.addf %266, %267 : vector<8x512xf32>
    %269 = vector.extract_strided_slice %268 {offsets = [0, 0], sizes = [8, 128], strides = [1, 1]} : vector<8x512xf32> to vector<8x128xf32>
    %270 = arith.negf %269 : vector<8x128xf32>
    %271 = math.exp %270 : vector<8x128xf32>
    %cst_67 = arith.constant 1.000000e+00 : f32
    %272 = vector.broadcast %cst_67 : f32 to vector<8x128xf32>
    %273 = arith.addf %272, %271 : vector<8x128xf32>
    %274 = arith.divf %272, %273 : vector<8x128xf32>
    %275 = vector.extract_strided_slice %268 {offsets = [0, 128], sizes = [8, 128], strides = [1, 1]} : vector<8x512xf32> to vector<8x128xf32>
    %276 = arith.negf %275 : vector<8x128xf32>
    %277 = math.exp %276 : vector<8x128xf32>
    %cst_68 = arith.constant 1.000000e+00 : f32
    %278 = vector.broadcast %cst_68 : f32 to vector<8x128xf32>
    %279 = arith.addf %278, %277 : vector<8x128xf32>
    %280 = arith.divf %278, %279 : vector<8x128xf32>
    %281 = vector.extract_strided_slice %268 {offsets = [0, 256], sizes = [8, 128], strides = [1, 1]} : vector<8x512xf32> to vector<8x128xf32>
    %282 = math.tanh %281 : vector<8x128xf32>
    %283 = vector.extract_strided_slice %268 {offsets = [0, 384], sizes = [8, 128], strides = [1, 1]} : vector<8x512xf32> to vector<8x128xf32>
    %284 = arith.negf %283 : vector<8x128xf32>
    %285 = math.exp %284 : vector<8x128xf32>
    %cst_69 = arith.constant 1.000000e+00 : f32
    %286 = vector.broadcast %cst_69 : f32 to vector<8x128xf32>
    %287 = arith.addf %286, %285 : vector<8x128xf32>
    %288 = arith.divf %286, %287 : vector<8x128xf32>
    %289 = arith.mulf %280, %229 : vector<8x128xf32>
    %290 = arith.mulf %274, %282 : vector<8x128xf32>
    %291 = arith.addf %289, %290 : vector<8x128xf32>
    %292 = math.tanh %291 : vector<8x128xf32>
    %293 = arith.mulf %288, %292 : vector<8x128xf32>
    %294 = tpu.concatenate %293, %259 in 1 : vector<8x128xf32>, vector<8x128xf32> -> vector<8x256xf32>
    %cst_70 = arith.constant dense<0.000000e+00> : vector<8x512xf32>
    %295 = tpu.matmul %294, %11, %cst_70 {dimension_numbers = #tpu.dot_dimension_numbers<[1], [0], [0], [1], [0, 0, 1, 1], [], []>} : vector<8x256xf32>, vector<256x512xf32>, vector<8x512xf32> -> vector<8x512xf32>
    %296 = arith.addf %295, %14 : vector<8x512xf32>
    %297 = vector.extract_strided_slice %296 {offsets = [0, 0], sizes = [8, 128], strides = [1, 1]} : vector<8x512xf32> to vector<8x128xf32>
    %298 = arith.negf %297 : vector<8x128xf32>
    %299 = math.exp %298 : vector<8x128xf32>
    %cst_71 = arith.constant 1.000000e+00 : f32
    %300 = vector.broadcast %cst_71 : f32 to vector<8x128xf32>
    %301 = arith.addf %300, %299 : vector<8x128xf32>
    %302 = arith.divf %300, %301 : vector<8x128xf32>
    %303 = vector.extract_strided_slice %296 {offsets = [0, 128], sizes = [8, 128], strides = [1, 1]} : vector<8x512xf32> to vector<8x128xf32>
    %304 = arith.negf %303 : vector<8x128xf32>
    %305 = math.exp %304 : vector<8x128xf32>
    %cst_72 = arith.constant 1.000000e+00 : f32
    %306 = vector.broadcast %cst_72 : f32 to vector<8x128xf32>
    %307 = arith.addf %306, %305 : vector<8x128xf32>
    %308 = arith.divf %306, %307 : vector<8x128xf32>
    %309 = vector.extract_strided_slice %296 {offsets = [0, 256], sizes = [8, 128], strides = [1, 1]} : vector<8x512xf32> to vector<8x128xf32>
    %310 = math.tanh %309 : vector<8x128xf32>
    %311 = vector.extract_strided_slice %296 {offsets = [0, 384], sizes = [8, 128], strides = [1, 1]} : vector<8x512xf32> to vector<8x128xf32>
    %312 = arith.negf %311 : vector<8x128xf32>
    %313 = math.exp %312 : vector<8x128xf32>
    %cst_73 = arith.constant 1.000000e+00 : f32
    %314 = vector.broadcast %cst_73 : f32 to vector<8x128xf32>
    %315 = arith.addf %314, %313 : vector<8x128xf32>
    %316 = arith.divf %314, %315 : vector<8x128xf32>
    %317 = arith.mulf %308, %257 : vector<8x128xf32>
    %318 = arith.mulf %302, %310 : vector<8x128xf32>
    %319 = arith.addf %317, %318 : vector<8x128xf32>
    %320 = math.tanh %319 : vector<8x128xf32>
    %321 = arith.mulf %316, %320 : vector<8x128xf32>
    %322 = arith.index_cast %c4_i32 : i32 to index
    %c0_74 = arith.constant 0 : index
    %c0_75 = arith.constant 0 : index
    %323 = vector.load %arg12[%322, %c0_74, %c0_75] : memref<8x8x128xf32, #tpu.memory_space<vmem>>, vector<1x8x128xf32>
    %324 = vector.shape_cast %323 : vector<1x8x128xf32> to vector<8x128xf32>
    %325 = vector.shape_cast %321 : vector<8x128xf32> to vector<1x8x128xf32>
    tpu.vector_store %arg12[%322, %c0_74, %c0_75], %325 {strides = array<i32>} : memref<8x8x128xf32, #tpu.memory_space<vmem>>, vector<1x8x128xf32>,
    %c5_i32 = arith.constant 5 : i32
    %326 = arith.index_cast %c5_i32 : i32 to index
    %c0_76 = arith.constant 0 : index
    %c0_77 = arith.constant 0 : index
    %327 = vector.load %arg11[%326, %c0_76, %c0_77] : memref<8x8x512xf32, #tpu.memory_space<vmem>>, vector<1x8x512xf32>
    %328 = vector.shape_cast %327 : vector<1x8x512xf32> to vector<8x512xf32>
    %cst_78 = arith.constant dense<0.000000e+00> : vector<8x512xf32>
    %329 = tpu.matmul %293, %10, %cst_78 {dimension_numbers = #tpu.dot_dimension_numbers<[1], [0], [0], [1], [0, 0, 1, 1], [], []>} : vector<8x128xf32>, vector<128x512xf32>, vector<8x512xf32> -> vector<8x512xf32>
    %330 = arith.addf %328, %329 : vector<8x512xf32>
    %331 = vector.extract_strided_slice %330 {offsets = [0, 0], sizes = [8, 128], strides = [1, 1]} : vector<8x512xf32> to vector<8x128xf32>
    %332 = arith.negf %331 : vector<8x128xf32>
    %333 = math.exp %332 : vector<8x128xf32>
    %cst_79 = arith.constant 1.000000e+00 : f32
    %334 = vector.broadcast %cst_79 : f32 to vector<8x128xf32>
    %335 = arith.addf %334, %333 : vector<8x128xf32>
    %336 = arith.divf %334, %335 : vector<8x128xf32>
    %337 = vector.extract_strided_slice %330 {offsets = [0, 128], sizes = [8, 128], strides = [1, 1]} : vector<8x512xf32> to vector<8x128xf32>
    %338 = arith.negf %337 : vector<8x128xf32>
    %339 = math.exp %338 : vector<8x128xf32>
    %cst_80 = arith.constant 1.000000e+00 : f32
    %340 = vector.broadcast %cst_80 : f32 to vector<8x128xf32>
    %341 = arith.addf %340, %339 : vector<8x128xf32>
    %342 = arith.divf %340, %341 : vector<8x128xf32>
    %343 = vector.extract_strided_slice %330 {offsets = [0, 256], sizes = [8, 128], strides = [1, 1]} : vector<8x512xf32> to vector<8x128xf32>
    %344 = math.tanh %343 : vector<8x128xf32>
    %345 = vector.extract_strided_slice %330 {offsets = [0, 384], sizes = [8, 128], strides = [1, 1]} : vector<8x512xf32> to vector<8x128xf32>
    %346 = arith.negf %345 : vector<8x128xf32>
    %347 = math.exp %346 : vector<8x128xf32>
    %cst_81 = arith.constant 1.000000e+00 : f32
    %348 = vector.broadcast %cst_81 : f32 to vector<8x128xf32>
    %349 = arith.addf %348, %347 : vector<8x128xf32>
    %350 = arith.divf %348, %349 : vector<8x128xf32>
    %351 = arith.mulf %342, %291 : vector<8x128xf32>
    %352 = arith.mulf %336, %344 : vector<8x128xf32>
    %353 = arith.addf %351, %352 : vector<8x128xf32>
    %354 = math.tanh %353 : vector<8x128xf32>
    %355 = arith.mulf %350, %354 : vector<8x128xf32>
    %356 = tpu.concatenate %355, %321 in 1 : vector<8x128xf32>, vector<8x128xf32> -> vector<8x256xf32>
    %cst_82 = arith.constant dense<0.000000e+00> : vector<8x512xf32>
    %357 = tpu.matmul %356, %11, %cst_82 {dimension_numbers = #tpu.dot_dimension_numbers<[1], [0], [0], [1], [0, 0, 1, 1], [], []>} : vector<8x256xf32>, vector<256x512xf32>, vector<8x512xf32> -> vector<8x512xf32>
    %358 = arith.addf %357, %14 : vector<8x512xf32>
    %359 = vector.extract_strided_slice %358 {offsets = [0, 0], sizes = [8, 128], strides = [1, 1]} : vector<8x512xf32> to vector<8x128xf32>
    %360 = arith.negf %359 : vector<8x128xf32>
    %361 = math.exp %360 : vector<8x128xf32>
    %cst_83 = arith.constant 1.000000e+00 : f32
    %362 = vector.broadcast %cst_83 : f32 to vector<8x128xf32>
    %363 = arith.addf %362, %361 : vector<8x128xf32>
    %364 = arith.divf %362, %363 : vector<8x128xf32>
    %365 = vector.extract_strided_slice %358 {offsets = [0, 128], sizes = [8, 128], strides = [1, 1]} : vector<8x512xf32> to vector<8x128xf32>
    %366 = arith.negf %365 : vector<8x128xf32>
    %367 = math.exp %366 : vector<8x128xf32>
    %cst_84 = arith.constant 1.000000e+00 : f32
    %368 = vector.broadcast %cst_84 : f32 to vector<8x128xf32>
    %369 = arith.addf %368, %367 : vector<8x128xf32>
    %370 = arith.divf %368, %369 : vector<8x128xf32>
    %371 = vector.extract_strided_slice %358 {offsets = [0, 256], sizes = [8, 128], strides = [1, 1]} : vector<8x512xf32> to vector<8x128xf32>
    %372 = math.tanh %371 : vector<8x128xf32>
    %373 = vector.extract_strided_slice %358 {offsets = [0, 384], sizes = [8, 128], strides = [1, 1]} : vector<8x512xf32> to vector<8x128xf32>
    %374 = arith.negf %373 : vector<8x128xf32>
    %375 = math.exp %374 : vector<8x128xf32>
    %cst_85 = arith.constant 1.000000e+00 : f32
    %376 = vector.broadcast %cst_85 : f32 to vector<8x128xf32>
    %377 = arith.addf %376, %375 : vector<8x128xf32>
    %378 = arith.divf %376, %377 : vector<8x128xf32>
    %379 = arith.mulf %370, %319 : vector<8x128xf32>
    %380 = arith.mulf %364, %372 : vector<8x128xf32>
    %381 = arith.addf %379, %380 : vector<8x128xf32>
    %382 = math.tanh %381 : vector<8x128xf32>
    %383 = arith.mulf %378, %382 : vector<8x128xf32>
    %384 = arith.index_cast %c5_i32 : i32 to index
    %c0_86 = arith.constant 0 : index
    %c0_87 = arith.constant 0 : index
    %385 = vector.load %arg12[%384, %c0_86, %c0_87] : memref<8x8x128xf32, #tpu.memory_space<vmem>>, vector<1x8x128xf32>
    %386 = vector.shape_cast %385 : vector<1x8x128xf32> to vector<8x128xf32>
    %387 = vector.shape_cast %383 : vector<8x128xf32> to vector<1x8x128xf32>
    tpu.vector_store %arg12[%384, %c0_86, %c0_87], %387 {strides = array<i32>} : memref<8x8x128xf32, #tpu.memory_space<vmem>>, vector<1x8x128xf32>,
    %c6_i32 = arith.constant 6 : i32
    %388 = arith.index_cast %c6_i32 : i32 to index
    %c0_88 = arith.constant 0 : index
    %c0_89 = arith.constant 0 : index
    %389 = vector.load %arg11[%388, %c0_88, %c0_89] : memref<8x8x512xf32, #tpu.memory_space<vmem>>, vector<1x8x512xf32>
    %390 = vector.shape_cast %389 : vector<1x8x512xf32> to vector<8x512xf32>
    %cst_90 = arith.constant dense<0.000000e+00> : vector<8x512xf32>
    %391 = tpu.matmul %355, %10, %cst_90 {dimension_numbers = #tpu.dot_dimension_numbers<[1], [0], [0], [1], [0, 0, 1, 1], [], []>} : vector<8x128xf32>, vector<128x512xf32>, vector<8x512xf32> -> vector<8x512xf32>
    %392 = arith.addf %390, %391 : vector<8x512xf32>
    %393 = vector.extract_strided_slice %392 {offsets = [0, 0], sizes = [8, 128], strides = [1, 1]} : vector<8x512xf32> to vector<8x128xf32>
    %394 = arith.negf %393 : vector<8x128xf32>
    %395 = math.exp %394 : vector<8x128xf32>
    %cst_91 = arith.constant 1.000000e+00 : f32
    %396 = vector.broadcast %cst_91 : f32 to vector<8x128xf32>
    %397 = arith.addf %396, %395 : vector<8x128xf32>
    %398 = arith.divf %396, %397 : vector<8x128xf32>
    %399 = vector.extract_strided_slice %392 {offsets = [0, 128], sizes = [8, 128], strides = [1, 1]} : vector<8x512xf32> to vector<8x128xf32>
    %400 = arith.negf %399 : vector<8x128xf32>
    %401 = math.exp %400 : vector<8x128xf32>
    %cst_92 = arith.constant 1.000000e+00 : f32
    %402 = vector.broadcast %cst_92 : f32 to vector<8x128xf32>
    %403 = arith.addf %402, %401 : vector<8x128xf32>
    %404 = arith.divf %402, %403 : vector<8x128xf32>
    %405 = vector.extract_strided_slice %392 {offsets = [0, 256], sizes = [8, 128], strides = [1, 1]} : vector<8x512xf32> to vector<8x128xf32>
    %406 = math.tanh %405 : vector<8x128xf32>
    %407 = vector.extract_strided_slice %392 {offsets = [0, 384], sizes = [8, 128], strides = [1, 1]} : vector<8x512xf32> to vector<8x128xf32>
    %408 = arith.negf %407 : vector<8x128xf32>
    %409 = math.exp %408 : vector<8x128xf32>
    %cst_93 = arith.constant 1.000000e+00 : f32
    %410 = vector.broadcast %cst_93 : f32 to vector<8x128xf32>
    %411 = arith.addf %410, %409 : vector<8x128xf32>
    %412 = arith.divf %410, %411 : vector<8x128xf32>
    %413 = arith.mulf %404, %353 : vector<8x128xf32>
    %414 = arith.mulf %398, %406 : vector<8x128xf32>
    %415 = arith.addf %413, %414 : vector<8x128xf32>
    %416 = math.tanh %415 : vector<8x128xf32>
    %417 = arith.mulf %412, %416 : vector<8x128xf32>
    %418 = tpu.concatenate %417, %383 in 1 : vector<8x128xf32>, vector<8x128xf32> -> vector<8x256xf32>
    %cst_94 = arith.constant dense<0.000000e+00> : vector<8x512xf32>
    %419 = tpu.matmul %418, %11, %cst_94 {dimension_numbers = #tpu.dot_dimension_numbers<[1], [0], [0], [1], [0, 0, 1, 1], [], []>} : vector<8x256xf32>, vector<256x512xf32>, vector<8x512xf32> -> vector<8x512xf32>
    %420 = arith.addf %419, %14 : vector<8x512xf32>
    %421 = vector.extract_strided_slice %420 {offsets = [0, 0], sizes = [8, 128], strides = [1, 1]} : vector<8x512xf32> to vector<8x128xf32>
    %422 = arith.negf %421 : vector<8x128xf32>
    %423 = math.exp %422 : vector<8x128xf32>
    %cst_95 = arith.constant 1.000000e+00 : f32
    %424 = vector.broadcast %cst_95 : f32 to vector<8x128xf32>
    %425 = arith.addf %424, %423 : vector<8x128xf32>
    %426 = arith.divf %424, %425 : vector<8x128xf32>
    %427 = vector.extract_strided_slice %420 {offsets = [0, 128], sizes = [8, 128], strides = [1, 1]} : vector<8x512xf32> to vector<8x128xf32>
    %428 = arith.negf %427 : vector<8x128xf32>
    %429 = math.exp %428 : vector<8x128xf32>
    %cst_96 = arith.constant 1.000000e+00 : f32
    %430 = vector.broadcast %cst_96 : f32 to vector<8x128xf32>
    %431 = arith.addf %430, %429 : vector<8x128xf32>
    %432 = arith.divf %430, %431 : vector<8x128xf32>
    %433 = vector.extract_strided_slice %420 {offsets = [0, 256], sizes = [8, 128], strides = [1, 1]} : vector<8x512xf32> to vector<8x128xf32>
    %434 = math.tanh %433 : vector<8x128xf32>
    %435 = vector.extract_strided_slice %420 {offsets = [0, 384], sizes = [8, 128], strides = [1, 1]} : vector<8x512xf32> to vector<8x128xf32>
    %436 = arith.negf %435 : vector<8x128xf32>
    %437 = math.exp %436 : vector<8x128xf32>
    %cst_97 = arith.constant 1.000000e+00 : f32
    %438 = vector.broadcast %cst_97 : f32 to vector<8x128xf32>
    %439 = arith.addf %438, %437 : vector<8x128xf32>
    %440 = arith.divf %438, %439 : vector<8x128xf32>
    %441 = arith.mulf %432, %381 : vector<8x128xf32>
    %442 = arith.mulf %426, %434 : vector<8x128xf32>
    %443 = arith.addf %441, %442 : vector<8x128xf32>
    %444 = math.tanh %443 : vector<8x128xf32>
    %445 = arith.mulf %440, %444 : vector<8x128xf32>
    %446 = arith.index_cast %c6_i32 : i32 to index
    %c0_98 = arith.constant 0 : index
    %c0_99 = arith.constant 0 : index
    %447 = vector.load %arg12[%446, %c0_98, %c0_99] : memref<8x8x128xf32, #tpu.memory_space<vmem>>, vector<1x8x128xf32>
    %448 = vector.shape_cast %447 : vector<1x8x128xf32> to vector<8x128xf32>
    %449 = vector.shape_cast %445 : vector<8x128xf32> to vector<1x8x128xf32>
    tpu.vector_store %arg12[%446, %c0_98, %c0_99], %449 {strides = array<i32>} : memref<8x8x128xf32, #tpu.memory_space<vmem>>, vector<1x8x128xf32>,
    %c7_i32 = arith.constant 7 : i32
    %450 = arith.index_cast %c7_i32 : i32 to index
    %c0_100 = arith.constant 0 : index
    %c0_101 = arith.constant 0 : index
    %451 = vector.load %arg11[%450, %c0_100, %c0_101] : memref<8x8x512xf32, #tpu.memory_space<vmem>>, vector<1x8x512xf32>
    %452 = vector.shape_cast %451 : vector<1x8x512xf32> to vector<8x512xf32>
    %cst_102 = arith.constant dense<0.000000e+00> : vector<8x512xf32>
    %453 = tpu.matmul %417, %10, %cst_102 {dimension_numbers = #tpu.dot_dimension_numbers<[1], [0], [0], [1], [0, 0, 1, 1], [], []>} : vector<8x128xf32>, vector<128x512xf32>, vector<8x512xf32> -> vector<8x512xf32>
    %454 = arith.addf %452, %453 : vector<8x512xf32>
    %455 = vector.extract_strided_slice %454 {offsets = [0, 0], sizes = [8, 128], strides = [1, 1]} : vector<8x512xf32> to vector<8x128xf32>
    %456 = arith.negf %455 : vector<8x128xf32>
    %457 = math.exp %456 : vector<8x128xf32>
    %cst_103 = arith.constant 1.000000e+00 : f32
    %458 = vector.broadcast %cst_103 : f32 to vector<8x128xf32>
    %459 = arith.addf %458, %457 : vector<8x128xf32>
    %460 = arith.divf %458, %459 : vector<8x128xf32>
    %461 = vector.extract_strided_slice %454 {offsets = [0, 128], sizes = [8, 128], strides = [1, 1]} : vector<8x512xf32> to vector<8x128xf32>
    %462 = arith.negf %461 : vector<8x128xf32>
    %463 = math.exp %462 : vector<8x128xf32>
    %cst_104 = arith.constant 1.000000e+00 : f32
    %464 = vector.broadcast %cst_104 : f32 to vector<8x128xf32>
    %465 = arith.addf %464, %463 : vector<8x128xf32>
    %466 = arith.divf %464, %465 : vector<8x128xf32>
    %467 = vector.extract_strided_slice %454 {offsets = [0, 256], sizes = [8, 128], strides = [1, 1]} : vector<8x512xf32> to vector<8x128xf32>
    %468 = math.tanh %467 : vector<8x128xf32>
    %469 = vector.extract_strided_slice %454 {offsets = [0, 384], sizes = [8, 128], strides = [1, 1]} : vector<8x512xf32> to vector<8x128xf32>
    %470 = arith.negf %469 : vector<8x128xf32>
    %471 = math.exp %470 : vector<8x128xf32>
    %cst_105 = arith.constant 1.000000e+00 : f32
    %472 = vector.broadcast %cst_105 : f32 to vector<8x128xf32>
    %473 = arith.addf %472, %471 : vector<8x128xf32>
    %474 = arith.divf %472, %473 : vector<8x128xf32>
    %475 = arith.mulf %466, %415 : vector<8x128xf32>
    %476 = arith.mulf %460, %468 : vector<8x128xf32>
    %477 = arith.addf %475, %476 : vector<8x128xf32>
    %478 = math.tanh %477 : vector<8x128xf32>
    %479 = arith.mulf %474, %478 : vector<8x128xf32>
    %480 = tpu.concatenate %479, %445 in 1 : vector<8x128xf32>, vector<8x128xf32> -> vector<8x256xf32>
    %cst_106 = arith.constant dense<0.000000e+00> : vector<8x512xf32>
    %481 = tpu.matmul %480, %11, %cst_106 {dimension_numbers = #tpu.dot_dimension_numbers<[1], [0], [0], [1], [0, 0, 1, 1], [], []>} : vector<8x256xf32>, vector<256x512xf32>, vector<8x512xf32> -> vector<8x512xf32>
    %482 = arith.addf %481, %14 : vector<8x512xf32>
    %483 = vector.extract_strided_slice %482 {offsets = [0, 0], sizes = [8, 128], strides = [1, 1]} : vector<8x512xf32> to vector<8x128xf32>
    %484 = arith.negf %483 : vector<8x128xf32>
    %485 = math.exp %484 : vector<8x128xf32>
    %cst_107 = arith.constant 1.000000e+00 : f32
    %486 = vector.broadcast %cst_107 : f32 to vector<8x128xf32>
    %487 = arith.addf %486, %485 : vector<8x128xf32>
    %488 = arith.divf %486, %487 : vector<8x128xf32>
    %489 = vector.extract_strided_slice %482 {offsets = [0, 128], sizes = [8, 128], strides = [1, 1]} : vector<8x512xf32> to vector<8x128xf32>
    %490 = arith.negf %489 : vector<8x128xf32>
    %491 = math.exp %490 : vector<8x128xf32>
    %cst_108 = arith.constant 1.000000e+00 : f32
    %492 = vector.broadcast %cst_108 : f32 to vector<8x128xf32>
    %493 = arith.addf %492, %491 : vector<8x128xf32>
    %494 = arith.divf %492, %493 : vector<8x128xf32>
    %495 = vector.extract_strided_slice %482 {offsets = [0, 256], sizes = [8, 128], strides = [1, 1]} : vector<8x512xf32> to vector<8x128xf32>
    %496 = math.tanh %495 : vector<8x128xf32>
    %497 = vector.extract_strided_slice %482 {offsets = [0, 384], sizes = [8, 128], strides = [1, 1]} : vector<8x512xf32> to vector<8x128xf32>
    %498 = arith.negf %497 : vector<8x128xf32>
    %499 = math.exp %498 : vector<8x128xf32>
    %cst_109 = arith.constant 1.000000e+00 : f32
    %500 = vector.broadcast %cst_109 : f32 to vector<8x128xf32>
    %501 = arith.addf %500, %499 : vector<8x128xf32>
    %502 = arith.divf %500, %501 : vector<8x128xf32>
    %503 = arith.mulf %494, %443 : vector<8x128xf32>
    %504 = arith.mulf %488, %496 : vector<8x128xf32>
    %505 = arith.addf %503, %504 : vector<8x128xf32>
    %506 = math.tanh %505 : vector<8x128xf32>
    %507 = arith.mulf %502, %506 : vector<8x128xf32>
    %508 = arith.index_cast %c7_i32 : i32 to index
    %c0_110 = arith.constant 0 : index
    %c0_111 = arith.constant 0 : index
    %509 = vector.load %arg12[%508, %c0_110, %c0_111] : memref<8x8x128xf32, #tpu.memory_space<vmem>>, vector<1x8x128xf32>
    %510 = vector.shape_cast %509 : vector<1x8x128xf32> to vector<8x128xf32>
    %511 = vector.shape_cast %507 : vector<8x128xf32> to vector<1x8x128xf32>
    tpu.vector_store %arg12[%508, %c0_110, %c0_111], %511 {strides = array<i32>} : memref<8x8x128xf32, #tpu.memory_space<vmem>>, vector<1x8x128xf32>,
    %c8_i32 = arith.constant 8 : i32
    %c0_112 = arith.constant 0 : index
    %c0_113 = arith.constant 0 : index
    %c0_114 = arith.constant 0 : index
    %512 = vector.load %arg9[%c0_112, %c0_113, %c0_114] : memref<2x8x128xf32, #tpu.memory_space<vmem>>, vector<1x8x128xf32>
    %513 = vector.shape_cast %512 : vector<1x8x128xf32> to vector<8x128xf32>
    %514 = vector.shape_cast %479 : vector<8x128xf32> to vector<1x8x128xf32>
    tpu.vector_store %arg9[%c0_112, %c0_113, %c0_114], %514 {strides = array<i32>} : memref<2x8x128xf32, #tpu.memory_space<vmem>>, vector<1x8x128xf32>,
    %c1 = arith.constant 1 : index
    %c0_115 = arith.constant 0 : index
    %c0_116 = arith.constant 0 : index
    %515 = vector.load %arg9[%c1, %c0_115, %c0_116] : memref<2x8x128xf32, #tpu.memory_space<vmem>>, vector<1x8x128xf32>
    %516 = vector.shape_cast %515 : vector<1x8x128xf32> to vector<8x128xf32>
    %517 = vector.shape_cast %507 : vector<8x128xf32> to vector<1x8x128xf32>
    tpu.vector_store %arg9[%c1, %c0_115, %c0_116], %517 {strides = array<i32>} : memref<2x8x128xf32, #tpu.memory_space<vmem>>, vector<1x8x128xf32>,
    %c0_117 = arith.constant 0 : index
    %c0_118 = arith.constant 0 : index
    %c0_119 = arith.constant 0 : index
    %518 = vector.load %arg10[%c0_117, %c0_118, %c0_119] : memref<2x8x128xf32, #tpu.memory_space<vmem>>, vector<1x8x128xf32>
    %519 = vector.shape_cast %518 : vector<1x8x128xf32> to vector<8x128xf32>
    %520 = vector.shape_cast %477 : vector<8x128xf32> to vector<1x8x128xf32>
    tpu.vector_store %arg10[%c0_117, %c0_118, %c0_119], %520 {strides = array<i32>} : memref<2x8x128xf32, #tpu.memory_space<vmem>>, vector<1x8x128xf32>,
    %c1_120 = arith.constant 1 : index
    %c0_121 = arith.constant 0 : index
    %c0_122 = arith.constant 0 : index
    %521 = vector.load %arg10[%c1_120, %c0_121, %c0_122] : memref<2x8x128xf32, #tpu.memory_space<vmem>>, vector<1x8x128xf32>
    %522 = vector.shape_cast %521 : vector<1x8x128xf32> to vector<8x128xf32>
    %523 = vector.shape_cast %505 : vector<8x128xf32> to vector<1x8x128xf32>
    tpu.vector_store %arg10[%c1_120, %c0_121, %c0_122], %523 {strides = array<i32>} : memref<2x8x128xf32, #tpu.memory_space<vmem>>, vector<1x8x128xf32>,
    %c0_123 = arith.constant 0 : index
    %c0_124 = arith.constant 0 : index
    %c0_125 = arith.constant 0 : index
    %524 = vector.load %arg12[%c0_123, %c0_124, %c0_125] : memref<8x8x128xf32, #tpu.memory_space<vmem>>, vector<8x8x128xf32>
    %525 = vector.shape_cast %524 : vector<8x8x128xf32> to vector<64x128xf32>
    %c0_126 = arith.constant 0 : index
    %c0_127 = arith.constant 0 : index
    %526 = vector.load %arg6[%c0_126, %c0_127] : memref<128x1xf32, #tpu.memory_space<vmem>>, vector<128x1xf32>
    %cst_128 = arith.constant dense<0.000000e+00> : vector<64x1xf32>
    %527 = tpu.matmul %525, %526, %cst_128 {dimension_numbers = #tpu.dot_dimension_numbers<[1], [0], [0], [1], [0, 0, 1, 1], [], []>} : vector<64x128xf32>, vector<128x1xf32>, vector<64x1xf32> -> vector<64x1xf32>
    %c0_129 = arith.constant 0 : index
    %c0_130 = arith.constant 0 : index
    %528 = vector.load %arg7[%c0_129, %c0_130] : memref<1x1xf32, #tpu.memory_space<vmem>>, vector<1x1xf32>
    %529 = vector.broadcast %528 : vector<1x1xf32> to vector<64x1xf32>
    %530 = arith.addf %527, %529 : vector<64x1xf32>
    %c0_131 = arith.constant 0 : index
    %c0_132 = arith.constant 0 : index
    %531 = vector.load %arg8[%c0_131, %c0_132] : memref<64x1xf32, #tpu.memory_space<vmem>>, vector<64x1xf32>
    tpu.vector_store %arg8[%c0_131, %c0_132], %530 {strides = array<i32>} : memref<64x1xf32, #tpu.memory_space<vmem>>, vector<64x1xf32>,
    return
  }
}

</mosaic_0001>

<bundles_post_ra>
// kernel: tpu_custom_call.1
= control target key start
LH: loop header
LB: loop body
LE: loop exit
PB: predicated region body
PF: predicated region fallthrough
CT: control target
= control target key end

     0   :  { %s8249_s0 = inlined_call_operand.vmem [shape: f32[8,8,1], index: 0, kind: input, shape index: {}]   ;;  %s8250_s1 = inlined_call_operand.vmem [shape: f32[1,512], index: 1, kind: input, shape index: {}]   ;;  %s8251_s2 = inlined_call_operand.hbm [shape: f32[128,512], index: 2, kind: input, shape index: {}]   ;;  %s8252_s3 = inlined_call_operand.vmem [shape: f32[1,512], index: 3, kind: input, shape index: {}]   ;;  %s8253_s4 = inlined_call_operand.hbm [shape: f32[256,512], index: 4, kind: input, shape index: {}]   ;;  %s8254_s5 = inlined_call_operand.vmem [shape: f32[1,512], index: 5, kind: input, shape index: {}]   ;;  %s8255_s6 = inlined_call_operand.vmem [shape: f32[128,1], index: 6, kind: input, shape index: {}]   ;;  %s8256_s7 = inlined_call_operand.<no memory space> [shape: f32[1,1], index: 7, kind: input, shape index: {}]   ;;  %s8257_s8 = inlined_call_operand.vmem [shape: f32[64,1], index: 8, kind: output, shape index: {0}]   ;;  %s8258_s9 = inlined_call_operand.hbm [shape: f32[2,8,128], index: 9, kind: output, shape index: {1}]   ;;  %s8259_s10 = inlined_call_operand.hbm [shape: f32[2,8,128], index: 10, kind: output, shape index: {2}]  }
   0x1   :  { %v16_v0 = vstv %s8256_s7 }
   0x2   :  { %17 = vst [vmem:[#allocation4] sm:$0x1] %v16_v0 }
   0x3   :  { %18 = vsyncpa [#allocation6], 0 }
   0x4   :  { %19 = vsyncpa [#allocation9], 0 }
   0x5   :  { %20 = vsyncpa [#allocation7], 0 }
   0x6   :  { %21 = vsyncpa [#allocation12], 0  ;;  %s4664_s15 = smov [#allocation5]  }
   0x7   :  { %s31_s16 = sshll.u32 %s4664_s15, 4  ;;  %s32_s16 = int_to_ptr.vmem [resolvable:$true] %s31_s16 }
   0x8   :  { %s4584_s17 = scalar_lea.vmem %s32_s16, 8192  ;;  %p4589_p1 = scmp.lt.s32.totalorder %s32_s16, %s32_s16 }
   0x9   :  { %p4585_p0 = scmp.ne.s32.totalorder %s32_s16, %s4584_s17  ;;  %p4590_p2 = scmp.lt.s32.totalorder %s4584_s17, %s4584_s17 }
   0xb   :  { %p4591_p3 = por %p4590_p2, %p4589_p1 }
   0xd   :  { %p4592_p4 = pnand %p4591_p3, %p4585_p0 }
   0xf   :  { %4595 = shalt.err (!%p4592_p4)
}
  0x10   :  { %s4665_s18 = smov 512   ;;  %s4666_s19 = smov 32  }
  0x11   :  { %37 = dma.hbm_to_vmem [thread:$0]  %s8251_s2, 8192, %s32_s16, [#allocation6], %s4665_s18, %s4665_s18, %s4666_s19  }
  0x12   :  { %s4667_s7 = smov [#allocation8]  }
  0x13   :  { %s45_s22 = sshll.u32 %s4667_s7, 4  ;;  %s46_s22 = int_to_ptr.vmem [resolvable:$true] %s45_s22 }
  0x14   :  { %s4604_s23 = scalar_lea.vmem %s46_s22, 16384  ;;  %p4609_p6 = scmp.lt.s32.totalorder %s46_s22, %s46_s22 }
  0x15   :  { %p4605_p5 = scmp.ne.s32.totalorder %s46_s22, %s4604_s23  ;;  %p4610_p7 = scmp.lt.s32.totalorder %s4604_s23, %s4604_s23 }
  0x17   :  { %p4611_p8 = por %p4610_p7, %p4609_p6 }
  0x19   :  { %p4612_p9 = pnand %p4611_p8, %p4605_p5 }
  0x1b   :  { %4615 = shalt.err (!%p4612_p9)
}
  0x1c   :  { %51 = dma.hbm_to_vmem [thread:$0]  %s8253_s4, 16384, %s46_s22, [#allocation9], %s4665_s18, %s4665_s18, %s4666_s19  }
  0x1d   :  { %4656 = dma.done.wait [#allocation6], 8192  }
  0x1e   :  { %4657 = vsyncadd [#allocation6], 4294959104 }
  0x1f   :  { %4658 = dma.done.wait [#allocation9], 16384  }
  0x20   :  { %4659 = vsyncadd [#allocation9], 4294950912  ;;  %v74_v1 = vlaneseq  ;;  %v8260_v2 = vmov 0.0   ;;  %v72_v8 = vld [vmem:[%s8250_s1] sm:$0xf]  ;;  %vm115_vm0 = vcmask 1040384  }
  0x21   :  { %301 = vmatprep.mubr.f32.mxu1 %v8260_v2  ;;  %188 = vmatprep.mubr.f32.mxu0 %v8260_v2  ;;  %v64_v11 = vld [vmem:[%s8249_s0] sm:$0xff]  ;;  %vm90_vm1 = vcmask 7168   ;;  %v4755_v12 = vld [vmem:[#allocation5 + $0x1e8] sm:$0xff]  ;;  %v67_v28 = vld [vmem:[%s8249_s0 + $0x18] sm:$0xff]  ;;  %s4669_s14 = smov [#allocation10]   ;;  %s4670_s16 = smov [#allocation11]  }
  0x22   :  { %v75_v3 = vshrl.u32 %v74_v1, 7  ;;  %v496_v14 = vld [vmem:[#allocation5 + $0x1e0] sm:$0xff]  ;;  %v493_v16 = vld [vmem:[#allocation5 + $0x1c8] sm:$0xff]  ;;  %v71_v48 = vld [vmem:[%s8249_s0 + $0x38] sm:$0xff]  ;;  %s3549_s15 = sshll.u32 %s4669_s14, 4  ;;  %s3561_s17 = sshll.u32 %s4670_s16, 4  ;;  %s3550_s15 = int_to_ptr.vmem [resolvable:$true] %s3549_s15  ;;  %s3562_s17 = int_to_ptr.vmem [resolvable:$true] %s3561_s17 }
  0x23   :  { %v492_v17 = vld [vmem:[#allocation5 + $0x1c0] sm:$0xff]  ;;  %v489_v19 = vld [vmem:[#allocation5 + $0x1a8] sm:$0xff]  ;;  %v4851_v53 = vld [vmem:[#allocation5 + $0x1f8] sm:$0xff]  ;;  %s4616_s18 = scalar_lea.vmem %s3550_s15, 256  ;;  %p4621_p11 = scmp.lt.s32.totalorder %s3550_s15, %s3550_s15 }
  0x24   :  { %v4739_v4 = vsub.s32 3, %v75_v3  ;;  %v4741_v5 = vsub.s32 2, %v75_v3  ;;  %v4743_v6 = vsub.s32 1, %v75_v3  ;;  %v4745_v7 = vsub.s32 0, %v75_v3  ;;  %v65_v18 = vld [vmem:[%s8249_s0 + $0x8] sm:$0xff]  ;;  %v66_v23 = vld [vmem:[%s8249_s0 + $0x10] sm:$0xff]  ;;  %p4617_p10 = scmp.ne.s32.totalorder %s3550_s15, %s4616_s18  ;;  %p4622_p12 = scmp.lt.s32.totalorder %s4616_s18, %s4616_s18 }
  0x25   :  { %v488_v20 = vld [vmem:[#allocation5 + $0x1a0] sm:$0xff]  ;;  %v485_v21 = vld [vmem:[#allocation5 + $0x188] sm:$0xff]  ;;  %v4854_v54 = vld [vmem:[#allocation5 + $0x1f0] sm:$0xff] }
  0x26   :  { %8812 = vst [vmem:[#allocation17_spill] sm:$0xff] %v4739_v4  ;;  %8813 = vst [vmem:[#allocation18_spill] sm:$0xff] %v4741_v5  ;;  %v89_v9 = vrot.slane %v72_v8, %v4739_v4  ;;  %v85_v10 = vrot.slane %v72_v8, %v4741_v5  ;;  %v81_v13 = vrot.slane %v72_v8, %v4743_v6  ;;  %v484_v22 = vld [vmem:[#allocation5 + $0x180] sm:$0xff]  ;;  %v481_v24 = vld [vmem:[#allocation5 + $0x168] sm:$0xff]  ;;  %p4623_p13 = por %p4622_p12, %p4621_p11 }
  0x27   :  { %8814 = vst [vmem:[#allocation19_spill] sm:$0xff] %v4743_v6  ;;  %8815 = vst [vmem:[#allocation20_spill] sm:$0xff] %v4745_v7  ;;  %v77_v15 = vrot.slane %v72_v8, %v4745_v7  ;;  %v480_v25 = vld [vmem:[#allocation5 + $0x160] sm:$0xff]  ;;  %v477_v26 = vld [vmem:[#allocation5 + $0x148] sm:$0xff] }
  0x28   :  { %3590 = vmatprep.subr.msk.mxu1 %vm115_vm0, %v89_v9  ;;  %3580 = vmatprep.subr.msk.mxu0 %vm115_vm0, %v81_v13  ;;  %v476_v27 = vld [vmem:[#allocation5 + $0x140] sm:$0xff]  ;;  %v473_v29 = vld [vmem:[#allocation5 + $0x128] sm:$0xff]  ;;  %v4858_v55 = vld [vmem:[#allocation5 + $0x1d8] sm:$0xff]  ;;  %p4624_p0 = pnand %p4623_p13, %p4617_p10 }
  0x29   :  { %3591 = vmatpush1.msk.msra.mxu1 %vm115_vm0, %v85_v10  ;;  %3581 = vmatpush1.msk.msra.mxu0 %vm115_vm0, %v77_v15  ;;  %v472_v30 = vld [vmem:[#allocation5 + $0x120] sm:$0xff]  ;;  %v469_v31 = vld [vmem:[#allocation5 + $0x108] sm:$0xff]  ;;  %v4863_v56 = vld [vmem:[#allocation5 + $0x1d0] sm:$0xff] }
  0x2a   :  { %3592 = vmatmul.mubr.msk.f32.vlgmr.msra.gmra.mxu1 %vm90_vm1, %v64_v11  ;;  %654 = vmatprep.subr.mxu1 %v4755_v12  ;;  %v468_v32 = vld [vmem:[#allocation5 + $0x100] sm:$0xff]  ;;  %v465_v34 = vld [vmem:[#allocation5 + $0xe8] sm:$0xff]  ;;  %v4866_v57 = vld [vmem:[#allocation5 + $0x1b8] sm:$0xff] }
  0x2b   :  { %655 = vmatpush1.msra.mxu1 %v496_v14  ;;  %307 = vmatprep.mubr.f32.mxu1 %v8260_v2  ;;  %v68_v33 = vld [vmem:[%s8249_s0 + $0x20] sm:$0xff]  ;;  %v461_v36 = vld [vmem:[#allocation5 + $0xc8] sm:$0xff]  ;;  %v4870_v58 = vld [vmem:[#allocation5 + $0x1b0] sm:$0xff] }
  0x2c   :  { %656 = vmatprep.subr.mxu1 %v493_v16  ;;  %3582 = vmatmul.mubr.msk.f32.vlgmr.msra.gmra.mxu0 %vm90_vm1, %v64_v11  ;;  %v464_v35 = vld [vmem:[#allocation5 + $0xe0] sm:$0xff]  ;;  %v4798_v39 = vld [vmem:[#allocation5 + $0xa8] sm:$0xff]  ;;  %v4874_v59 = vld [vmem:[#allocation5 + $0x198] sm:$0xff] }
  0x2d   :  { %657 = vmatpush1.msra.mxu1 %v492_v17  ;;  %194 = vmatprep.mubr.f32.mxu0 %v8260_v2  ;;  %v4792_v37 = vld [vmem:[#allocation5 + $0xc0] sm:$0xff]  ;;  %v4804_v41 = vld [vmem:[#allocation5 + $0x88] sm:$0xff]  ;;  %v4877_v60 = vld [vmem:[#allocation5 + $0x190] sm:$0xff] }
  0x2e   :  { %3593 = vmatmul.mubr.msk.f32.gmra.mxu1 %vm90_vm1, %v65_v18  ;;  %658 = vmatprep.subr.mxu1 %v489_v19  ;;  %v69_v38 = vld [vmem:[%s8249_s0 + $0x28] sm:$0xff]  ;;  %v70_v43 = vld [vmem:[%s8249_s0 + $0x30] sm:$0xff]  ;;  %v4880_v61 = vld [vmem:[#allocation5 + $0x178] sm:$0xff] }
  0x2f   :  { %659 = vmatpush1.msra.mxu1 %v488_v20  ;;  %313 = vmatprep.mubr.f32.mxu1 %v8260_v2  ;;  %v4800_v40 = vld [vmem:[#allocation5 + $0xa0] sm:$0xff]  ;;  %v4816_v44 = vld [vmem:[#allocation5 + $0x68] sm:$0xff]  ;;  %v4883_v62 = vld [vmem:[#allocation5 + $0x170] sm:$0xff] }
  0x30   :  { %660 = vmatprep.subr.mxu1 %v485_v21  ;;  %3583 = vmatmul.mubr.msk.f32.gmra.mxu0 %vm90_vm1, %v65_v18  ;;  %v4809_v42 = vld [vmem:[#allocation5 + $0x80] sm:$0xff]  ;;  %v4823_v46 = vld [vmem:[#allocation5 + $0x48] sm:$0xff]  ;;  %v4886_v63 = vld [vmem:[#allocation5 + $0x158] sm:$0xff] }
  0x31   :  { %661 = vmatpush1.msra.mxu1 %v484_v22  ;;  %200 = vmatprep.mubr.f32.mxu0 %v8260_v2  ;;  %v4819_v45 = vld [vmem:[#allocation5 + $0x60] sm:$0xff]  ;;  %v4835_v49 = vld [vmem:[#allocation5 + $0x28] sm:$0xff]  ;;  %v4889_v0 = vld [vmem:[#allocation5 + $0x150] sm:$0xff] }
  0x32   :  { %3594 = vmatmul.mubr.msk.f32.gmra.mxu1 %vm90_vm1, %v66_v23  ;;  %662 = vmatprep.subr.mxu1 %v481_v24  ;;  %v4828_v47 = vld [vmem:[#allocation5 + $0x40] sm:$0xff]  ;;  %v4842_v51 = vld [vmem:[#allocation5 + $0x8] sm:$0xff]  ;;  %v4892_v1 = vld [vmem:[#allocation5 + $0x138] sm:$0xff] }
  0x33   :  { %663 = vmatpush1.msra.mxu1 %v480_v25  ;;  %319 = vmatprep.mubr.f32.mxu1 %v8260_v2  ;;  %v4838_v50 = vld [vmem:[#allocation5 + $0x20] sm:$0xff]  ;;  %v4895_v3 = vld [vmem:[#allocation5 + $0x130] sm:$0xff]  ;;  %v4898_v8 = vld [vmem:[#allocation5 + $0x118] sm:$0xff] }
  0x34   :  { %664 = vmatprep.subr.mxu1 %v477_v26  ;;  %3584 = vmatmul.mubr.msk.f32.gmra.mxu0 %vm90_vm1, %v66_v23  ;;  %v4847_v52 = vld [vmem:[#allocation5] sm:$0xff]  ;;  %v4901_v9 = vld [vmem:[#allocation5 + $0x110] sm:$0xff]  ;;  %v4904_v10 = vld [vmem:[#allocation5 + $0xf8] sm:$0xff] }
  0x35   :  { %665 = vmatpush1.msra.mxu1 %v476_v27  ;;  %206 = vmatprep.mubr.f32.mxu0 %v8260_v2  ;;  %8816 = vst [vmem:[#allocation21_spill] sm:$0xff] %v4847_v52  ;;  %v4907_v11 = vld [vmem:[#allocation5 + $0xf0] sm:$0xff]  ;;  %v4910_v13 = vld [vmem:[#allocation5 + $0xd8] sm:$0xff]  ;;  %v4956_v27 = vld [vmem:[#allocation8 + $0x1e8] sm:$0xff] }
  0x36   :  { %3595 = vmatmul.mubr.msk.f32.gmra.mxu1 %vm90_vm1, %v67_v28  ;;  %666 = vmatprep.subr.mxu1 %v473_v29  ;;  %v4913_v14 = vld [vmem:[#allocation5 + $0xd0] sm:$0xff]  ;;  %v4916_v15 = vld [vmem:[#allocation5 + $0xb8] sm:$0xff]  ;;  %8819 = vst [vmem:[#allocation24_spill] sm:$0xff] %v4956_v27  ;;  %v4962_v29 = vld [vmem:[#allocation8 + $0x1e0] sm:$0xff] }
  0x37   :  { %667 = vmatpush1.msra.mxu1 %v472_v30  ;;  %325 = vmatprep.mubr.f32.mxu1 %v8260_v2  ;;  %v4919_v16 = vld [vmem:[#allocation5 + $0xb0] sm:$0xff]  ;;  %v4922_v17 = vld [vmem:[#allocation5 + $0x98] sm:$0xff]  ;;  %8821 = vst [vmem:[#allocation26_spill] sm:$0xff] %v4962_v29 }
  0x38   :  { %668 = vmatprep.subr.mxu1 %v469_v31  ;;  %3585 = vmatmul.mubr.msk.f32.gmra.mxu0 %vm90_vm1, %v67_v28  ;;  %v4925_v18 = vld [vmem:[#allocation5 + $0x90] sm:$0xff]  ;;  %v4928_v19 = vld [vmem:[#allocation5 + $0x78] sm:$0xff]  ;;  %v4968_v31 = vld [vmem:[#allocation8 + $0x1c8] sm:$0xff] }
  0x39   :  { %669 = vmatpush1.msra.mxu1 %v468_v32  ;;  %212 = vmatprep.mubr.f32.mxu0 %v8260_v2  ;;  %v4931_v20 = vld [vmem:[#allocation5 + $0x70] sm:$0xff]  ;;  %v4934_v21 = vld [vmem:[#allocation5 + $0x58] sm:$0xff]  ;;  %8823 = vst [vmem:[#allocation28_spill] sm:$0xff] %v4968_v31 }
  0x3a   :  { %3596 = vmatmul.mubr.msk.f32.gmra.mxu1 %vm90_vm1, %v68_v33  ;;  %670 = vmatprep.subr.mxu1 %v465_v34  ;;  %v4937_v22 = vld [vmem:[#allocation5 + $0x50] sm:$0xff]  ;;  %v4940_v23 = vld [vmem:[#allocation5 + $0x38] sm:$0xff] }
  0x3b   :  { %671 = vmatpush1.msra.mxu1 %v464_v35  ;;  %331 = vmatprep.mubr.f32.mxu1 %v8260_v2  ;;  %v4943_v24 = vld [vmem:[#allocation5 + $0x30] sm:$0xff]  ;;  %v4946_v25 = vld [vmem:[#allocation5 + $0x18] sm:$0xff]  ;;  %v4980_v35 = vld [vmem:[#allocation8 + $0x1a8] sm:$0xff] }
  0x3c   :  { %672 = vmatprep.subr.mxu1 %v461_v36  ;;  %3586 = vmatmul.mubr.msk.f32.gmra.mxu0 %vm90_vm1, %v68_v33  ;;  %8817 = vst [vmem:[#allocation22_spill] sm:$0xff] %v4946_v25  ;;  %v4949_v26 = vld [vmem:[#allocation5 + $0x10] sm:$0xff]  ;;  %v4958_v28 = vld [vmem:[#allocation8 + $0x1f8] sm:$0xff]  ;;  %v4974_v33 = vld [vmem:[#allocation8 + $0x1c0] sm:$0xff] }
  0x3d   :  { %673 = vmatpush1.msra.mxu1 %v4792_v37  ;;  %218 = vmatprep.mubr.f32.mxu0 %v8260_v2  ;;  %8818 = vst [vmem:[#allocation23_spill] sm:$0xff] %v4949_v26  ;;  %8820 = vst [vmem:[#allocation25_spill] sm:$0xff] %v4958_v28  ;;  %v4964_v30 = vld [vmem:[#allocation8 + $0x1f0] sm:$0xff]  ;;  %v4970_v32 = vld [vmem:[#allocation8 + $0x1d8] sm:$0xff] }
  0x3e   :  { %3597 = vmatmul.mubr.msk.f32.gmra.mxu1 %vm90_vm1, %v69_v38  ;;  %674 = vmatprep.subr.mxu1 %v4798_v39  ;;  %8822 = vst [vmem:[#allocation27_spill] sm:$0xff] %v4964_v30  ;;  %8824 = vst [vmem:[#allocation29_spill] sm:$0xff] %v4970_v32  ;;  %v4976_v34 = vld [vmem:[#allocation8 + $0x1d0] sm:$0xff]  ;;  %v4982_v36 = vld [vmem:[#allocation8 + $0x1b8] sm:$0xff] }
  0x3f   :  { %675 = vmatpush1.msra.mxu1 %v4800_v40  ;;  %337 = vmatprep.mubr.f32.mxu1 %v8260_v2  ;;  %8825 = vst [vmem:[#allocation30_spill] sm:$0xff] %v4974_v33  ;;  %8826 = vst [vmem:[#allocation31_spill] sm:$0xff] %v4976_v34 }
  0x40   :  { %676 = vmatprep.subr.mxu1 %v4804_v41  ;;  %3587 = vmatmul.mubr.msk.f32.gmra.mxu0 %vm90_vm1, %v69_v38  ;;  %8827 = vst [vmem:[#allocation32_spill] sm:$0xff] %v4980_v35  ;;  %8828 = vst [vmem:[#allocation33_spill] sm:$0xff] %v4982_v36  ;;  %v4986_v38 = vld [vmem:[#allocation8 + $0x1a0] sm:$0xff] }
  0x41   :  { %677 = vmatpush1.msra.mxu1 %v4809_v42  ;;  %224 = vmatprep.mubr.f32.mxu0 %v8260_v2  ;;  %8829 = vst [vmem:[#allocation34_spill] sm:$0xff] %v4986_v38 }
  0x42   :  { %3598 = vmatmul.mubr.msk.f32.gmra.mxu1 %vm90_vm1, %v70_v43  ;;  %678 = vmatprep.subr.mxu1 %v4816_v44 }
  0x43   :  { %679 = vmatpush1.msra.mxu1 %v4819_v45  ;;  %343 = vmatprep.mubr.f32.mxu1 %v8260_v2 }
  0x44   :  { %680 = vmatprep.subr.mxu1 %v4823_v46  ;;  %3588 = vmatmul.mubr.msk.f32.gmra.mxu0 %vm90_vm1, %v70_v43  ;;  %v4988_v43 = vld [vmem:[#allocation8 + $0x1b0] sm:$0xff] }
  0x45   :  { %681 = vmatpush1.msra.mxu1 %v4828_v47  ;;  %230 = vmatprep.mubr.f32.mxu0 %v8260_v2  ;;  %8830 = vst [vmem:[#allocation35_spill] sm:$0xff] %v4988_v43 }
  0x46   :  { %3599 = vmatmul.mubr.msk.f32.gmra.mxu1 %vm90_vm1, %v71_v48  ;;  %682 = vmatprep.subr.mxu1 %v4835_v49 }
  0x47   :  { %683 = vmatpush1.msra.mxu1 %v4838_v50  ;;  %718 = vmatprep.mubr.f32.mxu1 %v8260_v2 }
  0x48   :  { %684 = vmatprep.subr.mxu1 %v4842_v51  ;;  %3589 = vmatmul.mubr.msk.f32.gmra.mxu0 %vm90_vm1, %v71_v48  ;;  %v4992_v48 = vld [vmem:[#allocation8 + $0x188] sm:$0xff] }
  0x49   :  { %685 = vmatpush1.msra.mxu1 %v4847_v52  ;;  %888 = vmatprep.mubr.f32.mxu0 %v8260_v2  ;;  %8831 = vst [vmem:[#allocation36_spill] sm:$0xff] %v4992_v48 }
  0x4a   :  { %719 = vmatmul.mubr.f32.vlgmr.msra.gmra.mxu1 %v8260_v2  ;;  %725 = vmatprep.subr.mxu1 %v4851_v53 }
  0x4b   :  { %726 = vmatpush1.msra.mxu1 %v4854_v54  ;;  %789 = vmatprep.mubr.f32.mxu1 %v8260_v2 }
  0x4c   :  { %727 = vmatprep.subr.mxu1 %v4858_v55  ;;  %824 = vmatprep.subr.mxu0 %v4956_v27 }
  0x4d   :  { %728 = vmatpush1.msra.mxu1 %v4863_v56  ;;  %825 = vmatpush1.msra.mxu0 %v4962_v29 }
  0x4e   :  { %729 = vmatprep.subr.mxu1 %v4866_v57  ;;  %826 = vmatprep.subr.mxu0 %v4968_v31  ;;  %v5284_v31 = vld [vmem:[#allocation8 + $0x290] sm:$0xff] }
  0x4f   :  { %730 = vmatpush1.msra.mxu1 %v4870_v58  ;;  %827 = vmatpush1.msra.mxu0 %v4974_v33  ;;  %v5268_v33 = vld [vmem:[#allocation8 + $0x2b8] sm:$0xff]  ;;  %8930 = vst [vmem:[#allocation135_spill] sm:$0xff] %v5284_v31 }
  0x50   :  { %731 = vmatprep.subr.mxu1 %v4874_v59  ;;  %828 = vmatprep.subr.mxu0 %v4980_v35  ;;  %v5000_v35 = vld [vmem:[#allocation8 + $0x190] sm:$0xff]  ;;  %8924 = vst [vmem:[#allocation129_spill] sm:$0xff] %v5268_v33 }
  0x51   :  { %732 = vmatpush1.msra.mxu1 %v4877_v60  ;;  %829 = vmatpush1.msra.mxu0 %v4986_v38  ;;  %8834 = vst [vmem:[#allocation39_spill] sm:$0xff] %v5000_v35  ;;  %v5006_v38 = vld [vmem:[#allocation8 + $0x178] sm:$0xff] }
  0x52   :  { %733 = vmatprep.subr.mxu1 %v4880_v61  ;;  %830 = vmatprep.subr.mxu0 %v4992_v48  ;;  %8836 = vst [vmem:[#allocation41_spill] sm:$0xff] %v5006_v38  ;;  %v5012_v48 = vld [vmem:[#allocation8 + $0x170] sm:$0xff] }
  0x53   :  { %734 = vmatpush1.msra.mxu1 %v4883_v62  ;;  %8838 = vst [vmem:[#allocation43_spill] sm:$0xff] %v5012_v48 }
  0x54   :  { %735 = vmatprep.subr.mxu1 %v4886_v63 }
  0x55   :  { %736 = vmatpush1.msra.mxu1 %v4889_v0 }
  0x56   :  { %737 = vmatprep.subr.mxu1 %v4892_v1 }
  0x57   :  { %738 = vmatpush1.msra.mxu1 %v4895_v3 }
  0x58   :  { %739 = vmatprep.subr.mxu1 %v4898_v8 }
  0x59   :  { %740 = vmatpush1.msra.mxu1 %v4901_v9 }
  0x5a   :  { %741 = vmatprep.subr.mxu1 %v4904_v10 }
  0x5b   :  { %742 = vmatpush1.msra.mxu1 %v4907_v11 }
  0x5c   :  { %743 = vmatprep.subr.mxu1 %v4910_v13 }
  0x5d   :  { %744 = vmatpush1.msra.mxu1 %v4913_v14 }
  0x5e   :  { %745 = vmatprep.subr.mxu1 %v4916_v15 }
  0x5f   :  { %746 = vmatpush1.msra.mxu1 %v4919_v16 }
  0x60   :  { %747 = vmatprep.subr.mxu1 %v4922_v17 }
  0x61   :  { %748 = vmatpush1.msra.mxu1 %v4925_v18 }
  0x62   :  { %749 = vmatprep.subr.mxu1 %v4928_v19 }
  0x63   :  { %750 = vmatpush1.msra.mxu1 %v4931_v20 }
  0x64   :  { %751 = vmatprep.subr.mxu1 %v4934_v21 }
  0x65   :  { %752 = vmatpush1.msra.mxu1 %v4937_v22 }
  0x66   :  { %753 = vmatprep.subr.mxu1 %v4940_v23 }
  0x67   :  { %754 = vmatpush1.msra.mxu1 %v4943_v24 }
  0x68   :  { %755 = vmatprep.subr.mxu1 %v4946_v25 }
  0x69   :  { %756 = vmatpush1.msra.mxu1 %v4949_v26 }
  0x6a   :  { %790 = vmatmul.mubr.f32.vlgmr.msra.gmra.mxu1 %v8260_v2  ;;  %895 = vmatprep.subr.mxu1 %v4958_v28 }
  0x6b   :  { %959 = vmatprep.mubr.f32.mxu1 %v8260_v2  ;;  %896 = vmatpush1.msra.mxu1 %v4964_v30  ;;  %v4994_v2 = vld [vmem:[#allocation8 + $0x198] sm:$0xff]  ;;  %v5300_v30 = vld [vmem:[#allocation8 + $0x248] sm:$0xff] }
  0x6c   :  { %897 = vmatprep.subr.mxu1 %v4970_v32  ;;  %8832 = vst [vmem:[#allocation37_spill] sm:$0xff] %v4994_v2  ;;  %v5276_v32 = vld [vmem:[#allocation8 + $0x288] sm:$0xff]  ;;  %8935 = vst [vmem:[#allocation140_spill] sm:$0xff] %v5300_v30 }
  0x6d   :  { %898 = vmatpush1.msra.mxu1 %v4976_v34  ;;  %v4998_v34 = vld [vmem:[#allocation8 + $0x180] sm:$0xff]  ;;  %8927 = vst [vmem:[#allocation132_spill] sm:$0xff] %v5276_v32 }
  0x6e   :  { %899 = vmatprep.subr.mxu1 %v4982_v36  ;;  %8833 = vst [vmem:[#allocation38_spill] sm:$0xff] %v4998_v34  ;;  %831 = vmatpush1.msra.mxu0 %v4998_v34  ;;  %v5004_v36 = vld [vmem:[#allocation8 + $0x168] sm:$0xff]  ;;  %v5018_v34 = vld [vmem:[#allocation8 + $0x158] sm:$0xff] }
  0x6f   :  { %900 = vmatpush1.msra.mxu1 %v4988_v43  ;;  %8835 = vst [vmem:[#allocation40_spill] sm:$0xff] %v5004_v36  ;;  %832 = vmatprep.subr.mxu0 %v5004_v36  ;;  %v5010_v43 = vld [vmem:[#allocation8 + $0x160] sm:$0xff]  ;;  %8840 = vst [vmem:[#allocation45_spill] sm:$0xff] %v5018_v34  ;;  %v5024_v36 = vld [vmem:[#allocation8 + $0x150] sm:$0xff] }
  0x70   :  { %901 = vmatprep.subr.mxu1 %v4994_v2  ;;  %8837 = vst [vmem:[#allocation42_spill] sm:$0xff] %v5010_v43  ;;  %833 = vmatpush1.msra.mxu0 %v5010_v43  ;;  %v5016_v2 = vld [vmem:[#allocation8 + $0x148] sm:$0xff]  ;;  %8842 = vst [vmem:[#allocation47_spill] sm:$0xff] %v5024_v36  ;;  %v5030_v43 = vld [vmem:[#allocation8 + $0x138] sm:$0xff] }
  0x71   :  { %902 = vmatpush1.msra.mxu1 %v5000_v35  ;;  %8839 = vst [vmem:[#allocation44_spill] sm:$0xff] %v5016_v2  ;;  %834 = vmatprep.subr.mxu0 %v5016_v2  ;;  %v5022_v35 = vld [vmem:[#allocation8 + $0x140] sm:$0xff]  ;;  %8844 = vst [vmem:[#allocation49_spill] sm:$0xff] %v5030_v43  ;;  %v5036_v2 = vld [vmem:[#allocation8 + $0x130] sm:$0xff] }
  0x72   :  { %903 = vmatprep.subr.mxu1 %v5006_v38  ;;  %8841 = vst [vmem:[#allocation46_spill] sm:$0xff] %v5022_v35  ;;  %835 = vmatpush1.msra.mxu0 %v5022_v35  ;;  %v5028_v38 = vld [vmem:[#allocation8 + $0x128] sm:$0xff]  ;;  %8846 = vst [vmem:[#allocation51_spill] sm:$0xff] %v5036_v2  ;;  %v5042_v35 = vld [vmem:[#allocation8 + $0x118] sm:$0xff] }
  0x73   :  { %904 = vmatpush1.msra.mxu1 %v5012_v48  ;;  %8843 = vst [vmem:[#allocation48_spill] sm:$0xff] %v5028_v38  ;;  %836 = vmatprep.subr.mxu0 %v5028_v38  ;;  %v5034_v48 = vld [vmem:[#allocation8 + $0x120] sm:$0xff]  ;;  %8848 = vst [vmem:[#allocation53_spill] sm:$0xff] %v5042_v35  ;;  %v5048_v38 = vld [vmem:[#allocation8 + $0x110] sm:$0xff] }
  0x74   :  { %905 = vmatprep.subr.mxu1 %v5018_v34  ;;  %8845 = vst [vmem:[#allocation50_spill] sm:$0xff] %v5034_v48  ;;  %837 = vmatpush1.msra.mxu0 %v5034_v48  ;;  %v5040_v34 = vld [vmem:[#allocation8 + $0x108] sm:$0xff]  ;;  %8850 = vst [vmem:[#allocation55_spill] sm:$0xff] %v5048_v38  ;;  %v5054_v48 = vld [vmem:[#allocation8 + $0xf8] sm:$0xff] }
  0x75   :  { %906 = vmatpush1.msra.mxu1 %v5024_v36  ;;  %8847 = vst [vmem:[#allocation52_spill] sm:$0xff] %v5040_v34  ;;  %838 = vmatprep.subr.mxu0 %v5040_v34  ;;  %v5046_v36 = vld [vmem:[#allocation8 + $0x100] sm:$0xff]  ;;  %8852 = vst [vmem:[#allocation57_spill] sm:$0xff] %v5054_v48  ;;  %v5060_v34 = vld [vmem:[#allocation8 + $0xf0] sm:$0xff] }
  0x76   :  { %907 = vmatprep.subr.mxu1 %v5030_v43  ;;  %8849 = vst [vmem:[#allocation54_spill] sm:$0xff] %v5046_v36  ;;  %839 = vmatpush1.msra.mxu0 %v5046_v36  ;;  %v5052_v43 = vld [vmem:[#allocation8 + $0xe8] sm:$0xff]  ;;  %8854 = vst [vmem:[#allocation59_spill] sm:$0xff] %v5060_v34  ;;  %v5066_v36 = vld [vmem:[#allocation8 + $0xd8] sm:$0xff] }
  0x77   :  { %908 = vmatpush1.msra.mxu1 %v5036_v2  ;;  %8851 = vst [vmem:[#allocation56_spill] sm:$0xff] %v5052_v43  ;;  %840 = vmatprep.subr.mxu0 %v5052_v43  ;;  %v5058_v2 = vld [vmem:[#allocation8 + $0xe0] sm:$0xff]  ;;  %8856 = vst [vmem:[#allocation61_spill] sm:$0xff] %v5066_v36  ;;  %v5072_v43 = vld [vmem:[#allocation8 + $0xd0] sm:$0xff] }
  0x78   :  { %909 = vmatprep.subr.mxu1 %v5042_v35  ;;  %8853 = vst [vmem:[#allocation58_spill] sm:$0xff] %v5058_v2  ;;  %841 = vmatpush1.msra.mxu0 %v5058_v2  ;;  %v5064_v35 = vld [vmem:[#allocation8 + $0xc8] sm:$0xff]  ;;  %8858 = vst [vmem:[#allocation63_spill] sm:$0xff] %v5072_v43  ;;  %v5078_v2 = vld [vmem:[#allocation8 + $0xb8] sm:$0xff] }
  0x79   :  { %910 = vmatpush1.msra.mxu1 %v5048_v38  ;;  %8855 = vst [vmem:[#allocation60_spill] sm:$0xff] %v5064_v35  ;;  %842 = vmatprep.subr.mxu0 %v5064_v35  ;;  %v5070_v38 = vld [vmem:[#allocation8 + $0xc0] sm:$0xff]  ;;  %8860 = vst [vmem:[#allocation65_spill] sm:$0xff] %v5078_v2  ;;  %v5084_v35 = vld [vmem:[#allocation8 + $0xb0] sm:$0xff] }
  0x7a   :  { %911 = vmatprep.subr.mxu1 %v5054_v48  ;;  %8857 = vst [vmem:[#allocation62_spill] sm:$0xff] %v5070_v38  ;;  %843 = vmatpush1.msra.mxu0 %v5070_v38  ;;  %v5076_v48 = vld [vmem:[#allocation8 + $0xa8] sm:$0xff]  ;;  %8862 = vst [vmem:[#allocation67_spill] sm:$0xff] %v5084_v35  ;;  %v5090_v38 = vld [vmem:[#allocation8 + $0x98] sm:$0xff] }
  0x7b   :  { %912 = vmatpush1.msra.mxu1 %v5060_v34  ;;  %8859 = vst [vmem:[#allocation64_spill] sm:$0xff] %v5076_v48  ;;  %844 = vmatprep.subr.mxu0 %v5076_v48  ;;  %v5082_v34 = vld [vmem:[#allocation8 + $0xa0] sm:$0xff]  ;;  %8864 = vst [vmem:[#allocation69_spill] sm:$0xff] %v5090_v38  ;;  %v5096_v48 = vld [vmem:[#allocation8 + $0x90] sm:$0xff] }
  0x7c   :  { %913 = vmatprep.subr.mxu1 %v5066_v36  ;;  %8861 = vst [vmem:[#allocation66_spill] sm:$0xff] %v5082_v34  ;;  %845 = vmatpush1.msra.mxu0 %v5082_v34  ;;  %v5088_v36 = vld [vmem:[#allocation8 + $0x88] sm:$0xff]  ;;  %8866 = vst [vmem:[#allocation71_spill] sm:$0xff] %v5096_v48  ;;  %v5102_v34 = vld [vmem:[#allocation8 + $0x78] sm:$0xff] }
  0x7d   :  { %914 = vmatpush1.msra.mxu1 %v5072_v43  ;;  %8863 = vst [vmem:[#allocation68_spill] sm:$0xff] %v5088_v36  ;;  %846 = vmatprep.subr.mxu0 %v5088_v36  ;;  %v5094_v43 = vld [vmem:[#allocation8 + $0x80] sm:$0xff]  ;;  %8868 = vst [vmem:[#allocation73_spill] sm:$0xff] %v5102_v34  ;;  %v5108_v36 = vld [vmem:[#allocation8 + $0x70] sm:$0xff] }
  0x7e   :  { %915 = vmatprep.subr.mxu1 %v5078_v2  ;;  %8865 = vst [vmem:[#allocation70_spill] sm:$0xff] %v5094_v43  ;;  %847 = vmatpush1.msra.mxu0 %v5094_v43  ;;  %v5100_v2 = vld [vmem:[#allocation8 + $0x68] sm:$0xff]  ;;  %8870 = vst [vmem:[#allocation75_spill] sm:$0xff] %v5108_v36  ;;  %v5114_v43 = vld [vmem:[#allocation8 + $0x58] sm:$0xff] }
  0x7f   :  { %916 = vmatpush1.msra.mxu1 %v5084_v35  ;;  %8867 = vst [vmem:[#allocation72_spill] sm:$0xff] %v5100_v2  ;;  %848 = vmatprep.subr.mxu0 %v5100_v2  ;;  %v5106_v35 = vld [vmem:[#allocation8 + $0x60] sm:$0xff]  ;;  %8872 = vst [vmem:[#allocation77_spill] sm:$0xff] %v5114_v43  ;;  %v5120_v2 = vld [vmem:[#allocation8 + $0x50] sm:$0xff] }
  0x80   :  { %917 = vmatprep.subr.mxu1 %v5090_v38  ;;  %8869 = vst [vmem:[#allocation74_spill] sm:$0xff] %v5106_v35  ;;  %849 = vmatpush1.msra.mxu0 %v5106_v35  ;;  %v5112_v38 = vld [vmem:[#allocation8 + $0x48] sm:$0xff]  ;;  %8874 = vst [vmem:[#allocation79_spill] sm:$0xff] %v5120_v2  ;;  %v5126_v35 = vld [vmem:[#allocation8 + $0x38] sm:$0xff] }
  0x81   :  { %918 = vmatpush1.msra.mxu1 %v5096_v48  ;;  %8871 = vst [vmem:[#allocation76_spill] sm:$0xff] %v5112_v38  ;;  %850 = vmatprep.subr.mxu0 %v5112_v38  ;;  %v5118_v48 = vld [vmem:[#allocation8 + $0x40] sm:$0xff]  ;;  %8876 = vst [vmem:[#allocation81_spill] sm:$0xff] %v5126_v35  ;;  %v5132_v38 = vld [vmem:[#allocation8 + $0x30] sm:$0xff] }
  0x82   :  { %919 = vmatprep.subr.mxu1 %v5102_v34  ;;  %8873 = vst [vmem:[#allocation78_spill] sm:$0xff] %v5118_v48  ;;  %851 = vmatpush1.msra.mxu0 %v5118_v48  ;;  %v5124_v34 = vld [vmem:[#allocation8 + $0x28] sm:$0xff]  ;;  %8878 = vst [vmem:[#allocation83_spill] sm:$0xff] %v5132_v38  ;;  %v5138_v48 = vld [vmem:[#allocation8 + $0x18] sm:$0xff] }
  0x83   :  { %920 = vmatpush1.msra.mxu1 %v5108_v36  ;;  %8875 = vst [vmem:[#allocation80_spill] sm:$0xff] %v5124_v34  ;;  %852 = vmatprep.subr.mxu0 %v5124_v34  ;;  %v5130_v36 = vld [vmem:[#allocation8 + $0x20] sm:$0xff]  ;;  %8880 = vst [vmem:[#allocation85_spill] sm:$0xff] %v5138_v48  ;;  %v5144_v34 = vld [vmem:[#allocation8 + $0x10] sm:$0xff] }
  0x84   :  { %921 = vmatprep.subr.mxu1 %v5114_v43  ;;  %8877 = vst [vmem:[#allocation82_spill] sm:$0xff] %v5130_v36  ;;  %853 = vmatpush1.msra.mxu0 %v5130_v36  ;;  %v5136_v43 = vld [vmem:[#allocation8 + $0x8] sm:$0xff]  ;;  %8882 = vst [vmem:[#allocation87_spill] sm:$0xff] %v5144_v34  ;;  %v5150_v36 = vld [vmem:[#allocation8 + $0x3f8] sm:$0xff] }
  0x85   :  { %922 = vmatpush1.msra.mxu1 %v5120_v2  ;;  %8879 = vst [vmem:[#allocation84_spill] sm:$0xff] %v5136_v43  ;;  %854 = vmatprep.subr.mxu0 %v5136_v43  ;;  %v5142_v2 = vld [vmem:[#allocation8] sm:$0xff]  ;;  %8884 = vst [vmem:[#allocation89_spill] sm:$0xff] %v5150_v36  ;;  %v5156_v43 = vld [vmem:[#allocation8 + $0x3f0] sm:$0xff] }
  0x86   :  { %923 = vmatprep.subr.mxu1 %v5126_v35  ;;  %8881 = vst [vmem:[#allocation86_spill] sm:$0xff] %v5142_v2  ;;  %855 = vmatpush1.msra.mxu0 %v5142_v2  ;;  %v5148_v35 = vld [vmem:[#allocation8 + $0x3e8] sm:$0xff]  ;;  %8886 = vst [vmem:[#allocation91_spill] sm:$0xff] %v5156_v43  ;;  %v5162_v2 = vld [vmem:[#allocation8 + $0x3d8] sm:$0xff] }
  0x87   :  { %924 = vmatpush1.msra.mxu1 %v5132_v38  ;;  %8883 = vst [vmem:[#allocation88_spill] sm:$0xff] %v5148_v35  ;;  %856 = vmatprep.subr.mxu0 %v5148_v35  ;;  %v5154_v38 = vld [vmem:[#allocation8 + $0x3e0] sm:$0xff]  ;;  %8888 = vst [vmem:[#allocation93_spill] sm:$0xff] %v5162_v2  ;;  %v5168_v35 = vld [vmem:[#allocation8 + $0x3d0] sm:$0xff] }
  0x88   :  { %925 = vmatprep.subr.mxu1 %v5138_v48  ;;  %8885 = vst [vmem:[#allocation90_spill] sm:$0xff] %v5154_v38  ;;  %857 = vmatpush2.msra.mxu0 %v5154_v38  ;;  %v5160_v48 = vld [vmem:[#allocation8 + $0x3c8] sm:$0xff]  ;;  %8890 = vst [vmem:[#allocation95_spill] sm:$0xff] %v5168_v35  ;;  %v5174_v38 = vld [vmem:[#allocation8 + $0x3b8] sm:$0xff] }
  0x89   :  { %926 = vmatpush1.msra.mxu1 %v5144_v34  ;;  %8887 = vst [vmem:[#allocation92_spill] sm:$0xff] %v5160_v48  ;;  %858 = vmatprep.subr.mxu0 %v5160_v48  ;;  %v5166_v34 = vld [vmem:[#allocation8 + $0x3c0] sm:$0xff]  ;;  %8892 = vst [vmem:[#allocation97_spill] sm:$0xff] %v5174_v38  ;;  %v5180_v48 = vld [vmem:[#allocation8 + $0x3b0] sm:$0xff] }
  0x8a   :  { %927 = vmatprep.subr.mxu1 %v5150_v36  ;;  %8889 = vst [vmem:[#allocation94_spill] sm:$0xff] %v5166_v34  ;;  %859 = vmatpush2.msra.mxu0 %v5166_v34  ;;  %v5172_v36 = vld [vmem:[#allocation8 + $0x3a8] sm:$0xff]  ;;  %8894 = vst [vmem:[#allocation99_spill] sm:$0xff] %v5180_v48  ;;  %v5186_v34 = vld [vmem:[#allocation8 + $0x398] sm:$0xff] }
  0x8b   :  { %928 = vmatpush2.msra.mxu1 %v5156_v43  ;;  %8891 = vst [vmem:[#allocation96_spill] sm:$0xff] %v5172_v36  ;;  %860 = vmatprep.subr.mxu0 %v5172_v36  ;;  %v5178_v43 = vld [vmem:[#allocation8 + $0x3a0] sm:$0xff]  ;;  %8896 = vst [vmem:[#allocation101_spill] sm:$0xff] %v5186_v34  ;;  %v5192_v36 = vld [vmem:[#allocation8 + $0x390] sm:$0xff] }
  0x8c   :  { %929 = vmatprep.subr.mxu1 %v5162_v2  ;;  %8893 = vst [vmem:[#allocation98_spill] sm:$0xff] %v5178_v43  ;;  %861 = vmatpush2.msra.mxu0 %v5178_v43  ;;  %v5184_v2 = vld [vmem:[#allocation8 + $0x388] sm:$0xff]  ;;  %8898 = vst [vmem:[#allocation103_spill] sm:$0xff] %v5192_v36  ;;  %v5198_v43 = vld [vmem:[#allocation8 + $0x378] sm:$0xff] }
  0x8d   :  { %930 = vmatpush2.msra.mxu1 %v5168_v35  ;;  %8895 = vst [vmem:[#allocation100_spill] sm:$0xff] %v5184_v2  ;;  %862 = vmatprep.subr.mxu0 %v5184_v2  ;;  %v5190_v35 = vld [vmem:[#allocation8 + $0x380] sm:$0xff]  ;;  %8900 = vst [vmem:[#allocation105_spill] sm:$0xff] %v5198_v43  ;;  %v5204_v2 = vld [vmem:[#allocation8 + $0x370] sm:$0xff] }
  0x8e   :  { %931 = vmatprep.subr.mxu1 %v5174_v38  ;;  %8897 = vst [vmem:[#allocation102_spill] sm:$0xff] %v5190_v35  ;;  %863 = vmatpush2.msra.mxu0 %v5190_v35  ;;  %v5196_v38 = vld [vmem:[#allocation8 + $0x368] sm:$0xff]  ;;  %8902 = vst [vmem:[#allocation107_spill] sm:$0xff] %v5204_v2  ;;  %v5210_v35 = vld [vmem:[#allocation8 + $0x358] sm:$0xff] }
  0x8f   :  { %932 = vmatpush2.msra.mxu1 %v5180_v48  ;;  %8899 = vst [vmem:[#allocation104_spill] sm:$0xff] %v5196_v38  ;;  %864 = vmatprep.subr.mxu0 %v5196_v38  ;;  %v5202_v48 = vld [vmem:[#allocation8 + $0x360] sm:$0xff]  ;;  %8904 = vst [vmem:[#allocation109_spill] sm:$0xff] %v5210_v35  ;;  %v5216_v38 = vld [vmem:[#allocation8 + $0x350] sm:$0xff] }
  0x90   :  { %933 = vmatprep.subr.mxu1 %v5186_v34  ;;  %8901 = vst [vmem:[#allocation106_spill] sm:$0xff] %v5202_v48  ;;  %865 = vmatpush2.msra.mxu0 %v5202_v48  ;;  %v5208_v34 = vld [vmem:[#allocation8 + $0x348] sm:$0xff]  ;;  %8906 = vst [vmem:[#allocation111_spill] sm:$0xff] %v5216_v38  ;;  %v5222_v48 = vld [vmem:[#allocation8 + $0x338] sm:$0xff] }
  0x91   :  { %934 = vmatpush2.msra.mxu1 %v5192_v36  ;;  %8903 = vst [vmem:[#allocation108_spill] sm:$0xff] %v5208_v34  ;;  %866 = vmatprep.subr.mxu0 %v5208_v34  ;;  %v5214_v36 = vld [vmem:[#allocation8 + $0x340] sm:$0xff]  ;;  %8908 = vst [vmem:[#allocation113_spill] sm:$0xff] %v5222_v48  ;;  %v5228_v34 = vld [vmem:[#allocation8 + $0x330] sm:$0xff] }
  0x92   :  { %935 = vmatprep.subr.mxu1 %v5198_v43  ;;  %8905 = vst [vmem:[#allocation110_spill] sm:$0xff] %v5214_v36  ;;  %867 = vmatpush2.msra.mxu0 %v5214_v36  ;;  %v5220_v43 = vld [vmem:[#allocation8 + $0x328] sm:$0xff]  ;;  %8910 = vst [vmem:[#allocation115_spill] sm:$0xff] %v5228_v34  ;;  %v5234_v36 = vld [vmem:[#allocation8 + $0x318] sm:$0xff] }
  0x93   :  { %936 = vmatpush2.msra.mxu1 %v5204_v2  ;;  %8907 = vst [vmem:[#allocation112_spill] sm:$0xff] %v5220_v43  ;;  %868 = vmatprep.subr.mxu0 %v5220_v43  ;;  %v5226_v2 = vld [vmem:[#allocation8 + $0x320] sm:$0xff]  ;;  %8912 = vst [vmem:[#allocation117_spill] sm:$0xff] %v5234_v36  ;;  %v5240_v43 = vld [vmem:[#allocation8 + $0x310] sm:$0xff] }
  0x94   :  { %937 = vmatprep.subr.mxu1 %v5210_v35  ;;  %8909 = vst [vmem:[#allocation114_spill] sm:$0xff] %v5226_v2  ;;  %869 = vmatpush2.msra.mxu0 %v5226_v2  ;;  %v5232_v35 = vld [vmem:[#allocation8 + $0x308] sm:$0xff]  ;;  %8914 = vst [vmem:[#allocation119_spill] sm:$0xff] %v5240_v43  ;;  %v5246_v2 = vld [vmem:[#allocation8 + $0x2f8] sm:$0xff] }
  0x95   :  { %938 = vmatpush2.msra.mxu1 %v5216_v38  ;;  %8911 = vst [vmem:[#allocation116_spill] sm:$0xff] %v5232_v35  ;;  %870 = vmatprep.subr.mxu0 %v5232_v35  ;;  %v5238_v38 = vld [vmem:[#allocation8 + $0x300] sm:$0xff]  ;;  %8916 = vst [vmem:[#allocation121_spill] sm:$0xff] %v5246_v2  ;;  %v5252_v35 = vld [vmem:[#allocation8 + $0x2f0] sm:$0xff] }
  0x96   :  { %939 = vmatprep.subr.mxu1 %v5222_v48  ;;  %8913 = vst [vmem:[#allocation118_spill] sm:$0xff] %v5238_v38  ;;  %871 = vmatpush2.msra.mxu0 %v5238_v38  ;;  %v5244_v48 = vld [vmem:[#allocation8 + $0x2e8] sm:$0xff]  ;;  %8918 = vst [vmem:[#allocation123_spill] sm:$0xff] %v5252_v35  ;;  %v5258_v38 = vld [vmem:[#allocation8 + $0x2d8] sm:$0xff] }
  0x97   :  { %940 = vmatpush2.msra.mxu1 %v5228_v34  ;;  %8915 = vst [vmem:[#allocation120_spill] sm:$0xff] %v5244_v48  ;;  %872 = vmatprep.subr.mxu0 %v5244_v48  ;;  %v5250_v34 = vld [vmem:[#allocation8 + $0x2e0] sm:$0xff]  ;;  %8920 = vst [vmem:[#allocation125_spill] sm:$0xff] %v5258_v38  ;;  %v5264_v48 = vld [vmem:[#allocation8 + $0x2d0] sm:$0xff] }
  0x98   :  { %941 = vmatprep.subr.mxu1 %v5234_v36  ;;  %8917 = vst [vmem:[#allocation122_spill] sm:$0xff] %v5250_v34  ;;  %873 = vmatpush2.msra.mxu0 %v5250_v34  ;;  %v5256_v36 = vld [vmem:[#allocation8 + $0x2c8] sm:$0xff]  ;;  %8922 = vst [vmem:[#allocation127_spill] sm:$0xff] %v5264_v48  ;;  %v5274_v34 = vld [vmem:[#allocation8 + $0x2b0] sm:$0xff] }
  0x99   :  { %942 = vmatpush2.msra.mxu1 %v5240_v43  ;;  %8919 = vst [vmem:[#allocation124_spill] sm:$0xff] %v5256_v36  ;;  %v5260_v43 = vld [vmem:[#allocation8 + $0x2c0] sm:$0xff]  ;;  %874 = vmatprep.subr.mxu0 %v5256_v36  ;;  %8926 = vst [vmem:[#allocation131_spill] sm:$0xff] %v5274_v34 }
  0x9a   :  { %943 = vmatprep.subr.mxu1 %v5246_v2  ;;  %8921 = vst [vmem:[#allocation126_spill] sm:$0xff] %v5260_v43  ;;  %v5266_v2 = vld [vmem:[#allocation8 + $0x2a8] sm:$0xff]  ;;  %875 = vmatpush2.msra.mxu0 %v5260_v43  ;;  %v5282_v36 = vld [vmem:[#allocation8 + $0x280] sm:$0xff]  ;;  %v5290_v43 = vld [vmem:[#allocation8 + $0x278] sm:$0xff] }
  0x9b   :  { %944 = vmatpush2.msra.mxu1 %v5252_v35  ;;  %8923 = vst [vmem:[#allocation128_spill] sm:$0xff] %v5266_v2  ;;  %v5272_v35 = vld [vmem:[#allocation8 + $0x2a0] sm:$0xff]  ;;  %876 = vmatprep.subr.mxu0 %v5266_v2  ;;  %8929 = vst [vmem:[#allocation134_spill] sm:$0xff] %v5282_v36 }
  0x9c   :  { %945 = vmatprep.subr.mxu1 %v5258_v38  ;;  %8925 = vst [vmem:[#allocation130_spill] sm:$0xff] %v5272_v35  ;;  %v5280_v38 = vld [vmem:[#allocation8 + $0x298] sm:$0xff]  ;;  %877 = vmatpush2.msra.mxu0 %v5272_v35  ;;  %8932 = vst [vmem:[#allocation137_spill] sm:$0xff] %v5290_v43  ;;  %v5294_v2 = vld [vmem:[#allocation8 + $0x260] sm:$0xff] }
  0x9d   :  { %946 = vmatpush2.msra.mxu1 %v5264_v48  ;;  %8928 = vst [vmem:[#allocation133_spill] sm:$0xff] %v5280_v38  ;;  %v5288_v48 = vld [vmem:[#allocation8 + $0x268] sm:$0xff]  ;;  %878 = vmatprep.subr.mxu0 %v5276_v32  ;;  %8933 = vst [vmem:[#allocation138_spill] sm:$0xff] %v5294_v2  ;;  %v5302_v35 = vld [vmem:[#allocation8 + $0x258] sm:$0xff] }
  0x9e   :  { %947 = vmatprep.subr.mxu1 %v5268_v33  ;;  %8931 = vst [vmem:[#allocation136_spill] sm:$0xff] %v5288_v48  ;;  %v5296_v33 = vld [vmem:[#allocation8 + $0x270] sm:$0xff]  ;;  %879 = vmatpush2.msra.mxu0 %v5282_v36  ;;  %8936 = vst [vmem:[#allocation141_spill] sm:$0xff] %v5302_v35  ;;  %v5314_v36 = vld [vmem:[#allocation8 + $0x238] sm:$0xff] }
  0x9f   :  { %948 = vmatpush2.msra.mxu1 %v5274_v34  ;;  %8934 = vst [vmem:[#allocation139_spill] sm:$0xff] %v5296_v33  ;;  %880 = vmatprep.subr.mxu0 %v5288_v48  ;;  %v5306_v34 = vld [vmem:[#allocation8 + $0x240] sm:$0xff]  ;;  %v5308_v32 = vld [vmem:[#allocation8 + $0x250] sm:$0xff]  ;;  %8940 = vst [vmem:[#allocation145_spill] sm:$0xff] %v5314_v36 }
  0xa0   :  { %949 = vmatprep.subr.mxu1 %v5280_v38  ;;  %8937 = vst [vmem:[#allocation142_spill] sm:$0xff] %v5306_v34  ;;  %8938 = vst [vmem:[#allocation143_spill] sm:$0xff] %v5308_v32  ;;  %881 = vmatpush2.msra.mxu0 %v5294_v2  ;;  %v5312_v38 = vld [vmem:[#allocation8 + $0x228] sm:$0xff]  ;;  %v5320_v48 = vld [vmem:[#allocation8 + $0x230] sm:$0xff] }
  0xa1   :  { %950 = vmatpush2.msra.mxu1 %v5284_v31  ;;  %8939 = vst [vmem:[#allocation144_spill] sm:$0xff] %v5312_v38  ;;  %882 = vmatprep.subr.mxu0 %v5300_v30  ;;  %v5318_v31 = vld [vmem:[#allocation8 + $0x220] sm:$0xff]  ;;  %8942 = vst [vmem:[#allocation147_spill] sm:$0xff] %v5320_v48  ;;  %v5326_v2 = vld [vmem:[#allocation8 + $0x218] sm:$0xff] }
  0xa2   :  { %951 = vmatprep.subr.mxu1 %v5290_v43  ;;  %8941 = vst [vmem:[#allocation146_spill] sm:$0xff] %v5318_v31  ;;  %883 = vmatpush2.msra.mxu0 %v5306_v34  ;;  %v5324_v43 = vld [vmem:[#allocation8 + $0x208] sm:$0xff]  ;;  %8944 = vst [vmem:[#allocation149_spill] sm:$0xff] %v5326_v2  ;;  %v5332_v30 = vld [vmem:[#allocation8 + $0x210] sm:$0xff] }
  0xa3   :  { %952 = vmatpush2.msra.mxu1 %v5296_v33  ;;  %8943 = vst [vmem:[#allocation148_spill] sm:$0xff] %v5324_v43  ;;  %884 = vmatprep.subr.mxu0 %v5312_v38  ;;  %v5330_v33 = vld [vmem:[#allocation8 + $0x200] sm:$0xff]  ;;  %8946 = vst [vmem:[#allocation151_spill] sm:$0xff] %v5332_v30 }
  0xa4   :  { %953 = vmatprep.subr.mxu1 %v5302_v35  ;;  %8945 = vst [vmem:[#allocation150_spill] sm:$0xff] %v5330_v33  ;;  %885 = vmatpush2.msra.mxu0 %v5318_v31 }
  0xa5   :  { %954 = vmatpush2.msra.mxu1 %v5308_v32  ;;  %886 = vmatprep.subr.mxu0 %v5324_v43 }
  0xa6   :  { %955 = vmatprep.subr.mxu1 %v5314_v36  ;;  %887 = vmatpush2.msra.mxu0 %v5330_v33  ;;  %v350_v36 = vld [vmem:[%s8252_s3] sm:$0xf] }
  0xa7   :  { %956 = vmatpush2.msra.mxu1 %v5320_v48  ;;  %996 = vmatprep.subr.mxu0 %v4755_v12  ;;  %v5350_v43 = vrot.slane %v350_v36, %v4741_v5  ;;  %v5353_v33 = vrot.slane %v350_v36, %v4739_v4  ;;  %v5369_v4 = vrot.slane %v350_v36, %v4745_v7 }
  0xa8   :  { %957 = vmatprep.subr.mxu1 %v5326_v2 }
  0xa9   :  { %958 = vmatpush2.msra.mxu1 %v5332_v30 }
  0xaa   :  { %1067 = vmatprep.subr.mxu1 %v4851_v53 }
  0xea   :  { %v5345_v38 = vpop.f32.mrf.mxu1 }
  0xeb   :  { %v374_v25 = vadd.f32 %v5350_v43, %v5345_v38 }
  0xec   :  { %v5347_v31 = vpop.f32.mrf.mxu1  ;;  %v190_v2 = vpop.f32.mrf.mxu0 }
  0xee   :  { %v309_v48 = vpop.f32.mrf.mxu1  ;;  %v192_v30 = vpop.f32.mrf.mxu0 }
  0xef   :  { %v5356_v12 = vadd.f32 %v5350_v43, %v309_v48 }
  0xf0   :  { %v311_v53 = vpop.f32.mrf.mxu1  ;;  %v5361_v35 = vpop.f32.mrf.mxu0 }
  0xf1   :  { %8947 = vst [vmem:[#allocation152_spill] sm:$0xff] %v5356_v12  ;;  %v5359_v32 = vadd.f32 %v5353_v33, %v311_v53  ;;  %8949 = vst [vmem:[#allocation154_spill] sm:$0xff] %v5361_v35  ;;  %v5375_v53 = vrot.slane %v350_v36, %v4743_v6 }
  0xf2   :  { %v315_v34 = vpop.f32.mrf.mxu1  ;;  %v5366_v28 = vpop.f32.mrf.mxu0 }
  0xf3   :  { %8948 = vst [vmem:[#allocation153_spill] sm:$0xff] %v5359_v32  ;;  %v5364_v29 = vadd.f32 %v5350_v43, %v315_v34  ;;  %8951 = vst [vmem:[#allocation156_spill] sm:$0xff] %v5366_v28 }
  0xf4   :  { %v317_v5 = vpop.f32.mrf.mxu1  ;;  %v202_v27 = vpop.f32.mrf.mxu0  ;;  %8953 = vst [vmem:[#allocation158_spill] sm:$0xff] %v5375_v53 }
  0xf5   :  { %8950 = vst [vmem:[#allocation155_spill] sm:$0xff] %v5364_v29  ;;  %v5372_v48 = vadd.f32 %v5353_v33, %v317_v5  ;;  %v5381_v34 = vadd.f32 %v5369_v4, %v202_v27 }
  0xf6   :  { %v321_v12 = vpop.f32.mrf.mxu1  ;;  %v204_v35 = vpop.f32.mrf.mxu0 }
  0xf7   :  { %8952 = vst [vmem:[#allocation157_spill] sm:$0xff] %v5372_v48  ;;  %v5378_v32 = vadd.f32 %v5350_v43, %v321_v12  ;;  %8955 = vst [vmem:[#allocation160_spill] sm:$0xff] %v5381_v34  ;;  %v5387_v7 = vadd.f32 %v5375_v53, %v204_v35 }
  0xf8   :  { %v323_v29 = vpop.f32.mrf.mxu1  ;;  %v208_v48 = vpop.f32.mrf.mxu0 }
  0xf9   :  { %8954 = vst [vmem:[#allocation159_spill] sm:$0xff] %v5378_v32  ;;  %v5384_v28 = vadd.f32 %v5353_v33, %v323_v29  ;;  %8957 = vst [vmem:[#allocation162_spill] sm:$0xff] %v5387_v7  ;;  %v5393_v36 = vadd.f32 %v5369_v4, %v208_v48 }
  0xfa   :  { %v327_v5 = vpop.f32.mrf.mxu1  ;;  %v210_v32 = vpop.f32.mrf.mxu0 }
  0xfb   :  { %8956 = vst [vmem:[#allocation161_spill] sm:$0xff] %v5384_v28  ;;  %v5390_v26 = vadd.f32 %v5350_v43, %v327_v5  ;;  %8959 = vst [vmem:[#allocation164_spill] sm:$0xff] %v5393_v36  ;;  %v5399_v34 = vadd.f32 %v5375_v53, %v210_v32 }
  0xfc   :  { %v329_v12 = vpop.f32.mrf.mxu1  ;;  %v214_v28 = vpop.f32.mrf.mxu0 }
  0xfd   :  { %8958 = vst [vmem:[#allocation163_spill] sm:$0xff] %v5390_v26  ;;  %v5396_v27 = vadd.f32 %v5353_v33, %v329_v12  ;;  %8961 = vst [vmem:[#allocation166_spill] sm:$0xff] %v5399_v34  ;;  %v5405_v7 = vadd.f32 %v5369_v4, %v214_v28 }
  0xfe   :  { %v333_v29 = vpop.f32.mrf.mxu1  ;;  %v216_v26 = vpop.f32.mrf.mxu0 }
  0xff   :  { %8960 = vst [vmem:[#allocation165_spill] sm:$0xff] %v5396_v27  ;;  %v5402_v35 = vadd.f32 %v5350_v43, %v333_v29  ;;  %8963 = vst [vmem:[#allocation168_spill] sm:$0xff] %v5405_v7  ;;  %v5411_v36 = vadd.f32 %v5375_v53, %v216_v26 }
 0x100   :  { %v335_v5 = vpop.f32.mrf.mxu1  ;;  %v220_v27 = vpop.f32.mrf.mxu0 }
 0x101   :  { %8962 = vst [vmem:[#allocation167_spill] sm:$0xff] %v5402_v35  ;;  %v5408_v48 = vadd.f32 %v5353_v33, %v335_v5  ;;  %8965 = vst [vmem:[#allocation170_spill] sm:$0xff] %v5411_v36  ;;  %v5417_v34 = vadd.f32 %v5369_v4, %v220_v27 }
 0x102   :  { %v339_v12 = vpop.f32.mrf.mxu1  ;;  %v222_v35 = vpop.f32.mrf.mxu0 }
 0x103   :  { %8964 = vst [vmem:[#allocation169_spill] sm:$0xff] %v5408_v48  ;;  %v5414_v32 = vadd.f32 %v5350_v43, %v339_v12  ;;  %8967 = vst [vmem:[#allocation172_spill] sm:$0xff] %v5417_v34  ;;  %v5423_v7 = vadd.f32 %v5375_v53, %v222_v35  ;;  %v373_v35 = vadd.f32 %v5375_v53, %v192_v30 }
 0x104   :  { %v341_v29 = vpop.f32.mrf.mxu1  ;;  %v226_v48 = vpop.f32.mrf.mxu0 }
 0x105   :  { %8966 = vst [vmem:[#allocation171_spill] sm:$0xff] %v5414_v32  ;;  %v5420_v28 = vadd.f32 %v5353_v33, %v341_v29  ;;  %8969 = vst [vmem:[#allocation174_spill] sm:$0xff] %v5423_v7  ;;  %v5429_v36 = vadd.f32 %v5369_v4, %v226_v48 }
 0x106   :  { %v345_v5 = vpop.f32.mrf.mxu1  ;;  %v228_v32 = vpop.f32.mrf.mxu0 }
 0x107   :  { %8968 = vst [vmem:[#allocation173_spill] sm:$0xff] %v5420_v28  ;;  %v5426_v26 = vadd.f32 %v5350_v43, %v345_v5  ;;  %8971 = vst [vmem:[#allocation176_spill] sm:$0xff] %v5429_v36  ;;  %v5435_v34 = vadd.f32 %v5375_v53, %v228_v32  ;;  %v372_v5 = vadd.f32 %v5369_v4, %v190_v2 }
 0x108   :  { %v347_v12 = vpop.f32.mrf.mxu1  ;;  %v232_v28 = vpop.f32.mrf.mxu0 }
 0x109   :  { %8970 = vst [vmem:[#allocation175_spill] sm:$0xff] %v5426_v26  ;;  %v5432_v27 = vadd.f32 %v5353_v33, %v347_v12  ;;  %8973 = vst [vmem:[#allocation178_spill] sm:$0xff] %v5435_v34  ;;  %v5439_v7 = vadd.f32 %v5369_v4, %v232_v28  ;;  %v375_v28 = vadd.f32 %v5353_v33, %v5347_v31 }
 0x10a   :  { %v720_v29 = vpop.f32.mrf.mxu1 }
 0x10b   :  { %8972 = vst [vmem:[#allocation177_spill] sm:$0xff] %v5432_v27  ;;  %8974 = vst [vmem:[#allocation179_spill] sm:$0xff] %v5439_v7  ;;  %v796_v36 = vadd.f32 %v720_v29, %v372_v5  ;;  %v5909_v7 = vld [vmem:[#allocation8 + $0x1a8] sm:$0xff] }
 0x10c   :  { %v722_v26 = vpop.f32.mrf.mxu1 }
 0x10d   :  { %v797_v48 = vadd.f32 %v722_v26, %v373_v35  ;;  %v3600_v52 = vmul.f32 -1.442695, %v796_v36 }
 0x10f   :  { %v3601_v6 = vmul.f32 -1.442695, %v797_v48 }
 0x111   :  { %3726 = vpow2.f32 %v3601_v6 }
 0x112   :  { %3728 = vpow2.f32 %v3600_v52 }
 0x11e   :  { %v3727_v12 = vpop.eup %3726 }
 0x11f   :  { %v3729_v27 = vpop.eup %3728  ;;  %v809_v32 = vadd.f32 1.0, %v3727_v12  ;;  %v5457_v12 = vld [vmem:[#allocation5 + $0x1c8] sm:$0xff] }
 0x120   :  { %v803_v34 = vadd.f32 1.0, %v3729_v27 }
 0x121   :  { %3730 = vrcp.f32 %v809_v32  ;;  %v5461_v32 = vld [vmem:[#allocation5 + $0x1c0] sm:$0xff] }
 0x122   :  { %3732 = vrcp.f32 %v803_v34  ;;  %v5453_v34 = vld [vmem:[#allocation5 + $0x1e0] sm:$0xff] }
 0x12a   :  { %v791_v30 = vpop.f32.mrf.mxu1 }
 0x12b   :  { %v798_v2 = vadd.f32 %v791_v30, %v374_v25  ;;  %v5465_v30 = vld [vmem:[#allocation5 + $0x1a8] sm:$0xff] }
 0x12c   :  { %v793_v26 = vpop.f32.mrf.mxu1 }
 0x12d   :  { %3734 = vtanh.f32 %v798_v2  ;;  %v799_v29 = vadd.f32 %v793_v26, %v375_v28  ;;  %v5469_v28 = vld [vmem:[#allocation5 + $0x1a0] sm:$0xff]  ;;  %v9003_v2 = vld [vmem:[#allocation48_spill] sm:$0xff] }
 0x12e   :  { %v3731_v6 = vpop.eup %3730  ;;  %v9004_v26 = vld [vmem:[#allocation49_spill] sm:$0xff] }
 0x12f   :  { %v3602_v36 = vmul.f32 -1.442695, %v799_v29  ;;  %v3733_v52 = vpop.eup %3732  ;;  %v819_v5 = vmul.f32 0.0, %v3731_v6  ;;  %v9005_v29 = vld [vmem:[#allocation50_spill] sm:$0xff]  ;;  %v9007_v6 = vld [vmem:[#allocation52_spill] sm:$0xff] }
 0x131   :  { %3736 = vpow2.f32 %v3602_v36  ;;  %v9006_v36 = vld [vmem:[#allocation51_spill] sm:$0xff] }
 0x13a   :  { %v3735_v35 = vpop.eup %3734 }
 0x13b   :  { %v820_v27 = vmul.f32 %v3735_v35, %v3733_v52  ;;  %v9008_v52 = vld [vmem:[#allocation53_spill] sm:$0xff]  ;;  %v9009_v35 = vld [vmem:[#allocation54_spill] sm:$0xff] }
 0x13d   :  { %v5446_v48 = vadd.f32 %v820_v27, %v819_v5  ;;  %v9010_v5 = vld [vmem:[#allocation55_spill] sm:$0xff]  ;;  %v9011_v27 = vld [vmem:[#allocation56_spill] sm:$0xff] }
 0x13e   :  { %v3737_v38 = vpop.eup %3736 }
 0x13f   :  { %v816_v43 = vadd.f32 1.0, %v3737_v38  ;;  %3738 = vtanh.f32 %v5446_v48  ;;  %v9012_v38 = vld [vmem:[#allocation57_spill] sm:$0xff] }
 0x141   :  { %3740 = vrcp.f32 %v816_v43  ;;  %v9013_v43 = vld [vmem:[#allocation58_spill] sm:$0xff] }
 0x14c   :  { %v3739_v31 = vpop.eup %3738 }
 0x14e   :  { %v3741_v25 = vpop.eup %3740 }
 0x14f   :  { %v5449_v33 = vmul.f32 %v3741_v25, %v3739_v31  ;;  %v9014_v31 = vld [vmem:[#allocation59_spill] sm:$0xff]  ;;  %v9015_v25 = vld [vmem:[#allocation60_spill] sm:$0xff] }
 0x151   :  { %889 = vmatmul.mubr.f32.vlgmr.msra.gmra.mxu0 %v5449_v33  ;;  %960 = vmatmul.mubr.f32.vlgmr.msra.gmra.mxu1 %v5449_v33 }
 0x152   :  { %997 = vmatpush1.msra.mxu0 %v5453_v34  ;;  %1068 = vmatpush1.msra.mxu1 %v4854_v54  ;;  %v5473_v54 = vld [vmem:[#allocation5 + $0x188] sm:$0xff] }
 0x153   :  { %998 = vmatprep.subr.mxu0 %v5457_v12  ;;  %1069 = vmatprep.subr.mxu1 %v4858_v55  ;;  %v5477_v55 = vld [vmem:[#allocation5 + $0x180] sm:$0xff] }
 0x154   :  { %999 = vmatpush1.msra.mxu0 %v5461_v32  ;;  %1070 = vmatpush1.msra.mxu1 %v4863_v56  ;;  %v5481_v56 = vld [vmem:[#allocation5 + $0x168] sm:$0xff] }
 0x155   :  { %1000 = vmatprep.subr.mxu0 %v5465_v30  ;;  %1071 = vmatprep.subr.mxu1 %v4866_v57  ;;  %v5485_v57 = vld [vmem:[#allocation5 + $0x160] sm:$0xff] }
 0x156   :  { %1001 = vmatpush1.msra.mxu0 %v5469_v28  ;;  %1072 = vmatpush1.msra.mxu1 %v4870_v58  ;;  %v5489_v58 = vld [vmem:[#allocation5 + $0x148] sm:$0xff] }
 0x157   :  { %1002 = vmatprep.subr.mxu0 %v5473_v54  ;;  %1073 = vmatprep.subr.mxu1 %v4874_v59  ;;  %v5493_v59 = vld [vmem:[#allocation5 + $0x140] sm:$0xff] }
 0x158   :  { %1003 = vmatpush1.msra.mxu0 %v5477_v55  ;;  %1074 = vmatpush1.msra.mxu1 %v4877_v60  ;;  %v5497_v60 = vld [vmem:[#allocation5 + $0x128] sm:$0xff] }
 0x159   :  { %1004 = vmatprep.subr.mxu0 %v5481_v56  ;;  %1075 = vmatprep.subr.mxu1 %v4880_v61  ;;  %v5501_v61 = vld [vmem:[#allocation5 + $0x120] sm:$0xff] }
 0x15a   :  { %1005 = vmatpush1.msra.mxu0 %v5485_v57  ;;  %1076 = vmatpush1.msra.mxu1 %v4883_v62  ;;  %v5505_v62 = vld [vmem:[#allocation5 + $0x108] sm:$0xff] }
 0x15b   :  { %1006 = vmatprep.subr.mxu0 %v5489_v58  ;;  %1077 = vmatprep.subr.mxu1 %v4886_v63  ;;  %v5509_v63 = vld [vmem:[#allocation5 + $0x100] sm:$0xff] }
 0x15c   :  { %1007 = vmatpush1.msra.mxu0 %v5493_v59  ;;  %1078 = vmatpush1.msra.mxu1 %v4889_v0  ;;  %v5513_v0 = vld [vmem:[#allocation5 + $0xe8] sm:$0xff] }
 0x15d   :  { %1008 = vmatprep.subr.mxu0 %v5497_v60  ;;  %1079 = vmatprep.subr.mxu1 %v4892_v1  ;;  %v5517_v1 = vld [vmem:[#allocation5 + $0xe0] sm:$0xff] }
 0x15e   :  { %1009 = vmatpush1.msra.mxu0 %v5501_v61  ;;  %1080 = vmatpush1.msra.mxu1 %v4895_v3  ;;  %v5521_v3 = vld [vmem:[#allocation5 + $0xc8] sm:$0xff] }
 0x15f   :  { %1010 = vmatprep.subr.mxu0 %v5505_v62  ;;  %1081 = vmatprep.subr.mxu1 %v4898_v8  ;;  %v8987_v8 = vld [vmem:[#allocation32_spill] sm:$0xff] }
 0x160   :  { %1011 = vmatpush1.msra.mxu0 %v5509_v63  ;;  %1082 = vmatpush1.msra.mxu1 %v4901_v9  ;;  %v8988_v9 = vld [vmem:[#allocation33_spill] sm:$0xff] }
 0x161   :  { %1012 = vmatprep.subr.mxu0 %v5513_v0  ;;  %1083 = vmatprep.subr.mxu1 %v4904_v10  ;;  %v8989_v10 = vld [vmem:[#allocation34_spill] sm:$0xff] }
 0x162   :  { %1013 = vmatpush1.msra.mxu0 %v5517_v1  ;;  %1084 = vmatpush1.msra.mxu1 %v4907_v11  ;;  %v8990_v11 = vld [vmem:[#allocation35_spill] sm:$0xff] }
 0x163   :  { %1014 = vmatprep.subr.mxu0 %v5521_v3  ;;  %1085 = vmatprep.subr.mxu1 %v4910_v13  ;;  %v8991_v13 = vld [vmem:[#allocation36_spill] sm:$0xff] }
 0x164   :  { %1015 = vmatpush1.msra.mxu0 %v4792_v37  ;;  %1086 = vmatpush1.msra.mxu1 %v4913_v14  ;;  %v8975_v37 = vld [vmem:[#allocation22_spill] sm:$0xff]  ;;  %v8992_v14 = vld [vmem:[#allocation37_spill] sm:$0xff] }
 0x165   :  { %1016 = vmatprep.subr.mxu0 %v4798_v39  ;;  %1087 = vmatprep.subr.mxu1 %v4916_v15  ;;  %v8976_v39 = vld [vmem:[#allocation21_spill] sm:$0xff]  ;;  %v8993_v15 = vld [vmem:[#allocation38_spill] sm:$0xff]  ;;  %9131 = vst [vmem:[#allocation37_spill] sm:$0xff] %v5909_v7 }
 0x166   :  { %1017 = vmatpush1.msra.mxu0 %v4800_v40  ;;  %1088 = vmatpush1.msra.mxu1 %v4919_v16  ;;  %v8977_v40 = vmov 0.0   ;;  %v8994_v16 = vld [vmem:[#allocation39_spill] sm:$0xff] }
 0x167   :  { %1018 = vmatprep.subr.mxu0 %v4804_v41  ;;  %1089 = vmatprep.subr.mxu1 %v4922_v17  ;;  %v8978_v41 = vld [vmem:[#allocation23_spill] sm:$0xff]  ;;  %v8995_v17 = vld [vmem:[#allocation40_spill] sm:$0xff] }
 0x168   :  { %1019 = vmatpush1.msra.mxu0 %v4809_v42  ;;  %1090 = vmatpush1.msra.mxu1 %v4925_v18  ;;  %v8979_v42 = vld [vmem:[#allocation24_spill] sm:$0xff]  ;;  %v8996_v18 = vld [vmem:[#allocation41_spill] sm:$0xff] }
 0x169   :  { %1020 = vmatprep.subr.mxu0 %v4816_v44  ;;  %1091 = vmatprep.subr.mxu1 %v4928_v19  ;;  %v8980_v44 = vld [vmem:[#allocation25_spill] sm:$0xff]  ;;  %v8997_v19 = vld [vmem:[#allocation42_spill] sm:$0xff] }
 0x16a   :  { %1021 = vmatpush1.msra.mxu0 %v4819_v45  ;;  %1092 = vmatpush1.msra.mxu1 %v4931_v20  ;;  %v8981_v45 = vld [vmem:[#allocation26_spill] sm:$0xff]  ;;  %v8998_v20 = vld [vmem:[#allocation43_spill] sm:$0xff] }
 0x16b   :  { %1022 = vmatprep.subr.mxu0 %v4823_v46  ;;  %1093 = vmatprep.subr.mxu1 %v4934_v21  ;;  %v8982_v46 = vld [vmem:[#allocation27_spill] sm:$0xff]  ;;  %v8999_v21 = vld [vmem:[#allocation44_spill] sm:$0xff] }
 0x16c   :  { %1023 = vmatpush1.msra.mxu0 %v4828_v47  ;;  %1094 = vmatpush1.msra.mxu1 %v4937_v22  ;;  %v8983_v47 = vld [vmem:[#allocation28_spill] sm:$0xff]  ;;  %v9000_v22 = vld [vmem:[#allocation45_spill] sm:$0xff] }
 0x16d   :  { %1024 = vmatprep.subr.mxu0 %v4835_v49  ;;  %1095 = vmatprep.subr.mxu1 %v4940_v23  ;;  %v8984_v49 = vld [vmem:[#allocation29_spill] sm:$0xff]  ;;  %v9001_v23 = vld [vmem:[#allocation46_spill] sm:$0xff] }
 0x16e   :  { %1025 = vmatpush1.msra.mxu0 %v4838_v50  ;;  %1096 = vmatpush1.msra.mxu1 %v4943_v24  ;;  %v8985_v50 = vld [vmem:[#allocation30_spill] sm:$0xff]  ;;  %v9002_v24 = vld [vmem:[#allocation47_spill] sm:$0xff] }
 0x16f   :  { %1026 = vmatprep.subr.mxu0 %v4842_v51  ;;  %1097 = vmatprep.subr.mxu1 %v8975_v37  ;;  %v8986_v51 = vld [vmem:[#allocation31_spill] sm:$0xff]  ;;  %v9017_v37 = vld [vmem:[#allocation62_spill] sm:$0xff] }
 0x170   :  { %1027 = vmatpush1.msra.mxu0 %v8976_v39  ;;  %1060 = vmatprep.mubr.f32.mxu0 %v8977_v40  ;;  %v9018_v39 = vld [vmem:[#allocation63_spill] sm:$0xff] }
 0x171   :  { %1098 = vmatpush1.msra.mxu1 %v8978_v41  ;;  %1131 = vmatprep.mubr.f32.mxu1 %v8977_v40  ;;  %v9019_v41 = vld [vmem:[#allocation64_spill] sm:$0xff] }
 0x172   :  { %1061 = vmatmul.mubr.f32.vlgmr.msra.gmra.mxu0 %v5449_v33  ;;  %1132 = vmatmul.mubr.f32.vlgmr.msra.gmra.mxu1 %v5449_v33  ;;  %v9016_v33 = vld [vmem:[#allocation61_spill] sm:$0xff] }
 0x173   :  { %1166 = vmatprep.subr.mxu0 %v8979_v42  ;;  %1237 = vmatprep.subr.mxu1 %v8980_v44  ;;  %v9020_v42 = vld [vmem:[#allocation65_spill] sm:$0xff]  ;;  %v9021_v44 = vld [vmem:[#allocation66_spill] sm:$0xff] }
 0x174   :  { %1167 = vmatpush1.msra.mxu0 %v8981_v45  ;;  %1238 = vmatpush1.msra.mxu1 %v8982_v46  ;;  %v9022_v45 = vld [vmem:[#allocation67_spill] sm:$0xff]  ;;  %v9023_v46 = vld [vmem:[#allocation68_spill] sm:$0xff] }
 0x175   :  { %1168 = vmatprep.subr.mxu0 %v8983_v47  ;;  %1239 = vmatprep.subr.mxu1 %v8984_v49  ;;  %v9024_v47 = vld [vmem:[#allocation69_spill] sm:$0xff]  ;;  %v9025_v49 = vld [vmem:[#allocation70_spill] sm:$0xff] }
 0x176   :  { %1169 = vmatpush1.msra.mxu0 %v8985_v50  ;;  %1240 = vmatpush1.msra.mxu1 %v8986_v51  ;;  %v9026_v50 = vld [vmem:[#allocation71_spill] sm:$0xff]  ;;  %v9027_v51 = vld [vmem:[#allocation72_spill] sm:$0xff] }
 0x177   :  { %1170 = vmatprep.subr.mxu0 %v8987_v8  ;;  %1241 = vmatprep.subr.mxu1 %v8988_v9  ;;  %v9028_v8 = vld [vmem:[#allocation73_spill] sm:$0xff]  ;;  %v9029_v9 = vld [vmem:[#allocation74_spill] sm:$0xff] }
 0x178   :  { %1171 = vmatpush1.msra.mxu0 %v8989_v10  ;;  %1242 = vmatpush1.msra.mxu1 %v8990_v11  ;;  %v9030_v10 = vld [vmem:[#allocation75_spill] sm:$0xff]  ;;  %v9031_v11 = vld [vmem:[#allocation76_spill] sm:$0xff] }
 0x179   :  { %1172 = vmatprep.subr.mxu0 %v8991_v13  ;;  %1243 = vmatprep.subr.mxu1 %v8992_v14  ;;  %v9032_v13 = vld [vmem:[#allocation77_spill] sm:$0xff]  ;;  %v9033_v14 = vld [vmem:[#allocation78_spill] sm:$0xff] }
 0x17a   :  { %1173 = vmatpush1.msra.mxu0 %v8993_v15  ;;  %1244 = vmatpush1.msra.mxu1 %v8994_v16  ;;  %v9034_v15 = vld [vmem:[#allocation79_spill] sm:$0xff]  ;;  %v9035_v16 = vld [vmem:[#allocation80_spill] sm:$0xff] }
 0x17b   :  { %1174 = vmatprep.subr.mxu0 %v8995_v17  ;;  %1245 = vmatprep.subr.mxu1 %v8996_v18  ;;  %v9036_v17 = vld [vmem:[#allocation81_spill] sm:$0xff]  ;;  %v9037_v18 = vld [vmem:[#allocation82_spill] sm:$0xff] }
 0x17c   :  { %1175 = vmatpush1.msra.mxu0 %v8997_v19  ;;  %1246 = vmatpush1.msra.mxu1 %v8998_v20  ;;  %v9038_v19 = vld [vmem:[#allocation83_spill] sm:$0xff]  ;;  %v9039_v20 = vld [vmem:[#allocation84_spill] sm:$0xff] }
 0x17d   :  { %1176 = vmatprep.subr.mxu0 %v8999_v21  ;;  %1247 = vmatprep.subr.mxu1 %v9000_v22  ;;  %v9040_v21 = vld [vmem:[#allocation85_spill] sm:$0xff]  ;;  %v9041_v22 = vld [vmem:[#allocation86_spill] sm:$0xff] }
 0x17e   :  { %1177 = vmatpush1.msra.mxu0 %v9001_v23  ;;  %1248 = vmatpush1.msra.mxu1 %v9002_v24  ;;  %v9042_v23 = vld [vmem:[#allocation87_spill] sm:$0xff]  ;;  %v9043_v24 = vld [vmem:[#allocation88_spill] sm:$0xff] }
 0x17f   :  { %1178 = vmatprep.subr.mxu0 %v9003_v2  ;;  %1249 = vmatprep.subr.mxu1 %v9004_v26  ;;  %v9044_v2 = vld [vmem:[#allocation89_spill] sm:$0xff]  ;;  %v9045_v26 = vld [vmem:[#allocation90_spill] sm:$0xff] }
 0x180   :  { %1179 = vmatpush1.msra.mxu0 %v9005_v29  ;;  %1250 = vmatpush1.msra.mxu1 %v9006_v36  ;;  %v9046_v29 = vld [vmem:[#allocation91_spill] sm:$0xff]  ;;  %v9047_v36 = vld [vmem:[#allocation92_spill] sm:$0xff] }
 0x181   :  { %1180 = vmatprep.subr.mxu0 %v9007_v6  ;;  %1251 = vmatprep.subr.mxu1 %v9008_v52  ;;  %v9048_v6 = vld [vmem:[#allocation93_spill] sm:$0xff]  ;;  %v9049_v52 = vld [vmem:[#allocation94_spill] sm:$0xff] }
 0x182   :  { %1181 = vmatpush1.msra.mxu0 %v9009_v35  ;;  %1252 = vmatpush1.msra.mxu1 %v9010_v5  ;;  %v9050_v35 = vld [vmem:[#allocation95_spill] sm:$0xff]  ;;  %v9051_v5 = vld [vmem:[#allocation96_spill] sm:$0xff] }
 0x183   :  { %1182 = vmatprep.subr.mxu0 %v9011_v27  ;;  %1253 = vmatprep.subr.mxu1 %v9012_v38  ;;  %v9052_v27 = vld [vmem:[#allocation97_spill] sm:$0xff]  ;;  %v9053_v38 = vld [vmem:[#allocation98_spill] sm:$0xff] }
 0x184   :  { %1183 = vmatpush1.msra.mxu0 %v9013_v43  ;;  %1254 = vmatpush1.msra.mxu1 %v9014_v31  ;;  %v9054_v43 = vld [vmem:[#allocation99_spill] sm:$0xff]  ;;  %v9055_v31 = vld [vmem:[#allocation100_spill] sm:$0xff] }
 0x185   :  { %1184 = vmatprep.subr.mxu0 %v9015_v25  ;;  %1255 = vmatprep.subr.mxu1 %v9016_v33  ;;  %v9056_v25 = vld [vmem:[#allocation101_spill] sm:$0xff]  ;;  %v9057_v33 = vld [vmem:[#allocation102_spill] sm:$0xff] }
 0x186   :  { %1185 = vmatpush1.msra.mxu0 %v9017_v37  ;;  %1256 = vmatpush1.msra.mxu1 %v9018_v39  ;;  %v9058_v37 = vld [vmem:[#allocation103_spill] sm:$0xff]  ;;  %v9059_v39 = vld [vmem:[#allocation104_spill] sm:$0xff] }
 0x187   :  { %1186 = vmatprep.subr.mxu0 %v9019_v41  ;;  %1257 = vmatprep.subr.mxu1 %v9020_v42  ;;  %v9060_v41 = vld [vmem:[#allocation105_spill] sm:$0xff]  ;;  %v9061_v42 = vld [vmem:[#allocation106_spill] sm:$0xff] }
 0x188   :  { %1187 = vmatpush1.msra.mxu0 %v9021_v44  ;;  %1258 = vmatpush1.msra.mxu1 %v9022_v45  ;;  %v9062_v44 = vld [vmem:[#allocation107_spill] sm:$0xff]  ;;  %v9063_v45 = vld [vmem:[#allocation108_spill] sm:$0xff] }
 0x189   :  { %1188 = vmatprep.subr.mxu0 %v9023_v46  ;;  %1259 = vmatprep.subr.mxu1 %v9024_v47  ;;  %v9064_v46 = vld [vmem:[#allocation109_spill] sm:$0xff]  ;;  %v9065_v47 = vld [vmem:[#allocation110_spill] sm:$0xff] }
 0x18a   :  { %1189 = vmatpush1.msra.mxu0 %v9025_v49  ;;  %1260 = vmatpush1.msra.mxu1 %v9026_v50  ;;  %v9066_v49 = vld [vmem:[#allocation111_spill] sm:$0xff]  ;;  %v9067_v50 = vld [vmem:[#allocation112_spill] sm:$0xff] }
 0x18b   :  { %1190 = vmatprep.subr.mxu0 %v9027_v51  ;;  %1261 = vmatprep.subr.mxu1 %v9028_v8  ;;  %v9068_v51 = vld [vmem:[#allocation113_spill] sm:$0xff]  ;;  %v9069_v8 = vld [vmem:[#allocation114_spill] sm:$0xff] }
 0x18c   :  { %1191 = vmatpush1.msra.mxu0 %v9029_v9  ;;  %1262 = vmatpush1.msra.mxu1 %v9030_v10  ;;  %v9070_v9 = vld [vmem:[#allocation115_spill] sm:$0xff]  ;;  %v9071_v10 = vld [vmem:[#allocation116_spill] sm:$0xff] }
 0x18d   :  { %1192 = vmatprep.subr.mxu0 %v9031_v11  ;;  %1263 = vmatprep.subr.mxu1 %v9032_v13  ;;  %v9072_v11 = vld [vmem:[#allocation117_spill] sm:$0xff]  ;;  %v9073_v13 = vld [vmem:[#allocation118_spill] sm:$0xff] }
 0x18e   :  { %1193 = vmatpush1.msra.mxu0 %v9033_v14  ;;  %1264 = vmatpush1.msra.mxu1 %v9034_v15  ;;  %v9074_v14 = vld [vmem:[#allocation119_spill] sm:$0xff]  ;;  %v9075_v15 = vld [vmem:[#allocation120_spill] sm:$0xff] }
 0x18f   :  { %1194 = vmatprep.subr.mxu0 %v9035_v16  ;;  %1265 = vmatprep.subr.mxu1 %v9036_v17  ;;  %v9076_v16 = vld [vmem:[#allocation121_spill] sm:$0xff]  ;;  %v9077_v17 = vld [vmem:[#allocation122_spill] sm:$0xff] }
 0x190   :  { %1195 = vmatpush1.msra.mxu0 %v9037_v18  ;;  %1266 = vmatpush1.msra.mxu1 %v9038_v19  ;;  %v9078_v18 = vld [vmem:[#allocation123_spill] sm:$0xff]  ;;  %v9079_v19 = vld [vmem:[#allocation124_spill] sm:$0xff] }
 0x191   :  { %1196 = vmatprep.subr.mxu0 %v9039_v20  ;;  %1267 = vmatprep.subr.mxu1 %v9040_v21  ;;  %v9080_v20 = vld [vmem:[#allocation125_spill] sm:$0xff]  ;;  %v9081_v21 = vld [vmem:[#allocation126_spill] sm:$0xff] }
 0x192   :  { %1197 = vmatpush1.msra.mxu0 %v9041_v22  ;;  %1268 = vmatpush1.msra.mxu1 %v9042_v23  ;;  %v9082_v22 = vld [vmem:[#allocation127_spill] sm:$0xff]  ;;  %v9083_v23 = vld [vmem:[#allocation128_spill] sm:$0xff] }
 0x193   :  { %1198 = vmatprep.subr.mxu0 %v9043_v24  ;;  %1269 = vmatprep.subr.mxu1 %v9044_v2  ;;  %v9084_v24 = vld [vmem:[#allocation129_spill] sm:$0xff]  ;;  %v9085_v2 = vld [vmem:[#allocation130_spill] sm:$0xff] }
 0x194   :  { %1199 = vmatpush2.msra.mxu0 %v9045_v26  ;;  %1270 = vmatpush2.msra.mxu1 %v9046_v29  ;;  %v9086_v26 = vld [vmem:[#allocation131_spill] sm:$0xff]  ;;  %v9087_v29 = vld [vmem:[#allocation132_spill] sm:$0xff] }
 0x195   :  { %1200 = vmatprep.subr.mxu0 %v9047_v36  ;;  %1271 = vmatprep.subr.mxu1 %v9048_v6  ;;  %v9088_v36 = vld [vmem:[#allocation133_spill] sm:$0xff]  ;;  %v9089_v6 = vld [vmem:[#allocation134_spill] sm:$0xff] }
 0x196   :  { %1201 = vmatpush2.msra.mxu0 %v9049_v52  ;;  %1272 = vmatpush2.msra.mxu1 %v9050_v35  ;;  %v9090_v52 = vld [vmem:[#allocation135_spill] sm:$0xff]  ;;  %v9091_v35 = vld [vmem:[#allocation136_spill] sm:$0xff] }
 0x197   :  { %1202 = vmatprep.subr.mxu0 %v9051_v5  ;;  %1273 = vmatprep.subr.mxu1 %v9052_v27  ;;  %v9092_v5 = vld [vmem:[#allocation137_spill] sm:$0xff]  ;;  %v9093_v27 = vld [vmem:[#allocation138_spill] sm:$0xff] }
 0x198   :  { %1203 = vmatpush2.msra.mxu0 %v9053_v38  ;;  %1274 = vmatpush2.msra.mxu1 %v9054_v43  ;;  %v9094_v38 = vld [vmem:[#allocation139_spill] sm:$0xff]  ;;  %v9095_v43 = vld [vmem:[#allocation140_spill] sm:$0xff] }
 0x199   :  { %1204 = vmatprep.subr.mxu0 %v9055_v31  ;;  %1275 = vmatprep.subr.mxu1 %v9056_v25  ;;  %v9096_v31 = vld [vmem:[#allocation141_spill] sm:$0xff]  ;;  %v9097_v25 = vld [vmem:[#allocation142_spill] sm:$0xff] }
 0x19a   :  { %1205 = vmatpush2.msra.mxu0 %v9057_v33  ;;  %1276 = vmatpush2.msra.mxu1 %v9058_v37  ;;  %v9098_v33 = vld [vmem:[#allocation143_spill] sm:$0xff]  ;;  %v9099_v37 = vld [vmem:[#allocation144_spill] sm:$0xff] }
 0x19b   :  { %1206 = vmatprep.subr.mxu0 %v9059_v39  ;;  %1277 = vmatprep.subr.mxu1 %v9060_v41  ;;  %v9100_v39 = vld [vmem:[#allocation145_spill] sm:$0xff]  ;;  %v9101_v41 = vld [vmem:[#allocation146_spill] sm:$0xff] }
 0x19c   :  { %1207 = vmatpush2.msra.mxu0 %v9061_v42  ;;  %1278 = vmatpush2.msra.mxu1 %v9062_v44  ;;  %v9102_v42 = vld [vmem:[#allocation147_spill] sm:$0xff]  ;;  %v9103_v44 = vld [vmem:[#allocation148_spill] sm:$0xff] }
 0x19d   :  { %1208 = vmatprep.subr.mxu0 %v9063_v45  ;;  %1279 = vmatprep.subr.mxu1 %v9064_v46  ;;  %v9104_v45 = vld [vmem:[#allocation149_spill] sm:$0xff]  ;;  %v9105_v46 = vld [vmem:[#allocation150_spill] sm:$0xff] }
 0x19e   :  { %1209 = vmatpush2.msra.mxu0 %v9065_v47  ;;  %1280 = vmatpush2.msra.mxu1 %v9066_v49  ;;  %v9106_v47 = vld [vmem:[#allocation151_spill] sm:$0xff]  ;;  %v5683_v49 = vld [vmem:[#allocation5 + $0x1e8] sm:$0xff] }
 0x19f   :  { %1210 = vmatprep.subr.mxu0 %v9067_v50  ;;  %1281 = vmatprep.subr.mxu1 %v9068_v51  ;;  %v5686_v50 = vld [vmem:[#allocation5 + $0x1f8] sm:$0xff] }
 0x1a0   :  { %1211 = vmatpush2.msra.mxu0 %v9069_v8  ;;  %1282 = vmatpush2.msra.mxu1 %v9070_v9  ;;  %v628_v51 = vld [vmem:[%s8254_s5] sm:$0xf] }
 0x1a1   :  { %1212 = vmatprep.subr.mxu0 %v9071_v10  ;;  %1283 = vmatprep.subr.mxu1 %v9072_v11  ;;  %v9107_v8 = vld [vmem:[#allocation20_spill] sm:$0xff]  ;;  %v5695_v10 = vpop.f32.mrf.mxu0  ;;  %v9110_v11 = vld [vmem:[#allocation19_spill] sm:$0xff] }
 0x1a2   :  { %1213 = vmatpush2.msra.mxu0 %v9073_v13  ;;  %1284 = vmatpush2.msra.mxu1 %v9074_v14  ;;  %v5693_v9 = vrot.slane %v628_v51, %v9107_v8  ;;  %9109 = vst [vmem:[#allocation21_spill] sm:$0xff] %v5695_v10  ;;  %v5698_v13 = vrot.slane %v628_v51, %v9110_v11  ;;  %v5915_v10 = vld [vmem:[#allocation8 + $0x1a0] sm:$0xff] }
 0x1a3   :  { %1214 = vmatprep.subr.mxu0 %v9075_v15  ;;  %1285 = vmatprep.subr.mxu1 %v9076_v16  ;;  %9133 = vst [vmem:[#allocation39_spill] sm:$0xff] %v5915_v10 }
 0x1a4   :  { %1215 = vmatpush2.msra.mxu0 %v9077_v17  ;;  %1286 = vmatpush2.msra.mxu1 %v9078_v18  ;;  %9108 = vst [vmem:[#allocation22_spill] sm:$0xff] %v5693_v9  ;;  %9111 = vst [vmem:[#allocation23_spill] sm:$0xff] %v5698_v13 }
 0x1a5   :  { %1216 = vmatprep.subr.mxu0 %v9079_v19  ;;  %1287 = vmatprep.subr.mxu1 %v9080_v20 }
 0x1a6   :  { %1217 = vmatpush2.msra.mxu0 %v9081_v21  ;;  %1288 = vmatpush2.msra.mxu1 %v9082_v22  ;;  %v9112_v21 = vld [vmem:[#allocation17_spill] sm:$0xff] }
 0x1a7   :  { %1218 = vmatprep.subr.mxu0 %v9083_v23  ;;  %1289 = vmatprep.subr.mxu1 %v9084_v24  ;;  %v5703_v22 = vrot.slane %v628_v51, %v9112_v21 }
 0x1a8   :  { %1219 = vmatpush2.msra.mxu0 %v9085_v2  ;;  %1290 = vmatpush2.msra.mxu1 %v9086_v26  ;;  %v9114_v2 = vld [vmem:[#allocation18_spill] sm:$0xff] }
 0x1a9   :  { %1220 = vmatprep.subr.mxu0 %v9087_v29  ;;  %1291 = vmatprep.subr.mxu1 %v9088_v36  ;;  %9113 = vst [vmem:[#allocation24_spill] sm:$0xff] %v5703_v22  ;;  %v5707_v26 = vrot.slane %v628_v51, %v9114_v2 }
 0x1aa   :  { %1221 = vmatpush2.msra.mxu0 %v9089_v6  ;;  %1292 = vmatpush2.msra.mxu1 %v9090_v52 }
 0x1ab   :  { %1222 = vmatprep.subr.mxu0 %v9091_v35  ;;  %1293 = vmatprep.subr.mxu1 %v9092_v5  ;;  %9115 = vst [vmem:[#allocation25_spill] sm:$0xff] %v5707_v26 }
 0x1ac   :  { %1223 = vmatpush2.msra.mxu0 %v9093_v27  ;;  %1294 = vmatpush2.msra.mxu1 %v9094_v38  ;;  %v9116_v38 = vld [vmem:[#allocation154_spill] sm:$0xff] }
 0x1ad   :  { %1224 = vmatprep.subr.mxu0 %v9095_v43  ;;  %1295 = vmatprep.subr.mxu1 %v9096_v31  ;;  %v376_v43 = vadd.f32 %v5369_v4, %v9116_v38 }
 0x1ae   :  { %1225 = vmatpush2.msra.mxu0 %v9097_v25  ;;  %1296 = vmatpush2.msra.mxu1 %v9098_v33  ;;  %v9117_v33 = vld [vmem:[#allocation156_spill] sm:$0xff] }
 0x1af   :  { %1226 = vmatprep.subr.mxu0 %v9099_v37  ;;  %1297 = vmatprep.subr.mxu1 %v9100_v39  ;;  %v377_v37 = vadd.f32 %v5375_v53, %v9117_v33  ;;  %v5912_v53 = vld [vmem:[#allocation8 + $0x1b8] sm:$0xff] }
 0x1b0   :  { %1227 = vmatpush2.msra.mxu0 %v9101_v41  ;;  %1298 = vmatpush2.msra.mxu1 %v9102_v42  ;;  %9132 = vst [vmem:[#allocation38_spill] sm:$0xff] %v5912_v53 }
 0x1b1   :  { %1228 = vmatprep.subr.mxu0 %v9103_v44  ;;  %1299 = vmatprep.subr.mxu1 %v9104_v45 }
 0x1b2   :  { %1229 = vmatpush2.msra.mxu0 %v9105_v46  ;;  %1300 = vmatpush2.msra.mxu1 %v9106_v47 }
 0x1b3   :  { %1339 = vmatprep.subr.mxu0 %v5683_v49  ;;  %1410 = vmatprep.subr.mxu1 %v5686_v50 }
 0x211   :  { %v890_v14 = vpop.f32.mrf.mxu0  ;;  %v961_v19 = vpop.f32.mrf.mxu1 }
 0x212   :  { %v891_v15 = vadd.f32 %v890_v14, %v5693_v9  ;;  %v962_v6 = vadd.f32 %v961_v19, %v5707_v26 }
 0x213   :  { %v892_v16 = vpop.f32.mrf.mxu0  ;;  %v963_v23 = vpop.f32.mrf.mxu1 }
 0x214   :  { %v3603_v17 = vmul.f32 -1.442695, %v891_v15  ;;  %v893_v18 = vadd.f32 %v892_v16, %v5698_v13  ;;  %v964_v24 = vadd.f32 %v963_v23, %v5703_v22  ;;  %v9118_v16 = vld [vmem:[#allocation153_spill] sm:$0xff] }
 0x216   :  { %3742 = vpow2.f32 %v3603_v17  ;;  %v3604_v20 = vmul.f32 -1.442695, %v893_v18  ;;  %v3605_v29 = vmul.f32 -1.442695, %v964_v24  ;;  %v9119_v18 = vld [vmem:[#allocation152_spill] sm:$0xff] }
 0x218   :  { %3744 = vpow2.f32 %v3604_v20 }
 0x219   :  { %3746 = vpow2.f32 %v3605_v29 }
 0x223   :  { %v3743_v36 = vpop.eup %3742 }
 0x224   :  { %v969_v52 = vadd.f32 1.0, %v3743_v36 }
 0x225   :  { %v3745_v35 = vpop.eup %3744 }
 0x226   :  { %3748 = vrcp.f32 %v969_v52  ;;  %v975_v5 = vadd.f32 1.0, %v3745_v35  ;;  %v3747_v27 = vpop.eup %3746 }
 0x227   :  { %3750 = vtanh.f32 %v962_v6  ;;  %v982_v42 = vadd.f32 1.0, %v3747_v27 }
 0x228   :  { %3752 = vrcp.f32 %v975_v5 }
 0x232   :  { %v1062_v31 = vpop.f32.mrf.mxu0  ;;  %v1133_v11 = vpop.f32.mrf.mxu1 }
 0x233   :  { %v3749_v25 = vpop.eup %3748  ;;  %v1138_v39 = vadd.f32 %v1062_v31, %v376_v43  ;;  %v1140_v19 = vadd.f32 %v1133_v11, %v9119_v18  ;;  %v5830_v11 = vld [vmem:[#allocation5 + $0x90] sm:$0xff]  ;;  %v5845_v18 = vld [vmem:[#allocation5 + $0x48] sm:$0xff] }
 0x234   :  { %v3751_v41 = vpop.eup %3750  ;;  %v1064_v44 = vpop.f32.mrf.mxu0 }
 0x235   :  { %v3753_v45 = vpop.eup %3752  ;;  %v3606_v46 = vmul.f32 -1.442695, %v1138_v39  ;;  %v1139_v47 = vadd.f32 %v1064_v44, %v377_v37  ;;  %v986_v8 = vmul.f32 %v3751_v41, %v3749_v25  ;;  %v1135_v4 = vpop.f32.mrf.mxu1  ;;  %v5732_v41 = vld [vmem:[#allocation5 + $0x1f0] sm:$0xff]  ;;  %v5744_v44 = vld [vmem:[#allocation5 + $0x1b8] sm:$0xff] }
 0x236   :  { %v985_v51 = vmul.f32 0.0, %v3753_v45  ;;  %v1141_v17 = vadd.f32 %v1135_v4, %v9118_v16  ;;  %v5809_v45 = vld [vmem:[#allocation5 + $0xa8] sm:$0xff]  ;;  %v5836_v4 = vld [vmem:[#allocation5 + $0x78] sm:$0xff]  ;;  %v5839_v16 = vld [vmem:[#allocation5 + $0x60] sm:$0xff] }
 0x237   :  { %3754 = vpow2.f32 %v3606_v46  ;;  %v3607_v14 = vmul.f32 -1.442695, %v1139_v47  ;;  %v5818_v46 = vld [vmem:[#allocation5 + $0xb0] sm:$0xff]  ;;  %v5821_v47 = vld [vmem:[#allocation5 + $0x88] sm:$0xff] }
 0x238   :  { %v5714_v15 = vadd.f32 %v986_v8, %v985_v51  ;;  %3756 = vrcp.f32 %v982_v42  ;;  %v3608_v20 = vmul.f32 -1.442695, %v1141_v17  ;;  %v5740_v42 = vld [vmem:[#allocation5 + $0x1d0] sm:$0xff]  ;;  %v5824_v51 = vld [vmem:[#allocation5 + $0x98] sm:$0xff]  ;;  %v5827_v8 = vld [vmem:[#allocation5 + $0x80] sm:$0xff] }
 0x239   :  { %3758 = vpow2.f32 %v3607_v14  ;;  %v5833_v14 = vld [vmem:[#allocation5 + $0x68] sm:$0xff]  ;;  %v5842_v17 = vld [vmem:[#allocation5 + $0x70] sm:$0xff] }
 0x23a   :  { %3760 = vtanh.f32 %v5714_v15 }
 0x23b   :  { %3762 = vtanh.f32 %v1140_v19  ;;  %v5848_v19 = vld [vmem:[#allocation5 + $0x58] sm:$0xff] }
 0x23c   :  { %3764 = vpow2.f32 %v3608_v20  ;;  %v5851_v20 = vld [vmem:[#allocation5 + $0x40] sm:$0xff] }
 0x244   :  { %v3755_v21 = vpop.eup %3754 }
 0x245   :  { %v3757_v23 = vpop.eup %3756  ;;  %v1145_v24 = vadd.f32 1.0, %v3755_v21  ;;  %v5854_v21 = vld [vmem:[#allocation5 + $0x50] sm:$0xff] }
 0x246   :  { %v3759_v2 = vpop.eup %3758 }
 0x247   :  { %v3761_v29 = vpop.eup %3760  ;;  %3766 = vrcp.f32 %v1145_v24  ;;  %v1151_v36 = vadd.f32 1.0, %v3759_v2  ;;  %v5860_v24 = vld [vmem:[#allocation5 + $0x38] sm:$0xff]  ;;  %v5863_v2 = vld [vmem:[#allocation5 + $0x20] sm:$0xff] }
 0x248   :  { %v5719_v6 = vmul.f32 %v3761_v29, %v3757_v23  ;;  %v3763_v52 = vpop.eup %3762  ;;  %v5857_v23 = vld [vmem:[#allocation5 + $0x28] sm:$0xff]  ;;  %v5866_v29 = vld [vmem:[#allocation5 + $0x30] sm:$0xff] }
 0x249   :  { %3768 = vrcp.f32 %v1151_v36  ;;  %v3765_v35 = vpop.eup %3764  ;;  %v5869_v36 = vld [vmem:[#allocation5 + $0x8] sm:$0xff] }
 0x24a   :  { %9120 = vst [vmem:[#allocation26_spill] sm:$0xff] %v5719_v6  ;;  %1230 = vmatprep.mubr.f32.mxu0 %v5719_v6  ;;  %1301 = vmatprep.mubr.f32.mxu1 %v5719_v6  ;;  %v1158_v43 = vadd.f32 1.0, %v3765_v35  ;;  %v5875_v35 = vld [vmem:[#allocation5] sm:$0xff]  ;;  %v5906_v6 = vld [vmem:[#allocation8 + $0x1d0] sm:$0xff] }
 0x24b   :  { %9121 = vst [vmem:[#allocation27_spill] sm:$0xff] %v5875_v35  ;;  %9130 = vst [vmem:[#allocation36_spill] sm:$0xff] %v5906_v6 }
 0x24c   :  { %3770 = vrcp.f32 %v1158_v43  ;;  %v5891_v43 = vld [vmem:[#allocation8 + $0x1e0] sm:$0xff] }
 0x24d   :  { %9125 = vst [vmem:[#allocation31_spill] sm:$0xff] %v5891_v43 }
 0x254   :  { %v3767_v5 = vpop.eup %3766 }
 0x255   :  { %v1162_v27 = vmul.f32 %v3767_v5, %v3763_v52  ;;  %v5872_v52 = vld [vmem:[#allocation5 + $0x18] sm:$0xff]  ;;  %v5879_v5 = vld [vmem:[#allocation5 + $0x10] sm:$0xff] }
 0x256   :  { %v3769_v38 = vpop.eup %3768  ;;  %9122 = vst [vmem:[#allocation28_spill] sm:$0xff] %v5879_v5 }
 0x257   :  { %v1161_v31 = vmul.f32 %v3769_v38, %v5446_v48  ;;  %v5736_v48 = vld [vmem:[#allocation5 + $0x1d8] sm:$0xff] }
 0x258   :  { %v5888_v38 = vld [vmem:[#allocation8 + $0x1f8] sm:$0xff] }
 0x259   :  { %v5724_v25 = vadd.f32 %v1162_v27, %v1161_v31  ;;  %v3771_v33 = vpop.eup %3770  ;;  %v5885_v27 = vld [vmem:[#allocation8 + $0x1e8] sm:$0xff]  ;;  %9124 = vst [vmem:[#allocation30_spill] sm:$0xff] %v5888_v38  ;;  %v5894_v31 = vld [vmem:[#allocation8 + $0x1f0] sm:$0xff] }
 0x25a   :  { %9123 = vst [vmem:[#allocation29_spill] sm:$0xff] %v5885_v27  ;;  %9126 = vst [vmem:[#allocation32_spill] sm:$0xff] %v5894_v31 }
 0x25b   :  { %3772 = vtanh.f32 %v5724_v25 }
 0x268   :  { %v3773_v37 = vpop.eup %3772 }
 0x269   :  { %v5727_v39 = vmul.f32 %v3773_v37, %v3771_v33  ;;  %v5897_v33 = vld [vmem:[#allocation8 + $0x1c8] sm:$0xff]  ;;  %v5900_v37 = vld [vmem:[#allocation8 + $0x1d8] sm:$0xff] }
 0x26a   :  { %9127 = vst [vmem:[#allocation33_spill] sm:$0xff] %v5897_v33  ;;  %9128 = vst [vmem:[#allocation34_spill] sm:$0xff] %v5900_v37 }
 0x26b   :  { %1231 = vmatmul.mubr.f32.vlgmr.msra.gmra.mxu0 %v5727_v39  ;;  %1302 = vmatmul.mubr.f32.vlgmr.msra.gmra.mxu1 %v5727_v39 }
 0x26c   :  { %1340 = vmatpush1.msra.mxu0 %v5453_v34  ;;  %1411 = vmatpush1.msra.mxu1 %v5732_v41  ;;  %v5748_v34 = vld [vmem:[#allocation5 + $0x1b0] sm:$0xff] }
 0x26d   :  { %1341 = vmatprep.subr.mxu0 %v5457_v12  ;;  %1412 = vmatprep.subr.mxu1 %v5736_v48  ;;  %v5752_v12 = vld [vmem:[#allocation5 + $0x198] sm:$0xff] }
 0x26e   :  { %1342 = vmatpush1.msra.mxu0 %v5461_v32  ;;  %1413 = vmatpush1.msra.mxu1 %v5740_v42  ;;  %v5756_v32 = vld [vmem:[#allocation5 + $0x190] sm:$0xff] }
 0x26f   :  { %1343 = vmatprep.subr.mxu0 %v5465_v30  ;;  %1414 = vmatprep.subr.mxu1 %v5744_v44  ;;  %v5760_v30 = vld [vmem:[#allocation5 + $0x178] sm:$0xff] }
 0x270   :  { %1344 = vmatpush1.msra.mxu0 %v5469_v28  ;;  %1415 = vmatpush1.msra.mxu1 %v5748_v34  ;;  %v5764_v28 = vld [vmem:[#allocation5 + $0x170] sm:$0xff] }
 0x271   :  { %1345 = vmatprep.subr.mxu0 %v5473_v54  ;;  %1416 = vmatprep.subr.mxu1 %v5752_v12  ;;  %v5768_v54 = vld [vmem:[#allocation5 + $0x158] sm:$0xff] }
 0x272   :  { %1346 = vmatpush1.msra.mxu0 %v5477_v55  ;;  %1417 = vmatpush1.msra.mxu1 %v5756_v32  ;;  %v5772_v55 = vld [vmem:[#allocation5 + $0x150] sm:$0xff] }
 0x273   :  { %1347 = vmatprep.subr.mxu0 %v5481_v56  ;;  %1418 = vmatprep.subr.mxu1 %v5760_v30  ;;  %v5776_v56 = vld [vmem:[#allocation5 + $0x138] sm:$0xff] }
 0x274   :  { %1348 = vmatpush1.msra.mxu0 %v5485_v57  ;;  %1419 = vmatpush1.msra.mxu1 %v5764_v28  ;;  %v5780_v57 = vld [vmem:[#allocation5 + $0x130] sm:$0xff] }
 0x275   :  { %1349 = vmatprep.subr.mxu0 %v5489_v58  ;;  %1420 = vmatprep.subr.mxu1 %v5768_v54  ;;  %v5784_v58 = vld [vmem:[#allocation5 + $0x118] sm:$0xff] }
 0x276   :  { %1350 = vmatpush1.msra.mxu0 %v5493_v59  ;;  %1421 = vmatpush1.msra.mxu1 %v5772_v55  ;;  %v5788_v59 = vld [vmem:[#allocation5 + $0x110] sm:$0xff] }
 0x277   :  { %1351 = vmatprep.subr.mxu0 %v5497_v60  ;;  %1422 = vmatprep.subr.mxu1 %v5776_v56  ;;  %v5792_v60 = vld [vmem:[#allocation5 + $0xf8] sm:$0xff] }
 0x278   :  { %1352 = vmatpush1.msra.mxu0 %v5501_v61  ;;  %1423 = vmatpush1.msra.mxu1 %v5780_v57  ;;  %v5796_v61 = vld [vmem:[#allocation5 + $0xf0] sm:$0xff] }
 0x279   :  { %1353 = vmatprep.subr.mxu0 %v5505_v62  ;;  %1424 = vmatprep.subr.mxu1 %v5784_v58  ;;  %v5800_v62 = vld [vmem:[#allocation5 + $0xd8] sm:$0xff] }
 0x27a   :  { %1354 = vmatpush1.msra.mxu0 %v5509_v63  ;;  %1425 = vmatpush1.msra.mxu1 %v5788_v59  ;;  %v5803_v63 = vld [vmem:[#allocation5 + $0xc0] sm:$0xff] }
 0x27b   :  { %1355 = vmatprep.subr.mxu0 %v5513_v0  ;;  %1426 = vmatprep.subr.mxu1 %v5792_v60  ;;  %v5806_v0 = vld [vmem:[#allocation5 + $0xd0] sm:$0xff] }
 0x27c   :  { %1356 = vmatpush1.msra.mxu0 %v5517_v1  ;;  %1427 = vmatpush1.msra.mxu1 %v5796_v61  ;;  %v5812_v1 = vld [vmem:[#allocation5 + $0xb8] sm:$0xff] }
 0x27d   :  { %1357 = vmatprep.subr.mxu0 %v5521_v3  ;;  %1428 = vmatprep.subr.mxu1 %v5800_v62  ;;  %v5815_v3 = vld [vmem:[#allocation5 + $0xa0] sm:$0xff] }
 0x27e   :  { %1358 = vmatpush1.msra.mxu0 %v5803_v63  ;;  %1429 = vmatpush1.msra.mxu1 %v5806_v0 }
 0x27f   :  { %1359 = vmatprep.subr.mxu0 %v5809_v45  ;;  %1430 = vmatprep.subr.mxu1 %v5812_v1 }
 0x280   :  { %1360 = vmatpush1.msra.mxu0 %v5815_v3  ;;  %1431 = vmatpush1.msra.mxu1 %v5818_v46 }
 0x281   :  { %1361 = vmatprep.subr.mxu0 %v5821_v47  ;;  %1432 = vmatprep.subr.mxu1 %v5824_v51 }
 0x282   :  { %1362 = vmatpush1.msra.mxu0 %v5827_v8  ;;  %1433 = vmatpush1.msra.mxu1 %v5830_v11 }
 0x283   :  { %1363 = vmatprep.subr.mxu0 %v5833_v14  ;;  %1434 = vmatprep.subr.mxu1 %v5836_v4 }
 0x284   :  { %1364 = vmatpush1.msra.mxu0 %v5839_v16  ;;  %1435 = vmatpush1.msra.mxu1 %v5842_v17 }
 0x285   :  { %1365 = vmatprep.subr.mxu0 %v5845_v18  ;;  %1436 = vmatprep.subr.mxu1 %v5848_v19 }
 0x286   :  { %1366 = vmatpush1.msra.mxu0 %v5851_v20  ;;  %1437 = vmatpush1.msra.mxu1 %v5854_v21 }
 0x287   :  { %1367 = vmatprep.subr.mxu0 %v5857_v23  ;;  %1438 = vmatprep.subr.mxu1 %v5860_v24 }
 0x288   :  { %1368 = vmatpush1.msra.mxu0 %v5863_v2  ;;  %1439 = vmatpush1.msra.mxu1 %v5866_v29 }
 0x289   :  { %1369 = vmatprep.subr.mxu0 %v5869_v36  ;;  %1440 = vmatprep.subr.mxu1 %v5872_v52 }
 0x28a   :  { %1370 = vmatpush1.msra.mxu0 %v5875_v35  ;;  %1403 = vmatprep.mubr.f32.mxu0 %v8977_v40 }
 0x28b   :  { %1441 = vmatpush1.msra.mxu1 %v5879_v5  ;;  %1474 = vmatprep.mubr.f32.mxu1 %v8977_v40 }
 0x28c   :  { %1404 = vmatmul.mubr.f32.vlgmr.msra.gmra.mxu0 %v5727_v39  ;;  %1475 = vmatmul.mubr.f32.vlgmr.msra.gmra.mxu1 %v5727_v39  ;;  %v5903_v39 = vld [vmem:[#allocation8 + $0x1c0] sm:$0xff] }
 0x28d   :  { %1509 = vmatprep.subr.mxu0 %v5885_v27  ;;  %1580 = vmatprep.subr.mxu1 %v5888_v38  ;;  %9129 = vst [vmem:[#allocation35_spill] sm:$0xff] %v5903_v39 }
 0x28e   :  { %1510 = vmatpush1.msra.mxu0 %v5891_v43  ;;  %1581 = vmatpush1.msra.mxu1 %v5894_v31 }
 0x28f   :  { %1511 = vmatprep.subr.mxu0 %v5897_v33  ;;  %1582 = vmatprep.subr.mxu1 %v5900_v37  ;;  %v5918_v37 = vld [vmem:[#allocation8 + $0x1b0] sm:$0xff] }
 0x290   :  { %1512 = vmatpush1.msra.mxu0 %v5903_v39  ;;  %1583 = vmatpush1.msra.mxu1 %v5906_v6  ;;  %9134 = vst [vmem:[#allocation40_spill] sm:$0xff] %v5918_v37  ;;  %v5921_v39 = vld [vmem:[#allocation8 + $0x188] sm:$0xff]  ;;  %v5924_v6 = vld [vmem:[#allocation8 + $0x198] sm:$0xff] }
 0x291   :  { %1513 = vmatprep.subr.mxu0 %v5909_v7  ;;  %1584 = vmatprep.subr.mxu1 %v5912_v53  ;;  %9135 = vst [vmem:[#allocation41_spill] sm:$0xff] %v5921_v39  ;;  %9136 = vst [vmem:[#allocation42_spill] sm:$0xff] %v5924_v6  ;;  %v5927_v7 = vld [vmem:[#allocation8 + $0x180] sm:$0xff]  ;;  %v5930_v53 = vld [vmem:[#allocation8 + $0x190] sm:$0xff] }
 0x292   :  { %1514 = vmatpush1.msra.mxu0 %v5915_v10  ;;  %1585 = vmatpush1.msra.mxu1 %v5918_v37  ;;  %9137 = vst [vmem:[#allocation43_spill] sm:$0xff] %v5927_v7  ;;  %9138 = vst [vmem:[#allocation44_spill] sm:$0xff] %v5930_v53  ;;  %v5933_v10 = vld [vmem:[#allocation8 + $0x168] sm:$0xff]  ;;  %v5936_v37 = vld [vmem:[#allocation8 + $0x178] sm:$0xff] }
 0x293   :  { %1515 = vmatprep.subr.mxu0 %v5921_v39  ;;  %1586 = vmatprep.subr.mxu1 %v5924_v6  ;;  %9139 = vst [vmem:[#allocation45_spill] sm:$0xff] %v5933_v10  ;;  %9140 = vst [vmem:[#allocation46_spill] sm:$0xff] %v5936_v37  ;;  %v5939_v39 = vld [vmem:[#allocation8 + $0x160] sm:$0xff]  ;;  %v5942_v6 = vld [vmem:[#allocation8 + $0x170] sm:$0xff] }
 0x294   :  { %1516 = vmatpush1.msra.mxu0 %v5927_v7  ;;  %1587 = vmatpush1.msra.mxu1 %v5930_v53  ;;  %9141 = vst [vmem:[#allocation47_spill] sm:$0xff] %v5939_v39  ;;  %9142 = vst [vmem:[#allocation48_spill] sm:$0xff] %v5942_v6  ;;  %v5945_v7 = vld [vmem:[#allocation8 + $0x148] sm:$0xff]  ;;  %v5948_v53 = vld [vmem:[#allocation8 + $0x158] sm:$0xff] }
 0x295   :  { %1517 = vmatprep.subr.mxu0 %v5933_v10  ;;  %1588 = vmatprep.subr.mxu1 %v5936_v37  ;;  %9143 = vst [vmem:[#allocation49_spill] sm:$0xff] %v5945_v7  ;;  %9144 = vst [vmem:[#allocation50_spill] sm:$0xff] %v5948_v53  ;;  %v5951_v10 = vld [vmem:[#allocation8 + $0x140] sm:$0xff]  ;;  %v5954_v37 = vld [vmem:[#allocation8 + $0x150] sm:$0xff] }
 0x296   :  { %1518 = vmatpush1.msra.mxu0 %v5939_v39  ;;  %1589 = vmatpush1.msra.mxu1 %v5942_v6  ;;  %9145 = vst [vmem:[#allocation51_spill] sm:$0xff] %v5951_v10  ;;  %9146 = vst [vmem:[#allocation52_spill] sm:$0xff] %v5954_v37  ;;  %v5957_v39 = vld [vmem:[#allocation8 + $0x128] sm:$0xff]  ;;  %v5960_v6 = vld [vmem:[#allocation8 + $0x138] sm:$0xff] }
 0x297   :  { %1519 = vmatprep.subr.mxu0 %v5945_v7  ;;  %1590 = vmatprep.subr.mxu1 %v5948_v53  ;;  %9147 = vst [vmem:[#allocation53_spill] sm:$0xff] %v5957_v39  ;;  %9148 = vst [vmem:[#allocation54_spill] sm:$0xff] %v5960_v6  ;;  %v5963_v7 = vld [vmem:[#allocation8 + $0x120] sm:$0xff]  ;;  %v5966_v53 = vld [vmem:[#allocation8 + $0x130] sm:$0xff] }
 0x298   :  { %1520 = vmatpush1.msra.mxu0 %v5951_v10  ;;  %1591 = vmatpush1.msra.mxu1 %v5954_v37  ;;  %9149 = vst [vmem:[#allocation55_spill] sm:$0xff] %v5963_v7  ;;  %9150 = vst [vmem:[#allocation56_spill] sm:$0xff] %v5966_v53  ;;  %v5969_v10 = vld [vmem:[#allocation8 + $0x108] sm:$0xff]  ;;  %v5972_v37 = vld [vmem:[#allocation8 + $0x118] sm:$0xff] }
 0x299   :  { %1521 = vmatprep.subr.mxu0 %v5957_v39  ;;  %1592 = vmatprep.subr.mxu1 %v5960_v6  ;;  %9151 = vst [vmem:[#allocation57_spill] sm:$0xff] %v5969_v10  ;;  %9152 = vst [vmem:[#allocation58_spill] sm:$0xff] %v5972_v37  ;;  %v5975_v39 = vld [vmem:[#allocation8 + $0x100] sm:$0xff]  ;;  %v5978_v6 = vld [vmem:[#allocation8 + $0x110] sm:$0xff] }
 0x29a   :  { %1522 = vmatpush1.msra.mxu0 %v5963_v7  ;;  %1593 = vmatpush1.msra.mxu1 %v5966_v53  ;;  %9153 = vst [vmem:[#allocation59_spill] sm:$0xff] %v5975_v39  ;;  %9154 = vst [vmem:[#allocation60_spill] sm:$0xff] %v5978_v6  ;;  %v5981_v7 = vld [vmem:[#allocation8 + $0xe8] sm:$0xff]  ;;  %v5984_v53 = vld [vmem:[#allocation8 + $0xf8] sm:$0xff] }
 0x29b   :  { %1523 = vmatprep.subr.mxu0 %v5969_v10  ;;  %1594 = vmatprep.subr.mxu1 %v5972_v37  ;;  %9155 = vst [vmem:[#allocation61_spill] sm:$0xff] %v5981_v7  ;;  %9156 = vst [vmem:[#allocation62_spill] sm:$0xff] %v5984_v53  ;;  %v5987_v10 = vld [vmem:[#allocation8 + $0xe0] sm:$0xff]  ;;  %v5990_v37 = vld [vmem:[#allocation8 + $0xf0] sm:$0xff] }
 0x29c   :  { %1524 = vmatpush1.msra.mxu0 %v5975_v39  ;;  %1595 = vmatpush1.msra.mxu1 %v5978_v6  ;;  %9157 = vst [vmem:[#allocation63_spill] sm:$0xff] %v5987_v10  ;;  %9158 = vst [vmem:[#allocation64_spill] sm:$0xff] %v5990_v37  ;;  %v5993_v39 = vld [vmem:[#allocation8 + $0xc8] sm:$0xff]  ;;  %v5996_v6 = vld [vmem:[#allocation8 + $0xd8] sm:$0xff] }
 0x29d   :  { %1525 = vmatprep.subr.mxu0 %v5981_v7  ;;  %1596 = vmatprep.subr.mxu1 %v5984_v53  ;;  %9159 = vst [vmem:[#allocation65_spill] sm:$0xff] %v5993_v39  ;;  %9160 = vst [vmem:[#allocation66_spill] sm:$0xff] %v5996_v6  ;;  %v5999_v7 = vld [vmem:[#allocation8 + $0xc0] sm:$0xff]  ;;  %v6002_v53 = vld [vmem:[#allocation8 + $0xd0] sm:$0xff] }
 0x29e   :  { %1526 = vmatpush1.msra.mxu0 %v5987_v10  ;;  %1597 = vmatpush1.msra.mxu1 %v5990_v37  ;;  %9161 = vst [vmem:[#allocation67_spill] sm:$0xff] %v5999_v7  ;;  %9162 = vst [vmem:[#allocation68_spill] sm:$0xff] %v6002_v53  ;;  %v6005_v10 = vld [vmem:[#allocation8 + $0xa8] sm:$0xff]  ;;  %v6008_v37 = vld [vmem:[#allocation8 + $0xb8] sm:$0xff] }
 0x29f   :  { %1527 = vmatprep.subr.mxu0 %v5993_v39  ;;  %1598 = vmatprep.subr.mxu1 %v5996_v6  ;;  %9163 = vst [vmem:[#allocation69_spill] sm:$0xff] %v6005_v10  ;;  %9164 = vst [vmem:[#allocation70_spill] sm:$0xff] %v6008_v37  ;;  %v6011_v39 = vld [vmem:[#allocation8 + $0xa0] sm:$0xff]  ;;  %v6014_v6 = vld [vmem:[#allocation8 + $0xb0] sm:$0xff] }
 0x2a0   :  { %1528 = vmatpush1.msra.mxu0 %v5999_v7  ;;  %1599 = vmatpush1.msra.mxu1 %v6002_v53  ;;  %9165 = vst [vmem:[#allocation71_spill] sm:$0xff] %v6011_v39  ;;  %9166 = vst [vmem:[#allocation72_spill] sm:$0xff] %v6014_v6  ;;  %v6017_v7 = vld [vmem:[#allocation8 + $0x88] sm:$0xff]  ;;  %v6020_v53 = vld [vmem:[#allocation8 + $0x98] sm:$0xff] }
 0x2a1   :  { %1529 = vmatprep.subr.mxu0 %v6005_v10  ;;  %1600 = vmatprep.subr.mxu1 %v6008_v37  ;;  %9167 = vst [vmem:[#allocation73_spill] sm:$0xff] %v6017_v7  ;;  %9168 = vst [vmem:[#allocation74_spill] sm:$0xff] %v6020_v53  ;;  %v6023_v10 = vld [vmem:[#allocation8 + $0x80] sm:$0xff]  ;;  %v6026_v37 = vld [vmem:[#allocation8 + $0x90] sm:$0xff] }
 0x2a2   :  { %1530 = vmatpush1.msra.mxu0 %v6011_v39  ;;  %1601 = vmatpush1.msra.mxu1 %v6014_v6  ;;  %9169 = vst [vmem:[#allocation75_spill] sm:$0xff] %v6023_v10  ;;  %9170 = vst [vmem:[#allocation76_spill] sm:$0xff] %v6026_v37  ;;  %v6029_v39 = vld [vmem:[#allocation8 + $0x68] sm:$0xff]  ;;  %v6032_v6 = vld [vmem:[#allocation8 + $0x78] sm:$0xff] }
 0x2a3   :  { %1531 = vmatprep.subr.mxu0 %v6017_v7  ;;  %1602 = vmatprep.subr.mxu1 %v6020_v53  ;;  %9171 = vst [vmem:[#allocation77_spill] sm:$0xff] %v6029_v39  ;;  %9172 = vst [vmem:[#allocation78_spill] sm:$0xff] %v6032_v6  ;;  %v6035_v7 = vld [vmem:[#allocation8 + $0x60] sm:$0xff]  ;;  %v6038_v53 = vld [vmem:[#allocation8 + $0x70] sm:$0xff] }
 0x2a4   :  { %1532 = vmatpush1.msra.mxu0 %v6023_v10  ;;  %1603 = vmatpush1.msra.mxu1 %v6026_v37  ;;  %9173 = vst [vmem:[#allocation79_spill] sm:$0xff] %v6035_v7  ;;  %9174 = vst [vmem:[#allocation80_spill] sm:$0xff] %v6038_v53  ;;  %v6041_v10 = vld [vmem:[#allocation8 + $0x48] sm:$0xff]  ;;  %v6044_v37 = vld [vmem:[#allocation8 + $0x58] sm:$0xff] }
 0x2a5   :  { %1533 = vmatprep.subr.mxu0 %v6029_v39  ;;  %1604 = vmatprep.subr.mxu1 %v6032_v6  ;;  %9175 = vst [vmem:[#allocation81_spill] sm:$0xff] %v6041_v10  ;;  %9176 = vst [vmem:[#allocation82_spill] sm:$0xff] %v6044_v37  ;;  %v6047_v39 = vld [vmem:[#allocation8 + $0x40] sm:$0xff]  ;;  %v6050_v6 = vld [vmem:[#allocation8 + $0x50] sm:$0xff] }
 0x2a6   :  { %1534 = vmatpush1.msra.mxu0 %v6035_v7  ;;  %1605 = vmatpush1.msra.mxu1 %v6038_v53  ;;  %9177 = vst [vmem:[#allocation83_spill] sm:$0xff] %v6047_v39  ;;  %9178 = vst [vmem:[#allocation84_spill] sm:$0xff] %v6050_v6  ;;  %v6053_v7 = vld [vmem:[#allocation8 + $0x28] sm:$0xff]  ;;  %v6056_v53 = vld [vmem:[#allocation8 + $0x38] sm:$0xff] }
 0x2a7   :  { %1535 = vmatprep.subr.mxu0 %v6041_v10  ;;  %1606 = vmatprep.subr.mxu1 %v6044_v37  ;;  %9179 = vst [vmem:[#allocation85_spill] sm:$0xff] %v6053_v7  ;;  %9180 = vst [vmem:[#allocation86_spill] sm:$0xff] %v6056_v53  ;;  %v6059_v10 = vld [vmem:[#allocation8 + $0x20] sm:$0xff]  ;;  %v6062_v37 = vld [vmem:[#allocation8 + $0x30] sm:$0xff] }
 0x2a8   :  { %1536 = vmatpush1.msra.mxu0 %v6047_v39  ;;  %1607 = vmatpush1.msra.mxu1 %v6050_v6  ;;  %9181 = vst [vmem:[#allocation87_spill] sm:$0xff] %v6059_v10  ;;  %9182 = vst [vmem:[#allocation88_spill] sm:$0xff] %v6062_v37  ;;  %v6065_v39 = vld [vmem:[#allocation8 + $0x8] sm:$0xff]  ;;  %v6068_v6 = vld [vmem:[#allocation8 + $0x18] sm:$0xff] }
 0x2a9   :  { %1537 = vmatprep.subr.mxu0 %v6053_v7  ;;  %1608 = vmatprep.subr.mxu1 %v6056_v53  ;;  %9183 = vst [vmem:[#allocation89_spill] sm:$0xff] %v6065_v39  ;;  %9184 = vst [vmem:[#allocation90_spill] sm:$0xff] %v6068_v6  ;;  %v6071_v7 = vld [vmem:[#allocation8] sm:$0xff]  ;;  %v6074_v53 = vld [vmem:[#allocation8 + $0x10] sm:$0xff] }
 0x2aa   :  { %1538 = vmatpush1.msra.mxu0 %v6059_v10  ;;  %1609 = vmatpush1.msra.mxu1 %v6062_v37  ;;  %9185 = vst [vmem:[#allocation91_spill] sm:$0xff] %v6071_v7  ;;  %9186 = vst [vmem:[#allocation92_spill] sm:$0xff] %v6074_v53  ;;  %v6077_v10 = vld [vmem:[#allocation8 + $0x3e8] sm:$0xff]  ;;  %v6080_v37 = vld [vmem:[#allocation8 + $0x3f8] sm:$0xff] }
 0x2ab   :  { %1539 = vmatprep.subr.mxu0 %v6065_v39  ;;  %1610 = vmatprep.subr.mxu1 %v6068_v6  ;;  %9187 = vst [vmem:[#allocation93_spill] sm:$0xff] %v6077_v10  ;;  %9188 = vst [vmem:[#allocation94_spill] sm:$0xff] %v6080_v37  ;;  %v6083_v39 = vld [vmem:[#allocation8 + $0x3e0] sm:$0xff]  ;;  %v6086_v6 = vld [vmem:[#allocation8 + $0x3f0] sm:$0xff] }
 0x2ac   :  { %1540 = vmatpush1.msra.mxu0 %v6071_v7  ;;  %1611 = vmatpush1.msra.mxu1 %v6074_v53  ;;  %9189 = vst [vmem:[#allocation95_spill] sm:$0xff] %v6083_v39  ;;  %9190 = vst [vmem:[#allocation96_spill] sm:$0xff] %v6086_v6  ;;  %v6089_v7 = vld [vmem:[#allocation8 + $0x3c8] sm:$0xff]  ;;  %v6092_v53 = vld [vmem:[#allocation8 + $0x3d8] sm:$0xff] }
 0x2ad   :  { %1541 = vmatprep.subr.mxu0 %v6077_v10  ;;  %1612 = vmatprep.subr.mxu1 %v6080_v37  ;;  %9191 = vst [vmem:[#allocation97_spill] sm:$0xff] %v6089_v7  ;;  %9192 = vst [vmem:[#allocation98_spill] sm:$0xff] %v6092_v53  ;;  %v6095_v10 = vld [vmem:[#allocation8 + $0x3c0] sm:$0xff]  ;;  %v6098_v37 = vld [vmem:[#allocation8 + $0x3d0] sm:$0xff] }
 0x2ae   :  { %1542 = vmatpush2.msra.mxu0 %v6083_v39  ;;  %1613 = vmatpush2.msra.mxu1 %v6086_v6  ;;  %9193 = vst [vmem:[#allocation99_spill] sm:$0xff] %v6095_v10  ;;  %9194 = vst [vmem:[#allocation100_spill] sm:$0xff] %v6098_v37  ;;  %v6101_v39 = vld [vmem:[#allocation8 + $0x3a8] sm:$0xff]  ;;  %v6104_v6 = vld [vmem:[#allocation8 + $0x3b8] sm:$0xff] }
 0x2af   :  { %1543 = vmatprep.subr.mxu0 %v6089_v7  ;;  %1614 = vmatprep.subr.mxu1 %v6092_v53  ;;  %9195 = vst [vmem:[#allocation101_spill] sm:$0xff] %v6101_v39  ;;  %9196 = vst [vmem:[#allocation102_spill] sm:$0xff] %v6104_v6  ;;  %v6107_v7 = vld [vmem:[#allocation8 + $0x3a0] sm:$0xff]  ;;  %v6110_v53 = vld [vmem:[#allocation8 + $0x3b0] sm:$0xff] }
 0x2b0   :  { %1544 = vmatpush2.msra.mxu0 %v6095_v10  ;;  %1615 = vmatpush2.msra.mxu1 %v6098_v37  ;;  %9197 = vst [vmem:[#allocation103_spill] sm:$0xff] %v6107_v7  ;;  %9198 = vst [vmem:[#allocation104_spill] sm:$0xff] %v6110_v53  ;;  %v6113_v10 = vld [vmem:[#allocation8 + $0x388] sm:$0xff]  ;;  %v6116_v37 = vld [vmem:[#allocation8 + $0x398] sm:$0xff] }
 0x2b1   :  { %1545 = vmatprep.subr.mxu0 %v6101_v39  ;;  %1616 = vmatprep.subr.mxu1 %v6104_v6  ;;  %9199 = vst [vmem:[#allocation105_spill] sm:$0xff] %v6113_v10  ;;  %9200 = vst [vmem:[#allocation106_spill] sm:$0xff] %v6116_v37  ;;  %v6119_v39 = vld [vmem:[#allocation8 + $0x380] sm:$0xff]  ;;  %v6122_v6 = vld [vmem:[#allocation8 + $0x390] sm:$0xff] }
 0x2b2   :  { %1546 = vmatpush2.msra.mxu0 %v6107_v7  ;;  %1617 = vmatpush2.msra.mxu1 %v6110_v53  ;;  %9201 = vst [vmem:[#allocation107_spill] sm:$0xff] %v6119_v39  ;;  %9202 = vst [vmem:[#allocation108_spill] sm:$0xff] %v6122_v6  ;;  %v6125_v7 = vld [vmem:[#allocation8 + $0x368] sm:$0xff]  ;;  %v6128_v53 = vld [vmem:[#allocation8 + $0x378] sm:$0xff] }
 0x2b3   :  { %1547 = vmatprep.subr.mxu0 %v6113_v10  ;;  %1618 = vmatprep.subr.mxu1 %v6116_v37  ;;  %9203 = vst [vmem:[#allocation109_spill] sm:$0xff] %v6125_v7  ;;  %9204 = vst [vmem:[#allocation110_spill] sm:$0xff] %v6128_v53  ;;  %v6131_v10 = vld [vmem:[#allocation8 + $0x360] sm:$0xff]  ;;  %v6134_v37 = vld [vmem:[#allocation8 + $0x370] sm:$0xff] }
 0x2b4   :  { %1548 = vmatpush2.msra.mxu0 %v6119_v39  ;;  %1619 = vmatpush2.msra.mxu1 %v6122_v6  ;;  %9205 = vst [vmem:[#allocation111_spill] sm:$0xff] %v6131_v10  ;;  %9206 = vst [vmem:[#allocation112_spill] sm:$0xff] %v6134_v37  ;;  %v6137_v39 = vld [vmem:[#allocation8 + $0x348] sm:$0xff]  ;;  %v6140_v6 = vld [vmem:[#allocation8 + $0x358] sm:$0xff] }
 0x2b5   :  { %1549 = vmatprep.subr.mxu0 %v6125_v7  ;;  %1620 = vmatprep.subr.mxu1 %v6128_v53  ;;  %9207 = vst [vmem:[#allocation113_spill] sm:$0xff] %v6137_v39  ;;  %9208 = vst [vmem:[#allocation114_spill] sm:$0xff] %v6140_v6  ;;  %v6143_v7 = vld [vmem:[#allocation8 + $0x340] sm:$0xff]  ;;  %v6146_v53 = vld [vmem:[#allocation8 + $0x350] sm:$0xff] }
 0x2b6   :  { %1550 = vmatpush2.msra.mxu0 %v6131_v10  ;;  %1621 = vmatpush2.msra.mxu1 %v6134_v37  ;;  %9209 = vst [vmem:[#allocation115_spill] sm:$0xff] %v6143_v7  ;;  %9210 = vst [vmem:[#allocation116_spill] sm:$0xff] %v6146_v53  ;;  %v6149_v10 = vld [vmem:[#allocation8 + $0x328] sm:$0xff]  ;;  %v6152_v37 = vld [vmem:[#allocation8 + $0x338] sm:$0xff] }
 0x2b7   :  { %1551 = vmatprep.subr.mxu0 %v6137_v39  ;;  %1622 = vmatprep.subr.mxu1 %v6140_v6  ;;  %9211 = vst [vmem:[#allocation117_spill] sm:$0xff] %v6149_v10  ;;  %9212 = vst [vmem:[#allocation118_spill] sm:$0xff] %v6152_v37  ;;  %v6155_v39 = vld [vmem:[#allocation8 + $0x320] sm:$0xff]  ;;  %v6158_v6 = vld [vmem:[#allocation8 + $0x330] sm:$0xff] }
 0x2b8   :  { %1552 = vmatpush2.msra.mxu0 %v6143_v7  ;;  %1623 = vmatpush2.msra.mxu1 %v6146_v53  ;;  %9213 = vst [vmem:[#allocation119_spill] sm:$0xff] %v6155_v39  ;;  %9214 = vst [vmem:[#allocation120_spill] sm:$0xff] %v6158_v6  ;;  %v6161_v7 = vld [vmem:[#allocation8 + $0x308] sm:$0xff]  ;;  %v6164_v53 = vld [vmem:[#allocation8 + $0x318] sm:$0xff] }
 0x2b9   :  { %1553 = vmatprep.subr.mxu0 %v6149_v10  ;;  %1624 = vmatprep.subr.mxu1 %v6152_v37  ;;  %9215 = vst [vmem:[#allocation121_spill] sm:$0xff] %v6161_v7  ;;  %9216 = vst [vmem:[#allocation122_spill] sm:$0xff] %v6164_v53  ;;  %v6167_v10 = vld [vmem:[#allocation8 + $0x300] sm:$0xff]  ;;  %v6170_v37 = vld [vmem:[#allocation8 + $0x310] sm:$0xff] }
 0x2ba   :  { %1554 = vmatpush2.msra.mxu0 %v6155_v39  ;;  %1625 = vmatpush2.msra.mxu1 %v6158_v6  ;;  %9217 = vst [vmem:[#allocation123_spill] sm:$0xff] %v6167_v10  ;;  %9218 = vst [vmem:[#allocation124_spill] sm:$0xff] %v6170_v37  ;;  %v6173_v39 = vld [vmem:[#allocation8 + $0x2e8] sm:$0xff]  ;;  %v6176_v6 = vld [vmem:[#allocation8 + $0x2f8] sm:$0xff] }
 0x2bb   :  { %1555 = vmatprep.subr.mxu0 %v6161_v7  ;;  %1626 = vmatprep.subr.mxu1 %v6164_v53  ;;  %9219 = vst [vmem:[#allocation125_spill] sm:$0xff] %v6173_v39  ;;  %9220 = vst [vmem:[#allocation126_spill] sm:$0xff] %v6176_v6  ;;  %v6179_v7 = vld [vmem:[#allocation8 + $0x2e0] sm:$0xff]  ;;  %v6182_v53 = vld [vmem:[#allocation8 + $0x2f0] sm:$0xff] }
 0x2bc   :  { %1556 = vmatpush2.msra.mxu0 %v6167_v10  ;;  %1627 = vmatpush2.msra.mxu1 %v6170_v37  ;;  %9221 = vst [vmem:[#allocation127_spill] sm:$0xff] %v6179_v7  ;;  %9222 = vst [vmem:[#allocation128_spill] sm:$0xff] %v6182_v53  ;;  %v6185_v10 = vld [vmem:[#allocation8 + $0x2c8] sm:$0xff]  ;;  %v6188_v37 = vld [vmem:[#allocation8 + $0x2d8] sm:$0xff] }
 0x2bd   :  { %1557 = vmatprep.subr.mxu0 %v6173_v39  ;;  %1628 = vmatprep.subr.mxu1 %v6176_v6  ;;  %9223 = vst [vmem:[#allocation129_spill] sm:$0xff] %v6185_v10  ;;  %9224 = vst [vmem:[#allocation130_spill] sm:$0xff] %v6188_v37  ;;  %v6191_v39 = vld [vmem:[#allocation8 + $0x2c0] sm:$0xff]  ;;  %v6194_v6 = vld [vmem:[#allocation8 + $0x2d0] sm:$0xff] }
 0x2be   :  { %1558 = vmatpush2.msra.mxu0 %v6179_v7  ;;  %1629 = vmatpush2.msra.mxu1 %v6182_v53  ;;  %9225 = vst [vmem:[#allocation131_spill] sm:$0xff] %v6191_v39  ;;  %9226 = vst [vmem:[#allocation132_spill] sm:$0xff] %v6194_v6  ;;  %v6197_v7 = vld [vmem:[#allocation8 + $0x2a8] sm:$0xff]  ;;  %v6200_v53 = vld [vmem:[#allocation8 + $0x2b8] sm:$0xff] }
 0x2bf   :  { %1559 = vmatprep.subr.mxu0 %v6185_v10  ;;  %1630 = vmatprep.subr.mxu1 %v6188_v37  ;;  %9227 = vst [vmem:[#allocation133_spill] sm:$0xff] %v6197_v7  ;;  %9228 = vst [vmem:[#allocation134_spill] sm:$0xff] %v6200_v53  ;;  %v6203_v10 = vld [vmem:[#allocation8 + $0x2a0] sm:$0xff]  ;;  %v6206_v37 = vld [vmem:[#allocation8 + $0x2b0] sm:$0xff] }
 0x2c0   :  { %1560 = vmatpush2.msra.mxu0 %v6191_v39  ;;  %1631 = vmatpush2.msra.mxu1 %v6194_v6  ;;  %9229 = vst [vmem:[#allocation135_spill] sm:$0xff] %v6203_v10  ;;  %9230 = vst [vmem:[#allocation136_spill] sm:$0xff] %v6206_v37  ;;  %v6209_v39 = vld [vmem:[#allocation8 + $0x288] sm:$0xff]  ;;  %v6212_v6 = vld [vmem:[#allocation8 + $0x298] sm:$0xff] }
 0x2c1   :  { %1561 = vmatprep.subr.mxu0 %v6197_v7  ;;  %1632 = vmatprep.subr.mxu1 %v6200_v53  ;;  %9231 = vst [vmem:[#allocation137_spill] sm:$0xff] %v6209_v39  ;;  %9232 = vst [vmem:[#allocation138_spill] sm:$0xff] %v6212_v6  ;;  %v6215_v7 = vld [vmem:[#allocation8 + $0x280] sm:$0xff]  ;;  %v6218_v53 = vld [vmem:[#allocation8 + $0x290] sm:$0xff] }
 0x2c2   :  { %1562 = vmatpush2.msra.mxu0 %v6203_v10  ;;  %1633 = vmatpush2.msra.mxu1 %v6206_v37  ;;  %9233 = vst [vmem:[#allocation139_spill] sm:$0xff] %v6215_v7  ;;  %9234 = vst [vmem:[#allocation140_spill] sm:$0xff] %v6218_v53  ;;  %v6221_v10 = vld [vmem:[#allocation8 + $0x268] sm:$0xff]  ;;  %v6224_v37 = vld [vmem:[#allocation8 + $0x278] sm:$0xff] }
 0x2c3   :  { %1563 = vmatprep.subr.mxu0 %v6209_v39  ;;  %1634 = vmatprep.subr.mxu1 %v6212_v6  ;;  %9235 = vst [vmem:[#allocation141_spill] sm:$0xff] %v6221_v10  ;;  %9236 = vst [vmem:[#allocation142_spill] sm:$0xff] %v6224_v37  ;;  %v6227_v39 = vld [vmem:[#allocation8 + $0x260] sm:$0xff]  ;;  %v6230_v6 = vld [vmem:[#allocation8 + $0x270] sm:$0xff] }
 0x2c4   :  { %1564 = vmatpush2.msra.mxu0 %v6215_v7  ;;  %1635 = vmatpush2.msra.mxu1 %v6218_v53  ;;  %9237 = vst [vmem:[#allocation143_spill] sm:$0xff] %v6227_v39  ;;  %9238 = vst [vmem:[#allocation144_spill] sm:$0xff] %v6230_v6  ;;  %v6233_v7 = vld [vmem:[#allocation8 + $0x248] sm:$0xff]  ;;  %v6236_v53 = vld [vmem:[#allocation8 + $0x258] sm:$0xff] }
 0x2c5   :  { %1565 = vmatprep.subr.mxu0 %v6221_v10  ;;  %1636 = vmatprep.subr.mxu1 %v6224_v37  ;;  %9239 = vst [vmem:[#allocation145_spill] sm:$0xff] %v6233_v7  ;;  %9240 = vst [vmem:[#allocation146_spill] sm:$0xff] %v6236_v53  ;;  %v6239_v10 = vld [vmem:[#allocation8 + $0x240] sm:$0xff]  ;;  %v6242_v37 = vld [vmem:[#allocation8 + $0x250] sm:$0xff] }
 0x2c6   :  { %1566 = vmatpush2.msra.mxu0 %v6227_v39  ;;  %1637 = vmatpush2.msra.mxu1 %v6230_v6  ;;  %9241 = vst [vmem:[#allocation147_spill] sm:$0xff] %v6239_v10  ;;  %9242 = vst [vmem:[#allocation148_spill] sm:$0xff] %v6242_v37  ;;  %v6245_v39 = vld [vmem:[#allocation8 + $0x228] sm:$0xff]  ;;  %v6248_v6 = vld [vmem:[#allocation8 + $0x238] sm:$0xff] }
 0x2c7   :  { %1567 = vmatprep.subr.mxu0 %v6233_v7  ;;  %1638 = vmatprep.subr.mxu1 %v6236_v53  ;;  %9243 = vst [vmem:[#allocation149_spill] sm:$0xff] %v6245_v39  ;;  %9244 = vst [vmem:[#allocation150_spill] sm:$0xff] %v6248_v6  ;;  %v6251_v7 = vld [vmem:[#allocation8 + $0x220] sm:$0xff]  ;;  %v6254_v53 = vld [vmem:[#allocation8 + $0x230] sm:$0xff] }
 0x2c8   :  { %1568 = vmatpush2.msra.mxu0 %v6239_v10  ;;  %1639 = vmatpush2.msra.mxu1 %v6242_v37  ;;  %9245 = vst [vmem:[#allocation151_spill] sm:$0xff] %v6251_v7  ;;  %9246 = vst [vmem:[#allocation20_spill] sm:$0xff] %v6254_v53  ;;  %v6257_v10 = vld [vmem:[#allocation8 + $0x208] sm:$0xff]  ;;  %v6260_v37 = vld [vmem:[#allocation8 + $0x218] sm:$0xff] }
 0x2c9   :  { %1569 = vmatprep.subr.mxu0 %v6245_v39  ;;  %1640 = vmatprep.subr.mxu1 %v6248_v6  ;;  %9247 = vst [vmem:[#allocation19_spill] sm:$0xff] %v6257_v10  ;;  %9248 = vst [vmem:[#allocation17_spill] sm:$0xff] %v6260_v37  ;;  %v6263_v39 = vld [vmem:[#allocation8 + $0x200] sm:$0xff]  ;;  %v6266_v6 = vld [vmem:[#allocation8 + $0x210] sm:$0xff] }
 0x2ca   :  { %1570 = vmatpush2.msra.mxu0 %v6251_v7  ;;  %1641 = vmatpush2.msra.mxu1 %v6254_v53  ;;  %9249 = vst [vmem:[#allocation18_spill] sm:$0xff] %v6263_v39  ;;  %9250 = vst [vmem:[#allocation154_spill] sm:$0xff] %v6266_v6 }
 0x2cb   :  { %1571 = vmatprep.subr.mxu0 %v6257_v10  ;;  %1642 = vmatprep.subr.mxu1 %v6260_v37 }
 0x2cc   :  { %1572 = vmatpush2.msra.mxu0 %v6263_v39  ;;  %1643 = vmatpush2.msra.mxu1 %v6266_v6 }
 0x2cd   :  { %1682 = vmatprep.subr.mxu0 %v5683_v49  ;;  %1753 = vmatprep.subr.mxu1 %v5686_v50 }
 0x32b   :  { %v1232_v53 = vpop.f32.mrf.mxu0  ;;  %v1303_v37 = vpop.f32.mrf.mxu1 }
 0x32c   :  { %v1233_v7 = vadd.f32 %v1232_v53, %v5693_v9  ;;  %v1304_v49 = vadd.f32 %v1303_v37, %v5707_v26 }
 0x32d   :  { %v1234_v10 = vpop.f32.mrf.mxu0  ;;  %v1305_v39 = vpop.f32.mrf.mxu1 }
 0x32e   :  { %v3609_v33 = vmul.f32 -1.442695, %v1233_v7  ;;  %v1235_v31 = vadd.f32 %v1234_v10, %v5698_v13  ;;  %v1306_v38 = vadd.f32 %v1305_v39, %v5703_v22  ;;  %v9251_v13 = vld [vmem:[#allocation160_spill] sm:$0xff] }
 0x330   :  { %3774 = vpow2.f32 %v3609_v33  ;;  %v3610_v43 = vmul.f32 -1.442695, %v1235_v31  ;;  %v3611_v27 = vmul.f32 -1.442695, %v1306_v38  ;;  %v9252_v38 = vld [vmem:[#allocation162_spill] sm:$0xff] }
 0x332   :  { %3776 = vpow2.f32 %v3610_v43 }
 0x333   :  { %3778 = vpow2.f32 %v3611_v27 }
 0x33d   :  { %v3775_v6 = vpop.eup %3774 }
 0x33e   :  { %v1311_v5 = vadd.f32 1.0, %v3775_v6 }
 0x33f   :  { %v3777_v50 = vpop.eup %3776 }
 0x340   :  { %3780 = vrcp.f32 %v1311_v5  ;;  %v1317_v53 = vadd.f32 1.0, %v3777_v50  ;;  %v3779_v7 = vpop.eup %3778 }
 0x341   :  { %3782 = vtanh.f32 %v1304_v49  ;;  %v1324_v37 = vadd.f32 1.0, %v3779_v7 }
 0x342   :  { %3784 = vrcp.f32 %v1317_v53 }
 0x34c   :  { %v1405_v10 = vpop.f32.mrf.mxu0  ;;  %v1476_v5 = vpop.f32.mrf.mxu1 }
 0x34d   :  { %v3781_v33 = vpop.eup %3780  ;;  %v1481_v31 = vadd.f32 %v1405_v10, %v9251_v13  ;;  %v9253_v13 = vld [vmem:[#allocation157_spill] sm:$0xff]  ;;  %v9254_v10 = vld [vmem:[#allocation155_spill] sm:$0xff] }
 0x34e   :  { %v3783_v43 = vpop.eup %3782  ;;  %v1407_v9 = vpop.f32.mrf.mxu0 }
 0x34f   :  { %v3785_v40 = vpop.eup %3784  ;;  %v3612_v39 = vmul.f32 -1.442695, %v1481_v31  ;;  %v1482_v22 = vadd.f32 %v1407_v9, %v9252_v38  ;;  %v1328_v35 = vmul.f32 %v3783_v43, %v3781_v33  ;;  %v1478_v50 = vpop.f32.mrf.mxu1  ;;  %v1483_v31 = vadd.f32 %v1476_v5, %v9254_v10  ;;  %v6295_v10 = vld [vmem:[#allocation5 + $0x1e0] sm:$0xff] }
 0x350   :  { %v1327_v6 = vmul.f32 %v3785_v40, %v5714_v15  ;;  %v1484_v53 = vadd.f32 %v1478_v50, %v9253_v13 }
 0x351   :  { %3786 = vpow2.f32 %v3612_v39  ;;  %v3613_v27 = vmul.f32 -1.442695, %v1482_v22 }
 0x352   :  { %v6278_v49 = vadd.f32 %v1328_v35, %v1327_v6  ;;  %v3614_v26 = vmul.f32 -1.442695, %v1484_v53 }
 0x353   :  { %3788 = vpow2.f32 %v3613_v27 }
 0x354   :  { %3790 = vrcp.f32 %v1324_v37 }
 0x355   :  { %3792 = vtanh.f32 %v6278_v49 }
 0x356   :  { %3794 = vtanh.f32 %v1483_v31  ;;  %v6303_v31 = vld [vmem:[#allocation5 + $0x1c0] sm:$0xff] }
 0x357   :  { %3796 = vpow2.f32 %v3614_v26 }
 0x35e   :  { %v3787_v9 = vpop.eup %3786 }
 0x35f   :  { %v1488_v33 = vadd.f32 1.0, %v3787_v9  ;;  %v6307_v9 = vld [vmem:[#allocation5 + $0x1a8] sm:$0xff] }
 0x360   :  { %v3789_v40 = vpop.eup %3788 }
 0x361   :  { %v3791_v15 = vpop.eup %3790  ;;  %3798 = vrcp.f32 %v1488_v33  ;;  %v1494_v22 = vadd.f32 1.0, %v3789_v40  ;;  %v6311_v33 = vld [vmem:[#allocation5 + $0x1a0] sm:$0xff]  ;;  %v9285_v40 = vld [vmem:[#allocation55_spill] sm:$0xff] }
 0x362   :  { %v3793_v35 = vpop.eup %3792 }
 0x363   :  { %3800 = vrcp.f32 %v1494_v22  ;;  %v6283_v7 = vmul.f32 %v3793_v35, %v3791_v15  ;;  %v3795_v43 = vpop.eup %3794  ;;  %v9286_v15 = vld [vmem:[#allocation56_spill] sm:$0xff]  ;;  %v9287_v22 = vld [vmem:[#allocation57_spill] sm:$0xff]  ;;  %v9288_v35 = vld [vmem:[#allocation58_spill] sm:$0xff] }
 0x364   :  { %v3797_v39 = vpop.eup %3796 }
 0x365   :  { %9255 = vst [vmem:[#allocation156_spill] sm:$0xff] %v6283_v7  ;;  %1573 = vmatprep.mubr.f32.mxu0 %v6283_v7  ;;  %1644 = vmatprep.mubr.f32.mxu1 %v6283_v7  ;;  %v1501_v5 = vadd.f32 1.0, %v3797_v39  ;;  %v9290_v39 = vld [vmem:[#allocation60_spill] sm:$0xff]  ;;  %v6739_v7 = vld [vmem:[#allocation8 + $0x1a0] sm:$0xff] }
 0x367   :  { %3802 = vrcp.f32 %v1501_v5  ;;  %v9294_v5 = vld [vmem:[#allocation64_spill] sm:$0xff] }
 0x36e   :  { %v3799_v38 = vpop.eup %3798 }
 0x36f   :  { %v1505_v6 = vmul.f32 %v3799_v38, %v3795_v43  ;;  %v9289_v43 = vld [vmem:[#allocation59_spill] sm:$0xff]  ;;  %v9291_v38 = vld [vmem:[#allocation61_spill] sm:$0xff] }
 0x370   :  { %v3801_v37 = vpop.eup %3800 }
 0x371   :  { %v1504_v27 = vmul.f32 %v3801_v37, %v5724_v25  ;;  %v6299_v25 = vld [vmem:[#allocation5 + $0x1c8] sm:$0xff]  ;;  %v9293_v37 = vld [vmem:[#allocation63_spill] sm:$0xff] }
 0x373   :  { %v6288_v26 = vadd.f32 %v1505_v6, %v1504_v27  ;;  %v9292_v6 = vld [vmem:[#allocation62_spill] sm:$0xff]  ;;  %v9295_v27 = vld [vmem:[#allocation65_spill] sm:$0xff] }
 0x374   :  { %v3803_v50 = vpop.eup %3802 }
 0x375   :  { %3804 = vtanh.f32 %v6288_v26 }
 0x382   :  { %v3805_v13 = vpop.eup %3804 }
 0x383   :  { %v6291_v53 = vmul.f32 %v3805_v13, %v3803_v50  ;;  %v9296_v50 = vld [vmem:[#allocation66_spill] sm:$0xff]  ;;  %v9297_v13 = vld [vmem:[#allocation67_spill] sm:$0xff] }
 0x385   :  { %1574 = vmatmul.mubr.f32.vlgmr.msra.gmra.mxu0 %v6291_v53  ;;  %1645 = vmatmul.mubr.f32.vlgmr.msra.gmra.mxu1 %v6291_v53 }
 0x386   :  { %1683 = vmatpush1.msra.mxu0 %v6295_v10  ;;  %1754 = vmatpush1.msra.mxu1 %v5732_v41  ;;  %v6315_v41 = vld [vmem:[#allocation5 + $0x188] sm:$0xff] }
 0x387   :  { %1684 = vmatprep.subr.mxu0 %v6299_v25  ;;  %1755 = vmatprep.subr.mxu1 %v5736_v48  ;;  %v6319_v48 = vld [vmem:[#allocation5 + $0x180] sm:$0xff] }
 0x388   :  { %1685 = vmatpush1.msra.mxu0 %v6303_v31  ;;  %1756 = vmatpush1.msra.mxu1 %v5740_v42  ;;  %v6323_v42 = vld [vmem:[#allocation5 + $0x168] sm:$0xff] }
 0x389   :  { %1686 = vmatprep.subr.mxu0 %v6307_v9  ;;  %1757 = vmatprep.subr.mxu1 %v5744_v44  ;;  %v6327_v44 = vld [vmem:[#allocation5 + $0x160] sm:$0xff] }
 0x38a   :  { %1687 = vmatpush1.msra.mxu0 %v6311_v33  ;;  %1758 = vmatpush1.msra.mxu1 %v5748_v34  ;;  %v6331_v34 = vld [vmem:[#allocation5 + $0x148] sm:$0xff] }
 0x38b   :  { %1688 = vmatprep.subr.mxu0 %v6315_v41  ;;  %1759 = vmatprep.subr.mxu1 %v5752_v12  ;;  %v6335_v12 = vld [vmem:[#allocation5 + $0x140] sm:$0xff] }
 0x38c   :  { %1689 = vmatpush1.msra.mxu0 %v6319_v48  ;;  %1760 = vmatpush1.msra.mxu1 %v5756_v32  ;;  %v6339_v32 = vld [vmem:[#allocation5 + $0x128] sm:$0xff] }
 0x38d   :  { %1690 = vmatprep.subr.mxu0 %v6323_v42  ;;  %1761 = vmatprep.subr.mxu1 %v5760_v30  ;;  %v6343_v30 = vld [vmem:[#allocation5 + $0x120] sm:$0xff] }
 0x38e   :  { %1691 = vmatpush1.msra.mxu0 %v6327_v44  ;;  %1762 = vmatpush1.msra.mxu1 %v5764_v28  ;;  %v6347_v28 = vld [vmem:[#allocation5 + $0x108] sm:$0xff] }
 0x38f   :  { %1692 = vmatprep.subr.mxu0 %v6331_v34  ;;  %1763 = vmatprep.subr.mxu1 %v5768_v54  ;;  %v6351_v54 = vld [vmem:[#allocation5 + $0x100] sm:$0xff] }
 0x390   :  { %1693 = vmatpush1.msra.mxu0 %v6335_v12  ;;  %1764 = vmatpush1.msra.mxu1 %v5772_v55  ;;  %v6355_v55 = vld [vmem:[#allocation5 + $0xe8] sm:$0xff] }
 0x391   :  { %1694 = vmatprep.subr.mxu0 %v6339_v32  ;;  %1765 = vmatprep.subr.mxu1 %v5776_v56  ;;  %v6359_v56 = vld [vmem:[#allocation5 + $0xe0] sm:$0xff] }
 0x392   :  { %1695 = vmatpush1.msra.mxu0 %v6343_v30  ;;  %1766 = vmatpush1.msra.mxu1 %v5780_v57  ;;  %v6363_v57 = vld [vmem:[#allocation5 + $0xc8] sm:$0xff] }
 0x393   :  { %1696 = vmatprep.subr.mxu0 %v6347_v28  ;;  %1767 = vmatprep.subr.mxu1 %v5784_v58  ;;  %v9256_v58 = vld [vmem:[#allocation27_spill] sm:$0xff] }
 0x394   :  { %1697 = vmatpush1.msra.mxu0 %v6351_v54  ;;  %1768 = vmatpush1.msra.mxu1 %v5788_v59  ;;  %v9257_v59 = vmov 0.0  }
 0x395   :  { %1698 = vmatprep.subr.mxu0 %v6355_v55  ;;  %1769 = vmatprep.subr.mxu1 %v5792_v60  ;;  %v9258_v60 = vld [vmem:[#allocation28_spill] sm:$0xff] }
 0x396   :  { %1699 = vmatpush1.msra.mxu0 %v6359_v56  ;;  %1770 = vmatpush1.msra.mxu1 %v5796_v61  ;;  %v9259_v61 = vld [vmem:[#allocation29_spill] sm:$0xff] }
 0x397   :  { %1700 = vmatprep.subr.mxu0 %v6363_v57  ;;  %1771 = vmatprep.subr.mxu1 %v5800_v62  ;;  %v9260_v62 = vld [vmem:[#allocation30_spill] sm:$0xff] }
 0x398   :  { %1701 = vmatpush1.msra.mxu0 %v5803_v63  ;;  %1772 = vmatpush1.msra.mxu1 %v5806_v0  ;;  %v9261_v63 = vld [vmem:[#allocation31_spill] sm:$0xff]  ;;  %v9262_v0 = vld [vmem:[#allocation32_spill] sm:$0xff] }
 0x399   :  { %1702 = vmatprep.subr.mxu0 %v5809_v45  ;;  %1773 = vmatprep.subr.mxu1 %v5812_v1  ;;  %v9263_v45 = vld [vmem:[#allocation33_spill] sm:$0xff]  ;;  %v9264_v1 = vld [vmem:[#allocation34_spill] sm:$0xff] }
 0x39a   :  { %1703 = vmatpush1.msra.mxu0 %v5815_v3  ;;  %1774 = vmatpush1.msra.mxu1 %v5818_v46  ;;  %v9265_v3 = vld [vmem:[#allocation35_spill] sm:$0xff]  ;;  %v9266_v46 = vld [vmem:[#allocation36_spill] sm:$0xff]  ;;  %9408 = vst [vmem:[#allocation34_spill] sm:$0xff] %v6739_v7 }
 0x39b   :  { %1704 = vmatprep.subr.mxu0 %v5821_v47  ;;  %1775 = vmatprep.subr.mxu1 %v5824_v51  ;;  %v9267_v47 = vld [vmem:[#allocation37_spill] sm:$0xff]  ;;  %v9268_v51 = vld [vmem:[#allocation38_spill] sm:$0xff] }
 0x39c   :  { %1705 = vmatpush1.msra.mxu0 %v5827_v8  ;;  %1776 = vmatpush1.msra.mxu1 %v5830_v11  ;;  %v9269_v8 = vld [vmem:[#allocation39_spill] sm:$0xff]  ;;  %v9270_v11 = vld [vmem:[#allocation40_spill] sm:$0xff] }
 0x39d   :  { %1706 = vmatprep.subr.mxu0 %v5833_v14  ;;  %1777 = vmatprep.subr.mxu1 %v5836_v4  ;;  %v9271_v14 = vld [vmem:[#allocation41_spill] sm:$0xff]  ;;  %v9272_v4 = vld [vmem:[#allocation42_spill] sm:$0xff] }
 0x39e   :  { %1707 = vmatpush1.msra.mxu0 %v5839_v16  ;;  %1778 = vmatpush1.msra.mxu1 %v5842_v17  ;;  %v9273_v16 = vld [vmem:[#allocation43_spill] sm:$0xff]  ;;  %v9274_v17 = vld [vmem:[#allocation44_spill] sm:$0xff] }
 0x39f   :  { %1708 = vmatprep.subr.mxu0 %v5845_v18  ;;  %1779 = vmatprep.subr.mxu1 %v5848_v19  ;;  %v9275_v18 = vld [vmem:[#allocation45_spill] sm:$0xff]  ;;  %v9276_v19 = vld [vmem:[#allocation46_spill] sm:$0xff] }
 0x3a0   :  { %1709 = vmatpush1.msra.mxu0 %v5851_v20  ;;  %1780 = vmatpush1.msra.mxu1 %v5854_v21  ;;  %v9277_v20 = vld [vmem:[#allocation47_spill] sm:$0xff]  ;;  %v9278_v21 = vld [vmem:[#allocation48_spill] sm:$0xff] }
 0x3a1   :  { %1710 = vmatprep.subr.mxu0 %v5857_v23  ;;  %1781 = vmatprep.subr.mxu1 %v5860_v24  ;;  %v9279_v23 = vld [vmem:[#allocation49_spill] sm:$0xff]  ;;  %v9280_v24 = vld [vmem:[#allocation50_spill] sm:$0xff] }
 0x3a2   :  { %1711 = vmatpush1.msra.mxu0 %v5863_v2  ;;  %1782 = vmatpush1.msra.mxu1 %v5866_v29  ;;  %v9281_v2 = vld [vmem:[#allocation51_spill] sm:$0xff]  ;;  %v9282_v29 = vld [vmem:[#allocation52_spill] sm:$0xff] }
 0x3a3   :  { %1712 = vmatprep.subr.mxu0 %v5869_v36  ;;  %1783 = vmatprep.subr.mxu1 %v5872_v52  ;;  %v9283_v36 = vld [vmem:[#allocation53_spill] sm:$0xff]  ;;  %v9284_v52 = vld [vmem:[#allocation54_spill] sm:$0xff] }
 0x3a4   :  { %1713 = vmatpush1.msra.mxu0 %v9256_v58  ;;  %1746 = vmatprep.mubr.f32.mxu0 %v9257_v59  ;;  %v9299_v58 = vld [vmem:[#allocation69_spill] sm:$0xff] }
 0x3a5   :  { %1784 = vmatpush1.msra.mxu1 %v9258_v60  ;;  %1817 = vmatprep.mubr.f32.mxu1 %v9257_v59  ;;  %v9300_v60 = vld [vmem:[#allocation70_spill] sm:$0xff] }
 0x3a6   :  { %1747 = vmatmul.mubr.f32.vlgmr.msra.gmra.mxu0 %v6291_v53  ;;  %1818 = vmatmul.mubr.f32.vlgmr.msra.gmra.mxu1 %v6291_v53  ;;  %v9298_v53 = vld [vmem:[#allocation68_spill] sm:$0xff] }
 0x3a7   :  { %1852 = vmatprep.subr.mxu0 %v9259_v61  ;;  %1923 = vmatprep.subr.mxu1 %v9260_v62  ;;  %v9301_v61 = vld [vmem:[#allocation71_spill] sm:$0xff]  ;;  %v9302_v62 = vld [vmem:[#allocation72_spill] sm:$0xff] }
 0x3a8   :  { %1853 = vmatpush1.msra.mxu0 %v9261_v63  ;;  %1924 = vmatpush1.msra.mxu1 %v9262_v0  ;;  %v9303_v63 = vld [vmem:[#allocation73_spill] sm:$0xff]  ;;  %v9304_v0 = vld [vmem:[#allocation74_spill] sm:$0xff] }
 0x3a9   :  { %1854 = vmatprep.subr.mxu0 %v9263_v45  ;;  %1925 = vmatprep.subr.mxu1 %v9264_v1  ;;  %v9305_v45 = vld [vmem:[#allocation75_spill] sm:$0xff]  ;;  %v9306_v1 = vld [vmem:[#allocation76_spill] sm:$0xff] }
 0x3aa   :  { %1855 = vmatpush1.msra.mxu0 %v9265_v3  ;;  %1926 = vmatpush1.msra.mxu1 %v9266_v46  ;;  %v9307_v3 = vld [vmem:[#allocation77_spill] sm:$0xff]  ;;  %v9308_v46 = vld [vmem:[#allocation78_spill] sm:$0xff] }
 0x3ab   :  { %1856 = vmatprep.subr.mxu0 %v9267_v47  ;;  %1927 = vmatprep.subr.mxu1 %v9268_v51  ;;  %v9309_v47 = vld [vmem:[#allocation79_spill] sm:$0xff]  ;;  %v9310_v51 = vld [vmem:[#allocation80_spill] sm:$0xff] }
 0x3ac   :  { %1857 = vmatpush1.msra.mxu0 %v9269_v8  ;;  %1928 = vmatpush1.msra.mxu1 %v9270_v11  ;;  %v9311_v8 = vld [vmem:[#allocation81_spill] sm:$0xff]  ;;  %v9312_v11 = vld [vmem:[#allocation82_spill] sm:$0xff] }
 0x3ad   :  { %1858 = vmatprep.subr.mxu0 %v9271_v14  ;;  %1929 = vmatprep.subr.mxu1 %v9272_v4  ;;  %v9313_v14 = vld [vmem:[#allocation83_spill] sm:$0xff]  ;;  %v9314_v4 = vld [vmem:[#allocation84_spill] sm:$0xff] }
 0x3ae   :  { %1859 = vmatpush1.msra.mxu0 %v9273_v16  ;;  %1930 = vmatpush1.msra.mxu1 %v9274_v17  ;;  %v9315_v16 = vld [vmem:[#allocation85_spill] sm:$0xff]  ;;  %v9316_v17 = vld [vmem:[#allocation86_spill] sm:$0xff] }
 0x3af   :  { %1860 = vmatprep.subr.mxu0 %v9275_v18  ;;  %1931 = vmatprep.subr.mxu1 %v9276_v19  ;;  %v9317_v18 = vld [vmem:[#allocation87_spill] sm:$0xff]  ;;  %v9318_v19 = vld [vmem:[#allocation88_spill] sm:$0xff] }
 0x3b0   :  { %1861 = vmatpush1.msra.mxu0 %v9277_v20  ;;  %1932 = vmatpush1.msra.mxu1 %v9278_v21  ;;  %v9319_v20 = vld [vmem:[#allocation89_spill] sm:$0xff]  ;;  %v9320_v21 = vld [vmem:[#allocation90_spill] sm:$0xff] }
 0x3b1   :  { %1862 = vmatprep.subr.mxu0 %v9279_v23  ;;  %1933 = vmatprep.subr.mxu1 %v9280_v24  ;;  %v9321_v23 = vld [vmem:[#allocation91_spill] sm:$0xff]  ;;  %v9322_v24 = vld [vmem:[#allocation92_spill] sm:$0xff] }
 0x3b2   :  { %1863 = vmatpush1.msra.mxu0 %v9281_v2  ;;  %1934 = vmatpush1.msra.mxu1 %v9282_v29  ;;  %v9323_v2 = vld [vmem:[#allocation93_spill] sm:$0xff]  ;;  %v9324_v29 = vld [vmem:[#allocation94_spill] sm:$0xff] }
 0x3b3   :  { %1864 = vmatprep.subr.mxu0 %v9283_v36  ;;  %1935 = vmatprep.subr.mxu1 %v9284_v52  ;;  %v9325_v36 = vld [vmem:[#allocation95_spill] sm:$0xff]  ;;  %v9326_v52 = vld [vmem:[#allocation96_spill] sm:$0xff] }
 0x3b4   :  { %1865 = vmatpush1.msra.mxu0 %v9285_v40  ;;  %1936 = vmatpush1.msra.mxu1 %v9286_v15  ;;  %v9327_v40 = vld [vmem:[#allocation97_spill] sm:$0xff]  ;;  %v9328_v15 = vld [vmem:[#allocation98_spill] sm:$0xff] }
 0x3b5   :  { %1866 = vmatprep.subr.mxu0 %v9287_v22  ;;  %1937 = vmatprep.subr.mxu1 %v9288_v35  ;;  %v9329_v22 = vld [vmem:[#allocation99_spill] sm:$0xff]  ;;  %v9330_v35 = vld [vmem:[#allocation100_spill] sm:$0xff] }
 0x3b6   :  { %1867 = vmatpush1.msra.mxu0 %v9289_v43  ;;  %1938 = vmatpush1.msra.mxu1 %v9290_v39  ;;  %v9331_v43 = vld [vmem:[#allocation101_spill] sm:$0xff]  ;;  %v9332_v39 = vld [vmem:[#allocation102_spill] sm:$0xff] }
 0x3b7   :  { %1868 = vmatprep.subr.mxu0 %v9291_v38  ;;  %1939 = vmatprep.subr.mxu1 %v9292_v6  ;;  %v9333_v38 = vld [vmem:[#allocation103_spill] sm:$0xff]  ;;  %v9334_v6 = vld [vmem:[#allocation104_spill] sm:$0xff] }
 0x3b8   :  { %1869 = vmatpush1.msra.mxu0 %v9293_v37  ;;  %1940 = vmatpush1.msra.mxu1 %v9294_v5  ;;  %v9335_v37 = vld [vmem:[#allocation105_spill] sm:$0xff]  ;;  %v9336_v5 = vld [vmem:[#allocation106_spill] sm:$0xff] }
 0x3b9   :  { %1870 = vmatprep.subr.mxu0 %v9295_v27  ;;  %1941 = vmatprep.subr.mxu1 %v9296_v50  ;;  %v9337_v27 = vld [vmem:[#allocation107_spill] sm:$0xff]  ;;  %v9338_v50 = vld [vmem:[#allocation108_spill] sm:$0xff] }
 0x3ba   :  { %1871 = vmatpush1.msra.mxu0 %v9297_v13  ;;  %1942 = vmatpush1.msra.mxu1 %v9298_v53  ;;  %v9339_v13 = vld [vmem:[#allocation109_spill] sm:$0xff]  ;;  %v9340_v53 = vld [vmem:[#allocation110_spill] sm:$0xff] }
 0x3bb   :  { %1872 = vmatprep.subr.mxu0 %v9299_v58  ;;  %1943 = vmatprep.subr.mxu1 %v9300_v60  ;;  %v9341_v58 = vld [vmem:[#allocation111_spill] sm:$0xff]  ;;  %v9342_v60 = vld [vmem:[#allocation112_spill] sm:$0xff] }
 0x3bc   :  { %1873 = vmatpush1.msra.mxu0 %v9301_v61  ;;  %1944 = vmatpush1.msra.mxu1 %v9302_v62  ;;  %v9343_v61 = vld [vmem:[#allocation113_spill] sm:$0xff]  ;;  %v9344_v62 = vld [vmem:[#allocation114_spill] sm:$0xff] }
 0x3bd   :  { %1874 = vmatprep.subr.mxu0 %v9303_v63  ;;  %1945 = vmatprep.subr.mxu1 %v9304_v0  ;;  %v9345_v63 = vld [vmem:[#allocation115_spill] sm:$0xff]  ;;  %v9346_v0 = vld [vmem:[#allocation116_spill] sm:$0xff] }
 0x3be   :  { %1875 = vmatpush1.msra.mxu0 %v9305_v45  ;;  %1946 = vmatpush1.msra.mxu1 %v9306_v1  ;;  %v9347_v45 = vld [vmem:[#allocation117_spill] sm:$0xff]  ;;  %v9348_v1 = vld [vmem:[#allocation118_spill] sm:$0xff] }
 0x3bf   :  { %1876 = vmatprep.subr.mxu0 %v9307_v3  ;;  %1947 = vmatprep.subr.mxu1 %v9308_v46  ;;  %v9349_v3 = vld [vmem:[#allocation119_spill] sm:$0xff]  ;;  %v9350_v46 = vld [vmem:[#allocation120_spill] sm:$0xff] }
 0x3c0   :  { %1877 = vmatpush1.msra.mxu0 %v9309_v47  ;;  %1948 = vmatpush1.msra.mxu1 %v9310_v51  ;;  %v9351_v47 = vld [vmem:[#allocation121_spill] sm:$0xff]  ;;  %v9352_v51 = vld [vmem:[#allocation122_spill] sm:$0xff] }
 0x3c1   :  { %1878 = vmatprep.subr.mxu0 %v9311_v8  ;;  %1949 = vmatprep.subr.mxu1 %v9312_v11  ;;  %v9353_v8 = vld [vmem:[#allocation123_spill] sm:$0xff]  ;;  %v9354_v11 = vld [vmem:[#allocation124_spill] sm:$0xff] }
 0x3c2   :  { %1879 = vmatpush1.msra.mxu0 %v9313_v14  ;;  %1950 = vmatpush1.msra.mxu1 %v9314_v4  ;;  %v9355_v14 = vld [vmem:[#allocation125_spill] sm:$0xff]  ;;  %v9356_v4 = vld [vmem:[#allocation126_spill] sm:$0xff] }
 0x3c3   :  { %1880 = vmatprep.subr.mxu0 %v9315_v16  ;;  %1951 = vmatprep.subr.mxu1 %v9316_v17  ;;  %v9357_v16 = vld [vmem:[#allocation127_spill] sm:$0xff]  ;;  %v9358_v17 = vld [vmem:[#allocation128_spill] sm:$0xff] }
 0x3c4   :  { %1881 = vmatpush1.msra.mxu0 %v9317_v18  ;;  %1952 = vmatpush1.msra.mxu1 %v9318_v19  ;;  %v9359_v18 = vld [vmem:[#allocation129_spill] sm:$0xff]  ;;  %v9360_v19 = vld [vmem:[#allocation130_spill] sm:$0xff] }
 0x3c5   :  { %1882 = vmatprep.subr.mxu0 %v9319_v20  ;;  %1953 = vmatprep.subr.mxu1 %v9320_v21  ;;  %v9361_v20 = vld [vmem:[#allocation131_spill] sm:$0xff]  ;;  %v9362_v21 = vld [vmem:[#allocation132_spill] sm:$0xff] }
 0x3c6   :  { %1883 = vmatpush1.msra.mxu0 %v9321_v23  ;;  %1954 = vmatpush1.msra.mxu1 %v9322_v24  ;;  %v9363_v23 = vld [vmem:[#allocation133_spill] sm:$0xff]  ;;  %v9364_v24 = vld [vmem:[#allocation134_spill] sm:$0xff] }
 0x3c7   :  { %1884 = vmatprep.subr.mxu0 %v9323_v2  ;;  %1955 = vmatprep.subr.mxu1 %v9324_v29  ;;  %v9365_v2 = vld [vmem:[#allocation135_spill] sm:$0xff]  ;;  %v9366_v29 = vld [vmem:[#allocation136_spill] sm:$0xff] }
 0x3c8   :  { %1885 = vmatpush2.msra.mxu0 %v9325_v36  ;;  %1956 = vmatpush2.msra.mxu1 %v9326_v52  ;;  %v9367_v36 = vld [vmem:[#allocation137_spill] sm:$0xff]  ;;  %v9368_v52 = vld [vmem:[#allocation138_spill] sm:$0xff] }
 0x3c9   :  { %1886 = vmatprep.subr.mxu0 %v9327_v40  ;;  %1957 = vmatprep.subr.mxu1 %v9328_v15  ;;  %v9369_v40 = vld [vmem:[#allocation139_spill] sm:$0xff]  ;;  %v9370_v15 = vld [vmem:[#allocation140_spill] sm:$0xff] }
 0x3ca   :  { %1887 = vmatpush2.msra.mxu0 %v9329_v22  ;;  %1958 = vmatpush2.msra.mxu1 %v9330_v35  ;;  %v9371_v22 = vld [vmem:[#allocation141_spill] sm:$0xff]  ;;  %v9372_v35 = vld [vmem:[#allocation142_spill] sm:$0xff] }
 0x3cb   :  { %1888 = vmatprep.subr.mxu0 %v9331_v43  ;;  %1959 = vmatprep.subr.mxu1 %v9332_v39  ;;  %v9373_v43 = vld [vmem:[#allocation143_spill] sm:$0xff]  ;;  %v9374_v39 = vld [vmem:[#allocation144_spill] sm:$0xff] }
 0x3cc   :  { %1889 = vmatpush2.msra.mxu0 %v9333_v38  ;;  %1960 = vmatpush2.msra.mxu1 %v9334_v6  ;;  %v9375_v38 = vld [vmem:[#allocation145_spill] sm:$0xff]  ;;  %v9376_v6 = vld [vmem:[#allocation146_spill] sm:$0xff] }
 0x3cd   :  { %1890 = vmatprep.subr.mxu0 %v9335_v37  ;;  %1961 = vmatprep.subr.mxu1 %v9336_v5  ;;  %v9377_v37 = vld [vmem:[#allocation147_spill] sm:$0xff]  ;;  %v9378_v5 = vld [vmem:[#allocation148_spill] sm:$0xff] }
 0x3ce   :  { %1891 = vmatpush2.msra.mxu0 %v9337_v27  ;;  %1962 = vmatpush2.msra.mxu1 %v9338_v50  ;;  %v9379_v27 = vld [vmem:[#allocation149_spill] sm:$0xff]  ;;  %v9380_v50 = vld [vmem:[#allocation150_spill] sm:$0xff] }
 0x3cf   :  { %1892 = vmatprep.subr.mxu0 %v9339_v13  ;;  %1963 = vmatprep.subr.mxu1 %v9340_v53  ;;  %v9381_v13 = vld [vmem:[#allocation151_spill] sm:$0xff]  ;;  %v9382_v53 = vld [vmem:[#allocation20_spill] sm:$0xff] }
 0x3d0   :  { %1893 = vmatpush2.msra.mxu0 %v9341_v58  ;;  %1964 = vmatpush2.msra.mxu1 %v9342_v60  ;;  %v9383_v58 = vld [vmem:[#allocation19_spill] sm:$0xff]  ;;  %v9384_v60 = vld [vmem:[#allocation17_spill] sm:$0xff] }
 0x3d1   :  { %1894 = vmatprep.subr.mxu0 %v9343_v61  ;;  %1965 = vmatprep.subr.mxu1 %v9344_v62  ;;  %v9385_v61 = vld [vmem:[#allocation18_spill] sm:$0xff] }
 0x3d2   :  { %1895 = vmatpush2.msra.mxu0 %v9345_v63  ;;  %1966 = vmatpush2.msra.mxu1 %v9346_v0  ;;  %v9386_v62 = vld [vmem:[#allocation154_spill] sm:$0xff]  ;;  %v6528_v0 = vld [vmem:[#allocation5 + $0x1f8] sm:$0xff] }
 0x3d3   :  { %1896 = vmatprep.subr.mxu0 %v9347_v45  ;;  %1967 = vmatprep.subr.mxu1 %v9348_v1  ;;  %v6525_v63 = vld [vmem:[#allocation5 + $0x1e8] sm:$0xff] }
 0x3d4   :  { %1897 = vmatpush2.msra.mxu0 %v9349_v3  ;;  %1968 = vmatpush2.msra.mxu1 %v9350_v46  ;;  %v9387_v1 = vld [vmem:[#allocation22_spill] sm:$0xff] }
 0x3d5   :  { %1898 = vmatprep.subr.mxu0 %v9351_v47  ;;  %1969 = vmatprep.subr.mxu1 %v9352_v51  ;;  %v9388_v51 = vld [vmem:[#allocation23_spill] sm:$0xff] }
 0x3d6   :  { %1899 = vmatpush2.msra.mxu0 %v9353_v8  ;;  %1970 = vmatpush2.msra.mxu1 %v9354_v11 }
 0x3d7   :  { %1900 = vmatprep.subr.mxu0 %v9355_v14  ;;  %1971 = vmatprep.subr.mxu1 %v9356_v4 }
 0x3d8   :  { %1901 = vmatpush2.msra.mxu0 %v9357_v16  ;;  %1972 = vmatpush2.msra.mxu1 %v9358_v17  ;;  %v9389_v16 = vld [vmem:[#allocation24_spill] sm:$0xff] }
 0x3d9   :  { %1902 = vmatprep.subr.mxu0 %v9359_v18  ;;  %1973 = vmatprep.subr.mxu1 %v9360_v19 }
 0x3da   :  { %1903 = vmatpush2.msra.mxu0 %v9361_v20  ;;  %1974 = vmatpush2.msra.mxu1 %v9362_v21  ;;  %v9390_v20 = vld [vmem:[#allocation25_spill] sm:$0xff] }
 0x3db   :  { %1904 = vmatprep.subr.mxu0 %v9363_v23  ;;  %1975 = vmatprep.subr.mxu1 %v9364_v24 }
 0x3dc   :  { %1905 = vmatpush2.msra.mxu0 %v9365_v2  ;;  %1976 = vmatpush2.msra.mxu1 %v9366_v29 }
 0x3dd   :  { %1906 = vmatprep.subr.mxu0 %v9367_v36  ;;  %1977 = vmatprep.subr.mxu1 %v9368_v52 }
 0x3de   :  { %1907 = vmatpush2.msra.mxu0 %v9369_v40  ;;  %1978 = vmatpush2.msra.mxu1 %v9370_v15  ;;  %v9391_v40 = vld [vmem:[#allocation164_spill] sm:$0xff] }
 0x3df   :  { %1908 = vmatprep.subr.mxu0 %v9371_v22  ;;  %1979 = vmatprep.subr.mxu1 %v9372_v35 }
 0x3e0   :  { %1909 = vmatpush2.msra.mxu0 %v9373_v43  ;;  %1980 = vmatpush2.msra.mxu1 %v9374_v39 }
 0x3e1   :  { %1910 = vmatprep.subr.mxu0 %v9375_v38  ;;  %1981 = vmatprep.subr.mxu1 %v9376_v6  ;;  %v9392_v38 = vld [vmem:[#allocation166_spill] sm:$0xff] }
 0x3e2   :  { %1911 = vmatpush2.msra.mxu0 %v9377_v37  ;;  %1982 = vmatpush2.msra.mxu1 %v9378_v5 }
 0x3e3   :  { %1912 = vmatprep.subr.mxu0 %v9379_v27  ;;  %1983 = vmatprep.subr.mxu1 %v9380_v50 }
 0x3e4   :  { %1913 = vmatpush2.msra.mxu0 %v9381_v13  ;;  %1984 = vmatpush2.msra.mxu1 %v9382_v53 }
 0x3e5   :  { %1914 = vmatprep.subr.mxu0 %v9383_v58  ;;  %1985 = vmatprep.subr.mxu1 %v9384_v60  ;;  %v9393_v60 = vld [vmem:[#allocation161_spill] sm:$0xff] }
 0x3e6   :  { %1915 = vmatpush2.msra.mxu0 %v9385_v61  ;;  %1986 = vmatpush2.msra.mxu1 %v9386_v62  ;;  %v9394_v62 = vld [vmem:[#allocation159_spill] sm:$0xff] }
 0x3e7   :  { %2025 = vmatprep.subr.mxu0 %v6525_v63  ;;  %2096 = vmatprep.subr.mxu1 %v6528_v0 }
 0x445   :  { %v1575_v45 = vpop.f32.mrf.mxu0  ;;  %v1646_v11 = vpop.f32.mrf.mxu1 }
 0x446   :  { %v1576_v3 = vadd.f32 %v1575_v45, %v9387_v1  ;;  %v1647_v21 = vadd.f32 %v1646_v11, %v9390_v20 }
 0x447   :  { %v1577_v46 = vpop.f32.mrf.mxu0  ;;  %v1648_v4 = vpop.f32.mrf.mxu1 }
 0x448   :  { %v3615_v47 = vmul.f32 -1.442695, %v1576_v3  ;;  %v1578_v8 = vadd.f32 %v1577_v46, %v9388_v51  ;;  %v1649_v17 = vadd.f32 %v1648_v4, %v9389_v16 }
 0x44a   :  { %3806 = vpow2.f32 %v3615_v47  ;;  %v3616_v14 = vmul.f32 -1.442695, %v1578_v8  ;;  %v3617_v18 = vmul.f32 -1.442695, %v1649_v17 }
 0x44c   :  { %3808 = vpow2.f32 %v3616_v14 }
 0x44d   :  { %3810 = vpow2.f32 %v3617_v18 }
 0x457   :  { %v3807_v19 = vpop.eup %3806 }
 0x458   :  { %v1654_v23 = vadd.f32 1.0, %v3807_v19 }
 0x459   :  { %v3809_v24 = vpop.eup %3808 }
 0x45a   :  { %3812 = vrcp.f32 %v1654_v23  ;;  %v1660_v2 = vadd.f32 1.0, %v3809_v24  ;;  %v3811_v29 = vpop.eup %3810 }
 0x45b   :  { %3814 = vtanh.f32 %v1647_v21  ;;  %v1667_v27 = vadd.f32 1.0, %v3811_v29 }
 0x45c   :  { %3816 = vrcp.f32 %v1660_v2 }
 0x466   :  { %v1748_v36 = vpop.f32.mrf.mxu0  ;;  %v1819_v50 = vpop.f32.mrf.mxu1 }
 0x467   :  { %v3813_v52 = vpop.eup %3812  ;;  %v1824_v15 = vadd.f32 %v1748_v36, %v9391_v40  ;;  %v1826_v45 = vadd.f32 %v1819_v50, %v9394_v62  ;;  %v6660_v50 = vld [vmem:[#allocation5 + $0x78] sm:$0xff]  ;;  %v6675_v62 = vld [vmem:[#allocation5 + $0x40] sm:$0xff] }
 0x468   :  { %v3815_v22 = vpop.eup %3814  ;;  %v1750_v35 = vpop.f32.mrf.mxu0 }
 0x469   :  { %v3817_v43 = vpop.eup %3816  ;;  %v3618_v39 = vmul.f32 -1.442695, %v1824_v15  ;;  %v1825_v6 = vadd.f32 %v1750_v35, %v9392_v38  ;;  %v1671_v37 = vmul.f32 %v3815_v22, %v3813_v52  ;;  %v1821_v58 = vpop.f32.mrf.mxu1  ;;  %v6556_v15 = vld [vmem:[#allocation5 + $0x1f0] sm:$0xff]  ;;  %v6568_v35 = vld [vmem:[#allocation5 + $0x1b8] sm:$0xff]  ;;  %v6645_v38 = vld [vmem:[#allocation5 + $0x88] sm:$0xff] }
 0x46a   :  { %v1670_v5 = vmul.f32 %v3817_v43, %v6278_v49  ;;  %v1827_v61 = vadd.f32 %v1821_v58, %v9393_v60  ;;  %v6564_v22 = vld [vmem:[#allocation5 + $0x1d0] sm:$0xff]  ;;  %v6633_v43 = vld [vmem:[#allocation5 + $0xa8] sm:$0xff] }
 0x46b   :  { %3818 = vpow2.f32 %v3618_v39  ;;  %v3619_v13 = vmul.f32 -1.442695, %v1825_v6  ;;  %v6642_v39 = vld [vmem:[#allocation5 + $0xb0] sm:$0xff]  ;;  %v6648_v6 = vld [vmem:[#allocation5 + $0x98] sm:$0xff]  ;;  %v6669_v60 = vld [vmem:[#allocation5 + $0x48] sm:$0xff] }
 0x46c   :  { %v6538_v53 = vadd.f32 %v1671_v37, %v1670_v5  ;;  %v3620_v3 = vmul.f32 -1.442695, %v1827_v61  ;;  %v6651_v37 = vld [vmem:[#allocation5 + $0x80] sm:$0xff]  ;;  %v6654_v5 = vld [vmem:[#allocation5 + $0x90] sm:$0xff]  ;;  %v6672_v61 = vld [vmem:[#allocation5 + $0x58] sm:$0xff] }
 0x46d   :  { %3820 = vpow2.f32 %v3619_v13  ;;  %v6663_v13 = vld [vmem:[#allocation5 + $0x60] sm:$0xff]  ;;  %v6666_v58 = vld [vmem:[#allocation5 + $0x70] sm:$0xff] }
 0x46e   :  { %3822 = vrcp.f32 %v1667_v27  ;;  %v6657_v27 = vld [vmem:[#allocation5 + $0x68] sm:$0xff] }
 0x46f   :  { %3824 = vtanh.f32 %v6538_v53 }
 0x470   :  { %3826 = vtanh.f32 %v1826_v45  ;;  %v6678_v45 = vld [vmem:[#allocation5 + $0x50] sm:$0xff] }
 0x471   :  { %3828 = vpow2.f32 %v3620_v3  ;;  %v6681_v3 = vld [vmem:[#allocation5 + $0x28] sm:$0xff] }
 0x478   :  { %v3819_v46 = vpop.eup %3818 }
 0x479   :  { %v1831_v47 = vadd.f32 1.0, %v3819_v46  ;;  %v6684_v46 = vld [vmem:[#allocation5 + $0x38] sm:$0xff] }
 0x47a   :  { %v3821_v49 = vpop.eup %3820 }
 0x47b   :  { %v3823_v8 = vpop.eup %3822  ;;  %3830 = vrcp.f32 %v1831_v47  ;;  %v1837_v11 = vadd.f32 1.0, %v3821_v49  ;;  %v6687_v47 = vld [vmem:[#allocation5 + $0x20] sm:$0xff]  ;;  %v6690_v49 = vld [vmem:[#allocation5 + $0x30] sm:$0xff] }
 0x47c   :  { %v3825_v14 = vpop.eup %3824 }
 0x47d   :  { %3832 = vrcp.f32 %v1837_v11  ;;  %v6543_v4 = vmul.f32 %v3825_v14, %v3823_v8  ;;  %v3827_v17 = vpop.eup %3826  ;;  %v6693_v8 = vld [vmem:[#allocation5 + $0x8] sm:$0xff]  ;;  %v6696_v11 = vld [vmem:[#allocation5 + $0x18] sm:$0xff]  ;;  %v6699_v14 = vld [vmem:[#allocation5] sm:$0xff] }
 0x47e   :  { %v3829_v18 = vpop.eup %3828  ;;  %9396 = vst [vmem:[#allocation152_spill] sm:$0xff] %v6699_v14 }
 0x47f   :  { %9395 = vst [vmem:[#allocation153_spill] sm:$0xff] %v6543_v4  ;;  %1916 = vmatprep.mubr.f32.mxu0 %v6543_v4  ;;  %1987 = vmatprep.mubr.f32.mxu1 %v6543_v4  ;;  %v1844_v24 = vadd.f32 1.0, %v3829_v18  ;;  %v6709_v18 = vld [vmem:[#allocation8 + $0x1e8] sm:$0xff]  ;;  %v6736_v4 = vld [vmem:[#allocation8 + $0x1b8] sm:$0xff] }
 0x480   :  { %9398 = vst [vmem:[#allocation162_spill] sm:$0xff] %v6709_v18  ;;  %9407 = vst [vmem:[#allocation33_spill] sm:$0xff] %v6736_v4 }
 0x481   :  { %3834 = vrcp.f32 %v1844_v24  ;;  %v6721_v24 = vld [vmem:[#allocation8 + $0x1c8] sm:$0xff] }
 0x482   :  { %9402 = vst [vmem:[#allocation28_spill] sm:$0xff] %v6721_v24 }
 0x488   :  { %v3831_v19 = vpop.eup %3830 }
 0x489   :  { %v1848_v21 = vmul.f32 %v3831_v19, %v3827_v17  ;;  %v6703_v17 = vld [vmem:[#allocation5 + $0x10] sm:$0xff]  ;;  %v6712_v19 = vld [vmem:[#allocation8 + $0x1f8] sm:$0xff] }
 0x48a   :  { %v3833_v23 = vpop.eup %3832  ;;  %9397 = vst [vmem:[#allocation160_spill] sm:$0xff] %v6703_v17  ;;  %9399 = vst [vmem:[#allocation157_spill] sm:$0xff] %v6712_v19 }
 0x48b   :  { %v1847_v2 = vmul.f32 %v3833_v23, %v6288_v26  ;;  %v6560_v26 = vld [vmem:[#allocation5 + $0x1d8] sm:$0xff]  ;;  %v6718_v23 = vld [vmem:[#allocation8 + $0x1f0] sm:$0xff] }
 0x48c   :  { %9401 = vst [vmem:[#allocation27_spill] sm:$0xff] %v6718_v23 }
 0x48d   :  { %v6548_v29 = vadd.f32 %v1848_v21, %v1847_v2  ;;  %v6715_v21 = vld [vmem:[#allocation8 + $0x1e0] sm:$0xff]  ;;  %v6724_v2 = vld [vmem:[#allocation8 + $0x1d8] sm:$0xff] }
 0x48e   :  { %v3835_v36 = vpop.eup %3834  ;;  %9400 = vst [vmem:[#allocation155_spill] sm:$0xff] %v6715_v21  ;;  %9403 = vst [vmem:[#allocation29_spill] sm:$0xff] %v6724_v2 }
 0x48f   :  { %3836 = vtanh.f32 %v6548_v29 }
 0x49c   :  { %v3837_v52 = vpop.eup %3836 }
 0x49d   :  { %v6551_v40 = vmul.f32 %v3837_v52, %v3835_v36  ;;  %v6727_v36 = vld [vmem:[#allocation8 + $0x1c0] sm:$0xff]  ;;  %v6730_v52 = vld [vmem:[#allocation8 + $0x1d0] sm:$0xff] }
 0x49e   :  { %9404 = vst [vmem:[#allocation30_spill] sm:$0xff] %v6727_v36  ;;  %9405 = vst [vmem:[#allocation31_spill] sm:$0xff] %v6730_v52 }
 0x49f   :  { %1917 = vmatmul.mubr.f32.vlgmr.msra.gmra.mxu0 %v6551_v40  ;;  %1988 = vmatmul.mubr.f32.vlgmr.msra.gmra.mxu1 %v6551_v40 }
 0x4a0   :  { %2026 = vmatpush1.msra.mxu0 %v6295_v10  ;;  %2097 = vmatpush1.msra.mxu1 %v6556_v15  ;;  %v6572_v10 = vld [vmem:[#allocation5 + $0x1b0] sm:$0xff] }
 0x4a1   :  { %2027 = vmatprep.subr.mxu0 %v6299_v25  ;;  %2098 = vmatprep.subr.mxu1 %v6560_v26  ;;  %v6576_v25 = vld [vmem:[#allocation5 + $0x198] sm:$0xff] }
 0x4a2   :  { %2028 = vmatpush1.msra.mxu0 %v6303_v31  ;;  %2099 = vmatpush1.msra.mxu1 %v6564_v22  ;;  %v6580_v31 = vld [vmem:[#allocation5 + $0x190] sm:$0xff] }
 0x4a3   :  { %2029 = vmatprep.subr.mxu0 %v6307_v9  ;;  %2100 = vmatprep.subr.mxu1 %v6568_v35  ;;  %v6584_v9 = vld [vmem:[#allocation5 + $0x178] sm:$0xff] }
 0x4a4   :  { %2030 = vmatpush1.msra.mxu0 %v6311_v33  ;;  %2101 = vmatpush1.msra.mxu1 %v6572_v10  ;;  %v6588_v33 = vld [vmem:[#allocation5 + $0x170] sm:$0xff] }
 0x4a5   :  { %2031 = vmatprep.subr.mxu0 %v6315_v41  ;;  %2102 = vmatprep.subr.mxu1 %v6576_v25  ;;  %v6592_v41 = vld [vmem:[#allocation5 + $0x158] sm:$0xff] }
 0x4a6   :  { %2032 = vmatpush1.msra.mxu0 %v6319_v48  ;;  %2103 = vmatpush1.msra.mxu1 %v6580_v31  ;;  %v6596_v48 = vld [vmem:[#allocation5 + $0x150] sm:$0xff] }
 0x4a7   :  { %2033 = vmatprep.subr.mxu0 %v6323_v42  ;;  %2104 = vmatprep.subr.mxu1 %v6584_v9  ;;  %v6600_v42 = vld [vmem:[#allocation5 + $0x138] sm:$0xff] }
 0x4a8   :  { %2034 = vmatpush1.msra.mxu0 %v6327_v44  ;;  %2105 = vmatpush1.msra.mxu1 %v6588_v33  ;;  %v6604_v44 = vld [vmem:[#allocation5 + $0x130] sm:$0xff] }
 0x4a9   :  { %2035 = vmatprep.subr.mxu0 %v6331_v34  ;;  %2106 = vmatprep.subr.mxu1 %v6592_v41  ;;  %v6608_v34 = vld [vmem:[#allocation5 + $0x118] sm:$0xff] }
 0x4aa   :  { %2036 = vmatpush1.msra.mxu0 %v6335_v12  ;;  %2107 = vmatpush1.msra.mxu1 %v6596_v48  ;;  %v6612_v12 = vld [vmem:[#allocation5 + $0x110] sm:$0xff] }
 0x4ab   :  { %2037 = vmatprep.subr.mxu0 %v6339_v32  ;;  %2108 = vmatprep.subr.mxu1 %v6600_v42  ;;  %v6616_v32 = vld [vmem:[#allocation5 + $0xf8] sm:$0xff] }
 0x4ac   :  { %2038 = vmatpush1.msra.mxu0 %v6343_v30  ;;  %2109 = vmatpush1.msra.mxu1 %v6604_v44  ;;  %v6620_v30 = vld [vmem:[#allocation5 + $0xf0] sm:$0xff] }
 0x4ad   :  { %2039 = vmatprep.subr.mxu0 %v6347_v28  ;;  %2110 = vmatprep.subr.mxu1 %v6608_v34  ;;  %v6624_v28 = vld [vmem:[#allocation5 + $0xd8] sm:$0xff] }
 0x4ae   :  { %2040 = vmatpush1.msra.mxu0 %v6351_v54  ;;  %2111 = vmatpush1.msra.mxu1 %v6612_v12  ;;  %v6627_v54 = vld [vmem:[#allocation5 + $0xc0] sm:$0xff] }
 0x4af   :  { %2041 = vmatprep.subr.mxu0 %v6355_v55  ;;  %2112 = vmatprep.subr.mxu1 %v6616_v32  ;;  %v6630_v55 = vld [vmem:[#allocation5 + $0xd0] sm:$0xff] }
 0x4b0   :  { %2042 = vmatpush1.msra.mxu0 %v6359_v56  ;;  %2113 = vmatpush1.msra.mxu1 %v6620_v30  ;;  %v6636_v56 = vld [vmem:[#allocation5 + $0xb8] sm:$0xff] }
 0x4b1   :  { %2043 = vmatprep.subr.mxu0 %v6363_v57  ;;  %2114 = vmatprep.subr.mxu1 %v6624_v28  ;;  %v6639_v57 = vld [vmem:[#allocation5 + $0xa0] sm:$0xff] }
 0x4b2   :  { %2044 = vmatpush1.msra.mxu0 %v6627_v54  ;;  %2115 = vmatpush1.msra.mxu1 %v6630_v55 }
 0x4b3   :  { %2045 = vmatprep.subr.mxu0 %v6633_v43  ;;  %2116 = vmatprep.subr.mxu1 %v6636_v56 }
 0x4b4   :  { %2046 = vmatpush1.msra.mxu0 %v6639_v57  ;;  %2117 = vmatpush1.msra.mxu1 %v6642_v39 }
 0x4b5   :  { %2047 = vmatprep.subr.mxu0 %v6645_v38  ;;  %2118 = vmatprep.subr.mxu1 %v6648_v6 }
 0x4b6   :  { %2048 = vmatpush1.msra.mxu0 %v6651_v37  ;;  %2119 = vmatpush1.msra.mxu1 %v6654_v5 }
 0x4b7   :  { %2049 = vmatprep.subr.mxu0 %v6657_v27  ;;  %2120 = vmatprep.subr.mxu1 %v6660_v50 }
 0x4b8   :  { %2050 = vmatpush1.msra.mxu0 %v6663_v13  ;;  %2121 = vmatpush1.msra.mxu1 %v6666_v58 }
 0x4b9   :  { %2051 = vmatprep.subr.mxu0 %v6669_v60  ;;  %2122 = vmatprep.subr.mxu1 %v6672_v61 }
 0x4ba   :  { %2052 = vmatpush1.msra.mxu0 %v6675_v62  ;;  %2123 = vmatpush1.msra.mxu1 %v6678_v45 }
 0x4bb   :  { %2053 = vmatprep.subr.mxu0 %v6681_v3  ;;  %2124 = vmatprep.subr.mxu1 %v6684_v46 }
 0x4bc   :  { %2054 = vmatpush1.msra.mxu0 %v6687_v47  ;;  %2125 = vmatpush1.msra.mxu1 %v6690_v49 }
 0x4bd   :  { %2055 = vmatprep.subr.mxu0 %v6693_v8  ;;  %2126 = vmatprep.subr.mxu1 %v6696_v11 }
 0x4be   :  { %2056 = vmatpush1.msra.mxu0 %v6699_v14  ;;  %2089 = vmatprep.mubr.f32.mxu0 %v9257_v59 }
 0x4bf   :  { %2127 = vmatpush1.msra.mxu1 %v6703_v17  ;;  %2160 = vmatprep.mubr.f32.mxu1 %v9257_v59 }
 0x4c0   :  { %2090 = vmatmul.mubr.f32.vlgmr.msra.gmra.mxu0 %v6551_v40  ;;  %2161 = vmatmul.mubr.f32.vlgmr.msra.gmra.mxu1 %v6551_v40  ;;  %v6733_v40 = vld [vmem:[#allocation8 + $0x1a8] sm:$0xff] }
 0x4c1   :  { %2195 = vmatprep.subr.mxu0 %v6709_v18  ;;  %2266 = vmatprep.subr.mxu1 %v6712_v19  ;;  %9406 = vst [vmem:[#allocation32_spill] sm:$0xff] %v6733_v40 }
 0x4c2   :  { %2196 = vmatpush1.msra.mxu0 %v6715_v21  ;;  %2267 = vmatpush1.msra.mxu1 %v6718_v23 }
 0x4c3   :  { %2197 = vmatprep.subr.mxu0 %v6721_v24  ;;  %2268 = vmatprep.subr.mxu1 %v6724_v2  ;;  %v6742_v2 = vld [vmem:[#allocation8 + $0x1b0] sm:$0xff] }
 0x4c4   :  { %2198 = vmatpush1.msra.mxu0 %v6727_v36  ;;  %2269 = vmatpush1.msra.mxu1 %v6730_v52  ;;  %9409 = vst [vmem:[#allocation35_spill] sm:$0xff] %v6742_v2  ;;  %v6745_v36 = vld [vmem:[#allocation8 + $0x188] sm:$0xff]  ;;  %v6748_v52 = vld [vmem:[#allocation8 + $0x198] sm:$0xff] }
 0x4c5   :  { %2199 = vmatprep.subr.mxu0 %v6733_v40  ;;  %2270 = vmatprep.subr.mxu1 %v6736_v4  ;;  %9410 = vst [vmem:[#allocation36_spill] sm:$0xff] %v6745_v36  ;;  %9411 = vst [vmem:[#allocation37_spill] sm:$0xff] %v6748_v52  ;;  %v6751_v40 = vld [vmem:[#allocation8 + $0x180] sm:$0xff]  ;;  %v6754_v4 = vld [vmem:[#allocation8 + $0x190] sm:$0xff] }
 0x4c6   :  { %2200 = vmatpush1.msra.mxu0 %v6739_v7  ;;  %2271 = vmatpush1.msra.mxu1 %v6742_v2  ;;  %9412 = vst [vmem:[#allocation38_spill] sm:$0xff] %v6751_v40  ;;  %9413 = vst [vmem:[#allocation39_spill] sm:$0xff] %v6754_v4  ;;  %v6757_v7 = vld [vmem:[#allocation8 + $0x168] sm:$0xff]  ;;  %v6760_v2 = vld [vmem:[#allocation8 + $0x178] sm:$0xff] }
 0x4c7   :  { %2201 = vmatprep.subr.mxu0 %v6745_v36  ;;  %2272 = vmatprep.subr.mxu1 %v6748_v52  ;;  %9414 = vst [vmem:[#allocation40_spill] sm:$0xff] %v6757_v7  ;;  %9415 = vst [vmem:[#allocation41_spill] sm:$0xff] %v6760_v2  ;;  %v6763_v36 = vld [vmem:[#allocation8 + $0x160] sm:$0xff]  ;;  %v6766_v52 = vld [vmem:[#allocation8 + $0x170] sm:$0xff] }
 0x4c8   :  { %2202 = vmatpush1.msra.mxu0 %v6751_v40  ;;  %2273 = vmatpush1.msra.mxu1 %v6754_v4  ;;  %9416 = vst [vmem:[#allocation42_spill] sm:$0xff] %v6763_v36  ;;  %9417 = vst [vmem:[#allocation43_spill] sm:$0xff] %v6766_v52  ;;  %v6769_v40 = vld [vmem:[#allocation8 + $0x148] sm:$0xff]  ;;  %v6772_v4 = vld [vmem:[#allocation8 + $0x158] sm:$0xff] }
 0x4c9   :  { %2203 = vmatprep.subr.mxu0 %v6757_v7  ;;  %2274 = vmatprep.subr.mxu1 %v6760_v2  ;;  %9418 = vst [vmem:[#allocation44_spill] sm:$0xff] %v6769_v40  ;;  %9419 = vst [vmem:[#allocation45_spill] sm:$0xff] %v6772_v4  ;;  %v6775_v7 = vld [vmem:[#allocation8 + $0x140] sm:$0xff]  ;;  %v6778_v2 = vld [vmem:[#allocation8 + $0x150] sm:$0xff] }
 0x4ca   :  { %2204 = vmatpush1.msra.mxu0 %v6763_v36  ;;  %2275 = vmatpush1.msra.mxu1 %v6766_v52  ;;  %9420 = vst [vmem:[#allocation46_spill] sm:$0xff] %v6775_v7  ;;  %9421 = vst [vmem:[#allocation47_spill] sm:$0xff] %v6778_v2  ;;  %v6781_v36 = vld [vmem:[#allocation8 + $0x128] sm:$0xff]  ;;  %v6784_v52 = vld [vmem:[#allocation8 + $0x138] sm:$0xff] }
 0x4cb   :  { %2205 = vmatprep.subr.mxu0 %v6769_v40  ;;  %2276 = vmatprep.subr.mxu1 %v6772_v4  ;;  %9422 = vst [vmem:[#allocation48_spill] sm:$0xff] %v6781_v36  ;;  %9423 = vst [vmem:[#allocation49_spill] sm:$0xff] %v6784_v52  ;;  %v6787_v40 = vld [vmem:[#allocation8 + $0x120] sm:$0xff]  ;;  %v6790_v4 = vld [vmem:[#allocation8 + $0x130] sm:$0xff] }
 0x4cc   :  { %2206 = vmatpush1.msra.mxu0 %v6775_v7  ;;  %2277 = vmatpush1.msra.mxu1 %v6778_v2  ;;  %9424 = vst [vmem:[#allocation50_spill] sm:$0xff] %v6787_v40  ;;  %9425 = vst [vmem:[#allocation51_spill] sm:$0xff] %v6790_v4  ;;  %v6793_v7 = vld [vmem:[#allocation8 + $0x108] sm:$0xff]  ;;  %v6796_v2 = vld [vmem:[#allocation8 + $0x118] sm:$0xff] }
 0x4cd   :  { %2207 = vmatprep.subr.mxu0 %v6781_v36  ;;  %2278 = vmatprep.subr.mxu1 %v6784_v52  ;;  %9426 = vst [vmem:[#allocation52_spill] sm:$0xff] %v6793_v7  ;;  %9427 = vst [vmem:[#allocation53_spill] sm:$0xff] %v6796_v2  ;;  %v6799_v36 = vld [vmem:[#allocation8 + $0x100] sm:$0xff]  ;;  %v6802_v52 = vld [vmem:[#allocation8 + $0x110] sm:$0xff] }
 0x4ce   :  { %2208 = vmatpush1.msra.mxu0 %v6787_v40  ;;  %2279 = vmatpush1.msra.mxu1 %v6790_v4  ;;  %9428 = vst [vmem:[#allocation54_spill] sm:$0xff] %v6799_v36  ;;  %9429 = vst [vmem:[#allocation55_spill] sm:$0xff] %v6802_v52  ;;  %v6805_v40 = vld [vmem:[#allocation8 + $0xe8] sm:$0xff]  ;;  %v6808_v4 = vld [vmem:[#allocation8 + $0xf8] sm:$0xff] }
 0x4cf   :  { %2209 = vmatprep.subr.mxu0 %v6793_v7  ;;  %2280 = vmatprep.subr.mxu1 %v6796_v2  ;;  %9430 = vst [vmem:[#allocation56_spill] sm:$0xff] %v6805_v40  ;;  %9431 = vst [vmem:[#allocation57_spill] sm:$0xff] %v6808_v4  ;;  %v6811_v7 = vld [vmem:[#allocation8 + $0xe0] sm:$0xff]  ;;  %v6814_v2 = vld [vmem:[#allocation8 + $0xf0] sm:$0xff] }
 0x4d0   :  { %2210 = vmatpush1.msra.mxu0 %v6799_v36  ;;  %2281 = vmatpush1.msra.mxu1 %v6802_v52  ;;  %9432 = vst [vmem:[#allocation58_spill] sm:$0xff] %v6811_v7  ;;  %9433 = vst [vmem:[#allocation59_spill] sm:$0xff] %v6814_v2  ;;  %v6817_v36 = vld [vmem:[#allocation8 + $0xc8] sm:$0xff]  ;;  %v6820_v52 = vld [vmem:[#allocation8 + $0xd8] sm:$0xff] }
 0x4d1   :  { %2211 = vmatprep.subr.mxu0 %v6805_v40  ;;  %2282 = vmatprep.subr.mxu1 %v6808_v4  ;;  %9434 = vst [vmem:[#allocation60_spill] sm:$0xff] %v6817_v36  ;;  %9435 = vst [vmem:[#allocation61_spill] sm:$0xff] %v6820_v52  ;;  %v6823_v40 = vld [vmem:[#allocation8 + $0xc0] sm:$0xff]  ;;  %v6826_v4 = vld [vmem:[#allocation8 + $0xd0] sm:$0xff] }
 0x4d2   :  { %2212 = vmatpush1.msra.mxu0 %v6811_v7  ;;  %2283 = vmatpush1.msra.mxu1 %v6814_v2  ;;  %9436 = vst [vmem:[#allocation62_spill] sm:$0xff] %v6823_v40  ;;  %9437 = vst [vmem:[#allocation63_spill] sm:$0xff] %v6826_v4  ;;  %v6829_v7 = vld [vmem:[#allocation8 + $0xa8] sm:$0xff]  ;;  %v6832_v2 = vld [vmem:[#allocation8 + $0xb8] sm:$0xff] }
 0x4d3   :  { %2213 = vmatprep.subr.mxu0 %v6817_v36  ;;  %2284 = vmatprep.subr.mxu1 %v6820_v52  ;;  %9438 = vst [vmem:[#allocation64_spill] sm:$0xff] %v6829_v7  ;;  %9439 = vst [vmem:[#allocation65_spill] sm:$0xff] %v6832_v2  ;;  %v6835_v36 = vld [vmem:[#allocation8 + $0xa0] sm:$0xff]  ;;  %v6838_v52 = vld [vmem:[#allocation8 + $0xb0] sm:$0xff] }
 0x4d4   :  { %2214 = vmatpush1.msra.mxu0 %v6823_v40  ;;  %2285 = vmatpush1.msra.mxu1 %v6826_v4  ;;  %9440 = vst [vmem:[#allocation66_spill] sm:$0xff] %v6835_v36  ;;  %9441 = vst [vmem:[#allocation67_spill] sm:$0xff] %v6838_v52  ;;  %v6841_v40 = vld [vmem:[#allocation8 + $0x88] sm:$0xff]  ;;  %v6844_v4 = vld [vmem:[#allocation8 + $0x98] sm:$0xff] }
 0x4d5   :  { %2215 = vmatprep.subr.mxu0 %v6829_v7  ;;  %2286 = vmatprep.subr.mxu1 %v6832_v2  ;;  %9442 = vst [vmem:[#allocation68_spill] sm:$0xff] %v6841_v40  ;;  %9443 = vst [vmem:[#allocation69_spill] sm:$0xff] %v6844_v4  ;;  %v6847_v7 = vld [vmem:[#allocation8 + $0x80] sm:$0xff]  ;;  %v6850_v2 = vld [vmem:[#allocation8 + $0x90] sm:$0xff] }
 0x4d6   :  { %2216 = vmatpush1.msra.mxu0 %v6835_v36  ;;  %2287 = vmatpush1.msra.mxu1 %v6838_v52  ;;  %9444 = vst [vmem:[#allocation70_spill] sm:$0xff] %v6847_v7  ;;  %9445 = vst [vmem:[#allocation71_spill] sm:$0xff] %v6850_v2  ;;  %v6853_v36 = vld [vmem:[#allocation8 + $0x68] sm:$0xff]  ;;  %v6856_v52 = vld [vmem:[#allocation8 + $0x78] sm:$0xff] }
 0x4d7   :  { %2217 = vmatprep.subr.mxu0 %v6841_v40  ;;  %2288 = vmatprep.subr.mxu1 %v6844_v4  ;;  %9446 = vst [vmem:[#allocation72_spill] sm:$0xff] %v6853_v36  ;;  %9447 = vst [vmem:[#allocation73_spill] sm:$0xff] %v6856_v52  ;;  %v6859_v40 = vld [vmem:[#allocation8 + $0x60] sm:$0xff]  ;;  %v6862_v4 = vld [vmem:[#allocation8 + $0x70] sm:$0xff] }
 0x4d8   :  { %2218 = vmatpush1.msra.mxu0 %v6847_v7  ;;  %2289 = vmatpush1.msra.mxu1 %v6850_v2  ;;  %9448 = vst [vmem:[#allocation74_spill] sm:$0xff] %v6859_v40  ;;  %9449 = vst [vmem:[#allocation75_spill] sm:$0xff] %v6862_v4  ;;  %v6865_v7 = vld [vmem:[#allocation8 + $0x48] sm:$0xff]  ;;  %v6868_v2 = vld [vmem:[#allocation8 + $0x58] sm:$0xff] }
 0x4d9   :  { %2219 = vmatprep.subr.mxu0 %v6853_v36  ;;  %2290 = vmatprep.subr.mxu1 %v6856_v52  ;;  %9450 = vst [vmem:[#allocation76_spill] sm:$0xff] %v6865_v7  ;;  %9451 = vst [vmem:[#allocation77_spill] sm:$0xff] %v6868_v2  ;;  %v6871_v36 = vld [vmem:[#allocation8 + $0x40] sm:$0xff]  ;;  %v6874_v52 = vld [vmem:[#allocation8 + $0x50] sm:$0xff] }
 0x4da   :  { %2220 = vmatpush1.msra.mxu0 %v6859_v40  ;;  %2291 = vmatpush1.msra.mxu1 %v6862_v4  ;;  %9452 = vst [vmem:[#allocation78_spill] sm:$0xff] %v6871_v36  ;;  %9453 = vst [vmem:[#allocation79_spill] sm:$0xff] %v6874_v52  ;;  %v6877_v40 = vld [vmem:[#allocation8 + $0x28] sm:$0xff]  ;;  %v6880_v4 = vld [vmem:[#allocation8 + $0x38] sm:$0xff] }
 0x4db   :  { %2221 = vmatprep.subr.mxu0 %v6865_v7  ;;  %2292 = vmatprep.subr.mxu1 %v6868_v2  ;;  %9454 = vst [vmem:[#allocation80_spill] sm:$0xff] %v6877_v40  ;;  %9455 = vst [vmem:[#allocation81_spill] sm:$0xff] %v6880_v4  ;;  %v6883_v7 = vld [vmem:[#allocation8 + $0x20] sm:$0xff]  ;;  %v6886_v2 = vld [vmem:[#allocation8 + $0x30] sm:$0xff] }
 0x4dc   :  { %2222 = vmatpush1.msra.mxu0 %v6871_v36  ;;  %2293 = vmatpush1.msra.mxu1 %v6874_v52  ;;  %9456 = vst [vmem:[#allocation82_spill] sm:$0xff] %v6883_v7  ;;  %9457 = vst [vmem:[#allocation83_spill] sm:$0xff] %v6886_v2  ;;  %v6889_v36 = vld [vmem:[#allocation8 + $0x8] sm:$0xff]  ;;  %v6892_v52 = vld [vmem:[#allocation8 + $0x18] sm:$0xff] }
 0x4dd   :  { %2223 = vmatprep.subr.mxu0 %v6877_v40  ;;  %2294 = vmatprep.subr.mxu1 %v6880_v4  ;;  %9458 = vst [vmem:[#allocation84_spill] sm:$0xff] %v6889_v36  ;;  %9459 = vst [vmem:[#allocation85_spill] sm:$0xff] %v6892_v52  ;;  %v6895_v40 = vld [vmem:[#allocation8] sm:$0xff]  ;;  %v6898_v4 = vld [vmem:[#allocation8 + $0x10] sm:$0xff] }
 0x4de   :  { %2224 = vmatpush1.msra.mxu0 %v6883_v7  ;;  %2295 = vmatpush1.msra.mxu1 %v6886_v2  ;;  %9460 = vst [vmem:[#allocation86_spill] sm:$0xff] %v6895_v40  ;;  %9461 = vst [vmem:[#allocation87_spill] sm:$0xff] %v6898_v4  ;;  %v6901_v7 = vld [vmem:[#allocation8 + $0x3e8] sm:$0xff]  ;;  %v6904_v2 = vld [vmem:[#allocation8 + $0x3f8] sm:$0xff] }
 0x4df   :  { %2225 = vmatprep.subr.mxu0 %v6889_v36  ;;  %2296 = vmatprep.subr.mxu1 %v6892_v52  ;;  %9462 = vst [vmem:[#allocation88_spill] sm:$0xff] %v6901_v7  ;;  %9463 = vst [vmem:[#allocation89_spill] sm:$0xff] %v6904_v2  ;;  %v6907_v36 = vld [vmem:[#allocation8 + $0x3e0] sm:$0xff]  ;;  %v6910_v52 = vld [vmem:[#allocation8 + $0x3f0] sm:$0xff] }
 0x4e0   :  { %2226 = vmatpush1.msra.mxu0 %v6895_v40  ;;  %2297 = vmatpush1.msra.mxu1 %v6898_v4  ;;  %9464 = vst [vmem:[#allocation90_spill] sm:$0xff] %v6907_v36  ;;  %9465 = vst [vmem:[#allocation91_spill] sm:$0xff] %v6910_v52  ;;  %v6913_v40 = vld [vmem:[#allocation8 + $0x3c8] sm:$0xff]  ;;  %v6916_v4 = vld [vmem:[#allocation8 + $0x3d8] sm:$0xff] }
 0x4e1   :  { %2227 = vmatprep.subr.mxu0 %v6901_v7  ;;  %2298 = vmatprep.subr.mxu1 %v6904_v2  ;;  %9466 = vst [vmem:[#allocation92_spill] sm:$0xff] %v6913_v40  ;;  %9467 = vst [vmem:[#allocation93_spill] sm:$0xff] %v6916_v4  ;;  %v6919_v7 = vld [vmem:[#allocation8 + $0x3c0] sm:$0xff]  ;;  %v6922_v2 = vld [vmem:[#allocation8 + $0x3d0] sm:$0xff] }
 0x4e2   :  { %2228 = vmatpush2.msra.mxu0 %v6907_v36  ;;  %2299 = vmatpush2.msra.mxu1 %v6910_v52  ;;  %9468 = vst [vmem:[#allocation94_spill] sm:$0xff] %v6919_v7  ;;  %9469 = vst [vmem:[#allocation95_spill] sm:$0xff] %v6922_v2  ;;  %v6925_v36 = vld [vmem:[#allocation8 + $0x3a8] sm:$0xff]  ;;  %v6928_v52 = vld [vmem:[#allocation8 + $0x3b8] sm:$0xff] }
 0x4e3   :  { %2229 = vmatprep.subr.mxu0 %v6913_v40  ;;  %2300 = vmatprep.subr.mxu1 %v6916_v4  ;;  %9470 = vst [vmem:[#allocation96_spill] sm:$0xff] %v6925_v36  ;;  %9471 = vst [vmem:[#allocation97_spill] sm:$0xff] %v6928_v52  ;;  %v6931_v40 = vld [vmem:[#allocation8 + $0x3a0] sm:$0xff]  ;;  %v6934_v4 = vld [vmem:[#allocation8 + $0x3b0] sm:$0xff] }
 0x4e4   :  { %2230 = vmatpush2.msra.mxu0 %v6919_v7  ;;  %2301 = vmatpush2.msra.mxu1 %v6922_v2  ;;  %9472 = vst [vmem:[#allocation98_spill] sm:$0xff] %v6931_v40  ;;  %9473 = vst [vmem:[#allocation99_spill] sm:$0xff] %v6934_v4  ;;  %v6937_v7 = vld [vmem:[#allocation8 + $0x388] sm:$0xff]  ;;  %v6940_v2 = vld [vmem:[#allocation8 + $0x398] sm:$0xff] }
 0x4e5   :  { %2231 = vmatprep.subr.mxu0 %v6925_v36  ;;  %2302 = vmatprep.subr.mxu1 %v6928_v52  ;;  %9474 = vst [vmem:[#allocation100_spill] sm:$0xff] %v6937_v7  ;;  %9475 = vst [vmem:[#allocation101_spill] sm:$0xff] %v6940_v2  ;;  %v6943_v36 = vld [vmem:[#allocation8 + $0x380] sm:$0xff]  ;;  %v6946_v52 = vld [vmem:[#allocation8 + $0x390] sm:$0xff] }
 0x4e6   :  { %2232 = vmatpush2.msra.mxu0 %v6931_v40  ;;  %2303 = vmatpush2.msra.mxu1 %v6934_v4  ;;  %9476 = vst [vmem:[#allocation102_spill] sm:$0xff] %v6943_v36  ;;  %9477 = vst [vmem:[#allocation103_spill] sm:$0xff] %v6946_v52  ;;  %v6949_v40 = vld [vmem:[#allocation8 + $0x368] sm:$0xff]  ;;  %v6952_v4 = vld [vmem:[#allocation8 + $0x378] sm:$0xff] }
 0x4e7   :  { %2233 = vmatprep.subr.mxu0 %v6937_v7  ;;  %2304 = vmatprep.subr.mxu1 %v6940_v2  ;;  %9478 = vst [vmem:[#allocation104_spill] sm:$0xff] %v6949_v40  ;;  %9479 = vst [vmem:[#allocation105_spill] sm:$0xff] %v6952_v4  ;;  %v6955_v7 = vld [vmem:[#allocation8 + $0x360] sm:$0xff]  ;;  %v6958_v2 = vld [vmem:[#allocation8 + $0x370] sm:$0xff] }
 0x4e8   :  { %2234 = vmatpush2.msra.mxu0 %v6943_v36  ;;  %2305 = vmatpush2.msra.mxu1 %v6946_v52  ;;  %9480 = vst [vmem:[#allocation106_spill] sm:$0xff] %v6955_v7  ;;  %9481 = vst [vmem:[#allocation107_spill] sm:$0xff] %v6958_v2  ;;  %v6961_v36 = vld [vmem:[#allocation8 + $0x348] sm:$0xff]  ;;  %v6964_v52 = vld [vmem:[#allocation8 + $0x358] sm:$0xff] }
 0x4e9   :  { %2235 = vmatprep.subr.mxu0 %v6949_v40  ;;  %2306 = vmatprep.subr.mxu1 %v6952_v4  ;;  %9482 = vst [vmem:[#allocation108_spill] sm:$0xff] %v6961_v36  ;;  %9483 = vst [vmem:[#allocation109_spill] sm:$0xff] %v6964_v52  ;;  %v6967_v40 = vld [vmem:[#allocation8 + $0x340] sm:$0xff]  ;;  %v6970_v4 = vld [vmem:[#allocation8 + $0x350] sm:$0xff] }
 0x4ea   :  { %2236 = vmatpush2.msra.mxu0 %v6955_v7  ;;  %2307 = vmatpush2.msra.mxu1 %v6958_v2  ;;  %9484 = vst [vmem:[#allocation110_spill] sm:$0xff] %v6967_v40  ;;  %9485 = vst [vmem:[#allocation111_spill] sm:$0xff] %v6970_v4  ;;  %v6973_v7 = vld [vmem:[#allocation8 + $0x328] sm:$0xff]  ;;  %v6976_v2 = vld [vmem:[#allocation8 + $0x338] sm:$0xff] }
 0x4eb   :  { %2237 = vmatprep.subr.mxu0 %v6961_v36  ;;  %2308 = vmatprep.subr.mxu1 %v6964_v52  ;;  %9486 = vst [vmem:[#allocation112_spill] sm:$0xff] %v6973_v7  ;;  %9487 = vst [vmem:[#allocation113_spill] sm:$0xff] %v6976_v2  ;;  %v6979_v36 = vld [vmem:[#allocation8 + $0x320] sm:$0xff]  ;;  %v6982_v52 = vld [vmem:[#allocation8 + $0x330] sm:$0xff] }
 0x4ec   :  { %2238 = vmatpush2.msra.mxu0 %v6967_v40  ;;  %2309 = vmatpush2.msra.mxu1 %v6970_v4  ;;  %9488 = vst [vmem:[#allocation114_spill] sm:$0xff] %v6979_v36  ;;  %9489 = vst [vmem:[#allocation115_spill] sm:$0xff] %v6982_v52  ;;  %v6985_v40 = vld [vmem:[#allocation8 + $0x308] sm:$0xff]  ;;  %v6988_v4 = vld [vmem:[#allocation8 + $0x318] sm:$0xff] }
 0x4ed   :  { %2239 = vmatprep.subr.mxu0 %v6973_v7  ;;  %2310 = vmatprep.subr.mxu1 %v6976_v2  ;;  %9490 = vst [vmem:[#allocation116_spill] sm:$0xff] %v6985_v40  ;;  %9491 = vst [vmem:[#allocation117_spill] sm:$0xff] %v6988_v4  ;;  %v6991_v7 = vld [vmem:[#allocation8 + $0x300] sm:$0xff]  ;;  %v6994_v2 = vld [vmem:[#allocation8 + $0x310] sm:$0xff] }
 0x4ee   :  { %2240 = vmatpush2.msra.mxu0 %v6979_v36  ;;  %2311 = vmatpush2.msra.mxu1 %v6982_v52  ;;  %9492 = vst [vmem:[#allocation118_spill] sm:$0xff] %v6991_v7  ;;  %9493 = vst [vmem:[#allocation119_spill] sm:$0xff] %v6994_v2  ;;  %v6997_v36 = vld [vmem:[#allocation8 + $0x2e8] sm:$0xff]  ;;  %v7000_v52 = vld [vmem:[#allocation8 + $0x2f8] sm:$0xff] }
 0x4ef   :  { %2241 = vmatprep.subr.mxu0 %v6985_v40  ;;  %2312 = vmatprep.subr.mxu1 %v6988_v4  ;;  %9494 = vst [vmem:[#allocation120_spill] sm:$0xff] %v6997_v36  ;;  %9495 = vst [vmem:[#allocation121_spill] sm:$0xff] %v7000_v52  ;;  %v7003_v40 = vld [vmem:[#allocation8 + $0x2e0] sm:$0xff]  ;;  %v7006_v4 = vld [vmem:[#allocation8 + $0x2f0] sm:$0xff] }
 0x4f0   :  { %2242 = vmatpush2.msra.mxu0 %v6991_v7  ;;  %2313 = vmatpush2.msra.mxu1 %v6994_v2  ;;  %9496 = vst [vmem:[#allocation122_spill] sm:$0xff] %v7003_v40  ;;  %9497 = vst [vmem:[#allocation123_spill] sm:$0xff] %v7006_v4  ;;  %v7009_v7 = vld [vmem:[#allocation8 + $0x2c8] sm:$0xff]  ;;  %v7012_v2 = vld [vmem:[#allocation8 + $0x2d8] sm:$0xff] }
 0x4f1   :  { %2243 = vmatprep.subr.mxu0 %v6997_v36  ;;  %2314 = vmatprep.subr.mxu1 %v7000_v52  ;;  %9498 = vst [vmem:[#allocation124_spill] sm:$0xff] %v7009_v7  ;;  %9499 = vst [vmem:[#allocation125_spill] sm:$0xff] %v7012_v2  ;;  %v7015_v36 = vld [vmem:[#allocation8 + $0x2c0] sm:$0xff]  ;;  %v7018_v52 = vld [vmem:[#allocation8 + $0x2d0] sm:$0xff] }
 0x4f2   :  { %2244 = vmatpush2.msra.mxu0 %v7003_v40  ;;  %2315 = vmatpush2.msra.mxu1 %v7006_v4  ;;  %9500 = vst [vmem:[#allocation126_spill] sm:$0xff] %v7015_v36  ;;  %9501 = vst [vmem:[#allocation127_spill] sm:$0xff] %v7018_v52  ;;  %v7021_v40 = vld [vmem:[#allocation8 + $0x2a8] sm:$0xff]  ;;  %v7024_v4 = vld [vmem:[#allocation8 + $0x2b8] sm:$0xff] }
 0x4f3   :  { %2245 = vmatprep.subr.mxu0 %v7009_v7  ;;  %2316 = vmatprep.subr.mxu1 %v7012_v2  ;;  %9502 = vst [vmem:[#allocation128_spill] sm:$0xff] %v7021_v40  ;;  %9503 = vst [vmem:[#allocation129_spill] sm:$0xff] %v7024_v4  ;;  %v7027_v7 = vld [vmem:[#allocation8 + $0x2a0] sm:$0xff]  ;;  %v7030_v2 = vld [vmem:[#allocation8 + $0x2b0] sm:$0xff] }
 0x4f4   :  { %2246 = vmatpush2.msra.mxu0 %v7015_v36  ;;  %2317 = vmatpush2.msra.mxu1 %v7018_v52  ;;  %9504 = vst [vmem:[#allocation130_spill] sm:$0xff] %v7027_v7  ;;  %9505 = vst [vmem:[#allocation131_spill] sm:$0xff] %v7030_v2  ;;  %v7033_v36 = vld [vmem:[#allocation8 + $0x288] sm:$0xff]  ;;  %v7036_v52 = vld [vmem:[#allocation8 + $0x298] sm:$0xff] }
 0x4f5   :  { %2247 = vmatprep.subr.mxu0 %v7021_v40  ;;  %2318 = vmatprep.subr.mxu1 %v7024_v4  ;;  %9506 = vst [vmem:[#allocation132_spill] sm:$0xff] %v7033_v36  ;;  %9507 = vst [vmem:[#allocation133_spill] sm:$0xff] %v7036_v52  ;;  %v7039_v40 = vld [vmem:[#allocation8 + $0x280] sm:$0xff]  ;;  %v7042_v4 = vld [vmem:[#allocation8 + $0x290] sm:$0xff] }
 0x4f6   :  { %2248 = vmatpush2.msra.mxu0 %v7027_v7  ;;  %2319 = vmatpush2.msra.mxu1 %v7030_v2  ;;  %9508 = vst [vmem:[#allocation134_spill] sm:$0xff] %v7039_v40  ;;  %9509 = vst [vmem:[#allocation135_spill] sm:$0xff] %v7042_v4  ;;  %v7045_v7 = vld [vmem:[#allocation8 + $0x268] sm:$0xff]  ;;  %v7048_v2 = vld [vmem:[#allocation8 + $0x278] sm:$0xff] }
 0x4f7   :  { %2249 = vmatprep.subr.mxu0 %v7033_v36  ;;  %2320 = vmatprep.subr.mxu1 %v7036_v52  ;;  %9510 = vst [vmem:[#allocation136_spill] sm:$0xff] %v7045_v7  ;;  %9511 = vst [vmem:[#allocation137_spill] sm:$0xff] %v7048_v2  ;;  %v7051_v36 = vld [vmem:[#allocation8 + $0x260] sm:$0xff]  ;;  %v7054_v52 = vld [vmem:[#allocation8 + $0x270] sm:$0xff] }
 0x4f8   :  { %2250 = vmatpush2.msra.mxu0 %v7039_v40  ;;  %2321 = vmatpush2.msra.mxu1 %v7042_v4  ;;  %9512 = vst [vmem:[#allocation138_spill] sm:$0xff] %v7051_v36  ;;  %9513 = vst [vmem:[#allocation139_spill] sm:$0xff] %v7054_v52  ;;  %v7057_v40 = vld [vmem:[#allocation8 + $0x248] sm:$0xff]  ;;  %v7060_v4 = vld [vmem:[#allocation8 + $0x258] sm:$0xff] }
 0x4f9   :  { %2251 = vmatprep.subr.mxu0 %v7045_v7  ;;  %2322 = vmatprep.subr.mxu1 %v7048_v2  ;;  %9514 = vst [vmem:[#allocation140_spill] sm:$0xff] %v7057_v40  ;;  %9515 = vst [vmem:[#allocation141_spill] sm:$0xff] %v7060_v4  ;;  %v7063_v7 = vld [vmem:[#allocation8 + $0x240] sm:$0xff]  ;;  %v7066_v2 = vld [vmem:[#allocation8 + $0x250] sm:$0xff] }
 0x4fa   :  { %2252 = vmatpush2.msra.mxu0 %v7051_v36  ;;  %2323 = vmatpush2.msra.mxu1 %v7054_v52  ;;  %9516 = vst [vmem:[#allocation142_spill] sm:$0xff] %v7063_v7  ;;  %9517 = vst [vmem:[#allocation143_spill] sm:$0xff] %v7066_v2  ;;  %v7069_v36 = vld [vmem:[#allocation8 + $0x228] sm:$0xff]  ;;  %v7072_v52 = vld [vmem:[#allocation8 + $0x238] sm:$0xff] }
 0x4fb   :  { %2253 = vmatprep.subr.mxu0 %v7057_v40  ;;  %2324 = vmatprep.subr.mxu1 %v7060_v4  ;;  %9518 = vst [vmem:[#allocation144_spill] sm:$0xff] %v7069_v36  ;;  %9519 = vst [vmem:[#allocation145_spill] sm:$0xff] %v7072_v52  ;;  %v7075_v40 = vld [vmem:[#allocation8 + $0x220] sm:$0xff]  ;;  %v7078_v4 = vld [vmem:[#allocation8 + $0x230] sm:$0xff] }
 0x4fc   :  { %2254 = vmatpush2.msra.mxu0 %v7063_v7  ;;  %2325 = vmatpush2.msra.mxu1 %v7066_v2  ;;  %9520 = vst [vmem:[#allocation146_spill] sm:$0xff] %v7075_v40  ;;  %9521 = vst [vmem:[#allocation147_spill] sm:$0xff] %v7078_v4  ;;  %v7081_v7 = vld [vmem:[#allocation8 + $0x208] sm:$0xff]  ;;  %v7084_v2 = vld [vmem:[#allocation8 + $0x218] sm:$0xff] }
 0x4fd   :  { %2255 = vmatprep.subr.mxu0 %v7069_v36  ;;  %2326 = vmatprep.subr.mxu1 %v7072_v52  ;;  %9522 = vst [vmem:[#allocation148_spill] sm:$0xff] %v7081_v7  ;;  %9523 = vst [vmem:[#allocation149_spill] sm:$0xff] %v7084_v2  ;;  %v7087_v36 = vld [vmem:[#allocation8 + $0x200] sm:$0xff]  ;;  %v7090_v52 = vld [vmem:[#allocation8 + $0x210] sm:$0xff] }
 0x4fe   :  { %2256 = vmatpush2.msra.mxu0 %v7075_v40  ;;  %2327 = vmatpush2.msra.mxu1 %v7078_v4  ;;  %9524 = vst [vmem:[#allocation150_spill] sm:$0xff] %v7087_v36  ;;  %9525 = vst [vmem:[#allocation151_spill] sm:$0xff] %v7090_v52 }
 0x4ff   :  { %2257 = vmatprep.subr.mxu0 %v7081_v7  ;;  %2328 = vmatprep.subr.mxu1 %v7084_v2 }
 0x500   :  { %2258 = vmatpush2.msra.mxu0 %v7087_v36  ;;  %2329 = vmatpush2.msra.mxu1 %v7090_v52 }
 0x501   :  { %2368 = vmatprep.subr.mxu0 %v6525_v63  ;;  %2439 = vmatprep.subr.mxu1 %v6528_v0 }
 0x55f   :  { %v1918_v4 = vpop.f32.mrf.mxu0  ;;  %v1989_v2 = vpop.f32.mrf.mxu1 }
 0x560   :  { %v1919_v40 = vadd.f32 %v1918_v4, %v9387_v1  ;;  %v1990_v63 = vadd.f32 %v1989_v2, %v9390_v20 }
 0x561   :  { %v1920_v7 = vpop.f32.mrf.mxu0  ;;  %v1991_v36 = vpop.f32.mrf.mxu1 }
 0x562   :  { %v3621_v24 = vmul.f32 -1.442695, %v1919_v40  ;;  %v1921_v23 = vadd.f32 %v1920_v7, %v9388_v51  ;;  %v1992_v19 = vadd.f32 %v1991_v36, %v9389_v16  ;;  %v9526_v51 = vld [vmem:[#allocation168_spill] sm:$0xff] }
 0x564   :  { %3838 = vpow2.f32 %v3621_v24  ;;  %v3622_v21 = vmul.f32 -1.442695, %v1921_v23  ;;  %v3623_v18 = vmul.f32 -1.442695, %v1992_v19  ;;  %v9527_v19 = vld [vmem:[#allocation170_spill] sm:$0xff] }
 0x566   :  { %3840 = vpow2.f32 %v3622_v21 }
 0x567   :  { %3842 = vpow2.f32 %v3623_v18 }
 0x571   :  { %v3839_v52 = vpop.eup %3838 }
 0x572   :  { %v1997_v17 = vadd.f32 1.0, %v3839_v52 }
 0x573   :  { %v3841_v0 = vpop.eup %3840 }
 0x574   :  { %3844 = vrcp.f32 %v1997_v17  ;;  %v2003_v4 = vadd.f32 1.0, %v3841_v0  ;;  %v3843_v40 = vpop.eup %3842 }
 0x575   :  { %3846 = vtanh.f32 %v1990_v63  ;;  %v2010_v52 = vadd.f32 1.0, %v3843_v40 }
 0x576   :  { %3848 = vrcp.f32 %v2003_v4 }
 0x580   :  { %v2091_v7 = vpop.f32.mrf.mxu0  ;;  %v2162_v17 = vpop.f32.mrf.mxu1 }
 0x581   :  { %v3845_v24 = vpop.eup %3844  ;;  %v2167_v23 = vadd.f32 %v2091_v7, %v9526_v51  ;;  %v9528_v51 = vld [vmem:[#allocation165_spill] sm:$0xff]  ;;  %v9529_v7 = vld [vmem:[#allocation163_spill] sm:$0xff] }
 0x582   :  { %v3847_v21 = vpop.eup %3846  ;;  %v2093_v1 = vpop.f32.mrf.mxu0 }
 0x583   :  { %v3849_v59 = vpop.eup %3848  ;;  %v3624_v36 = vmul.f32 -1.442695, %v2167_v23  ;;  %v2168_v16 = vadd.f32 %v2093_v1, %v9527_v19  ;;  %v2014_v14 = vmul.f32 %v3847_v21, %v3845_v24  ;;  %v2164_v0 = vpop.f32.mrf.mxu1  ;;  %v2169_v23 = vadd.f32 %v2162_v17, %v9529_v7  ;;  %v7119_v7 = vld [vmem:[#allocation5 + $0x1e0] sm:$0xff] }
 0x584   :  { %v2013_v2 = vmul.f32 %v3849_v59, %v6538_v53  ;;  %v2170_v4 = vadd.f32 %v2164_v0, %v9528_v51 }
 0x585   :  { %3850 = vpow2.f32 %v3624_v36  ;;  %v3625_v18 = vmul.f32 -1.442695, %v2168_v16 }
 0x586   :  { %v7102_v63 = vadd.f32 %v2014_v14, %v2013_v2  ;;  %v3626_v20 = vmul.f32 -1.442695, %v2170_v4 }
 0x587   :  { %3852 = vpow2.f32 %v3625_v18 }
 0x588   :  { %3854 = vrcp.f32 %v2010_v52 }
 0x589   :  { %3856 = vtanh.f32 %v7102_v63 }
 0x58a   :  { %3858 = vtanh.f32 %v2169_v23  ;;  %v7127_v23 = vld [vmem:[#allocation5 + $0x1c0] sm:$0xff] }
 0x58b   :  { %3860 = vpow2.f32 %v3626_v20 }
 0x592   :  { %v3851_v1 = vpop.eup %3850 }
 0x593   :  { %v2174_v24 = vadd.f32 1.0, %v3851_v1  ;;  %v7131_v1 = vld [vmem:[#allocation5 + $0x1a8] sm:$0xff] }
 0x594   :  { %v3853_v59 = vpop.eup %3852 }
 0x595   :  { %v3855_v53 = vpop.eup %3854  ;;  %3862 = vrcp.f32 %v2174_v24  ;;  %v2180_v16 = vadd.f32 1.0, %v3853_v59  ;;  %v7135_v24 = vld [vmem:[#allocation5 + $0x1a0] sm:$0xff]  ;;  %v9560_v59 = vld [vmem:[#allocation50_spill] sm:$0xff] }
 0x596   :  { %v3857_v14 = vpop.eup %3856 }
 0x597   :  { %3864 = vrcp.f32 %v2180_v16  ;;  %v7107_v40 = vmul.f32 %v3857_v14, %v3855_v53  ;;  %v3859_v21 = vpop.eup %3858  ;;  %v9561_v53 = vld [vmem:[#allocation51_spill] sm:$0xff]  ;;  %v9562_v16 = vld [vmem:[#allocation52_spill] sm:$0xff]  ;;  %v9563_v14 = vld [vmem:[#allocation53_spill] sm:$0xff] }
 0x598   :  { %v3861_v36 = vpop.eup %3860 }
 0x599   :  { %9530 = vst [vmem:[#allocation20_spill] sm:$0xff] %v7107_v40  ;;  %2259 = vmatprep.mubr.f32.mxu0 %v7107_v40  ;;  %2330 = vmatprep.mubr.f32.mxu1 %v7107_v40  ;;  %v2187_v17 = vadd.f32 1.0, %v3861_v36  ;;  %v9565_v36 = vld [vmem:[#allocation55_spill] sm:$0xff]  ;;  %v7563_v40 = vld [vmem:[#allocation8 + $0x1a0] sm:$0xff] }
 0x59b   :  { %3866 = vrcp.f32 %v2187_v17  ;;  %v9569_v17 = vld [vmem:[#allocation59_spill] sm:$0xff] }
 0x5a2   :  { %v3863_v19 = vpop.eup %3862 }
 0x5a3   :  { %v2191_v2 = vmul.f32 %v3863_v19, %v3859_v21  ;;  %v9564_v21 = vld [vmem:[#allocation54_spill] sm:$0xff]  ;;  %v9566_v19 = vld [vmem:[#allocation56_spill] sm:$0xff] }
 0x5a4   :  { %v3865_v52 = vpop.eup %3864 }
 0x5a5   :  { %v2190_v18 = vmul.f32 %v3865_v52, %v6548_v29  ;;  %v7123_v29 = vld [vmem:[#allocation5 + $0x1c8] sm:$0xff] }
 0x5a6   :  { %v9568_v52 = vld [vmem:[#allocation58_spill] sm:$0xff] }
 0x5a7   :  { %v7112_v20 = vadd.f32 %v2191_v2, %v2190_v18  ;;  %v9567_v2 = vld [vmem:[#allocation57_spill] sm:$0xff]  ;;  %v9570_v18 = vld [vmem:[#allocation60_spill] sm:$0xff] }
 0x5a8   :  { %v3867_v0 = vpop.eup %3866 }
 0x5a9   :  { %3868 = vtanh.f32 %v7112_v20 }
 0x5b6   :  { %v3869_v51 = vpop.eup %3868 }
 0x5b7   :  { %v7115_v4 = vmul.f32 %v3869_v51, %v3867_v0  ;;  %v9571_v0 = vld [vmem:[#allocation61_spill] sm:$0xff]  ;;  %v9572_v51 = vld [vmem:[#allocation62_spill] sm:$0xff] }
 0x5b9   :  { %2260 = vmatmul.mubr.f32.vlgmr.msra.gmra.mxu0 %v7115_v4  ;;  %2331 = vmatmul.mubr.f32.vlgmr.msra.gmra.mxu1 %v7115_v4 }
 0x5ba   :  { %2369 = vmatpush1.msra.mxu0 %v7119_v7  ;;  %2440 = vmatpush1.msra.mxu1 %v6556_v15  ;;  %v7139_v15 = vld [vmem:[#allocation5 + $0x188] sm:$0xff] }
 0x5bb   :  { %2370 = vmatprep.subr.mxu0 %v7123_v29  ;;  %2441 = vmatprep.subr.mxu1 %v6560_v26  ;;  %v7143_v26 = vld [vmem:[#allocation5 + $0x180] sm:$0xff] }
 0x5bc   :  { %2371 = vmatpush1.msra.mxu0 %v7127_v23  ;;  %2442 = vmatpush1.msra.mxu1 %v6564_v22  ;;  %v7147_v22 = vld [vmem:[#allocation5 + $0x168] sm:$0xff] }
 0x5bd   :  { %2372 = vmatprep.subr.mxu0 %v7131_v1  ;;  %2443 = vmatprep.subr.mxu1 %v6568_v35  ;;  %v7151_v35 = vld [vmem:[#allocation5 + $0x160] sm:$0xff] }
 0x5be   :  { %2373 = vmatpush1.msra.mxu0 %v7135_v24  ;;  %2444 = vmatpush1.msra.mxu1 %v6572_v10  ;;  %v7155_v10 = vld [vmem:[#allocation5 + $0x148] sm:$0xff] }
 0x5bf   :  { %2374 = vmatprep.subr.mxu0 %v7139_v15  ;;  %2445 = vmatprep.subr.mxu1 %v6576_v25  ;;  %v7159_v25 = vld [vmem:[#allocation5 + $0x140] sm:$0xff] }
 0x5c0   :  { %2375 = vmatpush1.msra.mxu0 %v7143_v26  ;;  %2446 = vmatpush1.msra.mxu1 %v6580_v31  ;;  %v7163_v31 = vld [vmem:[#allocation5 + $0x128] sm:$0xff] }
 0x5c1   :  { %2376 = vmatprep.subr.mxu0 %v7147_v22  ;;  %2447 = vmatprep.subr.mxu1 %v6584_v9  ;;  %v7167_v9 = vld [vmem:[#allocation5 + $0x120] sm:$0xff] }
 0x5c2   :  { %2377 = vmatpush1.msra.mxu0 %v7151_v35  ;;  %2448 = vmatpush1.msra.mxu1 %v6588_v33  ;;  %v7171_v33 = vld [vmem:[#allocation5 + $0x108] sm:$0xff] }
 0x5c3   :  { %2378 = vmatprep.subr.mxu0 %v7155_v10  ;;  %2449 = vmatprep.subr.mxu1 %v6592_v41  ;;  %v7175_v41 = vld [vmem:[#allocation5 + $0x100] sm:$0xff] }
 0x5c4   :  { %2379 = vmatpush1.msra.mxu0 %v7159_v25  ;;  %2450 = vmatpush1.msra.mxu1 %v6596_v48  ;;  %v7179_v48 = vld [vmem:[#allocation5 + $0xe8] sm:$0xff] }
 0x5c5   :  { %2380 = vmatprep.subr.mxu0 %v7163_v31  ;;  %2451 = vmatprep.subr.mxu1 %v6600_v42  ;;  %v7183_v42 = vld [vmem:[#allocation5 + $0xe0] sm:$0xff] }
 0x5c6   :  { %2381 = vmatpush1.msra.mxu0 %v7167_v9  ;;  %2452 = vmatpush1.msra.mxu1 %v6604_v44  ;;  %v7187_v44 = vld [vmem:[#allocation5 + $0xc8] sm:$0xff] }
 0x5c7   :  { %2382 = vmatprep.subr.mxu0 %v7171_v33  ;;  %2453 = vmatprep.subr.mxu1 %v6608_v34  ;;  %v9531_v34 = vld [vmem:[#allocation152_spill] sm:$0xff] }
 0x5c8   :  { %2383 = vmatpush1.msra.mxu0 %v7175_v41  ;;  %2454 = vmatpush1.msra.mxu1 %v6612_v12  ;;  %v9532_v12 = vmov 0.0  }
 0x5c9   :  { %2384 = vmatprep.subr.mxu0 %v7179_v48  ;;  %2455 = vmatprep.subr.mxu1 %v6616_v32  ;;  %v9533_v32 = vld [vmem:[#allocation160_spill] sm:$0xff] }
 0x5ca   :  { %2385 = vmatpush1.msra.mxu0 %v7183_v42  ;;  %2456 = vmatpush1.msra.mxu1 %v6620_v30  ;;  %v9534_v30 = vld [vmem:[#allocation162_spill] sm:$0xff]  ;;  %9683 = vst [vmem:[#allocation160_spill] sm:$0xff] %v7563_v40 }
 0x5cb   :  { %2386 = vmatprep.subr.mxu0 %v7187_v44  ;;  %2457 = vmatprep.subr.mxu1 %v6624_v28  ;;  %v9535_v28 = vld [vmem:[#allocation157_spill] sm:$0xff] }
 0x5cc   :  { %2387 = vmatpush1.msra.mxu0 %v6627_v54  ;;  %2458 = vmatpush1.msra.mxu1 %v6630_v55  ;;  %v9536_v54 = vld [vmem:[#allocation155_spill] sm:$0xff] }
 0x5cd   :  { %2388 = vmatprep.subr.mxu0 %v6633_v43  ;;  %2459 = vmatprep.subr.mxu1 %v6636_v56  ;;  %v9537_v55 = vld [vmem:[#allocation27_spill] sm:$0xff]  ;;  %v9538_v43 = vld [vmem:[#allocation28_spill] sm:$0xff]  ;;  %v9539_v56 = vld [vmem:[#allocation29_spill] sm:$0xff] }
 0x5ce   :  { %2389 = vmatpush1.msra.mxu0 %v6639_v57  ;;  %2460 = vmatpush1.msra.mxu1 %v6642_v39  ;;  %v9540_v57 = vld [vmem:[#allocation30_spill] sm:$0xff]  ;;  %v9541_v39 = vld [vmem:[#allocation31_spill] sm:$0xff] }
 0x5cf   :  { %2390 = vmatprep.subr.mxu0 %v6645_v38  ;;  %2461 = vmatprep.subr.mxu1 %v6648_v6  ;;  %v9542_v38 = vld [vmem:[#allocation32_spill] sm:$0xff]  ;;  %v9543_v6 = vld [vmem:[#allocation33_spill] sm:$0xff] }
 0x5d0   :  { %2391 = vmatpush1.msra.mxu0 %v6651_v37  ;;  %2462 = vmatpush1.msra.mxu1 %v6654_v5  ;;  %v9544_v37 = vld [vmem:[#allocation34_spill] sm:$0xff]  ;;  %v9545_v5 = vld [vmem:[#allocation35_spill] sm:$0xff] }
 0x5d1   :  { %2392 = vmatprep.subr.mxu0 %v6657_v27  ;;  %2463 = vmatprep.subr.mxu1 %v6660_v50  ;;  %v9546_v27 = vld [vmem:[#allocation36_spill] sm:$0xff]  ;;  %v9547_v50 = vld [vmem:[#allocation37_spill] sm:$0xff] }
 0x5d2   :  { %2393 = vmatpush1.msra.mxu0 %v6663_v13  ;;  %2464 = vmatpush1.msra.mxu1 %v6666_v58  ;;  %v9548_v13 = vld [vmem:[#allocation38_spill] sm:$0xff]  ;;  %v9549_v58 = vld [vmem:[#allocation39_spill] sm:$0xff] }
 0x5d3   :  { %2394 = vmatprep.subr.mxu0 %v6669_v60  ;;  %2465 = vmatprep.subr.mxu1 %v6672_v61  ;;  %v9550_v60 = vld [vmem:[#allocation40_spill] sm:$0xff]  ;;  %v9551_v61 = vld [vmem:[#allocation41_spill] sm:$0xff] }
 0x5d4   :  { %2395 = vmatpush1.msra.mxu0 %v6675_v62  ;;  %2466 = vmatpush1.msra.mxu1 %v6678_v45  ;;  %v9552_v62 = vld [vmem:[#allocation42_spill] sm:$0xff]  ;;  %v9553_v45 = vld [vmem:[#allocation43_spill] sm:$0xff] }
 0x5d5   :  { %2396 = vmatprep.subr.mxu0 %v6681_v3  ;;  %2467 = vmatprep.subr.mxu1 %v6684_v46  ;;  %v9554_v3 = vld [vmem:[#allocation44_spill] sm:$0xff]  ;;  %v9555_v46 = vld [vmem:[#allocation45_spill] sm:$0xff] }
 0x5d6   :  { %2397 = vmatpush1.msra.mxu0 %v6687_v47  ;;  %2468 = vmatpush1.msra.mxu1 %v6690_v49  ;;  %v9556_v47 = vld [vmem:[#allocation46_spill] sm:$0xff]  ;;  %v9557_v49 = vld [vmem:[#allocation47_spill] sm:$0xff] }
 0x5d7   :  { %2398 = vmatprep.subr.mxu0 %v6693_v8  ;;  %2469 = vmatprep.subr.mxu1 %v6696_v11  ;;  %v9558_v8 = vld [vmem:[#allocation48_spill] sm:$0xff]  ;;  %v9559_v11 = vld [vmem:[#allocation49_spill] sm:$0xff] }
 0x5d8   :  { %2399 = vmatpush1.msra.mxu0 %v9531_v34  ;;  %2432 = vmatprep.mubr.f32.mxu0 %v9532_v12  ;;  %v9574_v34 = vld [vmem:[#allocation64_spill] sm:$0xff] }
 0x5d9   :  { %2470 = vmatpush1.msra.mxu1 %v9533_v32  ;;  %2503 = vmatprep.mubr.f32.mxu1 %v9532_v12  ;;  %v9575_v32 = vld [vmem:[#allocation65_spill] sm:$0xff] }
 0x5da   :  { %2433 = vmatmul.mubr.f32.vlgmr.msra.gmra.mxu0 %v7115_v4  ;;  %2504 = vmatmul.mubr.f32.vlgmr.msra.gmra.mxu1 %v7115_v4  ;;  %v9573_v4 = vld [vmem:[#allocation63_spill] sm:$0xff] }
 0x5db   :  { %2538 = vmatprep.subr.mxu0 %v9534_v30  ;;  %2609 = vmatprep.subr.mxu1 %v9535_v28  ;;  %v9576_v30 = vld [vmem:[#allocation66_spill] sm:$0xff]  ;;  %v9577_v28 = vld [vmem:[#allocation67_spill] sm:$0xff] }
 0x5dc   :  { %2539 = vmatpush1.msra.mxu0 %v9536_v54  ;;  %2610 = vmatpush1.msra.mxu1 %v9537_v55  ;;  %v9578_v54 = vld [vmem:[#allocation68_spill] sm:$0xff]  ;;  %v9579_v55 = vld [vmem:[#allocation69_spill] sm:$0xff] }
 0x5dd   :  { %2540 = vmatprep.subr.mxu0 %v9538_v43  ;;  %2611 = vmatprep.subr.mxu1 %v9539_v56  ;;  %v9580_v43 = vld [vmem:[#allocation70_spill] sm:$0xff]  ;;  %v9581_v56 = vld [vmem:[#allocation71_spill] sm:$0xff] }
 0x5de   :  { %2541 = vmatpush1.msra.mxu0 %v9540_v57  ;;  %2612 = vmatpush1.msra.mxu1 %v9541_v39  ;;  %v9582_v57 = vld [vmem:[#allocation72_spill] sm:$0xff]  ;;  %v9583_v39 = vld [vmem:[#allocation73_spill] sm:$0xff] }
 0x5df   :  { %2542 = vmatprep.subr.mxu0 %v9542_v38  ;;  %2613 = vmatprep.subr.mxu1 %v9543_v6  ;;  %v9584_v38 = vld [vmem:[#allocation74_spill] sm:$0xff]  ;;  %v9585_v6 = vld [vmem:[#allocation75_spill] sm:$0xff] }
 0x5e0   :  { %2543 = vmatpush1.msra.mxu0 %v9544_v37  ;;  %2614 = vmatpush1.msra.mxu1 %v9545_v5  ;;  %v9586_v37 = vld [vmem:[#allocation76_spill] sm:$0xff]  ;;  %v9587_v5 = vld [vmem:[#allocation77_spill] sm:$0xff] }
 0x5e1   :  { %2544 = vmatprep.subr.mxu0 %v9546_v27  ;;  %2615 = vmatprep.subr.mxu1 %v9547_v50  ;;  %v9588_v27 = vld [vmem:[#allocation78_spill] sm:$0xff]  ;;  %v9589_v50 = vld [vmem:[#allocation79_spill] sm:$0xff] }
 0x5e2   :  { %2545 = vmatpush1.msra.mxu0 %v9548_v13  ;;  %2616 = vmatpush1.msra.mxu1 %v9549_v58  ;;  %v9590_v13 = vld [vmem:[#allocation80_spill] sm:$0xff]  ;;  %v9591_v58 = vld [vmem:[#allocation81_spill] sm:$0xff] }
 0x5e3   :  { %2546 = vmatprep.subr.mxu0 %v9550_v60  ;;  %2617 = vmatprep.subr.mxu1 %v9551_v61  ;;  %v9592_v60 = vld [vmem:[#allocation82_spill] sm:$0xff]  ;;  %v9593_v61 = vld [vmem:[#allocation83_spill] sm:$0xff] }
 0x5e4   :  { %2547 = vmatpush1.msra.mxu0 %v9552_v62  ;;  %2618 = vmatpush1.msra.mxu1 %v9553_v45  ;;  %v9594_v62 = vld [vmem:[#allocation84_spill] sm:$0xff]  ;;  %v9595_v45 = vld [vmem:[#allocation85_spill] sm:$0xff] }
 0x5e5   :  { %2548 = vmatprep.subr.mxu0 %v9554_v3  ;;  %2619 = vmatprep.subr.mxu1 %v9555_v46  ;;  %v9596_v3 = vld [vmem:[#allocation86_spill] sm:$0xff]  ;;  %v9597_v46 = vld [vmem:[#allocation87_spill] sm:$0xff] }
 0x5e6   :  { %2549 = vmatpush1.msra.mxu0 %v9556_v47  ;;  %2620 = vmatpush1.msra.mxu1 %v9557_v49  ;;  %v9598_v47 = vld [vmem:[#allocation88_spill] sm:$0xff]  ;;  %v9599_v49 = vld [vmem:[#allocation89_spill] sm:$0xff] }
 0x5e7   :  { %2550 = vmatprep.subr.mxu0 %v9558_v8  ;;  %2621 = vmatprep.subr.mxu1 %v9559_v11  ;;  %v9600_v8 = vld [vmem:[#allocation90_spill] sm:$0xff]  ;;  %v9601_v11 = vld [vmem:[#allocation91_spill] sm:$0xff] }
 0x5e8   :  { %2551 = vmatpush1.msra.mxu0 %v9560_v59  ;;  %2622 = vmatpush1.msra.mxu1 %v9561_v53  ;;  %v9602_v59 = vld [vmem:[#allocation92_spill] sm:$0xff]  ;;  %v9603_v53 = vld [vmem:[#allocation93_spill] sm:$0xff] }
 0x5e9   :  { %2552 = vmatprep.subr.mxu0 %v9562_v16  ;;  %2623 = vmatprep.subr.mxu1 %v9563_v14  ;;  %v9604_v16 = vld [vmem:[#allocation94_spill] sm:$0xff]  ;;  %v9605_v14 = vld [vmem:[#allocation95_spill] sm:$0xff] }
 0x5ea   :  { %2553 = vmatpush1.msra.mxu0 %v9564_v21  ;;  %2624 = vmatpush1.msra.mxu1 %v9565_v36  ;;  %v9606_v21 = vld [vmem:[#allocation96_spill] sm:$0xff]  ;;  %v9607_v36 = vld [vmem:[#allocation97_spill] sm:$0xff] }
 0x5eb   :  { %2554 = vmatprep.subr.mxu0 %v9566_v19  ;;  %2625 = vmatprep.subr.mxu1 %v9567_v2  ;;  %v9608_v19 = vld [vmem:[#allocation98_spill] sm:$0xff]  ;;  %v9609_v2 = vld [vmem:[#allocation99_spill] sm:$0xff] }
 0x5ec   :  { %2555 = vmatpush1.msra.mxu0 %v9568_v52  ;;  %2626 = vmatpush1.msra.mxu1 %v9569_v17  ;;  %v9610_v52 = vld [vmem:[#allocation100_spill] sm:$0xff]  ;;  %v9611_v17 = vld [vmem:[#allocation101_spill] sm:$0xff] }
 0x5ed   :  { %2556 = vmatprep.subr.mxu0 %v9570_v18  ;;  %2627 = vmatprep.subr.mxu1 %v9571_v0  ;;  %v9612_v18 = vld [vmem:[#allocation102_spill] sm:$0xff]  ;;  %v9613_v0 = vld [vmem:[#allocation103_spill] sm:$0xff] }
 0x5ee   :  { %2557 = vmatpush1.msra.mxu0 %v9572_v51  ;;  %2628 = vmatpush1.msra.mxu1 %v9573_v4  ;;  %v9614_v51 = vld [vmem:[#allocation104_spill] sm:$0xff]  ;;  %v9615_v4 = vld [vmem:[#allocation105_spill] sm:$0xff] }
 0x5ef   :  { %2558 = vmatprep.subr.mxu0 %v9574_v34  ;;  %2629 = vmatprep.subr.mxu1 %v9575_v32  ;;  %v9616_v34 = vld [vmem:[#allocation106_spill] sm:$0xff]  ;;  %v9617_v32 = vld [vmem:[#allocation107_spill] sm:$0xff] }
 0x5f0   :  { %2559 = vmatpush1.msra.mxu0 %v9576_v30  ;;  %2630 = vmatpush1.msra.mxu1 %v9577_v28  ;;  %v9618_v30 = vld [vmem:[#allocation108_spill] sm:$0xff]  ;;  %v9619_v28 = vld [vmem:[#allocation109_spill] sm:$0xff] }
 0x5f1   :  { %2560 = vmatprep.subr.mxu0 %v9578_v54  ;;  %2631 = vmatprep.subr.mxu1 %v9579_v55  ;;  %v9620_v54 = vld [vmem:[#allocation110_spill] sm:$0xff]  ;;  %v9621_v55 = vld [vmem:[#allocation111_spill] sm:$0xff] }
 0x5f2   :  { %2561 = vmatpush1.msra.mxu0 %v9580_v43  ;;  %2632 = vmatpush1.msra.mxu1 %v9581_v56  ;;  %v9622_v43 = vld [vmem:[#allocation112_spill] sm:$0xff]  ;;  %v9623_v56 = vld [vmem:[#allocation113_spill] sm:$0xff] }
 0x5f3   :  { %2562 = vmatprep.subr.mxu0 %v9582_v57  ;;  %2633 = vmatprep.subr.mxu1 %v9583_v39  ;;  %v9624_v57 = vld [vmem:[#allocation114_spill] sm:$0xff]  ;;  %v9625_v39 = vld [vmem:[#allocation115_spill] sm:$0xff] }
 0x5f4   :  { %2563 = vmatpush1.msra.mxu0 %v9584_v38  ;;  %2634 = vmatpush1.msra.mxu1 %v9585_v6  ;;  %v9626_v38 = vld [vmem:[#allocation116_spill] sm:$0xff]  ;;  %v9627_v6 = vld [vmem:[#allocation117_spill] sm:$0xff] }
 0x5f5   :  { %2564 = vmatprep.subr.mxu0 %v9586_v37  ;;  %2635 = vmatprep.subr.mxu1 %v9587_v5  ;;  %v9628_v37 = vld [vmem:[#allocation118_spill] sm:$0xff]  ;;  %v9629_v5 = vld [vmem:[#allocation119_spill] sm:$0xff] }
 0x5f6   :  { %2565 = vmatpush1.msra.mxu0 %v9588_v27  ;;  %2636 = vmatpush1.msra.mxu1 %v9589_v50  ;;  %v9630_v27 = vld [vmem:[#allocation120_spill] sm:$0xff]  ;;  %v9631_v50 = vld [vmem:[#allocation121_spill] sm:$0xff] }
 0x5f7   :  { %2566 = vmatprep.subr.mxu0 %v9590_v13  ;;  %2637 = vmatprep.subr.mxu1 %v9591_v58  ;;  %v9632_v13 = vld [vmem:[#allocation122_spill] sm:$0xff]  ;;  %v9633_v58 = vld [vmem:[#allocation123_spill] sm:$0xff] }
 0x5f8   :  { %2567 = vmatpush1.msra.mxu0 %v9592_v60  ;;  %2638 = vmatpush1.msra.mxu1 %v9593_v61  ;;  %v9634_v60 = vld [vmem:[#allocation124_spill] sm:$0xff]  ;;  %v9635_v61 = vld [vmem:[#allocation125_spill] sm:$0xff] }
 0x5f9   :  { %2568 = vmatprep.subr.mxu0 %v9594_v62  ;;  %2639 = vmatprep.subr.mxu1 %v9595_v45  ;;  %v9636_v62 = vld [vmem:[#allocation126_spill] sm:$0xff]  ;;  %v9637_v45 = vld [vmem:[#allocation127_spill] sm:$0xff] }
 0x5fa   :  { %2569 = vmatpush1.msra.mxu0 %v9596_v3  ;;  %2640 = vmatpush1.msra.mxu1 %v9597_v46  ;;  %v9638_v3 = vld [vmem:[#allocation128_spill] sm:$0xff]  ;;  %v9639_v46 = vld [vmem:[#allocation129_spill] sm:$0xff] }
 0x5fb   :  { %2570 = vmatprep.subr.mxu0 %v9598_v47  ;;  %2641 = vmatprep.subr.mxu1 %v9599_v49  ;;  %v9640_v47 = vld [vmem:[#allocation130_spill] sm:$0xff]  ;;  %v9641_v49 = vld [vmem:[#allocation131_spill] sm:$0xff] }
 0x5fc   :  { %2571 = vmatpush2.msra.mxu0 %v9600_v8  ;;  %2642 = vmatpush2.msra.mxu1 %v9601_v11  ;;  %v9642_v8 = vld [vmem:[#allocation132_spill] sm:$0xff]  ;;  %v9643_v11 = vld [vmem:[#allocation133_spill] sm:$0xff] }
 0x5fd   :  { %2572 = vmatprep.subr.mxu0 %v9602_v59  ;;  %2643 = vmatprep.subr.mxu1 %v9603_v53  ;;  %v9644_v59 = vld [vmem:[#allocation134_spill] sm:$0xff]  ;;  %v9645_v53 = vld [vmem:[#allocation135_spill] sm:$0xff] }
 0x5fe   :  { %2573 = vmatpush2.msra.mxu0 %v9604_v16  ;;  %2644 = vmatpush2.msra.mxu1 %v9605_v14  ;;  %v9646_v16 = vld [vmem:[#allocation136_spill] sm:$0xff]  ;;  %v9647_v14 = vld [vmem:[#allocation137_spill] sm:$0xff] }
 0x5ff   :  { %2574 = vmatprep.subr.mxu0 %v9606_v21  ;;  %2645 = vmatprep.subr.mxu1 %v9607_v36  ;;  %v9648_v21 = vld [vmem:[#allocation138_spill] sm:$0xff]  ;;  %v9649_v36 = vld [vmem:[#allocation139_spill] sm:$0xff] }
 0x600   :  { %2575 = vmatpush2.msra.mxu0 %v9608_v19  ;;  %2646 = vmatpush2.msra.mxu1 %v9609_v2  ;;  %v9650_v19 = vld [vmem:[#allocation140_spill] sm:$0xff]  ;;  %v9651_v2 = vld [vmem:[#allocation141_spill] sm:$0xff] }
 0x601   :  { %2576 = vmatprep.subr.mxu0 %v9610_v52  ;;  %2647 = vmatprep.subr.mxu1 %v9611_v17  ;;  %v9652_v52 = vld [vmem:[#allocation142_spill] sm:$0xff]  ;;  %v9653_v17 = vld [vmem:[#allocation143_spill] sm:$0xff] }
 0x602   :  { %2577 = vmatpush2.msra.mxu0 %v9612_v18  ;;  %2648 = vmatpush2.msra.mxu1 %v9613_v0  ;;  %v9654_v18 = vld [vmem:[#allocation144_spill] sm:$0xff]  ;;  %v9655_v0 = vld [vmem:[#allocation145_spill] sm:$0xff] }
 0x603   :  { %2578 = vmatprep.subr.mxu0 %v9614_v51  ;;  %2649 = vmatprep.subr.mxu1 %v9615_v4  ;;  %v9656_v51 = vld [vmem:[#allocation146_spill] sm:$0xff]  ;;  %v9657_v4 = vld [vmem:[#allocation147_spill] sm:$0xff] }
 0x604   :  { %2579 = vmatpush2.msra.mxu0 %v9616_v34  ;;  %2650 = vmatpush2.msra.mxu1 %v9617_v32  ;;  %v9658_v34 = vld [vmem:[#allocation148_spill] sm:$0xff]  ;;  %v9659_v32 = vld [vmem:[#allocation149_spill] sm:$0xff] }
 0x605   :  { %2580 = vmatprep.subr.mxu0 %v9618_v30  ;;  %2651 = vmatprep.subr.mxu1 %v9619_v28  ;;  %v9660_v30 = vld [vmem:[#allocation150_spill] sm:$0xff]  ;;  %v9661_v28 = vld [vmem:[#allocation151_spill] sm:$0xff] }
 0x606   :  { %2581 = vmatpush2.msra.mxu0 %v9620_v54  ;;  %2652 = vmatpush2.msra.mxu1 %v9621_v55  ;;  %v7349_v54 = vld [vmem:[#allocation5 + $0x1e8] sm:$0xff]  ;;  %v7352_v55 = vld [vmem:[#allocation5 + $0x1f8] sm:$0xff] }
 0x607   :  { %2582 = vmatprep.subr.mxu0 %v9622_v43  ;;  %2653 = vmatprep.subr.mxu1 %v9623_v56  ;;  %v9662_v56 = vld [vmem:[#allocation22_spill] sm:$0xff] }
 0x608   :  { %2583 = vmatpush2.msra.mxu0 %v9624_v57  ;;  %2654 = vmatpush2.msra.mxu1 %v9625_v39 }
 0x609   :  { %2584 = vmatprep.subr.mxu0 %v9626_v38  ;;  %2655 = vmatprep.subr.mxu1 %v9627_v6  ;;  %v9663_v6 = vld [vmem:[#allocation23_spill] sm:$0xff] }
 0x60a   :  { %2585 = vmatpush2.msra.mxu0 %v9628_v37  ;;  %2656 = vmatpush2.msra.mxu1 %v9629_v5 }
 0x60b   :  { %2586 = vmatprep.subr.mxu0 %v9630_v27  ;;  %2657 = vmatprep.subr.mxu1 %v9631_v50 }
 0x60c   :  { %2587 = vmatpush2.msra.mxu0 %v9632_v13  ;;  %2658 = vmatpush2.msra.mxu1 %v9633_v58  ;;  %v9664_v13 = vld [vmem:[#allocation24_spill] sm:$0xff] }
 0x60d   :  { %2588 = vmatprep.subr.mxu0 %v9634_v60  ;;  %2659 = vmatprep.subr.mxu1 %v9635_v61 }
 0x60e   :  { %2589 = vmatpush2.msra.mxu0 %v9636_v62  ;;  %2660 = vmatpush2.msra.mxu1 %v9637_v45  ;;  %v9665_v62 = vld [vmem:[#allocation25_spill] sm:$0xff] }
 0x60f   :  { %2590 = vmatprep.subr.mxu0 %v9638_v3  ;;  %2661 = vmatprep.subr.mxu1 %v9639_v46 }
 0x610   :  { %2591 = vmatpush2.msra.mxu0 %v9640_v47  ;;  %2662 = vmatpush2.msra.mxu1 %v9641_v49 }
 0x611   :  { %2592 = vmatprep.subr.mxu0 %v9642_v8  ;;  %2663 = vmatprep.subr.mxu1 %v9643_v11 }
 0x612   :  { %2593 = vmatpush2.msra.mxu0 %v9644_v59  ;;  %2664 = vmatpush2.msra.mxu1 %v9645_v53  ;;  %v9666_v59 = vld [vmem:[#allocation172_spill] sm:$0xff] }
 0x613   :  { %2594 = vmatprep.subr.mxu0 %v9646_v16  ;;  %2665 = vmatprep.subr.mxu1 %v9647_v14 }
 0x614   :  { %2595 = vmatpush2.msra.mxu0 %v9648_v21  ;;  %2666 = vmatpush2.msra.mxu1 %v9649_v36 }
 0x615   :  { %2596 = vmatprep.subr.mxu0 %v9650_v19  ;;  %2667 = vmatprep.subr.mxu1 %v9651_v2  ;;  %v9667_v19 = vld [vmem:[#allocation174_spill] sm:$0xff] }
 0x616   :  { %2597 = vmatpush2.msra.mxu0 %v9652_v52  ;;  %2668 = vmatpush2.msra.mxu1 %v9653_v17 }
 0x617   :  { %2598 = vmatprep.subr.mxu0 %v9654_v18  ;;  %2669 = vmatprep.subr.mxu1 %v9655_v0 }
 0x618   :  { %2599 = vmatpush2.msra.mxu0 %v9656_v51  ;;  %2670 = vmatpush2.msra.mxu1 %v9657_v4 }
 0x619   :  { %2600 = vmatprep.subr.mxu0 %v9658_v34  ;;  %2671 = vmatprep.subr.mxu1 %v9659_v32  ;;  %v9668_v32 = vld [vmem:[#allocation169_spill] sm:$0xff] }
 0x61a   :  { %2601 = vmatpush2.msra.mxu0 %v9660_v30  ;;  %2672 = vmatpush2.msra.mxu1 %v9661_v28  ;;  %v9669_v28 = vld [vmem:[#allocation167_spill] sm:$0xff] }
 0x61b   :  { %2711 = vmatprep.subr.mxu0 %v7349_v54  ;;  %2782 = vmatprep.subr.mxu1 %v7352_v55 }
 0x679   :  { %v2261_v43 = vpop.f32.mrf.mxu0  ;;  %v2332_v5 = vpop.f32.mrf.mxu1 }
 0x67a   :  { %v2262_v57 = vadd.f32 %v2261_v43, %v9662_v56  ;;  %v2333_v45 = vadd.f32 %v2332_v5, %v9665_v62 }
 0x67b   :  { %v2263_v39 = vpop.f32.mrf.mxu0  ;;  %v2334_v50 = vpop.f32.mrf.mxu1 }
 0x67c   :  { %v3627_v38 = vmul.f32 -1.442695, %v2262_v57  ;;  %v2264_v37 = vadd.f32 %v2263_v39, %v9663_v6  ;;  %v2335_v58 = vadd.f32 %v2334_v50, %v9664_v13 }
 0x67e   :  { %3870 = vpow2.f32 %v3627_v38  ;;  %v3628_v27 = vmul.f32 -1.442695, %v2264_v37  ;;  %v3629_v60 = vmul.f32 -1.442695, %v2335_v58 }
 0x680   :  { %3872 = vpow2.f32 %v3628_v27 }
 0x681   :  { %3874 = vpow2.f32 %v3629_v60 }
 0x68b   :  { %v3871_v61 = vpop.eup %3870 }
 0x68c   :  { %v2340_v3 = vadd.f32 1.0, %v3871_v61 }
 0x68d   :  { %v3873_v46 = vpop.eup %3872 }
 0x68e   :  { %3876 = vrcp.f32 %v2340_v3  ;;  %v2346_v47 = vadd.f32 1.0, %v3873_v46  ;;  %v3875_v49 = vpop.eup %3874 }
 0x68f   :  { %3878 = vtanh.f32 %v2333_v45  ;;  %v2353_v18 = vadd.f32 1.0, %v3875_v49 }
 0x690   :  { %3880 = vrcp.f32 %v2346_v47 }
 0x69a   :  { %v2434_v8 = vpop.f32.mrf.mxu0  ;;  %v2505_v0 = vpop.f32.mrf.mxu1 }
 0x69b   :  { %v3877_v11 = vpop.eup %3876  ;;  %v2510_v53 = vadd.f32 %v2434_v8, %v9666_v59  ;;  %v2512_v43 = vadd.f32 %v2505_v0, %v9669_v28  ;;  %v7484_v0 = vld [vmem:[#allocation5 + $0x78] sm:$0xff]  ;;  %v7499_v28 = vld [vmem:[#allocation5 + $0x40] sm:$0xff] }
 0x69c   :  { %v3879_v16 = vpop.eup %3878  ;;  %v2436_v14 = vpop.f32.mrf.mxu0 }
 0x69d   :  { %v3881_v21 = vpop.eup %3880  ;;  %v3630_v36 = vmul.f32 -1.442695, %v2510_v53  ;;  %v2511_v2 = vadd.f32 %v2436_v14, %v9667_v19  ;;  %v2357_v52 = vmul.f32 %v3879_v16, %v3877_v11  ;;  %v2507_v34 = vpop.f32.mrf.mxu1  ;;  %v7380_v53 = vld [vmem:[#allocation5 + $0x1f0] sm:$0xff]  ;;  %v7392_v14 = vld [vmem:[#allocation5 + $0x1b8] sm:$0xff]  ;;  %v7469_v19 = vld [vmem:[#allocation5 + $0x88] sm:$0xff] }
 0x69e   :  { %v2356_v17 = vmul.f32 %v3881_v21, %v7102_v63  ;;  %v2513_v30 = vadd.f32 %v2507_v34, %v9668_v32  ;;  %v7388_v16 = vld [vmem:[#allocation5 + $0x1d0] sm:$0xff]  ;;  %v7457_v21 = vld [vmem:[#allocation5 + $0xa8] sm:$0xff] }
 0x69f   :  { %3882 = vpow2.f32 %v3630_v36  ;;  %v3631_v51 = vmul.f32 -1.442695, %v2511_v2  ;;  %v7466_v36 = vld [vmem:[#allocation5 + $0xb0] sm:$0xff]  ;;  %v7472_v2 = vld [vmem:[#allocation5 + $0x98] sm:$0xff]  ;;  %v7493_v32 = vld [vmem:[#allocation5 + $0x48] sm:$0xff] }
 0x6a0   :  { %v7362_v4 = vadd.f32 %v2357_v52, %v2356_v17  ;;  %v3632_v57 = vmul.f32 -1.442695, %v2513_v30  ;;  %v7475_v52 = vld [vmem:[#allocation5 + $0x80] sm:$0xff]  ;;  %v7478_v17 = vld [vmem:[#allocation5 + $0x90] sm:$0xff]  ;;  %v7496_v30 = vld [vmem:[#allocation5 + $0x58] sm:$0xff] }
 0x6a1   :  { %3884 = vpow2.f32 %v3631_v51  ;;  %v7487_v51 = vld [vmem:[#allocation5 + $0x60] sm:$0xff]  ;;  %v7490_v34 = vld [vmem:[#allocation5 + $0x70] sm:$0xff] }
 0x6a2   :  { %3886 = vrcp.f32 %v2353_v18  ;;  %v7481_v18 = vld [vmem:[#allocation5 + $0x68] sm:$0xff] }
 0x6a3   :  { %3888 = vtanh.f32 %v7362_v4 }
 0x6a4   :  { %3890 = vtanh.f32 %v2512_v43  ;;  %v7502_v43 = vld [vmem:[#allocation5 + $0x50] sm:$0xff] }
 0x6a5   :  { %3892 = vpow2.f32 %v3632_v57  ;;  %v7505_v57 = vld [vmem:[#allocation5 + $0x28] sm:$0xff] }
 0x6ac   :  { %v3883_v39 = vpop.eup %3882 }
 0x6ad   :  { %v2517_v38 = vadd.f32 1.0, %v3883_v39  ;;  %v7508_v39 = vld [vmem:[#allocation5 + $0x38] sm:$0xff] }
 0x6ae   :  { %v3885_v63 = vpop.eup %3884 }
 0x6af   :  { %v3887_v37 = vpop.eup %3886  ;;  %3894 = vrcp.f32 %v2517_v38  ;;  %v2523_v5 = vadd.f32 1.0, %v3885_v63  ;;  %v7511_v38 = vld [vmem:[#allocation5 + $0x20] sm:$0xff]  ;;  %v7514_v63 = vld [vmem:[#allocation5 + $0x30] sm:$0xff] }
 0x6b0   :  { %v3889_v27 = vpop.eup %3888 }
 0x6b1   :  { %3896 = vrcp.f32 %v2523_v5  ;;  %v7367_v50 = vmul.f32 %v3889_v27, %v3887_v37  ;;  %v3891_v58 = vpop.eup %3890  ;;  %v7517_v37 = vld [vmem:[#allocation5 + $0x8] sm:$0xff]  ;;  %v7520_v5 = vld [vmem:[#allocation5 + $0x18] sm:$0xff]  ;;  %v7523_v27 = vld [vmem:[#allocation5] sm:$0xff] }
 0x6b2   :  { %v3893_v60 = vpop.eup %3892  ;;  %9671 = vst [vmem:[#allocation17_spill] sm:$0xff] %v7523_v27 }
 0x6b3   :  { %9670 = vst [vmem:[#allocation19_spill] sm:$0xff] %v7367_v50  ;;  %2602 = vmatprep.mubr.f32.mxu0 %v7367_v50  ;;  %2673 = vmatprep.mubr.f32.mxu1 %v7367_v50  ;;  %v2530_v46 = vadd.f32 1.0, %v3893_v60  ;;  %v7533_v60 = vld [vmem:[#allocation8 + $0x1e8] sm:$0xff]  ;;  %v7560_v50 = vld [vmem:[#allocation8 + $0x1b8] sm:$0xff] }
 0x6b4   :  { %9673 = vst [vmem:[#allocation154_spill] sm:$0xff] %v7533_v60  ;;  %9682 = vst [vmem:[#allocation152_spill] sm:$0xff] %v7560_v50 }
 0x6b5   :  { %3898 = vrcp.f32 %v2530_v46  ;;  %v7545_v46 = vld [vmem:[#allocation8 + $0x1c8] sm:$0xff] }
 0x6b6   :  { %9677 = vst [vmem:[#allocation159_spill] sm:$0xff] %v7545_v46 }
 0x6bc   :  { %v3895_v61 = vpop.eup %3894 }
 0x6bd   :  { %v2534_v45 = vmul.f32 %v3895_v61, %v3891_v58  ;;  %v7527_v58 = vld [vmem:[#allocation5 + $0x10] sm:$0xff]  ;;  %v7536_v61 = vld [vmem:[#allocation8 + $0x1f8] sm:$0xff] }
 0x6be   :  { %v3897_v3 = vpop.eup %3896  ;;  %9672 = vst [vmem:[#allocation18_spill] sm:$0xff] %v7527_v58  ;;  %9674 = vst [vmem:[#allocation164_spill] sm:$0xff] %v7536_v61 }
 0x6bf   :  { %v2533_v47 = vmul.f32 %v3897_v3, %v7112_v20  ;;  %v7384_v20 = vld [vmem:[#allocation5 + $0x1d8] sm:$0xff]  ;;  %v7542_v3 = vld [vmem:[#allocation8 + $0x1f0] sm:$0xff] }
 0x6c0   :  { %9676 = vst [vmem:[#allocation161_spill] sm:$0xff] %v7542_v3 }
 0x6c1   :  { %v7372_v49 = vadd.f32 %v2534_v45, %v2533_v47  ;;  %v7539_v45 = vld [vmem:[#allocation8 + $0x1e0] sm:$0xff]  ;;  %v7548_v47 = vld [vmem:[#allocation8 + $0x1d8] sm:$0xff] }
 0x6c2   :  { %v3899_v8 = vpop.eup %3898  ;;  %9675 = vst [vmem:[#allocation166_spill] sm:$0xff] %v7539_v45  ;;  %9678 = vst [vmem:[#allocation168_spill] sm:$0xff] %v7548_v47 }
 0x6c3   :  { %3900 = vtanh.f32 %v7372_v49 }
 0x6d0   :  { %v3901_v11 = vpop.eup %3900 }
 0x6d1   :  { %v7375_v59 = vmul.f32 %v3901_v11, %v3899_v8  ;;  %v7551_v8 = vld [vmem:[#allocation8 + $0x1c0] sm:$0xff]  ;;  %v7554_v11 = vld [vmem:[#allocation8 + $0x1d0] sm:$0xff] }
 0x6d2   :  { %9679 = vst [vmem:[#allocation170_spill] sm:$0xff] %v7551_v8  ;;  %9680 = vst [vmem:[#allocation165_spill] sm:$0xff] %v7554_v11 }
 0x6d3   :  { %2603 = vmatmul.mubr.f32.vlgmr.msra.gmra.mxu0 %v7375_v59  ;;  %2674 = vmatmul.mubr.f32.vlgmr.msra.gmra.mxu1 %v7375_v59 }
 0x6d4   :  { %2712 = vmatpush1.msra.mxu0 %v7119_v7  ;;  %2783 = vmatpush1.msra.mxu1 %v7380_v53  ;;  %v7396_v7 = vld [vmem:[#allocation5 + $0x1b0] sm:$0xff] }
 0x6d5   :  { %2713 = vmatprep.subr.mxu0 %v7123_v29  ;;  %2784 = vmatprep.subr.mxu1 %v7384_v20  ;;  %v7400_v29 = vld [vmem:[#allocation5 + $0x198] sm:$0xff] }
 0x6d6   :  { %2714 = vmatpush1.msra.mxu0 %v7127_v23  ;;  %2785 = vmatpush1.msra.mxu1 %v7388_v16  ;;  %v7404_v23 = vld [vmem:[#allocation5 + $0x190] sm:$0xff] }
 0x6d7   :  { %2715 = vmatprep.subr.mxu0 %v7131_v1  ;;  %2786 = vmatprep.subr.mxu1 %v7392_v14  ;;  %v7408_v1 = vld [vmem:[#allocation5 + $0x178] sm:$0xff] }
 0x6d8   :  { %2716 = vmatpush1.msra.mxu0 %v7135_v24  ;;  %2787 = vmatpush1.msra.mxu1 %v7396_v7  ;;  %v7412_v24 = vld [vmem:[#allocation5 + $0x170] sm:$0xff] }
 0x6d9   :  { %2717 = vmatprep.subr.mxu0 %v7139_v15  ;;  %2788 = vmatprep.subr.mxu1 %v7400_v29  ;;  %v7416_v15 = vld [vmem:[#allocation5 + $0x158] sm:$0xff] }
 0x6da   :  { %2718 = vmatpush1.msra.mxu0 %v7143_v26  ;;  %2789 = vmatpush1.msra.mxu1 %v7404_v23  ;;  %v7420_v26 = vld [vmem:[#allocation5 + $0x150] sm:$0xff] }
 0x6db   :  { %2719 = vmatprep.subr.mxu0 %v7147_v22  ;;  %2790 = vmatprep.subr.mxu1 %v7408_v1  ;;  %v7424_v22 = vld [vmem:[#allocation5 + $0x138] sm:$0xff] }
 0x6dc   :  { %2720 = vmatpush1.msra.mxu0 %v7151_v35  ;;  %2791 = vmatpush1.msra.mxu1 %v7412_v24  ;;  %v7428_v35 = vld [vmem:[#allocation5 + $0x130] sm:$0xff] }
 0x6dd   :  { %2721 = vmatprep.subr.mxu0 %v7155_v10  ;;  %2792 = vmatprep.subr.mxu1 %v7416_v15  ;;  %v7432_v10 = vld [vmem:[#allocation5 + $0x118] sm:$0xff] }
 0x6de   :  { %2722 = vmatpush1.msra.mxu0 %v7159_v25  ;;  %2793 = vmatpush1.msra.mxu1 %v7420_v26  ;;  %v7436_v25 = vld [vmem:[#allocation5 + $0x110] sm:$0xff] }
 0x6df   :  { %2723 = vmatprep.subr.mxu0 %v7163_v31  ;;  %2794 = vmatprep.subr.mxu1 %v7424_v22  ;;  %v7440_v31 = vld [vmem:[#allocation5 + $0xf8] sm:$0xff] }
 0x6e0   :  { %2724 = vmatpush1.msra.mxu0 %v7167_v9  ;;  %2795 = vmatpush1.msra.mxu1 %v7428_v35  ;;  %v7444_v9 = vld [vmem:[#allocation5 + $0xf0] sm:$0xff] }
 0x6e1   :  { %2725 = vmatprep.subr.mxu0 %v7171_v33  ;;  %2796 = vmatprep.subr.mxu1 %v7432_v10  ;;  %v7448_v33 = vld [vmem:[#allocation5 + $0xd8] sm:$0xff] }
 0x6e2   :  { %2726 = vmatpush1.msra.mxu0 %v7175_v41  ;;  %2797 = vmatpush1.msra.mxu1 %v7436_v25  ;;  %v7451_v41 = vld [vmem:[#allocation5 + $0xc0] sm:$0xff] }
 0x6e3   :  { %2727 = vmatprep.subr.mxu0 %v7179_v48  ;;  %2798 = vmatprep.subr.mxu1 %v7440_v31  ;;  %v7454_v48 = vld [vmem:[#allocation5 + $0xd0] sm:$0xff] }
 0x6e4   :  { %2728 = vmatpush1.msra.mxu0 %v7183_v42  ;;  %2799 = vmatpush1.msra.mxu1 %v7444_v9  ;;  %v7460_v42 = vld [vmem:[#allocation5 + $0xb8] sm:$0xff] }
 0x6e5   :  { %2729 = vmatprep.subr.mxu0 %v7187_v44  ;;  %2800 = vmatprep.subr.mxu1 %v7448_v33  ;;  %v7463_v44 = vld [vmem:[#allocation5 + $0xa0] sm:$0xff] }
 0x6e6   :  { %2730 = vmatpush1.msra.mxu0 %v7451_v41  ;;  %2801 = vmatpush1.msra.mxu1 %v7454_v48 }
 0x6e7   :  { %2731 = vmatprep.subr.mxu0 %v7457_v21  ;;  %2802 = vmatprep.subr.mxu1 %v7460_v42 }
 0x6e8   :  { %2732 = vmatpush1.msra.mxu0 %v7463_v44  ;;  %2803 = vmatpush1.msra.mxu1 %v7466_v36 }
 0x6e9   :  { %2733 = vmatprep.subr.mxu0 %v7469_v19  ;;  %2804 = vmatprep.subr.mxu1 %v7472_v2 }
 0x6ea   :  { %2734 = vmatpush1.msra.mxu0 %v7475_v52  ;;  %2805 = vmatpush1.msra.mxu1 %v7478_v17 }
 0x6eb   :  { %2735 = vmatprep.subr.mxu0 %v7481_v18  ;;  %2806 = vmatprep.subr.mxu1 %v7484_v0 }
 0x6ec   :  { %2736 = vmatpush1.msra.mxu0 %v7487_v51  ;;  %2807 = vmatpush1.msra.mxu1 %v7490_v34 }
 0x6ed   :  { %2737 = vmatprep.subr.mxu0 %v7493_v32  ;;  %2808 = vmatprep.subr.mxu1 %v7496_v30 }
 0x6ee   :  { %2738 = vmatpush1.msra.mxu0 %v7499_v28  ;;  %2809 = vmatpush1.msra.mxu1 %v7502_v43 }
 0x6ef   :  { %2739 = vmatprep.subr.mxu0 %v7505_v57  ;;  %2810 = vmatprep.subr.mxu1 %v7508_v39 }
 0x6f0   :  { %2740 = vmatpush1.msra.mxu0 %v7511_v38  ;;  %2811 = vmatpush1.msra.mxu1 %v7514_v63 }
 0x6f1   :  { %2741 = vmatprep.subr.mxu0 %v7517_v37  ;;  %2812 = vmatprep.subr.mxu1 %v7520_v5 }
 0x6f2   :  { %2742 = vmatpush1.msra.mxu0 %v7523_v27  ;;  %2775 = vmatprep.mubr.f32.mxu0 %v9532_v12 }
 0x6f3   :  { %2813 = vmatpush1.msra.mxu1 %v7527_v58  ;;  %2846 = vmatprep.mubr.f32.mxu1 %v9532_v12 }
 0x6f4   :  { %2776 = vmatmul.mubr.f32.vlgmr.msra.gmra.mxu0 %v7375_v59  ;;  %2847 = vmatmul.mubr.f32.vlgmr.msra.gmra.mxu1 %v7375_v59  ;;  %v7557_v59 = vld [vmem:[#allocation8 + $0x1a8] sm:$0xff] }
 0x6f5   :  { %2881 = vmatprep.subr.mxu0 %v7533_v60  ;;  %2952 = vmatprep.subr.mxu1 %v7536_v61  ;;  %9681 = vst [vmem:[#allocation163_spill] sm:$0xff] %v7557_v59 }
 0x6f6   :  { %2882 = vmatpush1.msra.mxu0 %v7539_v45  ;;  %2953 = vmatpush1.msra.mxu1 %v7542_v3 }
 0x6f7   :  { %2883 = vmatprep.subr.mxu0 %v7545_v46  ;;  %2954 = vmatprep.subr.mxu1 %v7548_v47  ;;  %v7566_v47 = vld [vmem:[#allocation8 + $0x1b0] sm:$0xff] }
 0x6f8   :  { %2884 = vmatpush1.msra.mxu0 %v7551_v8  ;;  %2955 = vmatpush1.msra.mxu1 %v7554_v11  ;;  %9684 = vst [vmem:[#allocation162_spill] sm:$0xff] %v7566_v47  ;;  %v7569_v8 = vld [vmem:[#allocation8 + $0x188] sm:$0xff]  ;;  %v7572_v11 = vld [vmem:[#allocation8 + $0x198] sm:$0xff] }
 0x6f9   :  { %2885 = vmatprep.subr.mxu0 %v7557_v59  ;;  %2956 = vmatprep.subr.mxu1 %v7560_v50  ;;  %9685 = vst [vmem:[#allocation157_spill] sm:$0xff] %v7569_v8  ;;  %9686 = vst [vmem:[#allocation155_spill] sm:$0xff] %v7572_v11  ;;  %v7575_v59 = vld [vmem:[#allocation8 + $0x180] sm:$0xff]  ;;  %v7578_v50 = vld [vmem:[#allocation8 + $0x190] sm:$0xff] }
 0x6fa   :  { %2886 = vmatpush1.msra.mxu0 %v7563_v40  ;;  %2957 = vmatpush1.msra.mxu1 %v7566_v47  ;;  %9687 = vst [vmem:[#allocation27_spill] sm:$0xff] %v7575_v59  ;;  %9688 = vst [vmem:[#allocation28_spill] sm:$0xff] %v7578_v50  ;;  %v7581_v40 = vld [vmem:[#allocation8 + $0x168] sm:$0xff]  ;;  %v7584_v47 = vld [vmem:[#allocation8 + $0x178] sm:$0xff] }
 0x6fb   :  { %2887 = vmatprep.subr.mxu0 %v7569_v8  ;;  %2958 = vmatprep.subr.mxu1 %v7572_v11  ;;  %9689 = vst [vmem:[#allocation29_spill] sm:$0xff] %v7581_v40  ;;  %9690 = vst [vmem:[#allocation30_spill] sm:$0xff] %v7584_v47  ;;  %v7587_v8 = vld [vmem:[#allocation8 + $0x160] sm:$0xff]  ;;  %v7590_v11 = vld [vmem:[#allocation8 + $0x170] sm:$0xff] }
 0x6fc   :  { %2888 = vmatpush1.msra.mxu0 %v7575_v59  ;;  %2959 = vmatpush1.msra.mxu1 %v7578_v50  ;;  %9691 = vst [vmem:[#allocation31_spill] sm:$0xff] %v7587_v8  ;;  %9692 = vst [vmem:[#allocation32_spill] sm:$0xff] %v7590_v11  ;;  %v7593_v59 = vld [vmem:[#allocation8 + $0x148] sm:$0xff]  ;;  %v7596_v50 = vld [vmem:[#allocation8 + $0x158] sm:$0xff] }
 0x6fd   :  { %2889 = vmatprep.subr.mxu0 %v7581_v40  ;;  %2960 = vmatprep.subr.mxu1 %v7584_v47  ;;  %9693 = vst [vmem:[#allocation33_spill] sm:$0xff] %v7593_v59  ;;  %9694 = vst [vmem:[#allocation34_spill] sm:$0xff] %v7596_v50  ;;  %v7599_v40 = vld [vmem:[#allocation8 + $0x140] sm:$0xff]  ;;  %v7602_v47 = vld [vmem:[#allocation8 + $0x150] sm:$0xff] }
 0x6fe   :  { %2890 = vmatpush1.msra.mxu0 %v7587_v8  ;;  %2961 = vmatpush1.msra.mxu1 %v7590_v11  ;;  %9695 = vst [vmem:[#allocation35_spill] sm:$0xff] %v7599_v40  ;;  %9696 = vst [vmem:[#allocation36_spill] sm:$0xff] %v7602_v47  ;;  %v7605_v8 = vld [vmem:[#allocation8 + $0x128] sm:$0xff]  ;;  %v7608_v11 = vld [vmem:[#allocation8 + $0x138] sm:$0xff] }
 0x6ff   :  { %2891 = vmatprep.subr.mxu0 %v7593_v59  ;;  %2962 = vmatprep.subr.mxu1 %v7596_v50  ;;  %9697 = vst [vmem:[#allocation37_spill] sm:$0xff] %v7605_v8  ;;  %9698 = vst [vmem:[#allocation38_spill] sm:$0xff] %v7608_v11  ;;  %v7611_v59 = vld [vmem:[#allocation8 + $0x120] sm:$0xff]  ;;  %v7614_v50 = vld [vmem:[#allocation8 + $0x130] sm:$0xff] }
 0x700   :  { %2892 = vmatpush1.msra.mxu0 %v7599_v40  ;;  %2963 = vmatpush1.msra.mxu1 %v7602_v47  ;;  %9699 = vst [vmem:[#allocation39_spill] sm:$0xff] %v7611_v59  ;;  %9700 = vst [vmem:[#allocation40_spill] sm:$0xff] %v7614_v50  ;;  %v7617_v40 = vld [vmem:[#allocation8 + $0x108] sm:$0xff]  ;;  %v7620_v47 = vld [vmem:[#allocation8 + $0x118] sm:$0xff] }
 0x701   :  { %2893 = vmatprep.subr.mxu0 %v7605_v8  ;;  %2964 = vmatprep.subr.mxu1 %v7608_v11  ;;  %9701 = vst [vmem:[#allocation41_spill] sm:$0xff] %v7617_v40  ;;  %9702 = vst [vmem:[#allocation42_spill] sm:$0xff] %v7620_v47  ;;  %v7623_v8 = vld [vmem:[#allocation8 + $0x100] sm:$0xff]  ;;  %v7626_v11 = vld [vmem:[#allocation8 + $0x110] sm:$0xff] }
 0x702   :  { %2894 = vmatpush1.msra.mxu0 %v7611_v59  ;;  %2965 = vmatpush1.msra.mxu1 %v7614_v50  ;;  %9703 = vst [vmem:[#allocation43_spill] sm:$0xff] %v7623_v8  ;;  %9704 = vst [vmem:[#allocation44_spill] sm:$0xff] %v7626_v11  ;;  %v7629_v59 = vld [vmem:[#allocation8 + $0xe8] sm:$0xff]  ;;  %v7632_v50 = vld [vmem:[#allocation8 + $0xf8] sm:$0xff] }
 0x703   :  { %2895 = vmatprep.subr.mxu0 %v7617_v40  ;;  %2966 = vmatprep.subr.mxu1 %v7620_v47  ;;  %9705 = vst [vmem:[#allocation45_spill] sm:$0xff] %v7629_v59  ;;  %9706 = vst [vmem:[#allocation46_spill] sm:$0xff] %v7632_v50  ;;  %v7635_v40 = vld [vmem:[#allocation8 + $0xe0] sm:$0xff]  ;;  %v7638_v47 = vld [vmem:[#allocation8 + $0xf0] sm:$0xff] }
 0x704   :  { %2896 = vmatpush1.msra.mxu0 %v7623_v8  ;;  %2967 = vmatpush1.msra.mxu1 %v7626_v11  ;;  %9707 = vst [vmem:[#allocation47_spill] sm:$0xff] %v7635_v40  ;;  %9708 = vst [vmem:[#allocation48_spill] sm:$0xff] %v7638_v47  ;;  %v7641_v8 = vld [vmem:[#allocation8 + $0xc8] sm:$0xff]  ;;  %v7644_v11 = vld [vmem:[#allocation8 + $0xd8] sm:$0xff] }
 0x705   :  { %2897 = vmatprep.subr.mxu0 %v7629_v59  ;;  %2968 = vmatprep.subr.mxu1 %v7632_v50  ;;  %9709 = vst [vmem:[#allocation49_spill] sm:$0xff] %v7641_v8  ;;  %9710 = vst [vmem:[#allocation50_spill] sm:$0xff] %v7644_v11  ;;  %v7647_v59 = vld [vmem:[#allocation8 + $0xc0] sm:$0xff]  ;;  %v7650_v50 = vld [vmem:[#allocation8 + $0xd0] sm:$0xff] }
 0x706   :  { %2898 = vmatpush1.msra.mxu0 %v7635_v40  ;;  %2969 = vmatpush1.msra.mxu1 %v7638_v47  ;;  %9711 = vst [vmem:[#allocation51_spill] sm:$0xff] %v7647_v59  ;;  %9712 = vst [vmem:[#allocation52_spill] sm:$0xff] %v7650_v50  ;;  %v7653_v40 = vld [vmem:[#allocation8 + $0xa8] sm:$0xff]  ;;  %v7656_v47 = vld [vmem:[#allocation8 + $0xb8] sm:$0xff] }
 0x707   :  { %2899 = vmatprep.subr.mxu0 %v7641_v8  ;;  %2970 = vmatprep.subr.mxu1 %v7644_v11  ;;  %9713 = vst [vmem:[#allocation53_spill] sm:$0xff] %v7653_v40  ;;  %9714 = vst [vmem:[#allocation54_spill] sm:$0xff] %v7656_v47  ;;  %v7659_v8 = vld [vmem:[#allocation8 + $0xa0] sm:$0xff]  ;;  %v7662_v11 = vld [vmem:[#allocation8 + $0xb0] sm:$0xff] }
 0x708   :  { %2900 = vmatpush1.msra.mxu0 %v7647_v59  ;;  %2971 = vmatpush1.msra.mxu1 %v7650_v50  ;;  %9715 = vst [vmem:[#allocation55_spill] sm:$0xff] %v7659_v8  ;;  %9716 = vst [vmem:[#allocation56_spill] sm:$0xff] %v7662_v11  ;;  %v7665_v59 = vld [vmem:[#allocation8 + $0x88] sm:$0xff]  ;;  %v7668_v50 = vld [vmem:[#allocation8 + $0x98] sm:$0xff] }
 0x709   :  { %2901 = vmatprep.subr.mxu0 %v7653_v40  ;;  %2972 = vmatprep.subr.mxu1 %v7656_v47  ;;  %9717 = vst [vmem:[#allocation57_spill] sm:$0xff] %v7665_v59  ;;  %9718 = vst [vmem:[#allocation58_spill] sm:$0xff] %v7668_v50  ;;  %v7671_v40 = vld [vmem:[#allocation8 + $0x80] sm:$0xff]  ;;  %v7674_v47 = vld [vmem:[#allocation8 + $0x90] sm:$0xff] }
 0x70a   :  { %2902 = vmatpush1.msra.mxu0 %v7659_v8  ;;  %2973 = vmatpush1.msra.mxu1 %v7662_v11  ;;  %9719 = vst [vmem:[#allocation59_spill] sm:$0xff] %v7671_v40  ;;  %9720 = vst [vmem:[#allocation60_spill] sm:$0xff] %v7674_v47  ;;  %v7677_v8 = vld [vmem:[#allocation8 + $0x68] sm:$0xff]  ;;  %v7680_v11 = vld [vmem:[#allocation8 + $0x78] sm:$0xff] }
 0x70b   :  { %2903 = vmatprep.subr.mxu0 %v7665_v59  ;;  %2974 = vmatprep.subr.mxu1 %v7668_v50  ;;  %9721 = vst [vmem:[#allocation61_spill] sm:$0xff] %v7677_v8  ;;  %9722 = vst [vmem:[#allocation62_spill] sm:$0xff] %v7680_v11  ;;  %v7683_v59 = vld [vmem:[#allocation8 + $0x60] sm:$0xff]  ;;  %v7686_v50 = vld [vmem:[#allocation8 + $0x70] sm:$0xff] }
 0x70c   :  { %2904 = vmatpush1.msra.mxu0 %v7671_v40  ;;  %2975 = vmatpush1.msra.mxu1 %v7674_v47  ;;  %9723 = vst [vmem:[#allocation63_spill] sm:$0xff] %v7683_v59  ;;  %9724 = vst [vmem:[#allocation64_spill] sm:$0xff] %v7686_v50  ;;  %v7689_v40 = vld [vmem:[#allocation8 + $0x48] sm:$0xff]  ;;  %v7692_v47 = vld [vmem:[#allocation8 + $0x58] sm:$0xff] }
 0x70d   :  { %2905 = vmatprep.subr.mxu0 %v7677_v8  ;;  %2976 = vmatprep.subr.mxu1 %v7680_v11  ;;  %9725 = vst [vmem:[#allocation65_spill] sm:$0xff] %v7689_v40  ;;  %9726 = vst [vmem:[#allocation66_spill] sm:$0xff] %v7692_v47  ;;  %v7695_v8 = vld [vmem:[#allocation8 + $0x40] sm:$0xff]  ;;  %v7698_v11 = vld [vmem:[#allocation8 + $0x50] sm:$0xff] }
 0x70e   :  { %2906 = vmatpush1.msra.mxu0 %v7683_v59  ;;  %2977 = vmatpush1.msra.mxu1 %v7686_v50  ;;  %9727 = vst [vmem:[#allocation67_spill] sm:$0xff] %v7695_v8  ;;  %9728 = vst [vmem:[#allocation68_spill] sm:$0xff] %v7698_v11  ;;  %v7701_v59 = vld [vmem:[#allocation8 + $0x28] sm:$0xff]  ;;  %v7704_v50 = vld [vmem:[#allocation8 + $0x38] sm:$0xff] }
 0x70f   :  { %2907 = vmatprep.subr.mxu0 %v7689_v40  ;;  %2978 = vmatprep.subr.mxu1 %v7692_v47  ;;  %9729 = vst [vmem:[#allocation69_spill] sm:$0xff] %v7701_v59  ;;  %9730 = vst [vmem:[#allocation70_spill] sm:$0xff] %v7704_v50  ;;  %v7707_v40 = vld [vmem:[#allocation8 + $0x20] sm:$0xff]  ;;  %v7710_v47 = vld [vmem:[#allocation8 + $0x30] sm:$0xff] }
 0x710   :  { %2908 = vmatpush1.msra.mxu0 %v7695_v8  ;;  %2979 = vmatpush1.msra.mxu1 %v7698_v11  ;;  %9731 = vst [vmem:[#allocation71_spill] sm:$0xff] %v7707_v40  ;;  %9732 = vst [vmem:[#allocation72_spill] sm:$0xff] %v7710_v47  ;;  %v7713_v8 = vld [vmem:[#allocation8 + $0x8] sm:$0xff]  ;;  %v7716_v11 = vld [vmem:[#allocation8 + $0x18] sm:$0xff] }
 0x711   :  { %2909 = vmatprep.subr.mxu0 %v7701_v59  ;;  %2980 = vmatprep.subr.mxu1 %v7704_v50  ;;  %9733 = vst [vmem:[#allocation73_spill] sm:$0xff] %v7713_v8  ;;  %9734 = vst [vmem:[#allocation74_spill] sm:$0xff] %v7716_v11  ;;  %v7719_v59 = vld [vmem:[#allocation8] sm:$0xff]  ;;  %v7722_v50 = vld [vmem:[#allocation8 + $0x10] sm:$0xff] }
 0x712   :  { %2910 = vmatpush1.msra.mxu0 %v7707_v40  ;;  %2981 = vmatpush1.msra.mxu1 %v7710_v47  ;;  %9735 = vst [vmem:[#allocation75_spill] sm:$0xff] %v7719_v59  ;;  %9736 = vst [vmem:[#allocation76_spill] sm:$0xff] %v7722_v50  ;;  %v7725_v40 = vld [vmem:[#allocation8 + $0x3e8] sm:$0xff]  ;;  %v7728_v47 = vld [vmem:[#allocation8 + $0x3f8] sm:$0xff] }
 0x713   :  { %2911 = vmatprep.subr.mxu0 %v7713_v8  ;;  %2982 = vmatprep.subr.mxu1 %v7716_v11  ;;  %9737 = vst [vmem:[#allocation77_spill] sm:$0xff] %v7725_v40  ;;  %9738 = vst [vmem:[#allocation78_spill] sm:$0xff] %v7728_v47  ;;  %v7731_v8 = vld [vmem:[#allocation8 + $0x3e0] sm:$0xff]  ;;  %v7734_v11 = vld [vmem:[#allocation8 + $0x3f0] sm:$0xff] }
 0x714   :  { %2912 = vmatpush1.msra.mxu0 %v7719_v59  ;;  %2983 = vmatpush1.msra.mxu1 %v7722_v50  ;;  %9739 = vst [vmem:[#allocation79_spill] sm:$0xff] %v7731_v8  ;;  %9740 = vst [vmem:[#allocation80_spill] sm:$0xff] %v7734_v11  ;;  %v7737_v59 = vld [vmem:[#allocation8 + $0x3c8] sm:$0xff]  ;;  %v7740_v50 = vld [vmem:[#allocation8 + $0x3d8] sm:$0xff] }
 0x715   :  { %2913 = vmatprep.subr.mxu0 %v7725_v40  ;;  %2984 = vmatprep.subr.mxu1 %v7728_v47  ;;  %9741 = vst [vmem:[#allocation81_spill] sm:$0xff] %v7737_v59  ;;  %9742 = vst [vmem:[#allocation82_spill] sm:$0xff] %v7740_v50  ;;  %v7743_v40 = vld [vmem:[#allocation8 + $0x3c0] sm:$0xff]  ;;  %v7746_v47 = vld [vmem:[#allocation8 + $0x3d0] sm:$0xff] }
 0x716   :  { %2914 = vmatpush2.msra.mxu0 %v7731_v8  ;;  %2985 = vmatpush2.msra.mxu1 %v7734_v11  ;;  %9743 = vst [vmem:[#allocation83_spill] sm:$0xff] %v7743_v40  ;;  %9744 = vst [vmem:[#allocation84_spill] sm:$0xff] %v7746_v47  ;;  %v7749_v8 = vld [vmem:[#allocation8 + $0x3a8] sm:$0xff]  ;;  %v7752_v11 = vld [vmem:[#allocation8 + $0x3b8] sm:$0xff] }
 0x717   :  { %2915 = vmatprep.subr.mxu0 %v7737_v59  ;;  %2986 = vmatprep.subr.mxu1 %v7740_v50  ;;  %9745 = vst [vmem:[#allocation85_spill] sm:$0xff] %v7749_v8  ;;  %9746 = vst [vmem:[#allocation86_spill] sm:$0xff] %v7752_v11  ;;  %v7755_v59 = vld [vmem:[#allocation8 + $0x3a0] sm:$0xff]  ;;  %v7758_v50 = vld [vmem:[#allocation8 + $0x3b0] sm:$0xff] }
 0x718   :  { %2916 = vmatpush2.msra.mxu0 %v7743_v40  ;;  %2987 = vmatpush2.msra.mxu1 %v7746_v47  ;;  %9747 = vst [vmem:[#allocation87_spill] sm:$0xff] %v7755_v59  ;;  %9748 = vst [vmem:[#allocation88_spill] sm:$0xff] %v7758_v50  ;;  %v7761_v40 = vld [vmem:[#allocation8 + $0x388] sm:$0xff]  ;;  %v7764_v47 = vld [vmem:[#allocation8 + $0x398] sm:$0xff] }
 0x719   :  { %2917 = vmatprep.subr.mxu0 %v7749_v8  ;;  %2988 = vmatprep.subr.mxu1 %v7752_v11  ;;  %9749 = vst [vmem:[#allocation89_spill] sm:$0xff] %v7761_v40  ;;  %9750 = vst [vmem:[#allocation90_spill] sm:$0xff] %v7764_v47  ;;  %v7767_v8 = vld [vmem:[#allocation8 + $0x380] sm:$0xff]  ;;  %v7770_v11 = vld [vmem:[#allocation8 + $0x390] sm:$0xff] }
 0x71a   :  { %2918 = vmatpush2.msra.mxu0 %v7755_v59  ;;  %2989 = vmatpush2.msra.mxu1 %v7758_v50  ;;  %9751 = vst [vmem:[#allocation91_spill] sm:$0xff] %v7767_v8  ;;  %9752 = vst [vmem:[#allocation92_spill] sm:$0xff] %v7770_v11  ;;  %v7773_v59 = vld [vmem:[#allocation8 + $0x368] sm:$0xff]  ;;  %v7776_v50 = vld [vmem:[#allocation8 + $0x378] sm:$0xff] }
 0x71b   :  { %2919 = vmatprep.subr.mxu0 %v7761_v40  ;;  %2990 = vmatprep.subr.mxu1 %v7764_v47  ;;  %9753 = vst [vmem:[#allocation93_spill] sm:$0xff] %v7773_v59  ;;  %9754 = vst [vmem:[#allocation94_spill] sm:$0xff] %v7776_v50  ;;  %v7779_v40 = vld [vmem:[#allocation8 + $0x360] sm:$0xff]  ;;  %v7782_v47 = vld [vmem:[#allocation8 + $0x370] sm:$0xff] }
 0x71c   :  { %2920 = vmatpush2.msra.mxu0 %v7767_v8  ;;  %2991 = vmatpush2.msra.mxu1 %v7770_v11  ;;  %9755 = vst [vmem:[#allocation95_spill] sm:$0xff] %v7779_v40  ;;  %9756 = vst [vmem:[#allocation96_spill] sm:$0xff] %v7782_v47  ;;  %v7785_v8 = vld [vmem:[#allocation8 + $0x348] sm:$0xff]  ;;  %v7788_v11 = vld [vmem:[#allocation8 + $0x358] sm:$0xff] }
 0x71d   :  { %2921 = vmatprep.subr.mxu0 %v7773_v59  ;;  %2992 = vmatprep.subr.mxu1 %v7776_v50  ;;  %9757 = vst [vmem:[#allocation97_spill] sm:$0xff] %v7785_v8  ;;  %9758 = vst [vmem:[#allocation98_spill] sm:$0xff] %v7788_v11  ;;  %v7791_v59 = vld [vmem:[#allocation8 + $0x340] sm:$0xff]  ;;  %v7794_v50 = vld [vmem:[#allocation8 + $0x350] sm:$0xff] }
 0x71e   :  { %2922 = vmatpush2.msra.mxu0 %v7779_v40  ;;  %2993 = vmatpush2.msra.mxu1 %v7782_v47  ;;  %9759 = vst [vmem:[#allocation99_spill] sm:$0xff] %v7791_v59  ;;  %9760 = vst [vmem:[#allocation100_spill] sm:$0xff] %v7794_v50  ;;  %v7797_v40 = vld [vmem:[#allocation8 + $0x328] sm:$0xff]  ;;  %v7800_v47 = vld [vmem:[#allocation8 + $0x338] sm:$0xff] }
 0x71f   :  { %2923 = vmatprep.subr.mxu0 %v7785_v8  ;;  %2994 = vmatprep.subr.mxu1 %v7788_v11  ;;  %9761 = vst [vmem:[#allocation101_spill] sm:$0xff] %v7797_v40  ;;  %9762 = vst [vmem:[#allocation102_spill] sm:$0xff] %v7800_v47  ;;  %v7803_v8 = vld [vmem:[#allocation8 + $0x320] sm:$0xff]  ;;  %v7806_v11 = vld [vmem:[#allocation8 + $0x330] sm:$0xff] }
 0x720   :  { %2924 = vmatpush2.msra.mxu0 %v7791_v59  ;;  %2995 = vmatpush2.msra.mxu1 %v7794_v50  ;;  %9763 = vst [vmem:[#allocation103_spill] sm:$0xff] %v7803_v8  ;;  %9764 = vst [vmem:[#allocation104_spill] sm:$0xff] %v7806_v11  ;;  %v7809_v59 = vld [vmem:[#allocation8 + $0x308] sm:$0xff]  ;;  %v7812_v50 = vld [vmem:[#allocation8 + $0x318] sm:$0xff] }
 0x721   :  { %2925 = vmatprep.subr.mxu0 %v7797_v40  ;;  %2996 = vmatprep.subr.mxu1 %v7800_v47  ;;  %9765 = vst [vmem:[#allocation105_spill] sm:$0xff] %v7809_v59  ;;  %9766 = vst [vmem:[#allocation106_spill] sm:$0xff] %v7812_v50  ;;  %v7815_v40 = vld [vmem:[#allocation8 + $0x300] sm:$0xff]  ;;  %v7818_v47 = vld [vmem:[#allocation8 + $0x310] sm:$0xff] }
 0x722   :  { %2926 = vmatpush2.msra.mxu0 %v7803_v8  ;;  %2997 = vmatpush2.msra.mxu1 %v7806_v11  ;;  %9767 = vst [vmem:[#allocation107_spill] sm:$0xff] %v7815_v40  ;;  %9768 = vst [vmem:[#allocation108_spill] sm:$0xff] %v7818_v47  ;;  %v7821_v8 = vld [vmem:[#allocation8 + $0x2e8] sm:$0xff]  ;;  %v7824_v11 = vld [vmem:[#allocation8 + $0x2f8] sm:$0xff] }
 0x723   :  { %2927 = vmatprep.subr.mxu0 %v7809_v59  ;;  %2998 = vmatprep.subr.mxu1 %v7812_v50  ;;  %9769 = vst [vmem:[#allocation109_spill] sm:$0xff] %v7821_v8  ;;  %9770 = vst [vmem:[#allocation110_spill] sm:$0xff] %v7824_v11  ;;  %v7827_v59 = vld [vmem:[#allocation8 + $0x2e0] sm:$0xff]  ;;  %v7830_v50 = vld [vmem:[#allocation8 + $0x2f0] sm:$0xff] }
 0x724   :  { %2928 = vmatpush2.msra.mxu0 %v7815_v40  ;;  %2999 = vmatpush2.msra.mxu1 %v7818_v47  ;;  %9771 = vst [vmem:[#allocation111_spill] sm:$0xff] %v7827_v59  ;;  %9772 = vst [vmem:[#allocation112_spill] sm:$0xff] %v7830_v50  ;;  %v7833_v40 = vld [vmem:[#allocation8 + $0x2c8] sm:$0xff]  ;;  %v7836_v47 = vld [vmem:[#allocation8 + $0x2d8] sm:$0xff] }
 0x725   :  { %2929 = vmatprep.subr.mxu0 %v7821_v8  ;;  %3000 = vmatprep.subr.mxu1 %v7824_v11  ;;  %9773 = vst [vmem:[#allocation113_spill] sm:$0xff] %v7833_v40  ;;  %9774 = vst [vmem:[#allocation114_spill] sm:$0xff] %v7836_v47  ;;  %v7839_v8 = vld [vmem:[#allocation8 + $0x2c0] sm:$0xff]  ;;  %v7842_v11 = vld [vmem:[#allocation8 + $0x2d0] sm:$0xff] }
 0x726   :  { %2930 = vmatpush2.msra.mxu0 %v7827_v59  ;;  %3001 = vmatpush2.msra.mxu1 %v7830_v50  ;;  %9775 = vst [vmem:[#allocation115_spill] sm:$0xff] %v7839_v8  ;;  %9776 = vst [vmem:[#allocation116_spill] sm:$0xff] %v7842_v11  ;;  %v7845_v59 = vld [vmem:[#allocation8 + $0x2a8] sm:$0xff]  ;;  %v7848_v50 = vld [vmem:[#allocation8 + $0x2b8] sm:$0xff] }
 0x727   :  { %2931 = vmatprep.subr.mxu0 %v7833_v40  ;;  %3002 = vmatprep.subr.mxu1 %v7836_v47  ;;  %9777 = vst [vmem:[#allocation117_spill] sm:$0xff] %v7845_v59  ;;  %9778 = vst [vmem:[#allocation118_spill] sm:$0xff] %v7848_v50  ;;  %v7851_v40 = vld [vmem:[#allocation8 + $0x2a0] sm:$0xff]  ;;  %v7854_v47 = vld [vmem:[#allocation8 + $0x2b0] sm:$0xff] }
 0x728   :  { %2932 = vmatpush2.msra.mxu0 %v7839_v8  ;;  %3003 = vmatpush2.msra.mxu1 %v7842_v11  ;;  %9779 = vst [vmem:[#allocation119_spill] sm:$0xff] %v7851_v40  ;;  %9780 = vst [vmem:[#allocation120_spill] sm:$0xff] %v7854_v47  ;;  %v7857_v8 = vld [vmem:[#allocation8 + $0x288] sm:$0xff]  ;;  %v7860_v11 = vld [vmem:[#allocation8 + $0x298] sm:$0xff] }
 0x729   :  { %2933 = vmatprep.subr.mxu0 %v7845_v59  ;;  %3004 = vmatprep.subr.mxu1 %v7848_v50  ;;  %9781 = vst [vmem:[#allocation121_spill] sm:$0xff] %v7857_v8  ;;  %9782 = vst [vmem:[#allocation122_spill] sm:$0xff] %v7860_v11  ;;  %v7863_v59 = vld [vmem:[#allocation8 + $0x280] sm:$0xff]  ;;  %v7866_v50 = vld [vmem:[#allocation8 + $0x290] sm:$0xff] }
 0x72a   :  { %2934 = vmatpush2.msra.mxu0 %v7851_v40  ;;  %3005 = vmatpush2.msra.mxu1 %v7854_v47  ;;  %9783 = vst [vmem:[#allocation123_spill] sm:$0xff] %v7863_v59  ;;  %9784 = vst [vmem:[#allocation124_spill] sm:$0xff] %v7866_v50  ;;  %v7869_v40 = vld [vmem:[#allocation8 + $0x268] sm:$0xff]  ;;  %v7872_v47 = vld [vmem:[#allocation8 + $0x278] sm:$0xff] }
 0x72b   :  { %2935 = vmatprep.subr.mxu0 %v7857_v8  ;;  %3006 = vmatprep.subr.mxu1 %v7860_v11  ;;  %9785 = vst [vmem:[#allocation125_spill] sm:$0xff] %v7869_v40  ;;  %9786 = vst [vmem:[#allocation126_spill] sm:$0xff] %v7872_v47  ;;  %v7875_v8 = vld [vmem:[#allocation8 + $0x260] sm:$0xff]  ;;  %v7878_v11 = vld [vmem:[#allocation8 + $0x270] sm:$0xff] }
 0x72c   :  { %2936 = vmatpush2.msra.mxu0 %v7863_v59  ;;  %3007 = vmatpush2.msra.mxu1 %v7866_v50  ;;  %9787 = vst [vmem:[#allocation127_spill] sm:$0xff] %v7875_v8  ;;  %9788 = vst [vmem:[#allocation128_spill] sm:$0xff] %v7878_v11  ;;  %v7881_v59 = vld [vmem:[#allocation8 + $0x248] sm:$0xff]  ;;  %v7884_v50 = vld [vmem:[#allocation8 + $0x258] sm:$0xff] }
 0x72d   :  { %2937 = vmatprep.subr.mxu0 %v7869_v40  ;;  %3008 = vmatprep.subr.mxu1 %v7872_v47  ;;  %9789 = vst [vmem:[#allocation129_spill] sm:$0xff] %v7881_v59  ;;  %9790 = vst [vmem:[#allocation130_spill] sm:$0xff] %v7884_v50  ;;  %v7887_v40 = vld [vmem:[#allocation8 + $0x240] sm:$0xff]  ;;  %v7890_v47 = vld [vmem:[#allocation8 + $0x250] sm:$0xff] }
 0x72e   :  { %2938 = vmatpush2.msra.mxu0 %v7875_v8  ;;  %3009 = vmatpush2.msra.mxu1 %v7878_v11  ;;  %9791 = vst [vmem:[#allocation131_spill] sm:$0xff] %v7887_v40  ;;  %9792 = vst [vmem:[#allocation132_spill] sm:$0xff] %v7890_v47  ;;  %v7893_v8 = vld [vmem:[#allocation8 + $0x228] sm:$0xff]  ;;  %v7896_v11 = vld [vmem:[#allocation8 + $0x238] sm:$0xff] }
 0x72f   :  { %2939 = vmatprep.subr.mxu0 %v7881_v59  ;;  %3010 = vmatprep.subr.mxu1 %v7884_v50  ;;  %9793 = vst [vmem:[#allocation133_spill] sm:$0xff] %v7893_v8  ;;  %9794 = vst [vmem:[#allocation134_spill] sm:$0xff] %v7896_v11  ;;  %v7899_v59 = vld [vmem:[#allocation8 + $0x220] sm:$0xff]  ;;  %v7902_v50 = vld [vmem:[#allocation8 + $0x230] sm:$0xff] }
 0x730   :  { %2940 = vmatpush2.msra.mxu0 %v7887_v40  ;;  %3011 = vmatpush2.msra.mxu1 %v7890_v47  ;;  %9795 = vst [vmem:[#allocation135_spill] sm:$0xff] %v7899_v59  ;;  %9796 = vst [vmem:[#allocation136_spill] sm:$0xff] %v7902_v50  ;;  %v7905_v40 = vld [vmem:[#allocation8 + $0x208] sm:$0xff]  ;;  %v7908_v47 = vld [vmem:[#allocation8 + $0x218] sm:$0xff] }
 0x731   :  { %2941 = vmatprep.subr.mxu0 %v7893_v8  ;;  %3012 = vmatprep.subr.mxu1 %v7896_v11  ;;  %9797 = vst [vmem:[#allocation137_spill] sm:$0xff] %v7905_v40  ;;  %9798 = vst [vmem:[#allocation138_spill] sm:$0xff] %v7908_v47  ;;  %v7911_v8 = vld [vmem:[#allocation8 + $0x200] sm:$0xff]  ;;  %v7914_v11 = vld [vmem:[#allocation8 + $0x210] sm:$0xff] }
 0x732   :  { %2942 = vmatpush2.msra.mxu0 %v7899_v59  ;;  %3013 = vmatpush2.msra.mxu1 %v7902_v50  ;;  %9799 = vst [vmem:[#allocation139_spill] sm:$0xff] %v7911_v8  ;;  %9800 = vst [vmem:[#allocation140_spill] sm:$0xff] %v7914_v11 }
 0x733   :  { %2943 = vmatprep.subr.mxu0 %v7905_v40  ;;  %3014 = vmatprep.subr.mxu1 %v7908_v47 }
 0x734   :  { %2944 = vmatpush2.msra.mxu0 %v7911_v8  ;;  %3015 = vmatpush2.msra.mxu1 %v7914_v11 }
 0x735   :  { %3054 = vmatprep.subr.mxu0 %v7349_v54  ;;  %3125 = vmatprep.subr.mxu1 %v7352_v55 }
 0x793   :  { %v2604_v50 = vpop.f32.mrf.mxu0  ;;  %v2675_v47 = vpop.f32.mrf.mxu1 }
 0x794   :  { %v2605_v59 = vadd.f32 %v2604_v50, %v9662_v56  ;;  %v2676_v54 = vadd.f32 %v2675_v47, %v9665_v62 }
 0x795   :  { %v2606_v40 = vpop.f32.mrf.mxu0  ;;  %v2677_v8 = vpop.f32.mrf.mxu1 }
 0x796   :  { %v3633_v46 = vmul.f32 -1.442695, %v2605_v59  ;;  %v2607_v3 = vadd.f32 %v2606_v40, %v9663_v6  ;;  %v2678_v61 = vadd.f32 %v2677_v8, %v9664_v13  ;;  %v9801_v6 = vld [vmem:[#allocation176_spill] sm:$0xff] }
 0x798   :  { %3902 = vpow2.f32 %v3633_v46  ;;  %v3634_v45 = vmul.f32 -1.442695, %v2607_v3  ;;  %v3635_v60 = vmul.f32 -1.442695, %v2678_v61  ;;  %v9802_v61 = vld [vmem:[#allocation178_spill] sm:$0xff] }
 0x79a   :  { %3904 = vpow2.f32 %v3634_v45 }
 0x79b   :  { %3906 = vpow2.f32 %v3635_v60 }
 0x7a5   :  { %v3903_v11 = vpop.eup %3902 }
 0x7a6   :  { %v2683_v58 = vadd.f32 1.0, %v3903_v11 }
 0x7a7   :  { %v3905_v55 = vpop.eup %3904 }
 0x7a8   :  { %3908 = vrcp.f32 %v2683_v58  ;;  %v2689_v50 = vadd.f32 1.0, %v3905_v55  ;;  %v3907_v59 = vpop.eup %3906 }
 0x7a9   :  { %3910 = vtanh.f32 %v2676_v54  ;;  %v2696_v11 = vadd.f32 1.0, %v3907_v59 }
 0x7aa   :  { %3912 = vrcp.f32 %v2689_v50 }
 0x7b4   :  { %v2777_v40 = vpop.f32.mrf.mxu0  ;;  %v2848_v58 = vpop.f32.mrf.mxu1 }
 0x7b5   :  { %v3909_v46 = vpop.eup %3908  ;;  %v2853_v3 = vadd.f32 %v2777_v40, %v9801_v6  ;;  %v9803_v6 = vld [vmem:[#allocation173_spill] sm:$0xff]  ;;  %v9804_v40 = vld [vmem:[#allocation171_spill] sm:$0xff] }
 0x7b6   :  { %v3911_v45 = vpop.eup %3910  ;;  %v2779_v56 = vpop.f32.mrf.mxu0 }
 0x7b7   :  { %v3913_v12 = vpop.eup %3912  ;;  %v3636_v8 = vmul.f32 -1.442695, %v2853_v3  ;;  %v2854_v13 = vadd.f32 %v2779_v56, %v9802_v61  ;;  %v2700_v27 = vmul.f32 %v3911_v45, %v3909_v46  ;;  %v2850_v55 = vpop.f32.mrf.mxu1  ;;  %v2855_v3 = vadd.f32 %v2848_v58, %v9804_v40  ;;  %v4558_v40 = vld [vmem:[#allocation5 + $0x1e0] sm:$0xff] }
 0x7b8   :  { %v2699_v47 = vmul.f32 %v3913_v12, %v7362_v4  ;;  %v2856_v50 = vadd.f32 %v2850_v55, %v9803_v6 }
 0x7b9   :  { %3914 = vpow2.f32 %v3636_v8  ;;  %v3637_v60 = vmul.f32 -1.442695, %v2854_v13 }
 0x7ba   :  { %v7926_v54 = vadd.f32 %v2700_v27, %v2699_v47  ;;  %v3638_v62 = vmul.f32 -1.442695, %v2856_v50 }
 0x7bb   :  { %3916 = vpow2.f32 %v3637_v60 }
 0x7bc   :  { %3918 = vrcp.f32 %v2696_v11 }
 0x7bd   :  { %3920 = vtanh.f32 %v7926_v54 }
 0x7be   :  { %3922 = vtanh.f32 %v2855_v3  ;;  %v4559_v3 = vld [vmem:[#allocation5 + $0x1c8] sm:$0xff] }
 0x7bf   :  { %3924 = vpow2.f32 %v3638_v62 }
 0x7c6   :  { %v3915_v56 = vpop.eup %3914 }
 0x7c7   :  { %v2860_v46 = vadd.f32 1.0, %v3915_v56  ;;  %v4561_v56 = vld [vmem:[#allocation5 + $0x1a8] sm:$0xff] }
 0x7c8   :  { %v3917_v12 = vpop.eup %3916 }
 0x7c9   :  { %v3919_v4 = vpop.eup %3918  ;;  %3926 = vrcp.f32 %v2860_v46  ;;  %v2866_v13 = vadd.f32 1.0, %v3917_v12  ;;  %v4562_v46 = vld [vmem:[#allocation5 + $0x1a0] sm:$0xff]  ;;  %v4563_v12 = vld [vmem:[#allocation5 + $0x188] sm:$0xff] }
 0x7ca   :  { %v3921_v27 = vpop.eup %3920 }
 0x7cb   :  { %3928 = vrcp.f32 %v2866_v13  ;;  %v7931_v59 = vmul.f32 %v3921_v27, %v3919_v4  ;;  %v3923_v45 = vpop.eup %3922  ;;  %v9835_v4 = vld [vmem:[#allocation40_spill] sm:$0xff]  ;;  %v9836_v13 = vld [vmem:[#allocation41_spill] sm:$0xff]  ;;  %v9837_v27 = vld [vmem:[#allocation42_spill] sm:$0xff] }
 0x7cc   :  { %v3925_v8 = vpop.eup %3924 }
 0x7cd   :  { %2945 = vmatprep.mubr.f32.mxu0 %v7931_v59  ;;  %3016 = vmatprep.mubr.f32.mxu1 %v7931_v59  ;;  %v2873_v58 = vadd.f32 1.0, %v3925_v8  ;;  %v9839_v8 = vld [vmem:[#allocation44_spill] sm:$0xff] }
 0x7cf   :  { %3930 = vrcp.f32 %v2873_v58  ;;  %v9843_v58 = vld [vmem:[#allocation48_spill] sm:$0xff] }
 0x7d6   :  { %v3927_v61 = vpop.eup %3926 }
 0x7d7   :  { %v2877_v47 = vmul.f32 %v3927_v61, %v3923_v45  ;;  %v9838_v45 = vld [vmem:[#allocation43_spill] sm:$0xff]  ;;  %v9840_v61 = vld [vmem:[#allocation45_spill] sm:$0xff] }
 0x7d8   :  { %v3929_v11 = vpop.eup %3928 }
 0x7d9   :  { %v2876_v60 = vmul.f32 %v3929_v11, %v7372_v49  ;;  %v4560_v49 = vld [vmem:[#allocation5 + $0x1c0] sm:$0xff]  ;;  %v9842_v11 = vld [vmem:[#allocation47_spill] sm:$0xff] }
 0x7db   :  { %v7936_v62 = vadd.f32 %v2877_v47, %v2876_v60  ;;  %v9841_v47 = vld [vmem:[#allocation46_spill] sm:$0xff]  ;;  %v9844_v60 = vld [vmem:[#allocation49_spill] sm:$0xff] }
 0x7dc   :  { %v3931_v55 = vpop.eup %3930 }
 0x7dd   :  { %3932 = vtanh.f32 %v7936_v62 }
 0x7ea   :  { %v3933_v6 = vpop.eup %3932 }
 0x7eb   :  { %v7939_v50 = vmul.f32 %v3933_v6, %v3931_v55  ;;  %v9845_v55 = vld [vmem:[#allocation50_spill] sm:$0xff]  ;;  %v9846_v6 = vld [vmem:[#allocation51_spill] sm:$0xff] }
 0x7ed   :  { %2946 = vmatmul.mubr.f32.vlgmr.msra.gmra.mxu0 %v7939_v50  ;;  %3017 = vmatmul.mubr.f32.vlgmr.msra.gmra.mxu1 %v7939_v50 }
 0x7ee   :  { %3055 = vmatpush1.msra.mxu0 %v4558_v40  ;;  %3126 = vmatpush1.msra.mxu1 %v7380_v53  ;;  %v4564_v53 = vld [vmem:[#allocation5 + $0x180] sm:$0xff] }
 0x7ef   :  { %3056 = vmatprep.subr.mxu0 %v4559_v3  ;;  %3127 = vmatprep.subr.mxu1 %v7384_v20  ;;  %v4565_v20 = vld [vmem:[#allocation5 + $0x168] sm:$0xff]  ;;  %v9848_v40 = vld [vmem:[#allocation53_spill] sm:$0xff] }
 0x7f0   :  { %3057 = vmatpush1.msra.mxu0 %v4560_v49  ;;  %3128 = vmatpush1.msra.mxu1 %v7388_v16  ;;  %v4566_v16 = vld [vmem:[#allocation5 + $0x160] sm:$0xff]  ;;  %v9849_v3 = vld [vmem:[#allocation54_spill] sm:$0xff]  ;;  %v9850_v49 = vld [vmem:[#allocation55_spill] sm:$0xff] }
 0x7f1   :  { %3058 = vmatprep.subr.mxu0 %v4561_v56  ;;  %3129 = vmatprep.subr.mxu1 %v7392_v14  ;;  %v4567_v14 = vld [vmem:[#allocation5 + $0x148] sm:$0xff]  ;;  %v9851_v56 = vld [vmem:[#allocation56_spill] sm:$0xff] }
 0x7f2   :  { %3059 = vmatpush1.msra.mxu0 %v4562_v46  ;;  %3130 = vmatpush1.msra.mxu1 %v7396_v7  ;;  %v4568_v7 = vld [vmem:[#allocation5 + $0x140] sm:$0xff] }
 0x7f3   :  { %3060 = vmatprep.subr.mxu0 %v4563_v12  ;;  %3131 = vmatprep.subr.mxu1 %v7400_v29  ;;  %v4569_v29 = vld [vmem:[#allocation5 + $0x128] sm:$0xff]  ;;  %v9852_v46 = vld [vmem:[#allocation57_spill] sm:$0xff] }
 0x7f4   :  { %3061 = vmatpush1.msra.mxu0 %v4564_v53  ;;  %3132 = vmatpush1.msra.mxu1 %v7404_v23  ;;  %v4570_v23 = vld [vmem:[#allocation5 + $0x120] sm:$0xff]  ;;  %v9853_v12 = vld [vmem:[#allocation58_spill] sm:$0xff]  ;;  %v9854_v53 = vld [vmem:[#allocation59_spill] sm:$0xff] }
 0x7f5   :  { %3062 = vmatprep.subr.mxu0 %v4565_v20  ;;  %3133 = vmatprep.subr.mxu1 %v7408_v1  ;;  %v4571_v1 = vld [vmem:[#allocation5 + $0x108] sm:$0xff]  ;;  %v9855_v20 = vld [vmem:[#allocation60_spill] sm:$0xff] }
 0x7f6   :  { %3063 = vmatpush1.msra.mxu0 %v4566_v16  ;;  %3134 = vmatpush1.msra.mxu1 %v7412_v24  ;;  %v4572_v24 = vld [vmem:[#allocation5 + $0x100] sm:$0xff] }
 0x7f7   :  { %3064 = vmatprep.subr.mxu0 %v4567_v14  ;;  %3135 = vmatprep.subr.mxu1 %v7416_v15  ;;  %v4573_v15 = vld [vmem:[#allocation5 + $0xe8] sm:$0xff]  ;;  %v9856_v16 = vld [vmem:[#allocation61_spill] sm:$0xff] }
 0x7f8   :  { %3065 = vmatpush1.msra.mxu0 %v4568_v7  ;;  %3136 = vmatpush1.msra.mxu1 %v7420_v26  ;;  %v4574_v26 = vld [vmem:[#allocation5 + $0xe0] sm:$0xff]  ;;  %v9857_v14 = vld [vmem:[#allocation62_spill] sm:$0xff]  ;;  %v9858_v7 = vld [vmem:[#allocation63_spill] sm:$0xff] }
 0x7f9   :  { %3066 = vmatprep.subr.mxu0 %v4569_v29  ;;  %3137 = vmatprep.subr.mxu1 %v7424_v22  ;;  %v4575_v22 = vld [vmem:[#allocation5 + $0xc8] sm:$0xff]  ;;  %v9859_v29 = vld [vmem:[#allocation64_spill] sm:$0xff] }
 0x7fa   :  { %3067 = vmatpush1.msra.mxu0 %v4570_v23  ;;  %3138 = vmatpush1.msra.mxu1 %v7428_v35  ;;  %v9805_v35 = vld [vmem:[#allocation17_spill] sm:$0xff] }
 0x7fb   :  { %3068 = vmatprep.subr.mxu0 %v4571_v1  ;;  %3139 = vmatprep.subr.mxu1 %v7432_v10  ;;  %v9806_v10 = vmov 0.0   ;;  %v9860_v23 = vld [vmem:[#allocation65_spill] sm:$0xff]  ;;  %v9861_v1 = vld [vmem:[#allocation66_spill] sm:$0xff] }
 0x7fc   :  { %3069 = vmatpush1.msra.mxu0 %v4572_v24  ;;  %3140 = vmatpush1.msra.mxu1 %v7436_v25  ;;  %v9807_v25 = vld [vmem:[#allocation18_spill] sm:$0xff]  ;;  %v9862_v24 = vld [vmem:[#allocation67_spill] sm:$0xff] }
 0x7fd   :  { %3070 = vmatprep.subr.mxu0 %v4573_v15  ;;  %3141 = vmatprep.subr.mxu1 %v7440_v31  ;;  %v9808_v31 = vld [vmem:[#allocation154_spill] sm:$0xff]  ;;  %v9863_v15 = vld [vmem:[#allocation68_spill] sm:$0xff] }
 0x7fe   :  { %3071 = vmatpush1.msra.mxu0 %v4574_v26  ;;  %3142 = vmatpush1.msra.mxu1 %v7444_v9  ;;  %v9809_v9 = vld [vmem:[#allocation164_spill] sm:$0xff]  ;;  %v9864_v26 = vld [vmem:[#allocation69_spill] sm:$0xff] }
 0x7ff   :  { %3072 = vmatprep.subr.mxu0 %v4575_v22  ;;  %3143 = vmatprep.subr.mxu1 %v7448_v33  ;;  %v9810_v33 = vld [vmem:[#allocation166_spill] sm:$0xff] }
 0x800   :  { %3073 = vmatpush1.msra.mxu0 %v7451_v41  ;;  %3144 = vmatpush1.msra.mxu1 %v7454_v48  ;;  %v9811_v41 = vld [vmem:[#allocation161_spill] sm:$0xff]  ;;  %v9812_v48 = vld [vmem:[#allocation159_spill] sm:$0xff]  ;;  %v9865_v22 = vld [vmem:[#allocation70_spill] sm:$0xff] }
 0x801   :  { %3074 = vmatprep.subr.mxu0 %v7457_v21  ;;  %3145 = vmatprep.subr.mxu1 %v7460_v42  ;;  %v9813_v21 = vld [vmem:[#allocation168_spill] sm:$0xff]  ;;  %v9814_v42 = vld [vmem:[#allocation170_spill] sm:$0xff] }
 0x802   :  { %3075 = vmatpush1.msra.mxu0 %v7463_v44  ;;  %3146 = vmatpush1.msra.mxu1 %v7466_v36  ;;  %v9815_v44 = vld [vmem:[#allocation165_spill] sm:$0xff]  ;;  %v9816_v36 = vld [vmem:[#allocation163_spill] sm:$0xff] }
 0x803   :  { %3076 = vmatprep.subr.mxu0 %v7469_v19  ;;  %3147 = vmatprep.subr.mxu1 %v7472_v2  ;;  %v9817_v19 = vld [vmem:[#allocation152_spill] sm:$0xff] }
 0x804   :  { %3077 = vmatpush1.msra.mxu0 %v7475_v52  ;;  %3148 = vmatpush1.msra.mxu1 %v7478_v17  ;;  %v9818_v2 = vld [vmem:[#allocation160_spill] sm:$0xff]  ;;  %v9819_v52 = vld [vmem:[#allocation162_spill] sm:$0xff]  ;;  %v9820_v17 = vld [vmem:[#allocation157_spill] sm:$0xff] }
 0x805   :  { %3078 = vmatprep.subr.mxu0 %v7481_v18  ;;  %3149 = vmatprep.subr.mxu1 %v7484_v0  ;;  %v9821_v18 = vld [vmem:[#allocation155_spill] sm:$0xff] }
 0x806   :  { %3079 = vmatpush1.msra.mxu0 %v7487_v51  ;;  %3150 = vmatpush1.msra.mxu1 %v7490_v34  ;;  %v9822_v0 = vld [vmem:[#allocation27_spill] sm:$0xff]  ;;  %v9823_v51 = vld [vmem:[#allocation28_spill] sm:$0xff]  ;;  %v9824_v34 = vld [vmem:[#allocation29_spill] sm:$0xff] }
 0x807   :  { %3080 = vmatprep.subr.mxu0 %v7493_v32  ;;  %3151 = vmatprep.subr.mxu1 %v7496_v30  ;;  %v9825_v32 = vld [vmem:[#allocation30_spill] sm:$0xff]  ;;  %v9826_v30 = vld [vmem:[#allocation31_spill] sm:$0xff] }
 0x808   :  { %3081 = vmatpush1.msra.mxu0 %v7499_v28  ;;  %3152 = vmatpush1.msra.mxu1 %v7502_v43  ;;  %v9827_v28 = vld [vmem:[#allocation32_spill] sm:$0xff]  ;;  %v9828_v43 = vld [vmem:[#allocation33_spill] sm:$0xff] }
 0x809   :  { %3082 = vmatprep.subr.mxu0 %v7505_v57  ;;  %3153 = vmatprep.subr.mxu1 %v7508_v39  ;;  %v9829_v57 = vld [vmem:[#allocation34_spill] sm:$0xff]  ;;  %v9830_v39 = vld [vmem:[#allocation35_spill] sm:$0xff] }
 0x80a   :  { %3083 = vmatpush1.msra.mxu0 %v7511_v38  ;;  %3154 = vmatpush1.msra.mxu1 %v7514_v63  ;;  %v9831_v38 = vld [vmem:[#allocation36_spill] sm:$0xff]  ;;  %v9832_v63 = vld [vmem:[#allocation37_spill] sm:$0xff] }
 0x80b   :  { %3084 = vmatprep.subr.mxu0 %v7517_v37  ;;  %3155 = vmatprep.subr.mxu1 %v7520_v5  ;;  %v9833_v37 = vld [vmem:[#allocation38_spill] sm:$0xff]  ;;  %v9834_v5 = vld [vmem:[#allocation39_spill] sm:$0xff] }
 0x80c   :  { %3085 = vmatpush1.msra.mxu0 %v9805_v35  ;;  %3118 = vmatprep.mubr.f32.mxu0 %v9806_v10  ;;  %v9866_v35 = vld [vmem:[#allocation71_spill] sm:$0xff] }
 0x80d   :  { %3156 = vmatpush1.msra.mxu1 %v9807_v25  ;;  %3189 = vmatprep.mubr.f32.mxu1 %v9806_v10  ;;  %v9867_v10 = vld [vmem:[#allocation72_spill] sm:$0xff]  ;;  %v9868_v25 = vld [vmem:[#allocation73_spill] sm:$0xff] }
 0x80e   :  { %3119 = vmatmul.mubr.f32.vlgmr.msra.gmra.mxu0 %v7939_v50  ;;  %3190 = vmatmul.mubr.f32.vlgmr.msra.gmra.mxu1 %v7939_v50  ;;  %v9847_v50 = vld [vmem:[#allocation52_spill] sm:$0xff] }
 0x80f   :  { %3224 = vmatprep.subr.mxu0 %v9808_v31  ;;  %3295 = vmatprep.subr.mxu1 %v9809_v9  ;;  %v9869_v31 = vld [vmem:[#allocation74_spill] sm:$0xff]  ;;  %v9870_v9 = vld [vmem:[#allocation75_spill] sm:$0xff] }
 0x810   :  { %3225 = vmatpush1.msra.mxu0 %v9810_v33  ;;  %3296 = vmatpush1.msra.mxu1 %v9811_v41  ;;  %v9871_v33 = vld [vmem:[#allocation76_spill] sm:$0xff]  ;;  %v9872_v41 = vld [vmem:[#allocation77_spill] sm:$0xff] }
 0x811   :  { %3226 = vmatprep.subr.mxu0 %v9812_v48  ;;  %3297 = vmatprep.subr.mxu1 %v9813_v21  ;;  %v9873_v48 = vld [vmem:[#allocation78_spill] sm:$0xff]  ;;  %v9874_v21 = vld [vmem:[#allocation79_spill] sm:$0xff] }
 0x812   :  { %3227 = vmatpush1.msra.mxu0 %v9814_v42  ;;  %3298 = vmatpush1.msra.mxu1 %v9815_v44  ;;  %v9875_v42 = vld [vmem:[#allocation80_spill] sm:$0xff]  ;;  %v9876_v44 = vld [vmem:[#allocation81_spill] sm:$0xff] }
 0x813   :  { %3228 = vmatprep.subr.mxu0 %v9816_v36  ;;  %3299 = vmatprep.subr.mxu1 %v9817_v19  ;;  %v9877_v36 = vld [vmem:[#allocation82_spill] sm:$0xff]  ;;  %v9878_v19 = vld [vmem:[#allocation83_spill] sm:$0xff] }
 0x814   :  { %3229 = vmatpush1.msra.mxu0 %v9818_v2  ;;  %3300 = vmatpush1.msra.mxu1 %v9819_v52  ;;  %v9879_v2 = vld [vmem:[#allocation84_spill] sm:$0xff]  ;;  %v9880_v52 = vld [vmem:[#allocation85_spill] sm:$0xff] }
 0x815   :  { %3230 = vmatprep.subr.mxu0 %v9820_v17  ;;  %3301 = vmatprep.subr.mxu1 %v9821_v18  ;;  %v9881_v17 = vld [vmem:[#allocation86_spill] sm:$0xff]  ;;  %v9882_v18 = vld [vmem:[#allocation87_spill] sm:$0xff] }
 0x816   :  { %3231 = vmatpush1.msra.mxu0 %v9822_v0  ;;  %3302 = vmatpush1.msra.mxu1 %v9823_v51  ;;  %v9883_v0 = vld [vmem:[#allocation88_spill] sm:$0xff]  ;;  %v9884_v51 = vld [vmem:[#allocation89_spill] sm:$0xff] }
 0x817   :  { %3232 = vmatprep.subr.mxu0 %v9824_v34  ;;  %3303 = vmatprep.subr.mxu1 %v9825_v32  ;;  %v9885_v34 = vld [vmem:[#allocation90_spill] sm:$0xff]  ;;  %v9886_v32 = vld [vmem:[#allocation91_spill] sm:$0xff] }
 0x818   :  { %3233 = vmatpush1.msra.mxu0 %v9826_v30  ;;  %3304 = vmatpush1.msra.mxu1 %v9827_v28  ;;  %v9887_v30 = vld [vmem:[#allocation92_spill] sm:$0xff]  ;;  %v9888_v28 = vld [vmem:[#allocation93_spill] sm:$0xff] }
 0x819   :  { %3234 = vmatprep.subr.mxu0 %v9828_v43  ;;  %3305 = vmatprep.subr.mxu1 %v9829_v57  ;;  %v9889_v43 = vld [vmem:[#allocation94_spill] sm:$0xff]  ;;  %v9890_v57 = vld [vmem:[#allocation95_spill] sm:$0xff] }
 0x81a   :  { %3235 = vmatpush1.msra.mxu0 %v9830_v39  ;;  %3306 = vmatpush1.msra.mxu1 %v9831_v38  ;;  %v9891_v39 = vld [vmem:[#allocation96_spill] sm:$0xff]  ;;  %v9892_v38 = vld [vmem:[#allocation97_spill] sm:$0xff] }
 0x81b   :  { %3236 = vmatprep.subr.mxu0 %v9832_v63  ;;  %3307 = vmatprep.subr.mxu1 %v9833_v37  ;;  %v9893_v63 = vld [vmem:[#allocation98_spill] sm:$0xff]  ;;  %v9894_v37 = vld [vmem:[#allocation99_spill] sm:$0xff] }
 0x81c   :  { %3237 = vmatpush1.msra.mxu0 %v9834_v5  ;;  %3308 = vmatpush1.msra.mxu1 %v9835_v4  ;;  %v9895_v5 = vld [vmem:[#allocation100_spill] sm:$0xff]  ;;  %v9896_v4 = vld [vmem:[#allocation101_spill] sm:$0xff] }
 0x81d   :  { %3238 = vmatprep.subr.mxu0 %v9836_v13  ;;  %3309 = vmatprep.subr.mxu1 %v9837_v27  ;;  %v9897_v13 = vld [vmem:[#allocation102_spill] sm:$0xff]  ;;  %v9898_v27 = vld [vmem:[#allocation103_spill] sm:$0xff] }
 0x81e   :  { %3239 = vmatpush1.msra.mxu0 %v9838_v45  ;;  %3310 = vmatpush1.msra.mxu1 %v9839_v8  ;;  %v9899_v45 = vld [vmem:[#allocation104_spill] sm:$0xff]  ;;  %v9900_v8 = vld [vmem:[#allocation105_spill] sm:$0xff] }
 0x81f   :  { %3240 = vmatprep.subr.mxu0 %v9840_v61  ;;  %3311 = vmatprep.subr.mxu1 %v9841_v47  ;;  %v9901_v61 = vld [vmem:[#allocation106_spill] sm:$0xff]  ;;  %v9902_v47 = vld [vmem:[#allocation107_spill] sm:$0xff] }
 0x820   :  { %3241 = vmatpush1.msra.mxu0 %v9842_v11  ;;  %3312 = vmatpush1.msra.mxu1 %v9843_v58  ;;  %v9903_v11 = vld [vmem:[#allocation108_spill] sm:$0xff]  ;;  %v9904_v58 = vld [vmem:[#allocation109_spill] sm:$0xff] }
 0x821   :  { %3242 = vmatprep.subr.mxu0 %v9844_v60  ;;  %3313 = vmatprep.subr.mxu1 %v9845_v55  ;;  %v9905_v60 = vld [vmem:[#allocation110_spill] sm:$0xff]  ;;  %v9906_v55 = vld [vmem:[#allocation111_spill] sm:$0xff] }
 0x822   :  { %3243 = vmatpush1.msra.mxu0 %v9846_v6  ;;  %3314 = vmatpush1.msra.mxu1 %v9847_v50  ;;  %v9907_v6 = vld [vmem:[#allocation112_spill] sm:$0xff]  ;;  %v9908_v50 = vld [vmem:[#allocation113_spill] sm:$0xff] }
 0x823   :  { %3244 = vmatprep.subr.mxu0 %v9848_v40  ;;  %3315 = vmatprep.subr.mxu1 %v9849_v3  ;;  %v9909_v40 = vld [vmem:[#allocation114_spill] sm:$0xff]  ;;  %v9910_v3 = vld [vmem:[#allocation115_spill] sm:$0xff] }
 0x824   :  { %3245 = vmatpush1.msra.mxu0 %v9850_v49  ;;  %3316 = vmatpush1.msra.mxu1 %v9851_v56  ;;  %v9911_v49 = vld [vmem:[#allocation116_spill] sm:$0xff]  ;;  %v9912_v56 = vld [vmem:[#allocation117_spill] sm:$0xff] }
 0x825   :  { %3246 = vmatprep.subr.mxu0 %v9852_v46  ;;  %3317 = vmatprep.subr.mxu1 %v9853_v12  ;;  %v9913_v46 = vld [vmem:[#allocation118_spill] sm:$0xff]  ;;  %v9914_v12 = vld [vmem:[#allocation119_spill] sm:$0xff] }
 0x826   :  { %3247 = vmatpush1.msra.mxu0 %v9854_v53  ;;  %3318 = vmatpush1.msra.mxu1 %v9855_v20  ;;  %v9915_v53 = vld [vmem:[#allocation120_spill] sm:$0xff]  ;;  %v9916_v20 = vld [vmem:[#allocation121_spill] sm:$0xff] }
 0x827   :  { %3248 = vmatprep.subr.mxu0 %v9856_v16  ;;  %3319 = vmatprep.subr.mxu1 %v9857_v14  ;;  %v9917_v16 = vld [vmem:[#allocation122_spill] sm:$0xff]  ;;  %v9918_v14 = vld [vmem:[#allocation123_spill] sm:$0xff] }
 0x828   :  { %3249 = vmatpush1.msra.mxu0 %v9858_v7  ;;  %3320 = vmatpush1.msra.mxu1 %v9859_v29  ;;  %v9919_v7 = vld [vmem:[#allocation124_spill] sm:$0xff]  ;;  %v9920_v29 = vld [vmem:[#allocation125_spill] sm:$0xff] }
 0x829   :  { %3250 = vmatprep.subr.mxu0 %v9860_v23  ;;  %3321 = vmatprep.subr.mxu1 %v9861_v1  ;;  %v9921_v23 = vld [vmem:[#allocation126_spill] sm:$0xff]  ;;  %v9922_v1 = vld [vmem:[#allocation127_spill] sm:$0xff] }
 0x82a   :  { %3251 = vmatpush1.msra.mxu0 %v9862_v24  ;;  %3322 = vmatpush1.msra.mxu1 %v9863_v15  ;;  %v9923_v24 = vld [vmem:[#allocation128_spill] sm:$0xff]  ;;  %v9924_v15 = vld [vmem:[#allocation129_spill] sm:$0xff] }
 0x82b   :  { %3252 = vmatprep.subr.mxu0 %v9864_v26  ;;  %3323 = vmatprep.subr.mxu1 %v9865_v22  ;;  %v9925_v26 = vld [vmem:[#allocation130_spill] sm:$0xff]  ;;  %v9926_v22 = vld [vmem:[#allocation131_spill] sm:$0xff] }
 0x82c   :  { %3253 = vmatpush1.msra.mxu0 %v9866_v35  ;;  %3324 = vmatpush1.msra.mxu1 %v9867_v10  ;;  %v9927_v35 = vld [vmem:[#allocation132_spill] sm:$0xff]  ;;  %v9928_v10 = vld [vmem:[#allocation133_spill] sm:$0xff] }
 0x82d   :  { %3254 = vmatprep.subr.mxu0 %v9868_v25  ;;  %3325 = vmatprep.subr.mxu1 %v9869_v31  ;;  %v9929_v25 = vld [vmem:[#allocation134_spill] sm:$0xff]  ;;  %v9930_v31 = vld [vmem:[#allocation135_spill] sm:$0xff] }
 0x82e   :  { %3255 = vmatpush1.msra.mxu0 %v9870_v9  ;;  %3326 = vmatpush1.msra.mxu1 %v9871_v33  ;;  %v9931_v9 = vld [vmem:[#allocation136_spill] sm:$0xff]  ;;  %v9932_v33 = vld [vmem:[#allocation137_spill] sm:$0xff] }
 0x82f   :  { %3256 = vmatprep.subr.mxu0 %v9872_v41  ;;  %3327 = vmatprep.subr.mxu1 %v9873_v48  ;;  %v9933_v41 = vld [vmem:[#allocation138_spill] sm:$0xff]  ;;  %v9934_v48 = vld [vmem:[#allocation139_spill] sm:$0xff] }
 0x830   :  { %3257 = vmatpush2.msra.mxu0 %v9874_v21  ;;  %3328 = vmatpush2.msra.mxu1 %v9875_v42  ;;  %v9935_v21 = vld [vmem:[#allocation140_spill] sm:$0xff] }
 0x831   :  { %3258 = vmatprep.subr.mxu0 %v9876_v44  ;;  %3329 = vmatprep.subr.mxu1 %v9877_v36  ;;  %v8122_v42 = vld [vmem:[%s8255_s6 + $0x78] sm:$0xff]  ;;  %v9936_v36 = vld [vmem:[#allocation22_spill] sm:$0xff] }
 0x832   :  { %3259 = vmatpush2.msra.mxu0 %v9878_v19  ;;  %3330 = vmatpush2.msra.mxu1 %v9879_v2 }
 0x833   :  { %3260 = vmatprep.subr.mxu0 %v9880_v52  ;;  %3331 = vmatprep.subr.mxu1 %v9881_v17  ;;  %v9937_v17 = vld [vmem:[#allocation23_spill] sm:$0xff] }
 0x834   :  { %3261 = vmatpush2.msra.mxu0 %v9882_v18  ;;  %3332 = vmatpush2.msra.mxu1 %v9883_v0 }
 0x835   :  { %3262 = vmatprep.subr.mxu0 %v9884_v51  ;;  %3333 = vmatprep.subr.mxu1 %v9885_v34 }
 0x836   :  { %3263 = vmatpush2.msra.mxu0 %v9886_v32  ;;  %3334 = vmatpush2.msra.mxu1 %v9887_v30  ;;  %v9938_v32 = vld [vmem:[#allocation24_spill] sm:$0xff] }
 0x837   :  { %3264 = vmatprep.subr.mxu0 %v9888_v28  ;;  %3335 = vmatprep.subr.mxu1 %v9889_v43 }
 0x838   :  { %3265 = vmatpush2.msra.mxu0 %v9890_v57  ;;  %3336 = vmatpush2.msra.mxu1 %v9891_v39  ;;  %v9939_v57 = vld [vmem:[#allocation25_spill] sm:$0xff] }
 0x839   :  { %3266 = vmatprep.subr.mxu0 %v9892_v38  ;;  %3337 = vmatprep.subr.mxu1 %v9893_v63 }
 0x83a   :  { %3267 = vmatpush2.msra.mxu0 %v9894_v37  ;;  %3338 = vmatpush2.msra.mxu1 %v9895_v5 }
 0x83b   :  { %3268 = vmatprep.subr.mxu0 %v9896_v4  ;;  %3339 = vmatprep.subr.mxu1 %v9897_v13 }
 0x83c   :  { %3269 = vmatpush2.msra.mxu0 %v9898_v27  ;;  %3340 = vmatpush2.msra.mxu1 %v9899_v45  ;;  %v9940_v27 = vld [vmem:[#allocation21_spill] sm:$0xff]  ;;  %v9941_v45 = vld [vmem:[#allocation158_spill] sm:$0xff] }
 0x83d   :  { %3270 = vmatprep.subr.mxu0 %v9900_v8  ;;  %3341 = vmatprep.subr.mxu1 %v9901_v61  ;;  %v401_v8 = vadd.f32 %v9941_v45, %v9940_v27  ;;  %v9942_v61 = vld [vmem:[#allocation179_spill] sm:$0xff] }
 0x83e   :  { %3271 = vmatpush2.msra.mxu0 %v9902_v47  ;;  %3342 = vmatpush2.msra.mxu1 %v9903_v11  ;;  %v9949_v27 = vld [vmem:[#allocation19_spill] sm:$0xff] }
 0x83f   :  { %3272 = vmatprep.subr.mxu0 %v9904_v58  ;;  %3343 = vmatprep.subr.mxu1 %v9905_v60 }
 0x840   :  { %3273 = vmatpush2.msra.mxu0 %v9906_v55  ;;  %3344 = vmatpush2.msra.mxu1 %v9907_v6 }
 0x841   :  { %3274 = vmatprep.subr.mxu0 %v9908_v50  ;;  %3345 = vmatprep.subr.mxu1 %v9909_v40 }
 0x842   :  { %3275 = vmatpush2.msra.mxu0 %v9910_v3  ;;  %3346 = vmatpush2.msra.mxu1 %v9911_v49 }
 0x843   :  { %3276 = vmatprep.subr.mxu0 %v9912_v56  ;;  %3347 = vmatprep.subr.mxu1 %v9913_v46 }
 0x844   :  { %3277 = vmatpush2.msra.mxu0 %v9914_v12  ;;  %3348 = vmatpush2.msra.mxu1 %v9915_v53  ;;  %v9943_v53 = vld [vmem:[#allocation177_spill] sm:$0xff] }
 0x845   :  { %3278 = vmatprep.subr.mxu0 %v9916_v20  ;;  %3349 = vmatprep.subr.mxu1 %v9917_v16  ;;  %v9944_v16 = vld [vmem:[#allocation175_spill] sm:$0xff] }
 0x846   :  { %3279 = vmatpush2.msra.mxu0 %v9918_v14  ;;  %3350 = vmatpush2.msra.mxu1 %v9919_v7 }
 0x847   :  { %3280 = vmatprep.subr.mxu0 %v9920_v29  ;;  %3351 = vmatprep.subr.mxu1 %v9921_v23 }
 0x848   :  { %3281 = vmatpush2.msra.mxu0 %v9922_v1  ;;  %3352 = vmatpush2.msra.mxu1 %v9923_v24 }
 0x849   :  { %3282 = vmatprep.subr.mxu0 %v9924_v15  ;;  %3353 = vmatprep.subr.mxu1 %v9925_v26 }
 0x84a   :  { %3283 = vmatpush2.msra.mxu0 %v9926_v22  ;;  %3354 = vmatpush2.msra.mxu1 %v9927_v35 }
 0x84b   :  { %3284 = vmatprep.subr.mxu0 %v9928_v10  ;;  %3355 = vmatprep.subr.mxu1 %v9929_v25 }
 0x84c   :  { %3285 = vmatpush2.msra.mxu0 %v9930_v31  ;;  %3356 = vmatpush2.msra.mxu1 %v9931_v9 }
 0x84d   :  { %3286 = vmatprep.subr.mxu0 %v9932_v33  ;;  %3357 = vmatprep.subr.mxu1 %v9933_v41 }
 0x84e   :  { %3287 = vmatpush2.msra.mxu0 %v9934_v48  ;;  %3358 = vmatpush2.msra.mxu1 %v9935_v21 }
 0x84f   :  { %3673 = vmatprep.subr.mxu0 %v8122_v42 }
 0x8ad   :  { %v2947_v44 = vpop.f32.mrf.mxu0  ;;  %v3018_v0 = vpop.f32.mrf.mxu1 }
 0x8ae   :  { %v2948_v19 = vadd.f32 %v2947_v44, %v9936_v36  ;;  %v3019_v39 = vadd.f32 %v3018_v0, %v9939_v57  ;;  %v3415_v0 = vld [vmem:[%s8255_s6 + $0x48] sm:$0xff] }
 0x8af   :  { %v2949_v2 = vpop.f32.mrf.mxu0  ;;  %v3020_v34 = vpop.f32.mrf.mxu1 }
 0x8b0   :  { %v3639_v52 = vmul.f32 -1.442695, %v2948_v19  ;;  %v2950_v18 = vadd.f32 %v2949_v2, %v9937_v17  ;;  %v3021_v30 = vadd.f32 %v3020_v34, %v9938_v32  ;;  %v3420_v19 = vld [vmem:[%s8255_s6 + $0x70] sm:$0xff]  ;;  %v3413_v34 = vld [vmem:[%s8255_s6 + $0x38] sm:$0xff] }
 0x8b1   :  { %v9945_v2 = vld [vmem:[#allocation26_spill] sm:$0xff] }
 0x8b2   :  { %3934 = vpow2.f32 %v3639_v52  ;;  %v3640_v51 = vmul.f32 -1.442695, %v2950_v18  ;;  %v3641_v28 = vmul.f32 -1.442695, %v3021_v30  ;;  %v3418_v52 = vld [vmem:[%s8255_s6 + $0x60] sm:$0xff]  ;;  %v3417_v18 = vld [vmem:[%s8255_s6 + $0x58] sm:$0xff] }
 0x8b3   :  { %v3412_v30 = vld [vmem:[%s8255_s6 + $0x30] sm:$0xff] }
 0x8b4   :  { %3936 = vpow2.f32 %v3640_v51  ;;  %v3414_v51 = vld [vmem:[%s8255_s6 + $0x40] sm:$0xff] }
 0x8b5   :  { %3938 = vpow2.f32 %v3641_v28  ;;  %v3411_v28 = vld [vmem:[%s8255_s6 + $0x28] sm:$0xff] }
 0x8bf   :  { %v3935_v43 = vpop.eup %3934 }
 0x8c0   :  { %v3026_v38 = vadd.f32 1.0, %v3935_v43  ;;  %v3410_v43 = vld [vmem:[%s8255_s6 + $0x20] sm:$0xff] }
 0x8c1   :  { %v3937_v63 = vpop.eup %3936 }
 0x8c2   :  { %3940 = vrcp.f32 %v3026_v38  ;;  %v3032_v37 = vadd.f32 1.0, %v3937_v63  ;;  %v3939_v5 = vpop.eup %3938  ;;  %v3408_v38 = vld [vmem:[%s8255_s6 + $0x10] sm:$0xff]  ;;  %v3407_v63 = vld [vmem:[%s8255_s6 + $0x8] sm:$0xff] }
 0x8c3   :  { %3942 = vtanh.f32 %v3019_v39  ;;  %v3039_v3 = vadd.f32 1.0, %v3939_v5  ;;  %v3409_v39 = vld [vmem:[%s8255_s6 + $0x18] sm:$0xff] }
 0x8c4   :  { %3944 = vrcp.f32 %v3032_v37  ;;  %v3406_v37 = vld [vmem:[%s8255_s6] sm:$0xff] }
 0x8c5   :  { %v9946_v5 = vld [vmem:[#allocation156_spill] sm:$0xff] }
 0x8ce   :  { %v3120_v4 = vpop.f32.mrf.mxu0  ;;  %v3191_v49 = vpop.f32.mrf.mxu1 }
 0x8cf   :  { %v3941_v13 = vpop.eup %3940  ;;  %v3196_v47 = vadd.f32 %v3120_v4, %v9942_v61  ;;  %v3198_v14 = vadd.f32 %v3191_v49, %v9944_v16  ;;  %v9947_v4 = vld [vmem:[#allocation153_spill] sm:$0xff] }
 0x8d0   :  { %v3943_v11 = vpop.eup %3942  ;;  %v3122_v58 = vpop.f32.mrf.mxu0 }
 0x8d1   :  { %v3945_v60 = vpop.eup %3944  ;;  %v3642_v55 = vmul.f32 -1.442695, %v3196_v47  ;;  %v3197_v6 = vadd.f32 %v3122_v58, %v401_v8  ;;  %v3043_v50 = vmul.f32 %v3943_v11, %v3941_v13  ;;  %v3193_v12 = vpop.f32.mrf.mxu1  ;;  %v9948_v13 = vld [vmem:[#allocation20_spill] sm:$0xff] }
 0x8d2   :  { %v3042_v40 = vmul.f32 %v3945_v60, %v7926_v54  ;;  %v3199_v20 = vadd.f32 %v3193_v12, %v9943_v53 }
 0x8d3   :  { %3946 = vpow2.f32 %v3642_v55  ;;  %v3643_v56 = vmul.f32 -1.442695, %v3197_v6 }
 0x8d4   :  { %v8133_v46 = vadd.f32 %v3043_v50, %v3042_v40  ;;  %v3644_v7 = vmul.f32 -1.442695, %v3199_v20 }
 0x8d5   :  { %3948 = vpow2.f32 %v3643_v56  ;;  %v8200_v56 = vld [vmem:[#allocation4] ss:$0 sm:$0xff] }
 0x8d6   :  { %3950 = vrcp.f32 %v3039_v3 }
 0x8d7   :  { %3952 = vtanh.f32 %v8133_v46 }
 0x8d8   :  { %3954 = vtanh.f32 %v3198_v14 }
 0x8d9   :  { %3956 = vpow2.f32 %v3644_v7 }
 0x8e0   :  { %v3947_v29 = vpop.eup %3946 }
 0x8e1   :  { %v3203_v23 = vadd.f32 1.0, %v3947_v29 }
 0x8e2   :  { %v3949_v54 = vpop.eup %3948 }
 0x8e3   :  { %v3951_v1 = vpop.eup %3950  ;;  %3958 = vrcp.f32 %v3203_v23  ;;  %v3209_v24 = vadd.f32 1.0, %v3949_v54 }
 0x8e4   :  { %v3953_v15 = vpop.eup %3952 }
 0x8e5   :  { %3960 = vrcp.f32 %v3209_v24  ;;  %v8138_v26 = vmul.f32 %v3953_v15, %v3951_v1  ;;  %v3955_v22 = vpop.eup %3954 }
 0x8e6   :  { %v3957_v35 = vpop.eup %3956 }
 0x8e7   :  { %3288 = vmatprep.mubr.f32.mxu0 %v8138_v26  ;;  %3359 = vmatprep.mubr.f32.mxu1 %v8138_v26  ;;  %v3216_v9 = vadd.f32 1.0, %v3957_v35 }
 0x8e9   :  { %3962 = vrcp.f32 %v3216_v9 }
 0x8f0   :  { %v3959_v10 = vpop.eup %3958 }
 0x8f1   :  { %v3220_v25 = vmul.f32 %v3959_v10, %v3955_v22 }
 0x8f2   :  { %v3961_v31 = vpop.eup %3960 }
 0x8f3   :  { %v3219_v33 = vmul.f32 %v3961_v31, %v7936_v62  ;;  %v3419_v62 = vld [vmem:[%s8255_s6 + $0x68] sm:$0xff] }
 0x8f5   :  { %v3221_v41 = vadd.f32 %v3220_v25, %v3219_v33 }
 0x8f6   :  { %v3963_v48 = vpop.eup %3962 }
 0x8f7   :  { %3395 = vst [vmem:[#allocation11] sm:$0xff] %v3221_v41  ;;  %3964 = vtanh.f32 %v3221_v41 }
 0x904   :  { %v3965_v21 = vpop.eup %3964 }
 0x905   :  { %v3223_v44 = vmul.f32 %v3965_v21, %v3963_v48 }
 0x907   :  { %3289 = vmatmul.mubr.f32.vlgmr.msra.gmra.mxu0 %v3223_v44  ;;  %3392 = vst [vmem:[#allocation10] sm:$0xff] %v3223_v44  ;;  %3360 = vmatmul.mubr.f32.vlgmr.msra.gmra.mxu1 %v3223_v44 }
 0x908   :  { %3674 = vmatpush3.msra.mxu0 %v8122_v42  ;;  %3705 = vmatprep.mubr.f32.mxu0 %v9945_v2  ;;  %v3416_v42 = vld [vmem:[%s8255_s6 + $0x50] sm:$0xff] }
 0x909   :  { %3675 = vmatprep.subr.mxu0 %v3420_v19 }
 0x90a   :  { %3676 = vmatpush3.msra.mxu0 %v3420_v19 }
 0x90b   :  { %3677 = vmatprep.subr.mxu0 %v3419_v62 }
 0x90c   :  { %3678 = vmatpush3.msra.mxu0 %v3419_v62 }
 0x90d   :  { %3679 = vmatprep.subr.mxu0 %v3418_v52 }
 0x90e   :  { %3680 = vmatpush3.msra.mxu0 %v3418_v52 }
 0x90f   :  { %3681 = vmatprep.subr.mxu0 %v3417_v18 }
 0x910   :  { %3682 = vmatpush3.msra.mxu0 %v3417_v18 }
 0x911   :  { %3683 = vmatprep.subr.mxu0 %v3416_v42 }
 0x912   :  { %3684 = vmatpush3.msra.mxu0 %v3416_v42 }
 0x913   :  { %3685 = vmatprep.subr.mxu0 %v3415_v0 }
 0x914   :  { %3686 = vmatpush3.msra.mxu0 %v3415_v0 }
 0x915   :  { %3687 = vmatprep.subr.mxu0 %v3414_v51 }
 0x916   :  { %3688 = vmatpush3.msra.mxu0 %v3414_v51 }
 0x917   :  { %3689 = vmatprep.subr.mxu0 %v3413_v34 }
 0x918   :  { %3690 = vmatpush3.msra.mxu0 %v3413_v34 }
 0x919   :  { %3691 = vmatprep.subr.mxu0 %v3412_v30 }
 0x91a   :  { %3692 = vmatpush3.msra.mxu0 %v3412_v30 }
 0x91b   :  { %3693 = vmatprep.subr.mxu0 %v3411_v28 }
 0x91c   :  { %3694 = vmatpush3.msra.mxu0 %v3411_v28 }
 0x91d   :  { %3695 = vmatprep.subr.mxu0 %v3410_v43 }
 0x91e   :  { %3696 = vmatpush3.msra.mxu0 %v3410_v43 }
 0x91f   :  { %3697 = vmatprep.subr.mxu0 %v3409_v39 }
 0x920   :  { %3698 = vmatpush3.msra.mxu0 %v3409_v39 }
 0x921   :  { %3699 = vmatprep.subr.mxu0 %v3408_v38 }
 0x922   :  { %3700 = vmatpush3.msra.mxu0 %v3408_v38 }
 0x923   :  { %3701 = vmatprep.subr.mxu0 %v3407_v63 }
 0x924   :  { %3702 = vmatpush3.msra.mxu0 %v3407_v63 }
 0x925   :  { %3703 = vmatprep.subr.mxu0 %v3406_v37 }
 0x926   :  { %3704 = vmatpush3.msra.mxu0 %v3406_v37 }
 0x927   :  { %3706 = vmatmul.mubr.f32.vlgmr.msra.gmra.mxu0 %v9946_v5 }
 0x928   :  { %3708 = vmatprep.mubr.f32.mxu0 %v9947_v4 }
 0x92b   :  { %3709 = vmatmul.mubr.f32.gmra.mxu0 %v9948_v13 }
 0x92c   :  { %3711 = vmatprep.mubr.f32.mxu0 %v9949_v27 }
 0x92f   :  { %3712 = vmatmul.mubr.f32.gmra.mxu0 %v7931_v59 }
 0x930   :  { %3714 = vmatprep.mubr.f32.mxu0 %v8138_v26 }
 0x9c7   :  { %v3290_v45 = vpop.f32.mrf.mxu0  ;;  %v3361_v58 = vpop.f32.mrf.mxu1 }
 0x9c8   :  { %v3291_v8 = vadd.f32 %v3290_v45, %v9936_v36  ;;  %v3362_v59 = vadd.f32 %v3361_v58, %v9939_v57 }
 0x9c9   :  { %v3292_v61 = vpop.f32.mrf.mxu0  ;;  %v3363_v55 = vpop.f32.mrf.mxu1 }
 0x9ca   :  { %v3645_v47 = vmul.f32 -1.442695, %v3291_v8  ;;  %v3293_v11 = vadd.f32 %v3292_v61, %v9937_v17  ;;  %v3364_v6 = vadd.f32 %v3363_v55, %v9938_v32 }
 0x9cc   :  { %3966 = vpow2.f32 %v3645_v47  ;;  %v3646_v60 = vmul.f32 -1.442695, %v3293_v11  ;;  %v3647_v50 = vmul.f32 -1.442695, %v3364_v6 }
 0x9ce   :  { %3968 = vpow2.f32 %v3646_v60 }
 0x9cf   :  { %3970 = vpow2.f32 %v3647_v50 }
 0x9d9   :  { %v3967_v40 = vpop.eup %3966 }
 0x9da   :  { %v3369_v3 = vadd.f32 1.0, %v3967_v40 }
 0x9db   :  { %v3969_v49 = vpop.eup %3968 }
 0x9dc   :  { %3972 = vrcp.f32 %v3369_v3  ;;  %v3375_v36 = vadd.f32 1.0, %v3969_v49  ;;  %v3971_v12 = vpop.eup %3970 }
 0x9dd   :  { %3974 = vtanh.f32 %v3362_v59  ;;  %v3382_v7 = vadd.f32 1.0, %v3971_v12 }
 0x9de   :  { %3976 = vrcp.f32 %v3375_v36 }
 0x9df   :  { %3978 = vrcp.f32 %v3382_v7 }
 0x9e7   :  { %v3707_v17 = vpop.f32.mrf.mxu0 }
 0x9e8   :  { %v3501_v53 = vadd.f32 %v3707_v17, %v8200_v56 }
 0x9e9   :  { %v3973_v20 = vpop.eup %3972  ;;  %v3495_v16 = vpop.f32.mrf.mxu0 }
 0x9ea   :  { %v3975_v32 = vpop.eup %3974  ;;  %3535 = vst.msk [vmem:[%s8257_s8 + $0x8] sm:$0xff] %vm90_vm1, %v3501_v53  ;;  %v3496_v57 = vadd.f32 %v8200_v56, %v3495_v16 }
 0x9eb   :  { %v3977_v14 = vpop.eup %3976  ;;  %v3710_v29 = vpop.f32.mrf.mxu0  ;;  %v3386_v23 = vmul.f32 %v3975_v32, %v3973_v20 }
 0x9ec   :  { %v3385_v54 = vmul.f32 %v3977_v14, %v8133_v46  ;;  %3534 = vst.msk [vmem:[%s8257_s8] sm:$0xff] %vm90_vm1, %v3496_v57  ;;  %v3511_v1 = vadd.f32 %v3710_v29, %v8200_v56  ;;  %v3979_v25 = vpop.eup %3978 }
 0x9ed   :  { %v3505_v24 = vpop.f32.mrf.mxu0 }
 0x9ee   :  { %3537 = vst.msk [vmem:[%s8257_s8 + $0x18] sm:$0xff] %vm90_vm1, %v3511_v1  ;;  %v3506_v15 = vadd.f32 %v8200_v56, %v3505_v24  ;;  %v3387_v26 = vadd.f32 %v3386_v23, %v3385_v54 }
 0x9ef   :  { %v3713_v22 = vpop.f32.mrf.mxu0 }
 0x9f0   :  { %3536 = vst.msk [vmem:[%s8257_s8 + $0x10] sm:$0xff] %vm90_vm1, %v3506_v15  ;;  %v3521_v46 = vadd.f32 %v3713_v22, %v8200_v56  ;;  %3980 = vtanh.f32 %v3387_v26  ;;  %3397 = vst [vmem:[#allocation11 + $0x8] sm:$0xff] %v3387_v26 }
 0x9f1   :  { %v3515_v35 = vpop.f32.mrf.mxu0 }
 0x9f2   :  { %3539 = vst.msk [vmem:[%s8257_s8 + $0x28] sm:$0xff] %vm90_vm1, %v3521_v46  ;;  %v3516_v10 = vadd.f32 %v8200_v56, %v3515_v35 }
 0x9f4   :  { %3538 = vst.msk [vmem:[%s8257_s8 + $0x20] sm:$0xff] %vm90_vm1, %v3516_v10 }
 0x9fd   :  { %v3981_v31 = vpop.eup %3980 }
 0x9fe   :  { %v3389_v9 = vmul.f32 %v3981_v31, %v3979_v25 }
 0xa00   :  { %3394 = vst [vmem:[#allocation10 + $0x8] sm:$0xff] %v3389_v9  ;;  %3715 = vmatmul.mubr.f32.gmra.mxu0 %v3389_v9 }
 0xa01   :  { %4627 = shalt.err (!%p4624_p0)
}
 0xa02   :  { %s4671_s19 = smov 128   ;;  %s4672_s20 = smov 8  }
 0xa03   :  { %3555 = dma.vmem_to_hbm [thread:$0]  %s3550_s15, 256, %s8258_s9, [#allocation7], %s4671_s19, %s4671_s19, %s4672_s20  }
 0xa04   :  { %s4636_s3 = scalar_lea.vmem %s3562_s17, 256  ;;  %p4641_p2 = scmp.lt.s32.totalorder %s3562_s17, %s3562_s17 }
 0xa05   :  { %p4637_p1 = scmp.ne.s32.totalorder %s3562_s17, %s4636_s3  ;;  %p4642_p3 = scmp.lt.s32.totalorder %s4636_s3, %s4636_s3 }
 0xa07   :  { %p4643_p4 = por %p4642_p3, %p4641_p2 }
 0xa09   :  { %p4644_p5 = pnand %p4643_p4, %p4637_p1 }
 0xa0b   :  { %4647 = shalt.err (!%p4644_p5)
}
 0xa0c   :  { %3567 = dma.vmem_to_hbm [thread:$0]  %s3562_s17, 256, %s8259_s10, [#allocation12], %s4671_s19, %s4671_s19, %s4672_s20  }
 0xac0   :  { %v3716_v33 = vpop.f32.mrf.mxu0 }
 0xac1   :  { %v3531_v41 = vadd.f32 %v3716_v33, %v8200_v56 }
 0xac2   :  { %v3525_v48 = vpop.f32.mrf.mxu0 }
 0xac3   :  { %3541 = vst.msk [vmem:[%s8257_s8 + $0x38] sm:$0xff] %vm90_vm1, %v3531_v41  ;;  %v3526_v21 = vadd.f32 %v8200_v56, %v3525_v48 }
 0xac5   :  { %3540 = vst.msk [vmem:[%s8257_s8 + $0x30] sm:$0xff] %vm90_vm1, %v3526_v21 }
 0xac6   :  { %4660 = dma.done.wait [#allocation7], 256  }
 0xac7   :  { %4661 = vsyncadd [#allocation7], 4294967040 }
 0xac8   :  { %4662 = dma.done.wait [#allocation12], 256  }
 0xac9   :  { %4663 = vsyncadd [#allocation12], 4294967040 }
 0xaca   :  { %3576 = vsyncpa [#allocation6], 1 }
 0xacb   :  { %3577 = vsyncpa [#allocation9], 1 }
 0xacc   :  { %3578 = vsyncpa [#allocation7], 1 }
 0xacd   :  { %3579 = vsyncpa [#allocation12], 1 }

</bundles_post_ra>
